<compile_context>
chip_gen: v7x
topology: tpu7x:2x2x1
jax: 0.10.0
libtpu: 0.0.40
codegen_flags: <defaults>
</compile_context>

<pallas_src>
import functools

import numpy as np
import jax
import jax.numpy as jnp
from jax import lax
from jax.experimental import pallas as pl
from jax.experimental.pallas import tpu as pltpu

_EPS = 1e-5


def _round_up(x, m):
    return (x + m - 1) // m * m


def _largest_tile(dim, cap, unit):
    """Largest multiple of `unit` that divides `dim` and is <= cap."""
    best = unit
    t = unit
    limit = min(cap, dim)
    while t <= limit:
        if dim % t == 0:
            best = t
        t += unit
    return best


def _k_pad(K):
    """Padded K dimension used by both weight packing and the forward pass."""
    if K % 128 == 0:
        return K
    Kp = _round_up(K, 8)
    if Kp <= 2048:
        return Kp               # single full-extent K block (legal layout)
    return _round_up(K, 128)


# ---------------------------------------------------------------------------
# Pallas kernel: tiled matmul with fused bias + ReLU and fused per-tile
# BatchNorm partial statistics (sum / sum-of-squares over valid rows).
# ---------------------------------------------------------------------------
def _conv_mm_kernel(a_ref, b_ref, bias_ref, y_ref, s_ref, ss_ref, acc_ref,
                    *, tm, m_valid):
    # Grid indices MUST be read at the top level of the kernel (not inside the
    # pl.when bodies) -- see header comment.
    k_idx = pl.program_id(2)
    row0 = pl.program_id(0) * tm

    @pl.when(k_idx == 0)
    def _():
        acc_ref[...] = jnp.zeros_like(acc_ref)

    acc_ref[...] += jnp.dot(a_ref[...], b_ref[...],
                            preferred_element_type=jnp.float32)

    @pl.when(k_idx == pl.num_programs(2) - 1)
    def _():
        y = jnp.maximum(acc_ref[...] + bias_ref[...], 0.0)
        y_ref[...] = y.astype(y_ref.dtype)
        # BatchNorm partial statistics; mask out zero-padded rows (they hold
        # relu(bias), which must not pollute the batch statistics).
        row = row0 + lax.broadcasted_iota(jnp.int32, (tm, 1), 0)
        ym = jnp.where(row < m_valid, y, 0.0)
        s_ref[...] = jnp.broadcast_to(jnp.sum(ym, axis=0, keepdims=True),
                                      s_ref.shape)
        ss_ref[...] = jnp.broadcast_to(jnp.sum(ym * ym, axis=0, keepdims=True),
                                       ss_ref.shape)


# ---------------------------------------------------------------------------
# Glue: im2col (NHWC, bf16) + conv wrapper
# ---------------------------------------------------------------------------
def im2col_nhwc(x, kh, kw, stride, pad):
    """x: NHWC -> patches (N*OH*OW, kh*kw*C); K order = (tap_i, tap_j, c)."""
    N, H, W, C = x.shape
    xp = jnp.pad(x, ((0, 0), (pad, pad), (pad, pad), (0, 0)))
    OH = (H + 2 * pad - kh) // stride + 1
    OW = (W + 2 * pad - kw) // stride + 1
    cols = []
    for i in range(kh):
        for j in range(kw):
            cols.append(xp[:, i:i + stride * OH:stride, j:j + stride * OW:stride, :])
    p = jnp.stack(cols, axis=3)                       # (N, OH, OW, kh*kw, C)
    return p.reshape(N * OH * OW, kh * kw * C), OH, OW


def conv2d_bias_relu(x_nhwc, w_packed, bias_packed, ksize, stride, pad, y_dtype):
    """Conv+bias+ReLU as one tiled Pallas matmul; also returns BN partial sums.

    x_nhwc: (N,H,W,C) bf16; w_packed: (Kp, OCp) bf16; bias_packed: (1, OCp) f32.
    Returns (y_pad (Mp, OCp) y_dtype, sums (OCp,) f32, sumsq (OCp,) f32, meta).
    """
    N, H, W, C = x_nhwc.shape
    Kp, OCp = w_packed.shape
    patches, OH, OW = im2col_nhwc(x_nhwc, ksize, ksize, stride, pad)   # bf16
    M, K = patches.shape

    # Tile sizes (lane/sublane dense, VMEM-safe on v5e/v6e/v7x).
    Mp = _round_up(M, 8)
    tm = _largest_tile(Mp, 256, 8)
    tk = _largest_tile(Kp, 2048, 128) if Kp % 128 == 0 else Kp
    tn = _largest_tile(OCp, 256, 128)
    # Keep both v7x TensorCores busy: >= 2 blocks along a parallel axis when
    # possible.  Prefer splitting OC (A is small when this triggers).
    if (Mp // tm) * (OCp // tn) == 1:
        if tn >= 256:
            tn //= 2
        elif tm % 16 == 0:
            tm //= 2
    nm, nn, nk = Mp // tm, OCp // tn, Kp // tk

    a = jnp.pad(patches, ((0, Mp - M), (0, Kp - K)))        # bf16, zero pad

    kernel = functools.partial(_conv_mm_kernel, tm=tm, m_valid=M)
    flops = 2 * Mp * Kp * OCp
    bytes_accessed = (Mp * Kp * 2 + Kp * OCp * 2 +
                      Mp * OCp * jnp.dtype(y_dtype).itemsize +
                      2 * 8 * nm * OCp * 4)

    y, ps, pss = pl.pallas_call(
        kernel,
        out_shape=(jax.ShapeDtypeStruct((Mp, OCp), y_dtype),
                   jax.ShapeDtypeStruct((8 * nm, OCp), jnp.float32),
                   jax.ShapeDtypeStruct((8 * nm, OCp), jnp.float32)),
        grid_spec=pltpu.PrefetchScalarGridSpec(
            num_scalar_prefetch=0,
            grid=(nm, nn, nk),
            in_specs=[
                pl.BlockSpec((tm, tk), lambda i, j, k: (i, k)),
                pl.BlockSpec((tk, tn), lambda i, j, k: (k, j)),
                pl.BlockSpec((1, tn), lambda i, j, k: (0, j)),
            ],
            out_specs=[
                pl.BlockSpec((tm, tn), lambda i, j, k: (i, j)),
                pl.BlockSpec((8, tn), lambda i, j, k: (i, j)),
                pl.BlockSpec((8, tn), lambda i, j, k: (i, j)),
            ],
            scratch_shapes=[pltpu.VMEM((tm, tn), jnp.float32)]),
        compiler_params=pltpu.CompilerParams(
            dimension_semantics=("parallel", "parallel", "arbitrary")),
        cost_estimate=pl.CostEstimate(flops=flops, transcendentals=0,
                                      bytes_accessed=bytes_accessed),
    )(a, w_packed, bias_packed)

    # All 8 rows of each per-M-block partial are equal -> plain row sum / 8
    # (no strided gather between the matmul and the BN glue).
    sums = jnp.sum(ps, axis=0) * 0.125
    sumsq = jnp.sum(pss, axis=0) * 0.125
    return y, sums, sumsq, (N, OH, OW, M)


# ---------------------------------------------------------------------------
# Architecture (ngf=64, n_layers=3), parameters ('normal' init) and packing.
# ---------------------------------------------------------------------------
def layer_configs(input_nc, ngf=64, n_layers=3):
    cfgs = [(input_nc, ngf, 4, 2, 1, True)]
    for i in range(n_layers):
        in_ngf = 2 ** i * ngf if 2 ** i * ngf < 512 else 512
        out_ngf = 2 ** (i + 1) * ngf if 2 ** i * ngf < 512 else 512
        cfgs.append((in_ngf, out_ngf, 4, 2, 1, True))
    cfgs.append((512, 512, 3, 1, 1, True))
    cfgs.append((512, 512, 3, 1, 1, False))      # final conv: ReLU only, no BN
    return tuple(cfgs)


def init_params(key, cfgs):
    params = []
    for (cin, cout, k, _s, _p, has_bn) in cfgs:
        key, k1, k2, k3 = jax.random.split(key, 4)
        layer = {
            "w": 0.02 * jax.random.normal(k1, (cout, cin, k, k), jnp.float32),
            "b": 0.001 * jax.random.normal(k2, (cout,), jnp.float32),
        }
        if has_bn:
            layer["gamma"] = 1.0 + 0.02 * jax.random.normal(k3, (cout,), jnp.float32)
            layer["beta"] = jnp.zeros((cout,), jnp.float32)
        params.append(layer)
    return params


def pack_params(params, cfgs):
    """One-time weight re-layout: (OC,IC,KH,KW) f32 -> (Kp, OCp) bf16."""
    packed = []
    for layer, (cin, cout, k, _s, _p, has_bn) in zip(params, cfgs):
        K = k * k * cin
        Kp = _k_pad(K)
        OCp = _round_up(cout, 128)
        wmat = jnp.transpose(layer["w"], (2, 3, 1, 0)).reshape(K, cout)
        wmat = jnp.pad(wmat, ((0, Kp - K), (0, OCp - cout))).astype(jnp.bfloat16)
        bias = jnp.pad(layer["b"], (0, OCp - cout)).reshape(1, OCp).astype(jnp.float32)
        entry = {"w": wmat, "b": bias}
        if has_bn:
            entry["gamma"] = layer["gamma"].astype(jnp.float32)
            entry["beta"] = layer["beta"].astype(jnp.float32)
        packed.append(entry)
    return packed


def feature_extraction_forward(packed, x_nchw, cfgs):
    x = jnp.transpose(x_nchw, (0, 2, 3, 1)).astype(jnp.bfloat16)   # NHWC bf16
    pending = None                      # deferred BatchNorm affine (scale, shift)
    last = len(cfgs) - 1
    for idx, (layer, (_cin, cout, k, stride, pad, has_bn)) in enumerate(
            zip(packed, cfgs)):
        if pending is not None:
            scale, shift = pending
            # Deferred BN affine, fused by XLA into this layer's im2col glue.
            x = (x.astype(jnp.float32) * scale + shift).astype(jnp.bfloat16)
            pending = None
        y_dtype = jnp.float32 if idx == last else jnp.bfloat16
        y2d, sums, sumsq, (N, OH, OW, M) = conv2d_bias_relu(
            x, layer["w"], layer["b"], k, stride, pad, y_dtype)
        x = y2d[:M, :cout].reshape(N, OH, OW, cout)
        if has_bn:
            mean = sums[:cout] / M
            # TODO(synk): single-pass E[x^2]-E[x]^2 can cancel badly for very
            # large M; switch to a mean-shifted / Welford combine if needed.
            var = jnp.maximum(sumsq[:cout] / M - mean * mean, 0.0)
            scale = layer["gamma"] * lax.rsqrt(var + _EPS)
            shift = layer["beta"] - mean * scale
            pending = (scale, shift)
    if pending is not None:
        scale, shift = pending
        x = x.astype(jnp.float32) * scale + shift
    return jnp.transpose(x, (0, 3, 1, 2)).astype(jnp.float32)      # NCHW out


# ---------------------------------------------------------------------------
# Pure-JAX reference with the same compute dtypes / rounding points as the
# Pallas path, so the comparison isolates kernel bugs rather than MXU rounding.
# ---------------------------------------------------------------------------
def reference_forward(params, x, cfgs):
    last = len(cfgs) - 1
    for idx, (layer, (_cin, _cout, _k, stride, pad, has_bn)) in enumerate(
            zip(params, cfgs)):
        y = lax.conv_general_dilated(
            x.astype(jnp.bfloat16), layer["w"].astype(jnp.bfloat16),
            (stride, stride), [(pad, pad), (pad, pad)],
            dimension_numbers=("NCHW", "OIHW", "NCHW"),
            preferred_element_type=jnp.float32)
        y = jnp.maximum(y + layer["b"][None, :, None, None], 0.0)
        # The Pallas path stores intermediate activations in bf16 (stats from
        # the f32 pre-rounded value, affine applied to the bf16-stored value).
        yq = y.astype(jnp.bfloat16).astype(jnp.float32) if idx != last else y
        if has_bn:
            mean = jnp.mean(y, axis=(0, 2, 3), keepdims=True)
            var = jnp.maximum(
                jnp.mean(y * y, axis=(0, 2, 3), keepdims=True) - mean * mean, 0.0)
            scale = layer["gamma"][None, :, None, None] * lax.rsqrt(var + _EPS)
            shift = layer["beta"][None, :, None, None] - mean * scale
            yq = yq * scale + shift
        x = yq
    return x


if __name__ == "__main__":
    key = jax.random.PRNGKey(0)
    kx, kp = jax.random.split(key)

    # Small but non-degenerate: 32x32 -> 2x2 at the deepest layers, so the
    # training-mode BatchNorm statistics are taken over 8 samples per channel.
    N, input_nc, H, W = 2, 4, 32, 32
    x = jax.random.normal(kx, (N, input_nc, H, W), jnp.float32)
    cfgs = layer_configs(input_nc)
    params = init_params(kp, cfgs)
    packed = pack_params(params, cfgs)     # one-time weight re-layout (bf16)

    fwd = jax.jit(feature_extraction_forward, static_argnums=2)
    out = jax.block_until_ready(fwd(packed, x, cfgs))
    assert out.shape == (N, 512, 2, 2), out.shape

    ref = jax.jit(reference_forward, static_argnums=2)(params, x, cfgs)
    np.testing.assert_allclose(np.asarray(out), np.asarray(ref),
                               rtol=2e-2, atol=2e-2)

    print("KERNEL_OK")
</pallas_src>

<mosaic_0001>
module attributes {stable_mosaic.version = 11 : i64} {
  func.func @_conv_mm_kernel(%arg0: i32, %arg1: i32, %arg2: i32, %arg3: memref<256x64xbf16, #tpu.memory_space<vmem>>, %arg4: memref<64x128xbf16, #tpu.memory_space<vmem>>, %arg5: memref<1x128xf32, #tpu.memory_space<vmem>>, %arg6: memref<256x128xbf16, #tpu.memory_space<vmem>>, %arg7: memref<8x128xf32, #tpu.memory_space<vmem>>, %arg8: memref<8x128xf32, #tpu.memory_space<vmem>>, %arg9: memref<256x128xf32, #tpu.memory_space<vmem>>) attributes {dimension_semantics = [#tpu.dimension_semantics<parallel>, #tpu.dimension_semantics<parallel>, #tpu.dimension_semantics<arbitrary>], iteration_bounds = array<i64: 2, 1, 1>, scalar_prefetch = 0 : i64, scratch_operands = 1 : i64, tpu.core_type = #tpu.core_type<tc>, window_params = [{transform_indices = @transform_0, window_bounds = array<i64: 256, 64>}, {transform_indices = @transform_1, window_bounds = array<i64: 64, 128>}, {transform_indices = @transform_2, window_bounds = array<i64: 1, 128>}, {transform_indices = @transform_3, window_bounds = array<i64: 256, 128>}, {transform_indices = @transform_4, window_bounds = array<i64: 8, 128>}, {transform_indices = @transform_5, window_bounds = array<i64: 8, 128>}]} {
    %c256_i32 = arith.constant 256 : i32
    %0 = arith.muli %arg0, %c256_i32 : i32
    %c0_i32 = arith.constant 0 : i32
    %1 = arith.cmpi eq, %arg2, %c0_i32 : i32
    %2 = arith.extui %1 : i1 to i32
    %c0_i32_0 = arith.constant 0 : i32
    %3 = arith.cmpi ne, %2, %c0_i32_0 : i32
    scf.if %3 {
      %cst_10 = arith.constant 0.000000e+00 : f32
      %13 = vector.broadcast %cst_10 : f32 to vector<256x128xf32>
      %c0_11 = arith.constant 0 : index
      %c0_12 = arith.constant 0 : index
      %14 = vector.load %arg9[%c0_11, %c0_12] : memref<256x128xf32, #tpu.memory_space<vmem>>, vector<256x128xf32>
      tpu.vector_store %arg9[%c0_11, %c0_12], %13 {strides = array<i32>} : memref<256x128xf32, #tpu.memory_space<vmem>>, vector<256x128xf32>,
    } else {
    }
    %c0 = arith.constant 0 : index
    %c0_1 = arith.constant 0 : index
    %4 = vector.load %arg9[%c0, %c0_1] : memref<256x128xf32, #tpu.memory_space<vmem>>, vector<256x128xf32>
    %c0_2 = arith.constant 0 : index
    %c0_3 = arith.constant 0 : index
    %5 = vector.load %arg3[%c0_2, %c0_3] : memref<256x64xbf16, #tpu.memory_space<vmem>>, vector<256x64xbf16>
    %c0_4 = arith.constant 0 : index
    %c0_5 = arith.constant 0 : index
    %6 = vector.load %arg4[%c0_4, %c0_5] : memref<64x128xbf16, #tpu.memory_space<vmem>>, vector<64x128xbf16>
    %cst = arith.constant dense<0.000000e+00> : vector<256x128xf32>
    %7 = tpu.matmul %5, %6, %cst {dimension_numbers = #tpu.dot_dimension_numbers<[1], [0], [0], [1], [0, 0, 1, 1], [], []>} : vector<256x64xbf16>, vector<64x128xbf16>, vector<256x128xf32> -> vector<256x128xf32>
    %8 = arith.addf %4, %7 : vector<256x128xf32>
    %c0_6 = arith.constant 0 : index
    %c0_7 = arith.constant 0 : index
    %9 = vector.load %arg9[%c0_6, %c0_7] : memref<256x128xf32, #tpu.memory_space<vmem>>, vector<256x128xf32>
    tpu.vector_store %arg9[%c0_6, %c0_7], %8 {strides = array<i32>} : memref<256x128xf32, #tpu.memory_space<vmem>>, vector<256x128xf32>,
    %c0_i32_8 = arith.constant 0 : i32
    %10 = arith.cmpi eq, %arg2, %c0_i32_8 : i32
    %11 = arith.extui %10 : i1 to i32
    %c0_i32_9 = arith.constant 0 : i32
    %12 = arith.cmpi ne, %11, %c0_i32_9 : i32
    scf.if %12 {
      %c0_10 = arith.constant 0 : index
      %c0_11 = arith.constant 0 : index
      %13 = vector.load %arg9[%c0_10, %c0_11] : memref<256x128xf32, #tpu.memory_space<vmem>>, vector<256x128xf32>
      %c0_12 = arith.constant 0 : index
      %c0_13 = arith.constant 0 : index
      %14 = vector.load %arg5[%c0_12, %c0_13] : memref<1x128xf32, #tpu.memory_space<vmem>>, vector<1x128xf32>
      %15 = vector.broadcast %14 : vector<1x128xf32> to vector<256x128xf32>
      %16 = arith.addf %13, %15 : vector<256x128xf32>
      %cst_14 = arith.constant 0.000000e+00 : f32
      %17 = vector.broadcast %cst_14 : f32 to vector<256x128xf32>
      %18 = arith.maximumf %16, %17 : vector<256x128xf32>
      %19 = arith.truncf %18 : vector<256x128xf32> to vector<256x128xbf16>
      %c0_15 = arith.constant 0 : index
      %c0_16 = arith.constant 0 : index
      %20 = vector.load %arg6[%c0_15, %c0_16] : memref<256x128xbf16, #tpu.memory_space<vmem>>, vector<256x128xbf16>
      tpu.vector_store %arg6[%c0_15, %c0_16], %19 {strides = array<i32>} : memref<256x128xbf16, #tpu.memory_space<vmem>>, vector<256x128xbf16>,
      %21 = tpu.iota {dimensions = array<i32: 0>} : vector<256x1xi32>
      %22 = vector.broadcast %0 : i32 to vector<256x1xi32>
      %23 = arith.addi %22, %21 : vector<256x1xi32>
      %c512_i32 = arith.constant 512 : i32
      %24 = vector.broadcast %c512_i32 : i32 to vector<256x1xi32>
      %25 = arith.cmpi slt, %23, %24 : vector<256x1xi32>
      %cst_17 = arith.constant 0.000000e+00 : f32
      %26 = vector.shape_cast %25 : vector<256x1xi1> to vector<256x1xi1>
      %27 = vector.broadcast %26 : vector<256x1xi1> to vector<256x128xi1>
      %28 = vector.broadcast %cst_17 : f32 to vector<256x128xf32>
      %29 = arith.select %27, %18, %28 : vector<256x128xi1>, vector<256x128xf32>
      %cst_18 = arith.constant dense<0.000000e+00> : vector<128xf32>
      %30 = vector.multi_reduction <add>, %29, %cst_18 [0] : vector<256x128xf32> to vector<128xf32>
      %31 = vector.shape_cast %30 : vector<128xf32> to vector<1x128xf32>
      %32 = vector.shape_cast %31 : vector<1x128xf32> to vector<1x128xf32>
      %33 = vector.broadcast %32 : vector<1x128xf32> to vector<8x128xf32>
      %c0_19 = arith.constant 0 : index
      %c0_20 = arith.constant 0 : index
      %34 = vector.load %arg7[%c0_19, %c0_20] : memref<8x128xf32, #tpu.memory_space<vmem>>, vector<8x128xf32>
      tpu.vector_store %arg7[%c0_19, %c0_20], %33 {strides = array<i32>} : memref<8x128xf32, #tpu.memory_space<vmem>>, vector<8x128xf32>,
      %35 = arith.mulf %29, %29 : vector<256x128xf32>
      %cst_21 = arith.constant dense<0.000000e+00> : vector<128xf32>
      %36 = vector.multi_reduction <add>, %35, %cst_21 [0] : vector<256x128xf32> to vector<128xf32>
      %37 = vector.shape_cast %36 : vector<128xf32> to vector<1x128xf32>
      %38 = vector.shape_cast %37 : vector<1x128xf32> to vector<1x128xf32>
      %39 = vector.broadcast %38 : vector<1x128xf32> to vector<8x128xf32>
      %c0_22 = arith.constant 0 : index
      %c0_23 = arith.constant 0 : index
      %40 = vector.load %arg8[%c0_22, %c0_23] : memref<8x128xf32, #tpu.memory_space<vmem>>, vector<8x128xf32>
      tpu.vector_store %arg8[%c0_22, %c0_23], %39 {strides = array<i32>} : memref<8x128xf32, #tpu.memory_space<vmem>>, vector<8x128xf32>,
    } else {
    }
    return
  }
  func.func @transform_0(%arg0: i32, %arg1: i32, %arg2: i32) -> (i32, i32) {
    %c0_i32 = arith.constant 0 : i32
    return %arg0, %arg2 : i32, i32
  }
  func.func @transform_1(%arg0: i32, %arg1: i32, %arg2: i32) -> (i32, i32) {
    %c0_i32 = arith.constant 0 : i32
    return %arg2, %arg1 : i32, i32
  }
  func.func @transform_2(%arg0: i32, %arg1: i32, %arg2: i32) -> (i32, i32) {
    %c0_i32 = arith.constant 0 : i32
    %c0_i32_0 = arith.constant 0 : i32
    return %c0_i32, %arg1 : i32, i32
  }
  func.func @transform_3(%arg0: i32, %arg1: i32, %arg2: i32) -> (i32, i32) {
    %c0_i32 = arith.constant 0 : i32
    return %arg0, %arg1 : i32, i32
  }
  func.func @transform_4(%arg0: i32, %arg1: i32, %arg2: i32) -> (i32, i32) {
    %c0_i32 = arith.constant 0 : i32
    return %arg0, %arg1 : i32, i32
  }
  func.func @transform_5(%arg0: i32, %arg1: i32, %arg2: i32) -> (i32, i32) {
    %c0_i32 = arith.constant 0 : i32
    return %arg0, %arg1 : i32, i32
  }
}

module attributes {stable_mosaic.version = 11 : i64} {
  func.func @_conv_mm_kernel(%arg0: i32, %arg1: i32, %arg2: i32, %arg3: memref<64x1024xbf16, #tpu.memory_space<vmem>>, %arg4: memref<1024x128xbf16, #tpu.memory_space<vmem>>, %arg5: memref<1x128xf32, #tpu.memory_space<vmem>>, %arg6: memref<64x128xbf16, #tpu.memory_space<vmem>>, %arg7: memref<8x128xf32, #tpu.memory_space<vmem>>, %arg8: memref<8x128xf32, #tpu.memory_space<vmem>>, %arg9: memref<64x128xf32, #tpu.memory_space<vmem>>) attributes {dimension_semantics = [#tpu.dimension_semantics<parallel>, #tpu.dimension_semantics<parallel>, #tpu.dimension_semantics<arbitrary>], iteration_bounds = array<i64: 2, 1, 1>, scalar_prefetch = 0 : i64, scratch_operands = 1 : i64, tpu.core_type = #tpu.core_type<tc>, window_params = [{transform_indices = @transform_0, window_bounds = array<i64: 64, 1024>}, {transform_indices = @transform_1, window_bounds = array<i64: 1024, 128>}, {transform_indices = @transform_2, window_bounds = array<i64: 1, 128>}, {transform_indices = @transform_3, window_bounds = array<i64: 64, 128>}, {transform_indices = @transform_4, window_bounds = array<i64: 8, 128>}, {transform_indices = @transform_5, window_bounds = array<i64: 8, 128>}]} {
    %c64_i32 = arith.constant 64 : i32
    %0 = arith.muli %arg0, %c64_i32 : i32
    %c0_i32 = arith.constant 0 : i32
    %1 = arith.cmpi eq, %arg2, %c0_i32 : i32
    %2 = arith.extui %1 : i1 to i32
    %c0_i32_0 = arith.constant 0 : i32
    %3 = arith.cmpi ne, %2, %c0_i32_0 : i32
    scf.if %3 {
      %cst_10 = arith.constant 0.000000e+00 : f32
      %13 = vector.broadcast %cst_10 : f32 to vector<64x128xf32>
      %c0_11 = arith.constant 0 : index
      %c0_12 = arith.constant 0 : index
      %14 = vector.load %arg9[%c0_11, %c0_12] : memref<64x128xf32, #tpu.memory_space<vmem>>, vector<64x128xf32>
      tpu.vector_store %arg9[%c0_11, %c0_12], %13 {strides = array<i32>} : memref<64x128xf32, #tpu.memory_space<vmem>>, vector<64x128xf32>,
    } else {
    }
    %c0 = arith.constant 0 : index
    %c0_1 = arith.constant 0 : index
    %4 = vector.load %arg9[%c0, %c0_1] : memref<64x128xf32, #tpu.memory_space<vmem>>, vector<64x128xf32>
    %c0_2 = arith.constant 0 : index
    %c0_3 = arith.constant 0 : index
    %5 = vector.load %arg3[%c0_2, %c0_3] : memref<64x1024xbf16, #tpu.memory_space<vmem>>, vector<64x1024xbf16>
    %c0_4 = arith.constant 0 : index
    %c0_5 = arith.constant 0 : index
    %6 = vector.load %arg4[%c0_4, %c0_5] : memref<1024x128xbf16, #tpu.memory_space<vmem>>, vector<1024x128xbf16>
    %cst = arith.constant dense<0.000000e+00> : vector<64x128xf32>
    %7 = tpu.matmul %5, %6, %cst {dimension_numbers = #tpu.dot_dimension_numbers<[1], [0], [0], [1], [0, 0, 1, 1], [], []>} : vector<64x1024xbf16>, vector<1024x128xbf16>, vector<64x128xf32> -> vector<64x128xf32>
    %8 = arith.addf %4, %7 : vector<64x128xf32>
    %c0_6 = arith.constant 0 : index
    %c0_7 = arith.constant 0 : index
    %9 = vector.load %arg9[%c0_6, %c0_7] : memref<64x128xf32, #tpu.memory_space<vmem>>, vector<64x128xf32>
    tpu.vector_store %arg9[%c0_6, %c0_7], %8 {strides = array<i32>} : memref<64x128xf32, #tpu.memory_space<vmem>>, vector<64x128xf32>,
    %c0_i32_8 = arith.constant 0 : i32
    %10 = arith.cmpi eq, %arg2, %c0_i32_8 : i32
    %11 = arith.extui %10 : i1 to i32
    %c0_i32_9 = arith.constant 0 : i32
    %12 = arith.cmpi ne, %11, %c0_i32_9 : i32
    scf.if %12 {
      %c0_10 = arith.constant 0 : index
      %c0_11 = arith.constant 0 : index
      %13 = vector.load %arg9[%c0_10, %c0_11] : memref<64x128xf32, #tpu.memory_space<vmem>>, vector<64x128xf32>
      %c0_12 = arith.constant 0 : index
      %c0_13 = arith.constant 0 : index
      %14 = vector.load %arg5[%c0_12, %c0_13] : memref<1x128xf32, #tpu.memory_space<vmem>>, vector<1x128xf32>
      %15 = vector.broadcast %14 : vector<1x128xf32> to vector<64x128xf32>
      %16 = arith.addf %13, %15 : vector<64x128xf32>
      %cst_14 = arith.constant 0.000000e+00 : f32
      %17 = vector.broadcast %cst_14 : f32 to vector<64x128xf32>
      %18 = arith.maximumf %16, %17 : vector<64x128xf32>
      %19 = arith.truncf %18 : vector<64x128xf32> to vector<64x128xbf16>
      %c0_15 = arith.constant 0 : index
      %c0_16 = arith.constant 0 : index
      %20 = vector.load %arg6[%c0_15, %c0_16] : memref<64x128xbf16, #tpu.memory_space<vmem>>, vector<64x128xbf16>
      tpu.vector_store %arg6[%c0_15, %c0_16], %19 {strides = array<i32>} : memref<64x128xbf16, #tpu.memory_space<vmem>>, vector<64x128xbf16>,
      %21 = tpu.iota {dimensions = array<i32: 0>} : vector<64x1xi32>
      %22 = vector.broadcast %0 : i32 to vector<64x1xi32>
      %23 = arith.addi %22, %21 : vector<64x1xi32>
      %c128_i32 = arith.constant 128 : i32
      %24 = vector.broadcast %c128_i32 : i32 to vector<64x1xi32>
      %25 = arith.cmpi slt, %23, %24 : vector<64x1xi32>
      %cst_17 = arith.constant 0.000000e+00 : f32
      %26 = vector.shape_cast %25 : vector<64x1xi1> to vector<64x1xi1>
      %27 = vector.broadcast %26 : vector<64x1xi1> to vector<64x128xi1>
      %28 = vector.broadcast %cst_17 : f32 to vector<64x128xf32>
      %29 = arith.select %27, %18, %28 : vector<64x128xi1>, vector<64x128xf32>
      %cst_18 = arith.constant dense<0.000000e+00> : vector<128xf32>
      %30 = vector.multi_reduction <add>, %29, %cst_18 [0] : vector<64x128xf32> to vector<128xf32>
      %31 = vector.shape_cast %30 : vector<128xf32> to vector<1x128xf32>
      %32 = vector.shape_cast %31 : vector<1x128xf32> to vector<1x128xf32>
      %33 = vector.broadcast %32 : vector<1x128xf32> to vector<8x128xf32>
      %c0_19 = arith.constant 0 : index
      %c0_20 = arith.constant 0 : index
      %34 = vector.load %arg7[%c0_19, %c0_20] : memref<8x128xf32, #tpu.memory_space<vmem>>, vector<8x128xf32>
      tpu.vector_store %arg7[%c0_19, %c0_20], %33 {strides = array<i32>} : memref<8x128xf32, #tpu.memory_space<vmem>>, vector<8x128xf32>,
      %35 = arith.mulf %29, %29 : vector<64x128xf32>
      %cst_21 = arith.constant dense<0.000000e+00> : vector<128xf32>
      %36 = vector.multi_reduction <add>, %35, %cst_21 [0] : vector<64x128xf32> to vector<128xf32>
      %37 = vector.shape_cast %36 : vector<128xf32> to vector<1x128xf32>
      %38 = vector.shape_cast %37 : vector<1x128xf32> to vector<1x128xf32>
      %39 = vector.broadcast %38 : vector<1x128xf32> to vector<8x128xf32>
      %c0_22 = arith.constant 0 : index
      %c0_23 = arith.constant 0 : index
      %40 = vector.load %arg8[%c0_22, %c0_23] : memref<8x128xf32, #tpu.memory_space<vmem>>, vector<8x128xf32>
      tpu.vector_store %arg8[%c0_22, %c0_23], %39 {strides = array<i32>} : memref<8x128xf32, #tpu.memory_space<vmem>>, vector<8x128xf32>,
    } else {
    }
    return
  }
  func.func @transform_0(%arg0: i32, %arg1: i32, %arg2: i32) -> (i32, i32) {
    %c0_i32 = arith.constant 0 : i32
    return %arg0, %arg2 : i32, i32
  }
  func.func @transform_1(%arg0: i32, %arg1: i32, %arg2: i32) -> (i32, i32) {
    %c0_i32 = arith.constant 0 : i32
    return %arg2, %arg1 : i32, i32
  }
  func.func @transform_2(%arg0: i32, %arg1: i32, %arg2: i32) -> (i32, i32) {
    %c0_i32 = arith.constant 0 : i32
    %c0_i32_0 = arith.constant 0 : i32
    return %c0_i32, %arg1 : i32, i32
  }
  func.func @transform_3(%arg0: i32, %arg1: i32, %arg2: i32) -> (i32, i32) {
    %c0_i32 = arith.constant 0 : i32
    return %arg0, %arg1 : i32, i32
  }
  func.func @transform_4(%arg0: i32, %arg1: i32, %arg2: i32) -> (i32, i32) {
    %c0_i32 = arith.constant 0 : i32
    return %arg0, %arg1 : i32, i32
  }
  func.func @transform_5(%arg0: i32, %arg1: i32, %arg2: i32) -> (i32, i32) {
    %c0_i32 = arith.constant 0 : i32
    return %arg0, %arg1 : i32, i32
  }
}

module attributes {stable_mosaic.version = 11 : i64} {
  func.func @_conv_mm_kernel(%arg0: i32, %arg1: i32, %arg2: i32, %arg3: memref<32x2048xbf16, #tpu.memory_space<vmem>>, %arg4: memref<2048x128xbf16, #tpu.memory_space<vmem>>, %arg5: memref<1x128xf32, #tpu.memory_space<vmem>>, %arg6: memref<32x128xbf16, #tpu.memory_space<vmem>>, %arg7: memref<8x128xf32, #tpu.memory_space<vmem>>, %arg8: memref<8x128xf32, #tpu.memory_space<vmem>>, %arg9: memref<32x128xf32, #tpu.memory_space<vmem>>) attributes {dimension_semantics = [#tpu.dimension_semantics<parallel>, #tpu.dimension_semantics<parallel>, #tpu.dimension_semantics<arbitrary>], iteration_bounds = array<i64: 1, 2, 1>, scalar_prefetch = 0 : i64, scratch_operands = 1 : i64, tpu.core_type = #tpu.core_type<tc>, window_params = [{transform_indices = @transform_0, window_bounds = array<i64: 32, 2048>}, {transform_indices = @transform_1, window_bounds = array<i64: 2048, 128>}, {transform_indices = @transform_2, window_bounds = array<i64: 1, 128>}, {transform_indices = @transform_3, window_bounds = array<i64: 32, 128>}, {transform_indices = @transform_4, window_bounds = array<i64: 8, 128>}, {transform_indices = @transform_5, window_bounds = array<i64: 8, 128>}]} {
    %c32_i32 = arith.constant 32 : i32
    %0 = arith.muli %arg0, %c32_i32 : i32
    %c0_i32 = arith.constant 0 : i32
    %1 = arith.cmpi eq, %arg2, %c0_i32 : i32
    %2 = arith.extui %1 : i1 to i32
    %c0_i32_0 = arith.constant 0 : i32
    %3 = arith.cmpi ne, %2, %c0_i32_0 : i32
    scf.if %3 {
      %cst_10 = arith.constant 0.000000e+00 : f32
      %13 = vector.broadcast %cst_10 : f32 to vector<32x128xf32>
      %c0_11 = arith.constant 0 : index
      %c0_12 = arith.constant 0 : index
      %14 = vector.load %arg9[%c0_11, %c0_12] : memref<32x128xf32, #tpu.memory_space<vmem>>, vector<32x128xf32>
      tpu.vector_store %arg9[%c0_11, %c0_12], %13 {strides = array<i32>} : memref<32x128xf32, #tpu.memory_space<vmem>>, vector<32x128xf32>,
    } else {
    }
    %c0 = arith.constant 0 : index
    %c0_1 = arith.constant 0 : index
    %4 = vector.load %arg9[%c0, %c0_1] : memref<32x128xf32, #tpu.memory_space<vmem>>, vector<32x128xf32>
    %c0_2 = arith.constant 0 : index
    %c0_3 = arith.constant 0 : index
    %5 = vector.load %arg3[%c0_2, %c0_3] : memref<32x2048xbf16, #tpu.memory_space<vmem>>, vector<32x2048xbf16>
    %c0_4 = arith.constant 0 : index
    %c0_5 = arith.constant 0 : index
    %6 = vector.load %arg4[%c0_4, %c0_5] : memref<2048x128xbf16, #tpu.memory_space<vmem>>, vector<2048x128xbf16>
    %cst = arith.constant dense<0.000000e+00> : vector<32x128xf32>
    %7 = tpu.matmul %5, %6, %cst {dimension_numbers = #tpu.dot_dimension_numbers<[1], [0], [0], [1], [0, 0, 1, 1], [], []>} : vector<32x2048xbf16>, vector<2048x128xbf16>, vector<32x128xf32> -> vector<32x128xf32>
    %8 = arith.addf %4, %7 : vector<32x128xf32>
    %c0_6 = arith.constant 0 : index
    %c0_7 = arith.constant 0 : index
    %9 = vector.load %arg9[%c0_6, %c0_7] : memref<32x128xf32, #tpu.memory_space<vmem>>, vector<32x128xf32>
    tpu.vector_store %arg9[%c0_6, %c0_7], %8 {strides = array<i32>} : memref<32x128xf32, #tpu.memory_space<vmem>>, vector<32x128xf32>,
    %c0_i32_8 = arith.constant 0 : i32
    %10 = arith.cmpi eq, %arg2, %c0_i32_8 : i32
    %11 = arith.extui %10 : i1 to i32
    %c0_i32_9 = arith.constant 0 : i32
    %12 = arith.cmpi ne, %11, %c0_i32_9 : i32
    scf.if %12 {
      %c0_10 = arith.constant 0 : index
      %c0_11 = arith.constant 0 : index
      %13 = vector.load %arg9[%c0_10, %c0_11] : memref<32x128xf32, #tpu.memory_space<vmem>>, vector<32x128xf32>
      %c0_12 = arith.constant 0 : index
      %c0_13 = arith.constant 0 : index
      %14 = vector.load %arg5[%c0_12, %c0_13] : memref<1x128xf32, #tpu.memory_space<vmem>>, vector<1x128xf32>
      %15 = vector.broadcast %14 : vector<1x128xf32> to vector<32x128xf32>
      %16 = arith.addf %13, %15 : vector<32x128xf32>
      %cst_14 = arith.constant 0.000000e+00 : f32
      %17 = vector.broadcast %cst_14 : f32 to vector<32x128xf32>
      %18 = arith.maximumf %16, %17 : vector<32x128xf32>
      %19 = arith.truncf %18 : vector<32x128xf32> to vector<32x128xbf16>
      %c0_15 = arith.constant 0 : index
      %c0_16 = arith.constant 0 : index
      %20 = vector.load %arg6[%c0_15, %c0_16] : memref<32x128xbf16, #tpu.memory_space<vmem>>, vector<32x128xbf16>
      tpu.vector_store %arg6[%c0_15, %c0_16], %19 {strides = array<i32>} : memref<32x128xbf16, #tpu.memory_space<vmem>>, vector<32x128xbf16>,
      %21 = tpu.iota {dimensions = array<i32: 0>} : vector<32x1xi32>
      %22 = vector.broadcast %0 : i32 to vector<32x1xi32>
      %23 = arith.addi %22, %21 : vector<32x1xi32>
      %c32_i32_17 = arith.constant 32 : i32
      %24 = vector.broadcast %c32_i32_17 : i32 to vector<32x1xi32>
      %25 = arith.cmpi slt, %23, %24 : vector<32x1xi32>
      %cst_18 = arith.constant 0.000000e+00 : f32
      %26 = vector.shape_cast %25 : vector<32x1xi1> to vector<32x1xi1>
      %27 = vector.broadcast %26 : vector<32x1xi1> to vector<32x128xi1>
      %28 = vector.broadcast %cst_18 : f32 to vector<32x128xf32>
      %29 = arith.select %27, %18, %28 : vector<32x128xi1>, vector<32x128xf32>
      %cst_19 = arith.constant dense<0.000000e+00> : vector<128xf32>
      %30 = vector.multi_reduction <add>, %29, %cst_19 [0] : vector<32x128xf32> to vector<128xf32>
      %31 = vector.shape_cast %30 : vector<128xf32> to vector<1x128xf32>
      %32 = vector.shape_cast %31 : vector<1x128xf32> to vector<1x128xf32>
      %33 = vector.broadcast %32 : vector<1x128xf32> to vector<8x128xf32>
      %c0_20 = arith.constant 0 : index
      %c0_21 = arith.constant 0 : index
      %34 = vector.load %arg7[%c0_20, %c0_21] : memref<8x128xf32, #tpu.memory_space<vmem>>, vector<8x128xf32>
      tpu.vector_store %arg7[%c0_20, %c0_21], %33 {strides = array<i32>} : memref<8x128xf32, #tpu.memory_space<vmem>>, vector<8x128xf32>,
      %35 = arith.mulf %29, %29 : vector<32x128xf32>
      %cst_22 = arith.constant dense<0.000000e+00> : vector<128xf32>
      %36 = vector.multi_reduction <add>, %35, %cst_22 [0] : vector<32x128xf32> to vector<128xf32>
      %37 = vector.shape_cast %36 : vector<128xf32> to vector<1x128xf32>
      %38 = vector.shape_cast %37 : vector<1x128xf32> to vector<1x128xf32>
      %39 = vector.broadcast %38 : vector<1x128xf32> to vector<8x128xf32>
      %c0_23 = arith.constant 0 : index
      %c0_24 = arith.constant 0 : index
      %40 = vector.load %arg8[%c0_23, %c0_24] : memref<8x128xf32, #tpu.memory_space<vmem>>, vector<8x128xf32>
      tpu.vector_store %arg8[%c0_23, %c0_24], %39 {strides = array<i32>} : memref<8x128xf32, #tpu.memory_space<vmem>>, vector<8x128xf32>,
    } else {
    }
    return
  }
  func.func @transform_0(%arg0: i32, %arg1: i32, %arg2: i32) -> (i32, i32) {
    %c0_i32 = arith.constant 0 : i32
    return %arg0, %arg2 : i32, i32
  }
  func.func @transform_1(%arg0: i32, %arg1: i32, %arg2: i32) -> (i32, i32) {
    %c0_i32 = arith.constant 0 : i32
    return %arg2, %arg1 : i32, i32
  }
  func.func @transform_2(%arg0: i32, %arg1: i32, %arg2: i32) -> (i32, i32) {
    %c0_i32 = arith.constant 0 : i32
    %c0_i32_0 = arith.constant 0 : i32
    return %c0_i32, %arg1 : i32, i32
  }
  func.func @transform_3(%arg0: i32, %arg1: i32, %arg2: i32) -> (i32, i32) {
    %c0_i32 = arith.constant 0 : i32
    return %arg0, %arg1 : i32, i32
  }
  func.func @transform_4(%arg0: i32, %arg1: i32, %arg2: i32) -> (i32, i32) {
    %c0_i32 = arith.constant 0 : i32
    return %arg0, %arg1 : i32, i32
  }
  func.func @transform_5(%arg0: i32, %arg1: i32, %arg2: i32) -> (i32, i32) {
    %c0_i32 = arith.constant 0 : i32
    return %arg0, %arg1 : i32, i32
  }
}

module attributes {stable_mosaic.version = 11 : i64} {
  func.func @_conv_mm_kernel(%arg0: i32, %arg1: i32, %arg2: i32, %arg3: memref<8x2048xbf16, #tpu.memory_space<vmem>>, %arg4: memref<2048x256xbf16, #tpu.memory_space<vmem>>, %arg5: memref<1x256xf32, #tpu.memory_space<vmem>>, %arg6: memref<8x256xbf16, #tpu.memory_space<vmem>>, %arg7: memref<8x256xf32, #tpu.memory_space<vmem>>, %arg8: memref<8x256xf32, #tpu.memory_space<vmem>>, %arg9: memref<8x256xf32, #tpu.memory_space<vmem>>) attributes {dimension_semantics = [#tpu.dimension_semantics<parallel>, #tpu.dimension_semantics<parallel>, #tpu.dimension_semantics<arbitrary>], iteration_bounds = array<i64: 1, 2, 2>, scalar_prefetch = 0 : i64, scratch_operands = 1 : i64, tpu.core_type = #tpu.core_type<tc>, window_params = [{transform_indices = @transform_0, window_bounds = array<i64: 8, 2048>}, {transform_indices = @transform_1, window_bounds = array<i64: 2048, 256>}, {transform_indices = @transform_2, window_bounds = array<i64: 1, 256>}, {transform_indices = @transform_3, window_bounds = array<i64: 8, 256>}, {transform_indices = @transform_4, window_bounds = array<i64: 8, 256>}, {transform_indices = @transform_5, window_bounds = array<i64: 8, 256>}]} {
    %c8_i32 = arith.constant 8 : i32
    %0 = arith.muli %arg0, %c8_i32 : i32
    %c0_i32 = arith.constant 0 : i32
    %1 = arith.cmpi eq, %arg2, %c0_i32 : i32
    %2 = arith.extui %1 : i1 to i32
    %c0_i32_0 = arith.constant 0 : i32
    %3 = arith.cmpi ne, %2, %c0_i32_0 : i32
    scf.if %3 {
      %cst_9 = arith.constant 0.000000e+00 : f32
      %13 = vector.broadcast %cst_9 : f32 to vector<8x256xf32>
      %c0_10 = arith.constant 0 : index
      %c0_11 = arith.constant 0 : index
      %14 = vector.load %arg9[%c0_10, %c0_11] : memref<8x256xf32, #tpu.memory_space<vmem>>, vector<8x256xf32>
      tpu.vector_store %arg9[%c0_10, %c0_11], %13 {strides = array<i32>} : memref<8x256xf32, #tpu.memory_space<vmem>>, vector<8x256xf32>,
    } else {
    }
    %c0 = arith.constant 0 : index
    %c0_1 = arith.constant 0 : index
    %4 = vector.load %arg9[%c0, %c0_1] : memref<8x256xf32, #tpu.memory_space<vmem>>, vector<8x256xf32>
    %c0_2 = arith.constant 0 : index
    %c0_3 = arith.constant 0 : index
    %5 = vector.load %arg3[%c0_2, %c0_3] : memref<8x2048xbf16, #tpu.memory_space<vmem>>, vector<8x2048xbf16>
    %c0_4 = arith.constant 0 : index
    %c0_5 = arith.constant 0 : index
    %6 = vector.load %arg4[%c0_4, %c0_5] : memref<2048x256xbf16, #tpu.memory_space<vmem>>, vector<2048x256xbf16>
    %cst = arith.constant dense<0.000000e+00> : vector<8x256xf32>
    %7 = tpu.matmul %5, %6, %cst {dimension_numbers = #tpu.dot_dimension_numbers<[1], [0], [0], [1], [0, 0, 1, 1], [], []>} : vector<8x2048xbf16>, vector<2048x256xbf16>, vector<8x256xf32> -> vector<8x256xf32>
    %8 = arith.addf %4, %7 : vector<8x256xf32>
    %c0_6 = arith.constant 0 : index
    %c0_7 = arith.constant 0 : index
    %9 = vector.load %arg9[%c0_6, %c0_7] : memref<8x256xf32, #tpu.memory_space<vmem>>, vector<8x256xf32>
    tpu.vector_store %arg9[%c0_6, %c0_7], %8 {strides = array<i32>} : memref<8x256xf32, #tpu.memory_space<vmem>>, vector<8x256xf32>,
    %c1_i32 = arith.constant 1 : i32
    %10 = arith.cmpi eq, %arg2, %c1_i32 : i32
    %11 = arith.extui %10 : i1 to i32
    %c0_i32_8 = arith.constant 0 : i32
    %12 = arith.cmpi ne, %11, %c0_i32_8 : i32
    scf.if %12 {
      %c0_9 = arith.constant 0 : index
      %c0_10 = arith.constant 0 : index
      %13 = vector.load %arg9[%c0_9, %c0_10] : memref<8x256xf32, #tpu.memory_space<vmem>>, vector<8x256xf32>
      %c0_11 = arith.constant 0 : index
      %c0_12 = arith.constant 0 : index
      %14 = vector.load %arg5[%c0_11, %c0_12] : memref<1x256xf32, #tpu.memory_space<vmem>>, vector<1x256xf32>
      %15 = vector.broadcast %14 : vector<1x256xf32> to vector<8x256xf32>
      %16 = arith.addf %13, %15 : vector<8x256xf32>
      %cst_13 = arith.constant 0.000000e+00 : f32
      %17 = vector.broadcast %cst_13 : f32 to vector<8x256xf32>
      %18 = arith.maximumf %16, %17 : vector<8x256xf32>
      %19 = arith.truncf %18 : vector<8x256xf32> to vector<8x256xbf16>
      %c0_14 = arith.constant 0 : index
      %c0_15 = arith.constant 0 : index
      %20 = vector.load %arg6[%c0_14, %c0_15] : memref<8x256xbf16, #tpu.memory_space<vmem>>, vector<8x256xbf16>
      tpu.vector_store %arg6[%c0_14, %c0_15], %19 {strides = array<i32>} : memref<8x256xbf16, #tpu.memory_space<vmem>>, vector<8x256xbf16>,
      %21 = tpu.iota {dimensions = array<i32: 0>} : vector<8x1xi32>
      %22 = vector.broadcast %0 : i32 to vector<8x1xi32>
      %23 = arith.addi %22, %21 : vector<8x1xi32>
      %c8_i32_16 = arith.constant 8 : i32
      %24 = vector.broadcast %c8_i32_16 : i32 to vector<8x1xi32>
      %25 = arith.cmpi slt, %23, %24 : vector<8x1xi32>
      %cst_17 = arith.constant 0.000000e+00 : f32
      %26 = vector.shape_cast %25 : vector<8x1xi1> to vector<8x1xi1>
      %27 = vector.broadcast %26 : vector<8x1xi1> to vector<8x256xi1>
      %28 = vector.broadcast %cst_17 : f32 to vector<8x256xf32>
      %29 = arith.select %27, %18, %28 : vector<8x256xi1>, vector<8x256xf32>
      %cst_18 = arith.constant dense<0.000000e+00> : vector<256xf32>
      %30 = vector.multi_reduction <add>, %29, %cst_18 [0] : vector<8x256xf32> to vector<256xf32>
      %31 = vector.shape_cast %30 : vector<256xf32> to vector<1x256xf32>
      %32 = vector.shape_cast %31 : vector<1x256xf32> to vector<1x256xf32>
      %33 = vector.broadcast %32 : vector<1x256xf32> to vector<8x256xf32>
      %c0_19 = arith.constant 0 : index
      %c0_20 = arith.constant 0 : index
      %34 = vector.load %arg7[%c0_19, %c0_20] : memref<8x256xf32, #tpu.memory_space<vmem>>, vector<8x256xf32>
      tpu.vector_store %arg7[%c0_19, %c0_20], %33 {strides = array<i32>} : memref<8x256xf32, #tpu.memory_space<vmem>>, vector<8x256xf32>,
      %35 = arith.mulf %29, %29 : vector<8x256xf32>
      %cst_21 = arith.constant dense<0.000000e+00> : vector<256xf32>
      %36 = vector.multi_reduction <add>, %35, %cst_21 [0] : vector<8x256xf32> to vector<256xf32>
      %37 = vector.shape_cast %36 : vector<256xf32> to vector<1x256xf32>
      %38 = vector.shape_cast %37 : vector<1x256xf32> to vector<1x256xf32>
      %39 = vector.broadcast %38 : vector<1x256xf32> to vector<8x256xf32>
      %c0_22 = arith.constant 0 : index
      %c0_23 = arith.constant 0 : index
      %40 = vector.load %arg8[%c0_22, %c0_23] : memref<8x256xf32, #tpu.memory_space<vmem>>, vector<8x256xf32>
      tpu.vector_store %arg8[%c0_22, %c0_23], %39 {strides = array<i32>} : memref<8x256xf32, #tpu.memory_space<vmem>>, vector<8x256xf32>,
    } else {
    }
    return
  }
  func.func @transform_0(%arg0: i32, %arg1: i32, %arg2: i32) -> (i32, i32) {
    %c0_i32 = arith.constant 0 : i32
    return %arg0, %arg2 : i32, i32
  }
  func.func @transform_1(%arg0: i32, %arg1: i32, %arg2: i32) -> (i32, i32) {
    %c0_i32 = arith.constant 0 : i32
    return %arg2, %arg1 : i32, i32
  }
  func.func @transform_2(%arg0: i32, %arg1: i32, %arg2: i32) -> (i32, i32) {
    %c0_i32 = arith.constant 0 : i32
    %c0_i32_0 = arith.constant 0 : i32
    return %c0_i32, %arg1 : i32, i32
  }
  func.func @transform_3(%arg0: i32, %arg1: i32, %arg2: i32) -> (i32, i32) {
    %c0_i32 = arith.constant 0 : i32
    return %arg0, %arg1 : i32, i32
  }
  func.func @transform_4(%arg0: i32, %arg1: i32, %arg2: i32) -> (i32, i32) {
    %c0_i32 = arith.constant 0 : i32
    return %arg0, %arg1 : i32, i32
  }
  func.func @transform_5(%arg0: i32, %arg1: i32, %arg2: i32) -> (i32, i32) {
    %c0_i32 = arith.constant 0 : i32
    return %arg0, %arg1 : i32, i32
  }
}

module attributes {stable_mosaic.version = 11 : i64} {
  func.func @_conv_mm_kernel(%arg0: i32, %arg1: i32, %arg2: i32, %arg3: memref<8x1536xbf16, #tpu.memory_space<vmem>>, %arg4: memref<1536x256xbf16, #tpu.memory_space<vmem>>, %arg5: memref<1x256xf32, #tpu.memory_space<vmem>>, %arg6: memref<8x256xbf16, #tpu.memory_space<vmem>>, %arg7: memref<8x256xf32, #tpu.memory_space<vmem>>, %arg8: memref<8x256xf32, #tpu.memory_space<vmem>>, %arg9: memref<8x256xf32, #tpu.memory_space<vmem>>) attributes {dimension_semantics = [#tpu.dimension_semantics<parallel>, #tpu.dimension_semantics<parallel>, #tpu.dimension_semantics<arbitrary>], iteration_bounds = array<i64: 1, 2, 3>, scalar_prefetch = 0 : i64, scratch_operands = 1 : i64, tpu.core_type = #tpu.core_type<tc>, window_params = [{transform_indices = @transform_0, window_bounds = array<i64: 8, 1536>}, {transform_indices = @transform_1, window_bounds = array<i64: 1536, 256>}, {transform_indices = @transform_2, window_bounds = array<i64: 1, 256>}, {transform_indices = @transform_3, window_bounds = array<i64: 8, 256>}, {transform_indices = @transform_4, window_bounds = array<i64: 8, 256>}, {transform_indices = @transform_5, window_bounds = array<i64: 8, 256>}]} {
    %c8_i32 = arith.constant 8 : i32
    %0 = arith.muli %arg0, %c8_i32 : i32
    %c0_i32 = arith.constant 0 : i32
    %1 = arith.cmpi eq, %arg2, %c0_i32 : i32
    %2 = arith.extui %1 : i1 to i32
    %c0_i32_0 = arith.constant 0 : i32
    %3 = arith.cmpi ne, %2, %c0_i32_0 : i32
    scf.if %3 {
      %cst_9 = arith.constant 0.000000e+00 : f32
      %13 = vector.broadcast %cst_9 : f32 to vector<8x256xf32>
      %c0_10 = arith.constant 0 : index
      %c0_11 = arith.constant 0 : index
      %14 = vector.load %arg9[%c0_10, %c0_11] : memref<8x256xf32, #tpu.memory_space<vmem>>, vector<8x256xf32>
      tpu.vector_store %arg9[%c0_10, %c0_11], %13 {strides = array<i32>} : memref<8x256xf32, #tpu.memory_space<vmem>>, vector<8x256xf32>,
    } else {
    }
    %c0 = arith.constant 0 : index
    %c0_1 = arith.constant 0 : index
    %4 = vector.load %arg9[%c0, %c0_1] : memref<8x256xf32, #tpu.memory_space<vmem>>, vector<8x256xf32>
    %c0_2 = arith.constant 0 : index
    %c0_3 = arith.constant 0 : index
    %5 = vector.load %arg3[%c0_2, %c0_3] : memref<8x1536xbf16, #tpu.memory_space<vmem>>, vector<8x1536xbf16>
    %c0_4 = arith.constant 0 : index
    %c0_5 = arith.constant 0 : index
    %6 = vector.load %arg4[%c0_4, %c0_5] : memref<1536x256xbf16, #tpu.memory_space<vmem>>, vector<1536x256xbf16>
    %cst = arith.constant dense<0.000000e+00> : vector<8x256xf32>
    %7 = tpu.matmul %5, %6, %cst {dimension_numbers = #tpu.dot_dimension_numbers<[1], [0], [0], [1], [0, 0, 1, 1], [], []>} : vector<8x1536xbf16>, vector<1536x256xbf16>, vector<8x256xf32> -> vector<8x256xf32>
    %8 = arith.addf %4, %7 : vector<8x256xf32>
    %c0_6 = arith.constant 0 : index
    %c0_7 = arith.constant 0 : index
    %9 = vector.load %arg9[%c0_6, %c0_7] : memref<8x256xf32, #tpu.memory_space<vmem>>, vector<8x256xf32>
    tpu.vector_store %arg9[%c0_6, %c0_7], %8 {strides = array<i32>} : memref<8x256xf32, #tpu.memory_space<vmem>>, vector<8x256xf32>,
    %c2_i32 = arith.constant 2 : i32
    %10 = arith.cmpi eq, %arg2, %c2_i32 : i32
    %11 = arith.extui %10 : i1 to i32
    %c0_i32_8 = arith.constant 0 : i32
    %12 = arith.cmpi ne, %11, %c0_i32_8 : i32
    scf.if %12 {
      %c0_9 = arith.constant 0 : index
      %c0_10 = arith.constant 0 : index
      %13 = vector.load %arg9[%c0_9, %c0_10] : memref<8x256xf32, #tpu.memory_space<vmem>>, vector<8x256xf32>
      %c0_11 = arith.constant 0 : index
      %c0_12 = arith.constant 0 : index
      %14 = vector.load %arg5[%c0_11, %c0_12] : memref<1x256xf32, #tpu.memory_space<vmem>>, vector<1x256xf32>
      %15 = vector.broadcast %14 : vector<1x256xf32> to vector<8x256xf32>
      %16 = arith.addf %13, %15 : vector<8x256xf32>
      %cst_13 = arith.constant 0.000000e+00 : f32
      %17 = vector.broadcast %cst_13 : f32 to vector<8x256xf32>
      %18 = arith.maximumf %16, %17 : vector<8x256xf32>
      %19 = arith.truncf %18 : vector<8x256xf32> to vector<8x256xbf16>
      %c0_14 = arith.constant 0 : index
      %c0_15 = arith.constant 0 : index
      %20 = vector.load %arg6[%c0_14, %c0_15] : memref<8x256xbf16, #tpu.memory_space<vmem>>, vector<8x256xbf16>
      tpu.vector_store %arg6[%c0_14, %c0_15], %19 {strides = array<i32>} : memref<8x256xbf16, #tpu.memory_space<vmem>>, vector<8x256xbf16>,
      %21 = tpu.iota {dimensions = array<i32: 0>} : vector<8x1xi32>
      %22 = vector.broadcast %0 : i32 to vector<8x1xi32>
      %23 = arith.addi %22, %21 : vector<8x1xi32>
      %c8_i32_16 = arith.constant 8 : i32
      %24 = vector.broadcast %c8_i32_16 : i32 to vector<8x1xi32>
      %25 = arith.cmpi slt, %23, %24 : vector<8x1xi32>
      %cst_17 = arith.constant 0.000000e+00 : f32
      %26 = vector.shape_cast %25 : vector<8x1xi1> to vector<8x1xi1>
      %27 = vector.broadcast %26 : vector<8x1xi1> to vector<8x256xi1>
      %28 = vector.broadcast %cst_17 : f32 to vector<8x256xf32>
      %29 = arith.select %27, %18, %28 : vector<8x256xi1>, vector<8x256xf32>
      %cst_18 = arith.constant dense<0.000000e+00> : vector<256xf32>
      %30 = vector.multi_reduction <add>, %29, %cst_18 [0] : vector<8x256xf32> to vector<256xf32>
      %31 = vector.shape_cast %30 : vector<256xf32> to vector<1x256xf32>
      %32 = vector.shape_cast %31 : vector<1x256xf32> to vector<1x256xf32>
      %33 = vector.broadcast %32 : vector<1x256xf32> to vector<8x256xf32>
      %c0_19 = arith.constant 0 : index
      %c0_20 = arith.constant 0 : index
      %34 = vector.load %arg7[%c0_19, %c0_20] : memref<8x256xf32, #tpu.memory_space<vmem>>, vector<8x256xf32>
      tpu.vector_store %arg7[%c0_19, %c0_20], %33 {strides = array<i32>} : memref<8x256xf32, #tpu.memory_space<vmem>>, vector<8x256xf32>,
      %35 = arith.mulf %29, %29 : vector<8x256xf32>
      %cst_21 = arith.constant dense<0.000000e+00> : vector<256xf32>
      %36 = vector.multi_reduction <add>, %35, %cst_21 [0] : vector<8x256xf32> to vector<256xf32>
      %37 = vector.shape_cast %36 : vector<256xf32> to vector<1x256xf32>
      %38 = vector.shape_cast %37 : vector<1x256xf32> to vector<1x256xf32>
      %39 = vector.broadcast %38 : vector<1x256xf32> to vector<8x256xf32>
      %c0_22 = arith.constant 0 : index
      %c0_23 = arith.constant 0 : index
      %40 = vector.load %arg8[%c0_22, %c0_23] : memref<8x256xf32, #tpu.memory_space<vmem>>, vector<8x256xf32>
      tpu.vector_store %arg8[%c0_22, %c0_23], %39 {strides = array<i32>} : memref<8x256xf32, #tpu.memory_space<vmem>>, vector<8x256xf32>,
    } else {
    }
    return
  }
  func.func @transform_0(%arg0: i32, %arg1: i32, %arg2: i32) -> (i32, i32) {
    %c0_i32 = arith.constant 0 : i32
    return %arg0, %arg2 : i32, i32
  }
  func.func @transform_1(%arg0: i32, %arg1: i32, %arg2: i32) -> (i32, i32) {
    %c0_i32 = arith.constant 0 : i32
    return %arg2, %arg1 : i32, i32
  }
  func.func @transform_2(%arg0: i32, %arg1: i32, %arg2: i32) -> (i32, i32) {
    %c0_i32 = arith.constant 0 : i32
    %c0_i32_0 = arith.constant 0 : i32
    return %c0_i32, %arg1 : i32, i32
  }
  func.func @transform_3(%arg0: i32, %arg1: i32, %arg2: i32) -> (i32, i32) {
    %c0_i32 = arith.constant 0 : i32
    return %arg0, %arg1 : i32, i32
  }
  func.func @transform_4(%arg0: i32, %arg1: i32, %arg2: i32) -> (i32, i32) {
    %c0_i32 = arith.constant 0 : i32
    return %arg0, %arg1 : i32, i32
  }
  func.func @transform_5(%arg0: i32, %arg1: i32, %arg2: i32) -> (i32, i32) {
    %c0_i32 = arith.constant 0 : i32
    return %arg0, %arg1 : i32, i32
  }
}

module attributes {stable_mosaic.version = 11 : i64} {
  func.func @_conv_mm_kernel(%arg0: i32, %arg1: i32, %arg2: i32, %arg3: memref<8x1536xbf16, #tpu.memory_space<vmem>>, %arg4: memref<1536x256xbf16, #tpu.memory_space<vmem>>, %arg5: memref<1x256xf32, #tpu.memory_space<vmem>>, %arg6: memref<8x256xf32, #tpu.memory_space<vmem>>, %arg7: memref<8x256xf32, #tpu.memory_space<vmem>>, %arg8: memref<8x256xf32, #tpu.memory_space<vmem>>, %arg9: memref<8x256xf32, #tpu.memory_space<vmem>>) attributes {dimension_semantics = [#tpu.dimension_semantics<parallel>, #tpu.dimension_semantics<parallel>, #tpu.dimension_semantics<arbitrary>], iteration_bounds = array<i64: 1, 2, 3>, scalar_prefetch = 0 : i64, scratch_operands = 1 : i64, tpu.core_type = #tpu.core_type<tc>, window_params = [{transform_indices = @transform_0, window_bounds = array<i64: 8, 1536>}, {transform_indices = @transform_1, window_bounds = array<i64: 1536, 256>}, {transform_indices = @transform_2, window_bounds = array<i64: 1, 256>}, {transform_indices = @transform_3, window_bounds = array<i64: 8, 256>}, {transform_indices = @transform_4, window_bounds = array<i64: 8, 256>}, {transform_indices = @transform_5, window_bounds = array<i64: 8, 256>}]} {
    %c8_i32 = arith.constant 8 : i32
    %0 = arith.muli %arg0, %c8_i32 : i32
    %c0_i32 = arith.constant 0 : i32
    %1 = arith.cmpi eq, %arg2, %c0_i32 : i32
    %2 = arith.extui %1 : i1 to i32
    %c0_i32_0 = arith.constant 0 : i32
    %3 = arith.cmpi ne, %2, %c0_i32_0 : i32
    scf.if %3 {
      %cst_9 = arith.constant 0.000000e+00 : f32
      %13 = vector.broadcast %cst_9 : f32 to vector<8x256xf32>
      %c0_10 = arith.constant 0 : index
      %c0_11 = arith.constant 0 : index
      %14 = vector.load %arg9[%c0_10, %c0_11] : memref<8x256xf32, #tpu.memory_space<vmem>>, vector<8x256xf32>
      tpu.vector_store %arg9[%c0_10, %c0_11], %13 {strides = array<i32>} : memref<8x256xf32, #tpu.memory_space<vmem>>, vector<8x256xf32>,
    } else {
    }
    %c0 = arith.constant 0 : index
    %c0_1 = arith.constant 0 : index
    %4 = vector.load %arg9[%c0, %c0_1] : memref<8x256xf32, #tpu.memory_space<vmem>>, vector<8x256xf32>
    %c0_2 = arith.constant 0 : index
    %c0_3 = arith.constant 0 : index
    %5 = vector.load %arg3[%c0_2, %c0_3] : memref<8x1536xbf16, #tpu.memory_space<vmem>>, vector<8x1536xbf16>
    %c0_4 = arith.constant 0 : index
    %c0_5 = arith.constant 0 : index
    %6 = vector.load %arg4[%c0_4, %c0_5] : memref<1536x256xbf16, #tpu.memory_space<vmem>>, vector<1536x256xbf16>
    %cst = arith.constant dense<0.000000e+00> : vector<8x256xf32>
    %7 = tpu.matmul %5, %6, %cst {dimension_numbers = #tpu.dot_dimension_numbers<[1], [0], [0], [1], [0, 0, 1, 1], [], []>} : vector<8x1536xbf16>, vector<1536x256xbf16>, vector<8x256xf32> -> vector<8x256xf32>
    %8 = arith.addf %4, %7 : vector<8x256xf32>
    %c0_6 = arith.constant 0 : index
    %c0_7 = arith.constant 0 : index
    %9 = vector.load %arg9[%c0_6, %c0_7] : memref<8x256xf32, #tpu.memory_space<vmem>>, vector<8x256xf32>
    tpu.vector_store %arg9[%c0_6, %c0_7], %8 {strides = array<i32>} : memref<8x256xf32, #tpu.memory_space<vmem>>, vector<8x256xf32>,
    %c2_i32 = arith.constant 2 : i32
    %10 = arith.cmpi eq, %arg2, %c2_i32 : i32
    %11 = arith.extui %10 : i1 to i32
    %c0_i32_8 = arith.constant 0 : i32
    %12 = arith.cmpi ne, %11, %c0_i32_8 : i32
    scf.if %12 {
      %c0_9 = arith.constant 0 : index
      %c0_10 = arith.constant 0 : index
      %13 = vector.load %arg9[%c0_9, %c0_10] : memref<8x256xf32, #tpu.memory_space<vmem>>, vector<8x256xf32>
      %c0_11 = arith.constant 0 : index
      %c0_12 = arith.constant 0 : index
      %14 = vector.load %arg5[%c0_11, %c0_12] : memref<1x256xf32, #tpu.memory_space<vmem>>, vector<1x256xf32>
      %15 = vector.broadcast %14 : vector<1x256xf32> to vector<8x256xf32>
      %16 = arith.addf %13, %15 : vector<8x256xf32>
      %cst_13 = arith.constant 0.000000e+00 : f32
      %17 = vector.broadcast %cst_13 : f32 to vector<8x256xf32>
      %18 = arith.maximumf %16, %17 : vector<8x256xf32>
      %c0_14 = arith.constant 0 : index
      %c0_15 = arith.constant 0 : index
      %19 = vector.load %arg6[%c0_14, %c0_15] : memref<8x256xf32, #tpu.memory_space<vmem>>, vector<8x256xf32>
      tpu.vector_store %arg6[%c0_14, %c0_15], %18 {strides = array<i32>} : memref<8x256xf32, #tpu.memory_space<vmem>>, vector<8x256xf32>,
      %20 = tpu.iota {dimensions = array<i32: 0>} : vector<8x1xi32>
      %21 = vector.broadcast %0 : i32 to vector<8x1xi32>
      %22 = arith.addi %21, %20 : vector<8x1xi32>
      %c8_i32_16 = arith.constant 8 : i32
      %23 = vector.broadcast %c8_i32_16 : i32 to vector<8x1xi32>
      %24 = arith.cmpi slt, %22, %23 : vector<8x1xi32>
      %cst_17 = arith.constant 0.000000e+00 : f32
      %25 = vector.shape_cast %24 : vector<8x1xi1> to vector<8x1xi1>
      %26 = vector.broadcast %25 : vector<8x1xi1> to vector<8x256xi1>
      %27 = vector.broadcast %cst_17 : f32 to vector<8x256xf32>
      %28 = arith.select %26, %18, %27 : vector<8x256xi1>, vector<8x256xf32>
      %cst_18 = arith.constant dense<0.000000e+00> : vector<256xf32>
      %29 = vector.multi_reduction <add>, %28, %cst_18 [0] : vector<8x256xf32> to vector<256xf32>
      %30 = vector.shape_cast %29 : vector<256xf32> to vector<1x256xf32>
      %31 = vector.shape_cast %30 : vector<1x256xf32> to vector<1x256xf32>
      %32 = vector.broadcast %31 : vector<1x256xf32> to vector<8x256xf32>
      %c0_19 = arith.constant 0 : index
      %c0_20 = arith.constant 0 : index
      %33 = vector.load %arg7[%c0_19, %c0_20] : memref<8x256xf32, #tpu.memory_space<vmem>>, vector<8x256xf32>
      tpu.vector_store %arg7[%c0_19, %c0_20], %32 {strides = array<i32>} : memref<8x256xf32, #tpu.memory_space<vmem>>, vector<8x256xf32>,
      %34 = arith.mulf %28, %28 : vector<8x256xf32>
      %cst_21 = arith.constant dense<0.000000e+00> : vector<256xf32>
      %35 = vector.multi_reduction <add>, %34, %cst_21 [0] : vector<8x256xf32> to vector<256xf32>
      %36 = vector.shape_cast %35 : vector<256xf32> to vector<1x256xf32>
      %37 = vector.shape_cast %36 : vector<1x256xf32> to vector<1x256xf32>
      %38 = vector.broadcast %37 : vector<1x256xf32> to vector<8x256xf32>
      %c0_22 = arith.constant 0 : index
      %c0_23 = arith.constant 0 : index
      %39 = vector.load %arg8[%c0_22, %c0_23] : memref<8x256xf32, #tpu.memory_space<vmem>>, vector<8x256xf32>
      tpu.vector_store %arg8[%c0_22, %c0_23], %38 {strides = array<i32>} : memref<8x256xf32, #tpu.memory_space<vmem>>, vector<8x256xf32>,
    } else {
    }
    return
  }
  func.func @transform_0(%arg0: i32, %arg1: i32, %arg2: i32) -> (i32, i32) {
    %c0_i32 = arith.constant 0 : i32
    return %arg0, %arg2 : i32, i32
  }
  func.func @transform_1(%arg0: i32, %arg1: i32, %arg2: i32) -> (i32, i32) {
    %c0_i32 = arith.constant 0 : i32
    return %arg2, %arg1 : i32, i32
  }
  func.func @transform_2(%arg0: i32, %arg1: i32, %arg2: i32) -> (i32, i32) {
    %c0_i32 = arith.constant 0 : i32
    %c0_i32_0 = arith.constant 0 : i32
    return %c0_i32, %arg1 : i32, i32
  }
  func.func @transform_3(%arg0: i32, %arg1: i32, %arg2: i32) -> (i32, i32) {
    %c0_i32 = arith.constant 0 : i32
    return %arg0, %arg1 : i32, i32
  }
  func.func @transform_4(%arg0: i32, %arg1: i32, %arg2: i32) -> (i32, i32) {
    %c0_i32 = arith.constant 0 : i32
    return %arg0, %arg1 : i32, i32
  }
  func.func @transform_5(%arg0: i32, %arg1: i32, %arg2: i32) -> (i32, i32) {
    %c0_i32 = arith.constant 0 : i32
    return %arg0, %arg1 : i32, i32
  }
}

</mosaic_0001>

<bundles_post_ra>
// kernel: feature_extraction_forward.6
= control target key start
LH: loop header
LB: loop body
LE: loop exit
PB: predicated region body
PF: predicated region fallthrough
CT: control target
= control target key end

     0   :  { %11 = vsyncpa [#allocation4], 0  ;;  %s2595_s0 = inlined_call_operand.vmem [shape: bf16[512,64], index: 0, kind: input, shape index: {}]   ;;  %s2596_s1 = inlined_call_operand.hbm [shape: bf16[64,128], index: 1, kind: input, shape index: {}]   ;;  %s2597_s2 = inlined_call_operand.hbm [shape: f32[1,128], index: 2, kind: input, shape index: {}]   ;;  %s2598_s3 = inlined_call_operand.vmem [shape: bf16[512,128], index: 3, kind: output, shape index: {0}]   ;;  %s2599_s4 = inlined_call_operand.vmem [shape: f32[16,128], index: 4, kind: output, shape index: {1}]   ;;  %s2600_s5 = inlined_call_operand.vmem [shape: f32[16,128], index: 5, kind: output, shape index: {2}]  }
   0x1   :  { %12 = vsyncpa [#allocation6], 0  ;;  %s2068_s18 = smov 0   ;;  %s2070_s19 = smov 0  }
   0x2   :  { %s2072_s20 = smov 0  }
   0x3 LB: > { %s1597_s21 = sadd.s32 4294967295, %s2032_s20   ;;  %s37_s22 = sadd.s32 1, %s2028_s19  ;;  %s2032_s20 = sphi %s2072_s20, %s18_s20   ;;  %s2028_s19 = sphi %s2070_s19, %s2610_s19   ;;  %s2024_s18 = sphi %s2068_s18, %s2609_s18  }
   0x4   : > { %p39_p0 = scmp.ge.s32.totalorder %s37_s22, 2  ;;  %p1599_p1 = scmp.ge.s32.totalorder %s2032_s20, 1 }
   0x5   : > { %p208_p2 = scmp.lt.s32.totalorder %s2032_s20, 3  ;;  %p2093_p4 = scmp.eq.s32.totalorder %s1597_s21, 0 }
   0x6   : > { %s2612_s22 = smov (%p39_p0, %s37_s22), 0  ;;  %s2034_s25 = smov [#allocation3]  }
   0x7   : > { %p2089_p3 = pnand %p1599_p1, %p208_p2  ;;  %s224_s26 = sshll.u32 %s2034_s25, 4  ;;  %s225_s26 = int_to_ptr.vmem [resolvable:$true] %s224_s26 }
   0x8   : > { %s2605_s24 = scalar_select %p2093_p4, 1, 0 }
   0x9   : > { %s2604_s23 = scalar_select %p2089_p3, 1, 0 }
   0xa   : > { %p1887_p5 = pneg %p2089_p3  ;;  %s2035_s28 = smov [#allocation5]  }
   0xb   : > { %s240_s29 = sshll.u32 %s2035_s28, 4  ;;  %s1946_s7 = scalar_lea.hbm %s2596_s1, 512  ;;  %s2105_s29 = int_to_ptr.vmem [resolvable:$true] %s240_s29 }
   0xc   : > { %p2101_p6 = pnand %p2093_p4, %p1887_p5  ;;  %p1947_p7 = scmp.ne.s32.totalorder %s2596_s1, %s1946_s7 }
   0xd   : > { %p1953_p11 = scmp.lt.u32.totalorder %s1946_s7, %s2596_s1 }
   0xe   : > { %p1948_p8 = pneg %p2101_p6 }
  0x10   : > { %p1949_p9 = pnand %p1948_p8, %p1947_p7 }
  0x12   : > { %p1950_p10 = pneg %p1949_p9 }
  0x14   : > { %p1955_p12 = pnand %p1953_p11, %p1950_p10 }
  0x16   : > { %1958 = shalt.err (!%p1955_p12)
}
  0x17   : > { %s1959_s12 = scalar_lea.vmem %s225_s26, 512  ;;  %p1967_p2 = scmp.lt.s32.totalorder %s225_s26, %s225_s26 }
  0x18   : > { %p1960_p13 = scmp.ne.s32.totalorder %s225_s26, %s1959_s12  ;;  %p1968_p5 = scmp.lt.s32.totalorder %s1959_s12, %s1959_s12 }
  0x1a   : > { %p1962_p0 = pnand %p1960_p13, %p1948_p8  ;;  %p1969_p4 = por %p1968_p5, %p1967_p2 }
  0x1c   : > { %p1963_p1 = pneg %p1962_p0 }
  0x1e   : > { %p1970_p3 = pnand %p1969_p4, %p1963_p1 }
  0x20   : > { %1973 = shalt.err (!%p1970_p3)
}
  0x21   : > { %s2036_s13 = smov 64   ;;  %s2037_s14 = smov 4  }
  0x22   : > { %1890 = dma.hbm_to_vmem [thread:$0]  (!%p2101_p6), %s2596_s1, 512, %s225_s26, [#allocation4], %s2036_s13, %s2036_s13, %s2037_s14  }
  0x23   : > { %s1974_s25 = scalar_lea.hbm %s2597_s2, 16 }
  0x24   : > { %p1975_p7 = scmp.ne.s32.totalorder %s2597_s2, %s1974_s25  ;;  %p1981_p9 = scmp.lt.u32.totalorder %s1974_s25, %s2597_s2 }
  0x26   : > { %p1977_p3 = pnand %p1975_p7, %p1948_p8 }
  0x28   : > { %p1978_p4 = pneg %p1977_p3 }
  0x2a   : > { %p1983_p10 = pnand %p1981_p9, %p1978_p4 }
  0x2c   : > { %1986 = shalt.err (!%p1983_p10)
}
  0x2d   : > { %s1987_s26 = scalar_lea.vmem %s2105_s29, 16  ;;  %s1994_s8 = scalar_lea.vmem %s2105_s29, 32 }
  0x2e   : > { %p1988_p11 = scmp.ne.s32.totalorder %s2105_s29, %s1987_s26  ;;  %p1995_p0 = scmp.lt.s32.totalorder %s2105_s29, %s2105_s29 }
  0x2f   : > { %p1996_p1 = scmp.lt.s32.totalorder %s1994_s8, %s1987_s26 }
  0x30   : > { %p1990_p12 = pnand %p1988_p11, %p1948_p8 }
  0x31   : > { %p1997_p2 = por %p1996_p1, %p1995_p0 }
  0x32   : > { %p1991_p13 = pneg %p1990_p12 }
  0x34   : > { %p1998_p5 = pnand %p1997_p2, %p1991_p13 }
  0x36   : > { %2001 = shalt.err (!%p1998_p5)
}
  0x37   : > { %1893 = dma.hbm_to_vmem [thread:$0]  (!%p2101_p6), %s2597_s2, 16, %s2105_s29, [#allocation6]  }
  0x38   : > { %p2607_p7 = scmp.ne.s32.totalorder %s2604_s23, 0 }
  0x39   : > { %p2608_p8 = scmp.ne.s32.totalorder (!%p2607_p7), %s2605_s24, 0 }
  0x3a   : > { %265 = sbr.rel (%p2607_p7) target bundleno = 382 (0x17e), region = 32 }
  0x41   : > { %2015 = dma.done.wait (%p2608_p8), [#allocation4], 512  }
  0x42   : > { %2017 = vsyncadd (%p2608_p8), [#allocation4], 4294966784 }
  0x43   : > { %2019 = dma.done.wait (%p2608_p8), [#allocation6], 16  }
  0x44   : > { %2021 = vsyncadd (%p2608_p8), [#allocation6], 4294967280  ;;  %s1606_s27 = sshll.u32 %s2024_s18, 5  ;;  %v1926_v0 = vld [vmem:[#allocation3] sm:$0xff]   ;;  %v1927_v1 = vld [vmem:[#allocation3 + $0x8] sm:$0xff]   ;;  %vm564_vm0 = vcmask 523264   ;;  %v1104_v20 = vlaneseq }
  0x45   : > { %p318_p3 = scmp.lt.s32.totalorder %s1606_s27, 63  ;;  %1831 = vmatprep.subr.bf16.mxu0 %v1926_v0  ;;  %1871 = vmatprep.subr.bf16.mxu1 %v1926_v0  ;;  %v1928_v2 = vld [vmem:[#allocation3 + $0x10] sm:$0xff]   ;;  %v1929_v4 = vld [vmem:[#allocation3 + $0x18] sm:$0xff]   ;;  %s1612_s24 = sshll.u32 %s2024_s18, 8  ;;  %v2245_v41 = vld [vmem:[#allocation5] ss:$0 sm:$0xff] }
  0x46   : > { %1832 = vmatpush3.bf16.msra.mxu0 %v1926_v0  ;;  %1875 = vmatpush3.bf16.msra.mxu1 %v1926_v0  ;;  %v2208_v21 = vshrl.u32 %v1104_v20, 7  ;;  %v2213_v24 = vstv %s1612_s24  ;;  %p336_p6 = scmp.lt.s32.totalorder %s2024_s18, 1 }
  0x47   : > { %s2614_s27 = smov (!%p318_p3, %s1606_s27), 63  ;;  %1833 = vmatprep.subr.bf16.mxu0 %v1927_v1  ;;  %1872 = vmatprep.subr.bf16.mxu1 %v1927_v1 }
  0x48   : > { %s1607_s23 = sshll.u32 %s2614_s27, 2  ;;  %v1107_v22 = vadd.s32 16, %v2208_v21  ;;  %v1106_v23 = vadd.s32 8, %v2208_v21  ;;  %v1108_v25 = vadd.s32 24, %v2208_v21  ;;  %v2221_v27 = vadd.s32 %v2213_v24, %v2208_v21  ;;  %s2616_s18 = smov (!%p336_p6, %s2024_s18), 1 }
  0x49   : > { %s2174_s12 = scalar_lea.vmem %s2595_s0, %s1607_s23  ;;  %v1111_v29 = vadd.s32 48, %v2208_v21  ;;  %v1109_v30 = vadd.s32 32, %v2208_v21  ;;  %v1112_v31 = vadd.s32 56, %v2208_v21  ;;  %v1110_v33 = vadd.s32 40, %v2208_v21  ;;  %s2321_s15 = scalar_lea.vmem %s2598_s3, %s1607_s23 }
  0x4a   : > { %v1930_v3 = vld [vmem:[%s2174_s12] sm:$0xff]   ;;  %1834 = vmatpush3.bf16.msra.mxu0 %v1927_v1  ;;  %1876 = vmatpush3.bf16.msra.mxu1 %v1927_v1  ;;  %v1931_v5 = vld [vmem:[%s2174_s12 + $0x8] sm:$0xff]   ;;  %v1932_v7 = vld [vmem:[%s2174_s12 + $0x10] sm:$0xff]   ;;  %v2217_v26 = vadd.s32 %v2213_v24, %v1107_v22  ;;  %v2224_v28 = vadd.s32 %v2213_v24, %v1106_v23  ;;  %v2230_v32 = vadd.s32 %v2213_v24, %v1108_v25  ;;  %v1115_v34 = vadd.s32 80, %v2208_v21  ;;  %s1610_s16 = sshll.u32 %s2616_s18, 3 }
  0x4b   : > { %1839 = vmatprep.mubr.msk.bf16.mxu0 %vm564_vm0, %v1930_v3  ;;  %1835 = vmatprep.subr.bf16.mxu0 %v1928_v2  ;;  %v1938_v6 = vld [vmem:[%s2174_s12 + $0x40] sm:$0xff]   ;;  %v1939_v8 = vld [vmem:[%s2174_s12 + $0x48] sm:$0xff]   ;;  %v1940_v9 = vld [vmem:[%s2174_s12 + $0x50] sm:$0xff]   ;;  %v1113_v35 = vadd.s32 64, %v2208_v21  ;;  %v1116_v36 = vadd.s32 88, %v2208_v21  ;;  %v1114_v37 = vadd.s32 72, %v2208_v21  ;;  %v2242_v39 = vadd.s32 %v2213_v24, %v1111_v29  ;;  %s342_s25 = scalar_lea.vmem %s2599_s4, %s1610_s16  ;;  %s349_s6 = scalar_lea.vmem %s2600_s5, %s1610_s16 }
  0x4c   : > { %1873 = vmatprep.subr.bf16.mxu1 %v1928_v2  ;;  %1855 = vmatprep.mubr.msk.bf16.mxu1 %vm564_vm0, %v1938_v6  ;;  %v1933_v10 = vld [vmem:[%s2174_s12 + $0x18] sm:$0xff]   ;;  %v1934_v12 = vld [vmem:[%s2174_s12 + $0x20] sm:$0xff]   ;;  %v1935_v14 = vld [vmem:[%s2174_s12 + $0x28] sm:$0xff]   ;;  %v1119_v38 = vadd.s32 112, %v2208_v21  ;;  %vm1172_vm1 = vcmp.lt.s32.totalorder %v2217_v26, 512  ;;  %vm1170_vm2 = vcmp.lt.s32.totalorder %v2221_v27, 512  ;;  %v2248_v42 = vadd.s32 %v2213_v24, %v1109_v30 }
  0x4d   : > { %v1941_v11 = vld [vmem:[%s2174_s12 + $0x58] sm:$0xff]   ;;  %v1942_v13 = vld [vmem:[%s2174_s12 + $0x60] sm:$0xff]   ;;  %v1943_v15 = vld [vmem:[%s2174_s12 + $0x68] sm:$0xff]   ;;  %vm1171_vm3 = vcmp.lt.s32.totalorder %v2224_v28, 512  ;;  %v1117_v40 = vadd.s32 96, %v2208_v21  ;;  %v2251_v43 = vadd.s32 %v2213_v24, %v1112_v31  ;;  %v1120_v44 = vadd.s32 120, %v2208_v21 }
  0x4e   : > { %1836 = vmatpush3.bf16.msra.mxu0 %v1928_v2  ;;  %1877 = vmatpush3.bf16.msra.mxu1 %v1928_v2  ;;  %v1936_v16 = vld [vmem:[%s2174_s12 + $0x30] sm:$0xff]   ;;  %v1937_v18 = vld [vmem:[%s2174_s12 + $0x38] sm:$0xff]   ;;  %v1118_v45 = vadd.s32 104, %v2208_v21  ;;  %vm1173_vm4 = vcmp.lt.s32.totalorder %v2230_v32, 512  ;;  %v2257_v46 = vadd.s32 %v2213_v24, %v1110_v33  ;;  %v2260_v47 = vadd.s32 %v2213_v24, %v1115_v34 }
  0x4f   : > { %1837 = vmatprep.subr.bf16.mxu0 %v1929_v4  ;;  %1874 = vmatprep.subr.bf16.mxu1 %v1929_v4  ;;  %v1944_v17 = vld [vmem:[%s2174_s12 + $0x70] sm:$0xff]   ;;  %v1945_v19 = vld [vmem:[%s2174_s12 + $0x78] sm:$0xff]   ;;  %v2263_v48 = vadd.s32 %v2213_v24, %v1113_v35  ;;  %v1123_v49 = vadd.s32 144, %v2208_v21  ;;  %v2267_v51 = vadd.s32 %v2213_v24, %v1116_v36  ;;  %v2270_v52 = vadd.s32 %v2213_v24, %v1114_v37 }
  0x50   : > { %v2273_v53 = vadd.s32 %v2213_v24, %v1119_v38  ;;  %v1121_v55 = vadd.s32 128, %v2208_v21  ;;  %v2278_v58 = vadd.s32 %v2213_v24, %v1117_v40  ;;  %v1124_v61 = vadd.s32 152, %v2208_v21 }
  0x51   : > { %v2286_v0 = vadd.s32 %v2213_v24, %v1120_v44  ;;  %v2289_v1 = vadd.s32 %v2213_v24, %v1118_v45  ;;  %v1122_v3 = vadd.s32 136, %v2208_v21  ;;  %vm1174_vm5 = vcmp.lt.s32.totalorder %v2248_v42, 512 }
  0x52   : > { %1838 = vmatpush3.bf16.msra.mxu0 %v1929_v4  ;;  %1878 = vmatpush3.bf16.msra.mxu1 %v1929_v4  ;;  %v2295_v6 = vadd.s32 %v2213_v24, %v1123_v49  ;;  %vm1176_vm6 = vcmp.lt.s32.totalorder %v2242_v39, 512  ;;  %vm1175_vm7 = vcmp.lt.s32.totalorder %v2257_v46, 512  ;;  %vm1177_vm8 = vcmp.lt.s32.totalorder %v2251_v43, 512 }
  0x53   : > { %v2327_v22 = vadd.s32 %v2213_v24, %v1122_v3  ;;  %v1127_v27 = vadd.s32 176, %v2208_v21  ;;  %v1125_v29 = vadd.s32 160, %v2208_v21  ;;  %vm1178_vm9 = vcmp.lt.s32.totalorder %v2263_v48, 512 }
  0x54   : > { %vm1180_vm11 = vcmp.lt.s32.totalorder %v2260_v47, 512  ;;  %vm1179_vm12 = vcmp.lt.s32.totalorder %v2270_v52, 512  ;;  %vm1181_vm13 = vcmp.lt.s32.totalorder %v2267_v51, 512  ;;  %vm1182_vm14 = vcmp.lt.s32.totalorder %v2278_v58, 512 }
  0x55   : > { %1840 = vmatmul.mubr.msk.bf16.vlgmr.msra.gmra.mrb[0].mxu0 %vm564_vm0, %v1931_v5  ;;  %1856 = vmatmul.mubr.msk.bf16.vlgmr.msra.gmra.mrb[0].mxu1 %vm564_vm0, %v1939_v8  ;;  %vm1184_vm15 = vcmp.lt.s32.totalorder %v2273_v53, 512 }
  0x56   : > { %1843 = vmatprep.mubr.msk.bf16.mxu0 %vm564_vm0, %v1932_v7  ;;  %1859 = vmatprep.mubr.msk.bf16.mxu1 %vm564_vm0, %v1940_v9 }
  0x5d   : > { %1844 = vmatmul.mubr.msk.bf16.gmra.mrb[4].mxu0 %vm564_vm0, %v1933_v10  ;;  %1860 = vmatmul.mubr.msk.bf16.gmra.mrb[4].mxu1 %vm564_vm0, %v1941_v11 }
  0x5e   : > { %1847 = vmatprep.mubr.msk.bf16.mxu0 %vm564_vm0, %v1934_v12  ;;  %1863 = vmatprep.mubr.msk.bf16.mxu1 %vm564_vm0, %v1942_v13  ;;  %v2305_v13 = vadd.s32 %v2213_v24, %v1121_v55 }
  0x60   : > { %vm1186_vm10 = vcmp.lt.s32.totalorder %v2305_v13, 512 }
  0x65   : > { %1848 = vmatmul.mubr.msk.bf16.gmra.mrb[8].mxu0 %vm564_vm0, %v1935_v14  ;;  %1864 = vmatmul.mubr.msk.bf16.gmra.mrb[8].mxu1 %vm564_vm0, %v1943_v15 }
  0x66   : > { %1851 = vmatprep.mubr.msk.bf16.mxu0 %vm564_vm0, %v1936_v16  ;;  %1867 = vmatprep.mubr.msk.bf16.mxu1 %vm564_vm0, %v1944_v17  ;;  %v2312_v17 = vadd.s32 %v2213_v24, %v1124_v61 }
  0x6d   : > { %1852 = vmatmul.mubr.msk.bf16.gmra.mrb[12].mxu0 %vm564_vm0, %v1937_v18  ;;  %1868 = vmatmul.mubr.msk.bf16.gmra.mrb[12].mxu1 %vm564_vm0, %v1945_v19  ;;  %vm1183_vm0 = vcmp.lt.s32.totalorder %v2289_v1, 512 }
 0x128   : > { %v1841_v50 = vpop.f32.mrb[0].mxu0  ;;  %v1857_v54 = vpop.f32.mrb[0].mxu1 }
 0x129   : > { %v882_v56 = vadd.f32 %v1841_v50, %v2245_v41  ;;  %v647_v57 = vpop.f32.mrb[1].mxu0  ;;  %v2281_v59 = vadd.f32 %v1857_v54, %v2245_v41  ;;  %v711_v60 = vpop.f32.mrb[1].mxu1 }
 0x12a   : > { %v880_v62 = vadd.f32 %v2245_v41, %v647_v57  ;;  %v1842_v63 = vpop.f32.mrb[2].mxu0  ;;  %v1858_v2 = vpop.f32.mrb[2].mxu1  ;;  %v2298_v7 = vadd.f32 %v2245_v41, %v711_v60 }
 0x12b   : > { %v883_v4 = vadd.f32 %v1842_v63, %v2245_v41  ;;  %v650_v5 = vpop.f32.mrb[3].mxu0  ;;  %v2301_v8 = vadd.f32 %v1858_v2, %v2245_v41  ;;  %v714_v9 = vpop.f32.mrb[3].mxu1  ;;  %v914_v10 = vmax.f32 %v882_v56, 0.0  ;;  %v930_v15 = vmax.f32 %v2281_v59, 0.0 }
 0x12c   : > { %v912_v11 = vmax.f32 %v880_v62, 0.0  ;;  %v881_v12 = vadd.f32 %v2245_v41, %v650_v5  ;;  %v2324_v20 = vadd.f32 %v2245_v41, %v714_v9  ;;  %v928_v25 = vmax.f32 %v2298_v7, 0.0 }
 0x12d   : > { %v915_v14 = vmax.f32 %v883_v4, 0.0  ;;  %v931_v16 = vmax.f32 %v2301_v8, 0.0  ;;  %v1268_v30 = vsel %vm1172_vm1, %v914_v10, 0.0  ;;  %v1128_v56 = vadd.s32 184, %v2208_v21 }
 0x12e   : > { %v1266_v18 = vsel %vm1170_vm2, %v912_v11, 0.0  ;;  %v913_v19 = vmax.f32 %v881_v12, 0.0  ;;  %v929_v54 = vmax.f32 %v2324_v20, 0.0  ;;  %v1338_v57 = vmul.f32 %v1268_v30, %v1268_v30 }
 0x12f   : > { %v1724_v23 = vpack.c.bf16 %v915_v14, %v914_v10  ;;  %v1336_v31 = vmul.f32 %v1266_v18, %v1266_v18  ;;  %v1764_v45 = vpack.c.bf16 %v931_v16, %v930_v15  ;;  %v1269_v28 = vsel %vm1173_vm4, %v915_v14, 0.0 }
 0x130   : > { %v1719_v33 = vpack.c.bf16 %v913_v19, %v912_v11  ;;  %v1267_v34 = vsel %vm1171_vm3, %v913_v19, 0.0  ;;  %v1845_v35 = vpop.f32.mrb[4].mxu0  ;;  %v1861_v36 = vpop.f32.mrb[4].mxu1  ;;  %v1759_v5 = vpack.c.bf16 %v929_v54, %v928_v25  ;;  %v1339_v9 = vmul.f32 %v1269_v28, %v1269_v28 }
 0x131   : > { %1796 = vst [vmem:[%s2321_s15 + $0x8] sm:$0xff] %v1724_v23   ;;  %v1298_v37 = vadd.f32 %v1267_v34, %v1266_v18  ;;  %v1337_v38 = vmul.f32 %v1267_v34, %v1267_v34  ;;  %v886_v40 = vadd.f32 %v1845_v35, %v2245_v41  ;;  %v663_v44 = vpop.f32.mrb[5].mxu0  ;;  %v2343_v26 = vpop.f32.mrb[5].mxu1  ;;  %1804 = vst [vmem:[%s2321_s15 + $0x48] sm:$0xff] %v1764_v45   ;;  %v1126_v23 = vadd.s32 168, %v2208_v21 }
 0x132   : > { %1720 = vst [vmem:[%s2321_s15] sm:$0xff] %v1719_v33   ;;  %v884_v49 = vadd.f32 %v2245_v41, %v663_v44  ;;  %v1846_v50 = vpop.f32.mrb[6].mxu0  ;;  %v2350_v55 = vpop.f32.mrb[6].mxu1  ;;  %1803 = vst [vmem:[%s2321_s15 + $0x40] sm:$0xff] %v1759_v5   ;;  %v2370_v19 = vadd.s32 %v2213_v24, %v1127_v27  ;;  %v2379_v27 = vadd.s32 %v2213_v24, %v1125_v29  ;;  %vm1185_vm1 = vcmp.lt.s32.totalorder %v2286_v0, 512 }
 0x133   : > { %v1299_v60 = vadd.f32 %v1298_v37, %v1268_v30  ;;  %v1368_v61 = vadd.f32 %v1337_v38, %v1336_v31  ;;  %v887_v62 = vadd.f32 %v1846_v50, %v2245_v41  ;;  %v666_v63 = vpop.f32.mrb[7].mxu0  ;;  %v2357_v32 = vpop.f32.mrb[7].mxu1  ;;  %v918_v2 = vmax.f32 %v886_v40, 0.0 }
 0x134   : > { %v916_v3 = vmax.f32 %v884_v49, 0.0  ;;  %v885_v4 = vadd.f32 %v2245_v41, %v666_v63  ;;  %v2385_v50 = vadd.s32 %v2213_v24, %v1128_v56  ;;  %vm1187_vm2 = vcmp.lt.s32.totalorder %v2327_v22, 512 }
 0x135   : > { %v1369_v10 = vadd.f32 %v1368_v61, %v1338_v57  ;;  %v1300_v11 = vadd.f32 %v1299_v60, %v1269_v28  ;;  %v919_v12 = vmax.f32 %v887_v62, 0.0  ;;  %v1272_v35 = vsel %vm1176_vm6, %v918_v2, 0.0 }
 0x136   : > { %v1270_v14 = vsel %vm1174_vm5, %v916_v3, 0.0  ;;  %v917_v18 = vmax.f32 %v885_v4, 0.0  ;;  %v2395_v61 = vadd.f32 %v1861_v36, %v2245_v41  ;;  %v1342_v63 = vmul.f32 %v1272_v35, %v1272_v35 }
 0x137   : > { %v1301_v30 = vadd.f32 %v1300_v11, %v1270_v14  ;;  %v1340_v31 = vmul.f32 %v1270_v14, %v1270_v14  ;;  %v1370_v33 = vadd.f32 %v1369_v10, %v1339_v9  ;;  %v1734_v34 = vpack.c.bf16 %v919_v12, %v918_v2 }
 0x138   : > { %v1729_v42 = vpack.c.bf16 %v917_v18, %v916_v3  ;;  %v1271_v37 = vsel %vm1175_vm7, %v917_v18, 0.0  ;;  %v1849_v38 = vpop.f32.mrb[8].mxu0  ;;  %v2381_v40 = vpop.f32.mrb[8].mxu1  ;;  %v1273_v46 = vsel %vm1177_vm8, %v919_v12, 0.0  ;;  %v2405_v11 = vadd.s32 %v2213_v24, %v1126_v23 }
 0x139   : > { %v1371_v44 = vadd.f32 %v1370_v33, %v1340_v31  ;;  %1798 = vst [vmem:[%s2321_s15 + $0x18] sm:$0xff] %v1734_v34   ;;  %v1302_v45 = vadd.f32 %v1301_v30, %v1271_v37  ;;  %v1341_v28 = vmul.f32 %v1271_v37, %v1271_v37  ;;  %v679_v49 = vpop.f32.mrb[9].mxu0  ;;  %v2387_v39 = vpop.f32.mrb[9].mxu1  ;;  %v890_v57 = vadd.f32 %v1849_v38, %v2245_v41 }
 0x13a   : > { %1797 = vst [vmem:[%s2321_s15 + $0x10] sm:$0xff] %v1729_v42   ;;  %v888_v29 = vadd.f32 %v2245_v41, %v679_v49  ;;  %v1850_v60 = vpop.f32.mrb[10].mxu0  ;;  %v2397_v62 = vpop.f32.mrb[10].mxu1  ;;  %v1343_v36 = vmul.f32 %v1273_v46, %v1273_v46  ;;  %v2416_v23 = vsel %vm1186_vm10, %v928_v25, 0.0  ;;  %v2420_v33 = vadd.f32 %v2350_v55, %v2245_v41 }
 0x13b   : > { %v1303_v2 = vadd.f32 %v1302_v45, %v1272_v35  ;;  %v1372_v56 = vadd.f32 %v1371_v44, %v1341_v28  ;;  %v891_v3 = vadd.f32 %v1850_v60, %v2245_v41  ;;  %v682_v4 = vpop.f32.mrb[11].mxu0  ;;  %v2401_v43 = vpop.f32.mrb[11].mxu1  ;;  %v922_v5 = vmax.f32 %v890_v57, 0.0 }
 0x13c   : > { %v920_v9 = vmax.f32 %v888_v29, 0.0  ;;  %v889_v10 = vadd.f32 %v2245_v41, %v682_v4  ;;  %v934_v48 = vmax.f32 %v2395_v61, 0.0  ;;  %vm1188_vm3 = vcmp.lt.s32.totalorder %v2295_v6, 512 }
 0x13d   : > { %v1373_v12 = vadd.f32 %v1372_v56, %v1342_v63  ;;  %v1304_v14 = vadd.f32 %v1303_v2, %v1273_v46  ;;  %v923_v18 = vmax.f32 %v891_v3, 0.0  ;;  %v1276_v37 = vsel %vm1180_vm11, %v922_v5, 0.0 }
 0x13e   : > { %v1274_v30 = vsel %vm1178_vm9, %v920_v9, 0.0  ;;  %v921_v31 = vmax.f32 %v889_v10, 0.0  ;;  %v2431_v46 = vadd.f32 %v2245_v41, %v2343_v26  ;;  %v935_v63 = vmax.f32 %v2420_v33, 0.0 }
 0x13f   : > { %v1305_v34 = vadd.f32 %v1304_v14, %v1274_v30  ;;  %v1344_v35 = vmul.f32 %v1274_v30, %v1274_v30  ;;  %v1374_v42 = vadd.f32 %v1373_v12, %v1343_v36  ;;  %v1744_v38 = vpack.c.bf16 %v923_v18, %v922_v5 }
 0x140   : > { %v1739_v7 = vpack.c.bf16 %v921_v31, %v920_v9  ;;  %v1275_v13 = vsel %vm1179_vm12, %v921_v31, 0.0  ;;  %v1853_v25 = vpop.f32.mrb[12].mxu0  ;;  %v2427_v44 = vpop.f32.mrb[12].mxu1  ;;  %v1277_v47 = vsel %vm1181_vm13, %v923_v18, 0.0  ;;  %v1346_v56 = vmul.f32 %v1276_v37, %v1276_v37 }
 0x141   : > { %v1375_v55 = vadd.f32 %v1374_v42, %v1344_v35  ;;  %v1306_v45 = vadd.f32 %v1305_v34, %v1275_v13  ;;  %v1345_v28 = vmul.f32 %v1275_v13, %v1275_v13  ;;  %v695_v49 = vpop.f32.mrb[13].mxu0  ;;  %v2433_v57 = vpop.f32.mrb[13].mxu1  ;;  %1800 = vst [vmem:[%s2321_s15 + $0x28] sm:$0xff] %v1744_v38   ;;  %v894_v52 = vadd.f32 %v1853_v25, %v2245_v41 }
 0x142   : > { %1799 = vst [vmem:[%s2321_s15 + $0x20] sm:$0xff] %v1739_v7   ;;  %v892_v29 = vadd.f32 %v2245_v41, %v695_v49  ;;  %v1854_v60 = vpop.f32.mrb[14].mxu0  ;;  %v2442_v2 = vpop.f32.mrb[14].mxu1  ;;  %v1774_v12 = vpack.c.bf16 %v935_v63, %v934_v48  ;;  %v1347_v14 = vmul.f32 %v1277_v47, %v1277_v47  ;;  %v1352_v42 = vmul.f32 %v2416_v23, %v2416_v23 }
 0x143   : > { %v1307_v3 = vadd.f32 %v1306_v45, %v1276_v37  ;;  %v1376_v26 = vadd.f32 %v1375_v55, %v1345_v28  ;;  %v895_v4 = vadd.f32 %v1854_v60, %v2245_v41  ;;  %v698_v5 = vpop.f32.mrb[15].mxu0  ;;  %v2446_v51 = vpop.f32.mrb[15].mxu1  ;;  %v926_v9 = vmax.f32 %v894_v52, 0.0 }
 0x144   : > { %v924_v10 = vmax.f32 %v892_v29, 0.0  ;;  %v893_v36 = vadd.f32 %v2245_v41, %v698_v5  ;;  %vm1189_vm4 = vcmp.lt.s32.totalorder %v2312_v17, 512  ;;  %1806 = vst [vmem:[%s2321_s15 + $0x58] sm:$0xff] %v1774_v12   ;;  %v1129_v37 = vadd.s32 192, %v2208_v21 }
 0x145   : > { %v1377_v18 = vadd.f32 %v1376_v26, %v1346_v56  ;;  %v1308_v30 = vadd.f32 %v1307_v3, %v1277_v47  ;;  %v927_v31 = vmax.f32 %v895_v4, 0.0  ;;  %v932_v25 = vmax.f32 %v2431_v46, 0.0 }
 0x146   : > { %v1278_v34 = vsel %vm1182_vm14, %v924_v10, 0.0  ;;  %v925_v35 = vmax.f32 %v893_v36, 0.0  ;;  %vm1190_vm5 = vcmp.lt.s32.totalorder %v2379_v27, 512  ;;  %v1280_v58 = vsel %vm1184_vm15, %v926_v9, 0.0 }
 0x147   : > { %v1309_v38 = vadd.f32 %v1308_v30, %v1278_v34  ;;  %v1348_v7 = vmul.f32 %v1278_v34, %v1278_v34  ;;  %v1378_v13 = vadd.f32 %v1377_v18, %v1347_v14  ;;  %v1754_v55 = vpack.c.bf16 %v927_v31, %v926_v9 }
 0x148   : > { %v1749_v45 = vpack.c.bf16 %v925_v35, %v924_v10  ;;  %v1279_v28 = vsel %vm1183_vm0, %v925_v35, 0.0  ;;  %v1281_v47 = vsel %vm1185_vm1, %v927_v31, 0.0  ;;  %v901_v46 = vadd.f32 %v2245_v41, %v2357_v32 }
 0x149   : > { %v1379_v49 = vadd.f32 %v1378_v13, %v1348_v7  ;;  %v1310_v52 = vadd.f32 %v1309_v38, %v1279_v28  ;;  %v1349_v29 = vmul.f32 %v1279_v28, %v1279_v28  ;;  %1802 = vst [vmem:[%s2321_s15 + $0x38] sm:$0xff] %v1754_v55   ;;  %v2475_v53 = vadd.f32 %v2381_v40, %v2245_v41 }
 0x14a   : > { %1801 = vst [vmem:[%s2321_s15 + $0x30] sm:$0xff] %v1749_v45   ;;  %v2479_v60 = vadd.f32 %v2245_v41, %v2387_v39  ;;  %v2483_v1 = vadd.f32 %v2397_v62, %v2245_v41  ;;  %v1350_v0 = vmul.f32 %v1280_v58, %v1280_v58  ;;  %v2487_v26 = vadd.f32 %v2245_v41, %v2401_v43 }
 0x14b   : > { %v1311_v56 = vadd.f32 %v1310_v52, %v1280_v58  ;;  %v1380_v3 = vadd.f32 %v1379_v49, %v1349_v29  ;;  %v933_v32 = vmax.f32 %v901_v46, 0.0  ;;  %v938_v4 = vmax.f32 %v2475_v53, 0.0 }
 0x14c   : > { %v936_v40 = vmax.f32 %v2479_v60, 0.0  ;;  %v939_v39 = vmax.f32 %v2483_v1, 0.0  ;;  %v1351_v5 = vmul.f32 %v1281_v47, %v1281_v47  ;;  %vm1192_vm6 = vcmp.lt.s32.totalorder %v2370_v19, 512 }
 0x14d   : > { %v1381_v9 = vadd.f32 %v1380_v3, %v1350_v0  ;;  %v1312_v10 = vadd.f32 %v1311_v56, %v1281_v47  ;;  %v937_v62 = vmax.f32 %v2487_v26, 0.0  ;;  %v1283_v43 = vsel %vm1187_vm2, %v929_v54, 0.0 }
 0x14e   : > { %v1769_v36 = vpack.c.bf16 %v933_v32, %v932_v25  ;;  %vm1191_vm7 = vcmp.lt.s32.totalorder %v2405_v11, 512  ;;  %v2501_v12 = vadd.f32 %v2427_v44, %v2245_v41  ;;  %v1131_v30 = vadd.s32 208, %v2208_v21 }
 0x14f   : > { %v1313_v14 = vadd.f32 %v1312_v10, %v2416_v23  ;;  %v1382_v18 = vadd.f32 %v1381_v9, %v1351_v5  ;;  %v1130_v31 = vadd.s32 200, %v2208_v21  ;;  %v1284_v20 = vsel %vm1188_vm3, %v930_v15, 0.0 }
 0x150   : > { %1805 = vst [vmem:[%s2321_s15 + $0x50] sm:$0xff] %v1769_v36   ;;  %v1162_v22 = vadd.s32 %v2213_v24, %v1129_v37  ;;  %v1784_v54 = vpack.c.bf16 %v939_v39, %v938_v4  ;;  %v1779_v23 = vpack.c.bf16 %v937_v62, %v936_v40  ;;  %v1285_v59 = vsel %vm1189_vm4, %v931_v16, 0.0 }
 0x151   : > { %v1383_v44 = vadd.f32 %v1382_v18, %v1352_v42  ;;  %v1314_v34 = vadd.f32 %v1313_v14, %v1283_v43  ;;  %v1353_v6 = vmul.f32 %v1283_v43, %v1283_v43  ;;  %v1286_v15 = vsel %vm1190_vm5, %v932_v25, 0.0 }
 0x152   : > { %1808 = vst [vmem:[%s2321_s15 + $0x68] sm:$0xff] %v1784_v54   ;;  %1807 = vst [vmem:[%s2321_s15 + $0x60] sm:$0xff] %v1779_v23   ;;  %v942_v35 = vmax.f32 %v2501_v12, 0.0  ;;  %v908_v37 = vadd.f32 %v2245_v41, %v2433_v57  ;;  %v2531_v42 = vadd.f32 %v2442_v2, %v2245_v41  ;;  %v1354_v8 = vmul.f32 %v1284_v20, %v1284_v20 }
 0x153   : > { %v1315_v38 = vadd.f32 %v1314_v34, %v1284_v20  ;;  %v1384_v17 = vadd.f32 %v1383_v44, %v1353_v6  ;;  %v2535_v16 = vadd.f32 %v2245_v41, %v2446_v51  ;;  %v1355_v27 = vmul.f32 %v1285_v59, %v1285_v59 }
 0x154   : > { %v1132_v7 = vadd.s32 216, %v2208_v21  ;;  %v940_v13 = vmax.f32 %v908_v37, 0.0  ;;  %v943_v25 = vmax.f32 %v2531_v42, 0.0  ;;  %v1356_v55 = vmul.f32 %v1286_v15, %v1286_v15 }
 0x155   : > { %v1385_v58 = vadd.f32 %v1384_v17, %v1354_v8  ;;  %v1316_v57 = vadd.f32 %v1315_v38, %v1285_v59  ;;  %v941_v2 = vmax.f32 %v2535_v16, 0.0  ;;  %vm1193_vm8 = vcmp.lt.s32.totalorder %v2385_v50, 512 }
 0x156   : > { %v1287_v45 = vsel %vm1191_vm7, %v933_v32, 0.0  ;;  %v1163_v41 = vadd.s32 %v2213_v24, %v1130_v31  ;;  %v1794_v51 = vpack.c.bf16 %v943_v25, %v942_v35  ;;  %vm1194_vm9 = vcmp.lt.s32.totalorder %v1162_v22, 512 }
 0x157   : > { %v1317_v28 = vadd.f32 %v1316_v57, %v1286_v15  ;;  %v1386_v49 = vadd.f32 %v1385_v58, %v1355_v27  ;;  %v1133_v47 = vadd.s32 224, %v2208_v21  ;;  %v1288_v52 = vsel %vm1192_vm6, %v934_v48, 0.0 }
 0x158   : > { %v1164_v11 = vadd.s32 %v2213_v24, %v1131_v30  ;;  %1810 = vst [vmem:[%s2321_s15 + $0x78] sm:$0xff] %v1794_v51   ;;  %v1789_v29 = vpack.c.bf16 %v941_v2, %v940_v13  ;;  %v1357_v0 = vmul.f32 %v1287_v45, %v1287_v45  ;;  %v1165_v56 = vadd.s32 %v2213_v24, %v1132_v7 }
 0x159   : > { %v1387_v46 = vadd.f32 %v1386_v49, %v1356_v55  ;;  %v1318_v60 = vadd.f32 %v1317_v28, %v1287_v45  ;;  %v1289_v3 = vsel %vm1193_vm8, %v935_v63, 0.0  ;;  %v1290_v32 = vsel %vm1194_vm9, %v936_v40, 0.0 }
 0x15a   : > { %vm1195_vm10 = vcmp.lt.s32.totalorder %v1163_v41, 512  ;;  %1809 = vst [vmem:[%s2321_s15 + $0x70] sm:$0xff] %v1789_v29   ;;  %v1134_v19 = vadd.s32 232, %v2208_v21  ;;  %v1358_v61 = vmul.f32 %v1288_v52, %v1288_v52  ;;  %v1166_v9 = vadd.s32 %v2213_v24, %v1133_v47 }
 0x15b   : > { %v1319_v48 = vadd.f32 %v1318_v60, %v1288_v52  ;;  %v1388_v5 = vadd.f32 %v1387_v46, %v1357_v0  ;;  %vm1196_vm11 = vcmp.lt.s32.totalorder %v1164_v11, 512  ;;  %v1135_v10 = vadd.s32 240, %v2208_v21 }
 0x15c   : > { %v1359_v43 = vmul.f32 %v1289_v3, %v1289_v3  ;;  %v1360_v33 = vmul.f32 %v1290_v32, %v1290_v32  ;;  %vm1197_vm12 = vcmp.lt.s32.totalorder %v1165_v56, 512  ;;  %v1291_v50 = vsel %vm1195_vm10, %v937_v62, 0.0 }
 0x15d   : > { %v1389_v36 = vadd.f32 %v1388_v5, %v1358_v61  ;;  %v1320_v14 = vadd.f32 %v1319_v48, %v1289_v3  ;;  %v1136_v63 = vadd.s32 248, %v2208_v21  ;;  %vm1198_vm13 = vcmp.lt.s32.totalorder %v1166_v9, 512 }
 0x15e   : > { %v1167_v30 = vadd.s32 %v2213_v24, %v1134_v19  ;;  %v1292_v31 = vsel %vm1196_vm11, %v938_v4, 0.0  ;;  %v1168_v20 = vadd.s32 %v2213_v24, %v1135_v10  ;;  %v1361_v23 = vmul.f32 %v1291_v50, %v1291_v50 }
 0x15f   : > { %v1321_v40 = vadd.f32 %v1320_v14, %v1290_v32  ;;  %v1390_v18 = vadd.f32 %v1389_v36, %v1359_v43  ;;  %v1293_v44 = vsel %vm1197_vm12, %v939_v39, 0.0  ;;  %v1294_v26 = vsel %vm1198_vm13, %v940_v13, 0.0 }
 0x160   : > { %v1169_v62 = vadd.s32 %v2213_v24, %v1136_v63  ;;  %v1362_v21 = vmul.f32 %v1292_v31, %v1292_v31  ;;  %vm1199_vm14 = vcmp.lt.s32.totalorder %v1167_v30, 512  ;;  %vm1200_vm15 = vcmp.lt.s32.totalorder %v1168_v20, 512 }
 0x161   : > { %v1391_v22 = vadd.f32 %v1390_v18, %v1360_v33  ;;  %v1322_v54 = vadd.f32 %v1321_v40, %v1291_v50  ;;  %v1363_v6 = vmul.f32 %v1293_v44, %v1293_v44  ;;  %v1364_v4 = vmul.f32 %v1294_v26, %v1294_v26 }
 0x162   : > { %v1295_v37 = vsel %vm1199_vm14, %v941_v2, 0.0  ;;  %vm1201_vm0 = vcmp.lt.s32.totalorder %v1169_v62, 512  ;;  %v1296_v1 = vsel %vm1200_vm15, %v942_v35, 0.0 }
 0x163   : > { %v1323_v59 = vadd.f32 %v1322_v54, %v1292_v31  ;;  %v1392_v34 = vadd.f32 %v1391_v22, %v1361_v23  ;;  %v1365_v17 = vmul.f32 %v1295_v37, %v1295_v37  ;;  %v1297_v16 = vsel %vm1201_vm0, %v943_v25, 0.0 }
 0x164   : > { %v1366_v27 = vmul.f32 %v1296_v1, %v1296_v1  ;;  %v1367_v58 = vmul.f32 %v1297_v16, %v1297_v16 }
 0x165   : > { %v1393_v15 = vadd.f32 %v1392_v34, %v1362_v21  ;;  %v1324_v53 = vadd.f32 %v1323_v59, %v1293_v44 }
 0x167   : > { %v1325_v8 = vadd.f32 %v1324_v53, %v1294_v26  ;;  %v1394_v38 = vadd.f32 %v1393_v15, %v1363_v6 }
 0x169   : > { %v1395_v39 = vadd.f32 %v1394_v38, %v1364_v4  ;;  %v1326_v24 = vadd.f32 %v1325_v8, %v1295_v37 }
 0x16b   : > { %v1327_v7 = vadd.f32 %v1326_v24, %v1296_v1  ;;  %v1396_v13 = vadd.f32 %v1395_v39, %v1365_v17 }
 0x16d   : > { %v1328_v57 = vadd.f32 %v1327_v7, %v1297_v16  ;;  %v1397_v55 = vadd.f32 %v1396_v13, %v1366_v27 }
 0x16f   : > { %v1329_v2 = vrot.slane %v1328_v57, 4  ;;  %v1398_v45 = vadd.f32 %v1397_v55, %v1367_v58 }
 0x171   : > { %v1330_v41 = vadd.f32 %v1329_v2, %v1328_v57  ;;  %v1399_v51 = vrot.slane %v1398_v45, 4 }
 0x173   : > { %v1331_v12 = vrot.slane %v1330_v41, 2  ;;  %v1400_v35 = vadd.f32 %v1399_v51, %v1398_v45 }
 0x175   : > { %v1332_v28 = vadd.f32 %v1331_v12, %v1330_v41  ;;  %v1401_v49 = vrot.slane %v1400_v35, 2 }
 0x177   : > { %v1333_v47 = vrot.slane %v1332_v28, 1  ;;  %v1402_v42 = vadd.f32 %v1401_v49, %v1400_v35 }
 0x179   : > { %v1334_v25 = vadd.f32 %v1333_v47, %v1332_v28  ;;  %v1403_v52 = vrot.slane %v1402_v42, 1 }
 0x17b   : > { %1335 = vst [vmem:[%s342_s25] sm:$0xff] %v1334_v25  ;;  %v1404_v11 = vadd.f32 %v1403_v52, %v1402_v42 }
 0x17d   : > { %1405 = vst [vmem:[%s349_s6] sm:$0xff] %v1404_v11 }
 0x17e PF: > { %s18_s20 = sadd.s32 1, %s2032_s20   ;;  %s2609_s18 = smov %s2028_s19 }
 0x17f   : > { %p15_p4 = scmp.ge.s32.totalorder %s18_s20, 4   ;;  %s2610_s19 = smov %s2612_s22 }
 0x181   :  { %17 = sbr.rel (!%p15_p4) target bundleno = 3 (0x3), region = 105 }
 0x188   :  { %1474 = vsyncpa [#allocation4], 1 }
 0x189   :  { %1476 = vsyncpa [#allocation4 + $0x1], 1 }
 0x18a   :  { %1477 = vsyncpa [#allocation6], 1 }

// kernel: feature_extraction_forward.7
= control target key start
LH: loop header
LB: loop body
LE: loop exit
PB: predicated region body
PF: predicated region fallthrough
CT: control target
= control target key end

     0   :  { %s2172_s18 = smov 0   ;;  %s2174_s19 = smov 0   ;;  %s2507_s0 = inlined_call_operand.vmem [shape: bf16[128,1024], index: 0, kind: input, shape index: {}]   ;;  %s2508_s1 = inlined_call_operand.vmem [shape: bf16[1024,128], index: 1, kind: input, shape index: {}]   ;;  %s2509_s2 = inlined_call_operand.vmem [shape: f32[1,128], index: 2, kind: input, shape index: {}]   ;;  %s2510_s3 = inlined_call_operand.vmem [shape: bf16[128,128], index: 3, kind: output, shape index: {0}]   ;;  %s2511_s4 = inlined_call_operand.vmem [shape: f32[16,128], index: 4, kind: output, shape index: {1}]   ;;  %s2512_s5 = inlined_call_operand.vmem [shape: f32[16,128], index: 5, kind: output, shape index: {2}]  }
   0x1   :  { %s2176_s20 = smov 0  }
   0x2 LB: > { %s35_s21 = sadd.s32 1, %s2136_s19  ;;  %p1722_p0 = scmp.ge.s32.totalorder %s2140_s20, 1  ;;  %s2140_s20 = sphi %s2176_s20, %s16_s20   ;;  %s2136_s19 = sphi %s2174_s19, %s2514_s19   ;;  %s2132_s18 = sphi %s2172_s18, %s2513_s18  }
   0x3   : > { %p37_p1 = scmp.ge.s32.totalorder %s35_s21, 2  ;;  %p250_p2 = scmp.lt.s32.totalorder %s2140_s20, 3 }
   0x5   : > { %s2516_s21 = smov (%p37_p1, %s35_s21), 0  ;;  %p251_p3 = pnand %p1722_p0, %p250_p2 }
   0x6   : > { %v2054_v0 = vld [vmem:[%s2508_s1 + $0x40] sm:$0xff] (!%p251_p3)   ;;  %v2058_v4 = vld [vmem:[%s2508_s1 + $0x48] sm:$0xff] (!%p251_p3)   ;;  %v2062_v8 = vld [vmem:[%s2508_s1 + $0x50] sm:$0xff] (!%p251_p3)   ;;  %s1723_s8 = sshll.u32 (!%p251_p3), %s2132_s18, 3  ;;  %p344_p5 = scmp.lt.s32.totalorder (!%p251_p3), %s2132_s18, 1 }
   0x7   : > { %254 = sbr.rel (%p251_p3) target bundleno = 339 (0x153), region = 32  ;;  %v2055_v1 = vld [vmem:[%s2508_s1 + $0xc0] sm:$0xff] (!%p251_p3)   ;;  %1870 = vmatprep.subr.bf16.mxu0 (!%p251_p3), %v2054_v0  ;;  %v2059_v5 = vld [vmem:[%s2508_s1 + $0xc8] sm:$0xff] (!%p251_p3)   ;;  %v2063_v9 = vld [vmem:[%s2508_s1 + $0xd0] sm:$0xff] (!%p251_p3)   ;;  %p313_p4 = scmp.lt.s32.totalorder (!%p251_p3), %s1723_s8, 15 }
   0x8   : > { %v2056_v2 = vld [vmem:[%s2508_s1] sm:$0xff] (!%p251_p3)   ;;  %1910 = vmatprep.subr.bf16.mxu1 (!%p251_p3), %v2055_v1  ;;  %v2060_v6 = vld [vmem:[%s2508_s1 + $0x8] sm:$0xff] (!%p251_p3)   ;;  %v2064_v10 = vld [vmem:[%s2508_s1 + $0x10] sm:$0xff] (!%p251_p3)  }
   0x9   : > { %v2057_v3 = vld [vmem:[%s2508_s1 + $0x80] sm:$0xff] (!%p251_p3)   ;;  %1871 = vmatpush3.bf16.msra.mxu0 (!%p251_p3), %v2056_v2  ;;  %v2061_v7 = vld [vmem:[%s2508_s1 + $0x88] sm:$0xff] (!%p251_p3)   ;;  %v2065_v11 = vld [vmem:[%s2508_s1 + $0x90] sm:$0xff] (!%p251_p3)  }
   0xa   : > { %1911 = vmatpush3.bf16.msra.mxu1 (!%p251_p3), %v2057_v3  ;;  %1872 = vmatprep.subr.bf16.mxu0 (!%p251_p3), %v2058_v4  ;;  %v2066_v12 = vld [vmem:[%s2508_s1 + $0x58] sm:$0xff] (!%p251_p3)   ;;  %v2070_v16 = vld [vmem:[%s2508_s1 + $0x60] sm:$0xff] (!%p251_p3)   ;;  %v2074_v20 = vld [vmem:[%s2508_s1 + $0x68] sm:$0xff] (!%p251_p3)  }
   0xb   : > { %1912 = vmatprep.subr.bf16.mxu1 (!%p251_p3), %v2059_v5  ;;  %v2067_v13 = vld [vmem:[%s2508_s1 + $0xd8] sm:$0xff] (!%p251_p3)   ;;  %v2071_v17 = vld [vmem:[%s2508_s1 + $0xe0] sm:$0xff] (!%p251_p3)   ;;  %v2075_v21 = vld [vmem:[%s2508_s1 + $0xe8] sm:$0xff] (!%p251_p3)  }
   0xc   : > { %v2068_v14 = vld [vmem:[%s2508_s1 + $0x18] sm:$0xff] (!%p251_p3)   ;;  %v2072_v18 = vld [vmem:[%s2508_s1 + $0x20] sm:$0xff] (!%p251_p3)   ;;  %v2076_v22 = vld [vmem:[%s2508_s1 + $0x28] sm:$0xff] (!%p251_p3)  }
   0xd   : > { %1873 = vmatpush3.bf16.msra.mxu0 (!%p251_p3), %v2060_v6  ;;  %v2069_v15 = vld [vmem:[%s2508_s1 + $0x98] sm:$0xff] (!%p251_p3)   ;;  %v2073_v19 = vld [vmem:[%s2508_s1 + $0xa0] sm:$0xff] (!%p251_p3)   ;;  %v2077_v23 = vld [vmem:[%s2508_s1 + $0xa8] sm:$0xff] (!%p251_p3)  }
   0xe   : > { %1913 = vmatpush3.bf16.msra.mxu1 %v2061_v7  ;;  %1874 = vmatprep.subr.bf16.mxu0 %v2062_v8  ;;  %s2518_s8 = smov (!%p313_p4, %s1723_s8), 15  ;;  %v2078_v24 = vld [vmem:[%s2508_s1 + $0x70] sm:$0xff]   ;;  %v2082_v28 = vld [vmem:[%s2508_s1 + $0x78] sm:$0xff]   ;;  %v2086_v40 = vld [vmem:[%s2508_s1 + $0x140] sm:$0xff]  }
   0xf   : > { %1914 = vmatprep.subr.bf16.mxu1 %v2063_v9  ;;  %v2079_v25 = vld [vmem:[%s2508_s1 + $0xf0] sm:$0xff]   ;;  %s1838_s11 = sshll.u32 %s2518_s8, 5  ;;  %v2083_v29 = vld [vmem:[%s2508_s1 + $0xf8] sm:$0xff]   ;;  %v2087_v41 = vld [vmem:[%s2508_s1 + $0x1c0] sm:$0xff]   ;;  %s1727_s14 = sshll.u32 %s2518_s8, 2 }
  0x10   : > { %v2080_v26 = vld [vmem:[%s2508_s1 + $0x30] sm:$0xff]   ;;  %s2289_s24 = scalar_lea.vmem %s2507_s0, %s1838_s11  ;;  %v2084_v30 = vld [vmem:[%s2508_s1 + $0x38] sm:$0xff]   ;;  %v2088_v42 = vld [vmem:[%s2508_s1 + $0x100] sm:$0xff]   ;;  %s2463_s8 = scalar_lea.vmem %s2510_s3, %s1727_s14 }
  0x11   : > { %1875 = vmatpush3.bf16.msra.mxu0 %v2064_v10  ;;  %v2081_v27 = vld [vmem:[%s2508_s1 + $0xb0] sm:$0xff]   ;;  %v2085_v31 = vld [vmem:[%s2508_s1 + $0xb8] sm:$0xff]   ;;  %v380_v32 = vld [vmem:[%s2289_s24] sm:$0xff] }
  0x12   : > { %1915 = vmatpush3.bf16.msra.mxu1 %v2065_v11  ;;  %1876 = vmatprep.subr.bf16.mxu0 %v2066_v12  ;;  %v384_v33 = vld [vmem:[%s2289_s24 + $0x20] sm:$0xff]  ;;  %v381_v34 = vld [vmem:[%s2289_s24 + $0x8] sm:$0xff]  ;;  %v2094_v56 = vld [vmem:[%s2508_s1 + $0x150] sm:$0xff]  }
  0x13   : > { %1916 = vmatprep.subr.bf16.mxu1 %v2067_v13  ;;  %v1731_v35 = vcombine.low %v380_v32, %v384_v33  ;;  %v1732_v36 = vcombine.high %v380_v32, %v384_v33  ;;  %v385_v37 = vld [vmem:[%s2289_s24 + $0x28] sm:$0xff]  ;;  %v2089_v43 = vld [vmem:[%s2508_s1 + $0x180] sm:$0xff]   ;;  %v2095_v57 = vld [vmem:[%s2508_s1 + $0x1d0] sm:$0xff]  }
  0x14   : > { %v1733_v38 = vcombine.low %v381_v34, %v385_v37  ;;  %v1734_v39 = vcombine.high %v381_v34, %v385_v37  ;;  %v2090_v44 = vld [vmem:[%s2508_s1 + $0x148] sm:$0xff]   ;;  %v388_v48 = vld [vmem:[%s2289_s24 + $0x40] sm:$0xff]  ;;  %v2096_v58 = vld [vmem:[%s2508_s1 + $0x110] sm:$0xff]  }
  0x15   : > { %1877 = vmatpush3.bf16.msra.mxu0 %v2068_v14  ;;  %1116 = vmatprep.mubr.bf16.mxu0 %v1732_v36  ;;  %v2091_v45 = vld [vmem:[%s2508_s1 + $0x1c8] sm:$0xff]   ;;  %v392_v49 = vld [vmem:[%s2289_s24 + $0x60] sm:$0xff]  ;;  %v2097_v59 = vld [vmem:[%s2508_s1 + $0x190] sm:$0xff]  }
  0x16   : > { %1917 = vmatpush3.bf16.msra.mxu1 %v2069_v15  ;;  %1878 = vmatprep.subr.bf16.mxu0 %v2070_v16  ;;  %v2092_v46 = vld [vmem:[%s2508_s1 + $0x108] sm:$0xff]   ;;  %v1740_v50 = vcombine.high %v388_v48, %v392_v49  ;;  %v1739_v53 = vcombine.low %v388_v48, %v392_v49  ;;  %v2098_v60 = vld [vmem:[%s2508_s1 + $0x158] sm:$0xff]   ;;  %v396_v0 = vld [vmem:[%s2289_s24 + $0x80] sm:$0xff] }
  0x17   : > { %1918 = vmatprep.subr.bf16.mxu1 %v2071_v17  ;;  %1181 = vmatprep.mubr.bf16.mxu1 %v1734_v39  ;;  %v2093_v47 = vld [vmem:[%s2508_s1 + $0x188] sm:$0xff]   ;;  %v2099_v61 = vld [vmem:[%s2508_s1 + $0x1d8] sm:$0xff]   ;;  %v400_v1 = vld [vmem:[%s2289_s24 + $0xa0] sm:$0xff] }
  0x18   : > { %v389_v51 = vld [vmem:[%s2289_s24 + $0x48] sm:$0xff]  ;;  %v2100_v62 = vld [vmem:[%s2508_s1 + $0x118] sm:$0xff]   ;;  %v1748_v4 = vcombine.high %v396_v0, %v400_v1  ;;  %v1747_v6 = vcombine.low %v396_v0, %v400_v1  ;;  %v2102_v8 = vld [vmem:[%s2508_s1 + $0x160] sm:$0xff]  }
  0x19   : > { %1879 = vmatpush3.bf16.msra.mxu0 %v2072_v18  ;;  %v393_v52 = vld [vmem:[%s2289_s24 + $0x68] sm:$0xff]  ;;  %v2101_v63 = vld [vmem:[%s2508_s1 + $0x198] sm:$0xff]   ;;  %v2103_v9 = vld [vmem:[%s2508_s1 + $0x1e0] sm:$0xff]  }
  0x1a   : > { %1919 = vmatpush3.bf16.msra.mxu1 %v2073_v19  ;;  %1880 = vmatprep.subr.bf16.mxu0 %v2074_v20  ;;  %v1742_v54 = vcombine.high %v389_v51, %v393_v52  ;;  %v1741_v55 = vcombine.low %v389_v51, %v393_v52  ;;  %v397_v2 = vld [vmem:[%s2289_s24 + $0x88] sm:$0xff]  ;;  %v2104_v10 = vld [vmem:[%s2508_s1 + $0x120] sm:$0xff]   ;;  %v382_v32 = vld [vmem:[%s2289_s24 + $0x10] sm:$0xff] }
  0x1b   : > { %1920 = vmatprep.subr.bf16.mxu1 %v2075_v21  ;;  %v401_v3 = vld [vmem:[%s2289_s24 + $0xa8] sm:$0xff]  ;;  %v2105_v11 = vld [vmem:[%s2508_s1 + $0x1a0] sm:$0xff]   ;;  %v386_v33 = vld [vmem:[%s2289_s24 + $0x30] sm:$0xff] }
  0x1c   : > { %v1750_v5 = vcombine.high %v397_v2, %v401_v3  ;;  %v1749_v7 = vcombine.low %v397_v2, %v401_v3  ;;  %v2106_v12 = vld [vmem:[%s2508_s1 + $0x168] sm:$0xff]   ;;  %v404_v16 = vld [vmem:[%s2289_s24 + $0xc0] sm:$0xff]  ;;  %v1735_v34 = vcombine.low %v382_v32, %v386_v33  ;;  %v383_v36 = vld [vmem:[%s2289_s24 + $0x18] sm:$0xff] }
  0x1d   : > { %1881 = vmatpush3.bf16.msra.mxu0 %v2076_v22  ;;  %v2107_v13 = vld [vmem:[%s2508_s1 + $0x1e8] sm:$0xff]   ;;  %v408_v17 = vld [vmem:[%s2289_s24 + $0xe0] sm:$0xff]  ;;  %v387_v37 = vld [vmem:[%s2289_s24 + $0x38] sm:$0xff] }
  0x1e   : > { %1921 = vmatpush3.bf16.msra.mxu1 %v2077_v23  ;;  %1882 = vmatprep.subr.bf16.mxu0 %v2078_v24  ;;  %v2108_v14 = vld [vmem:[%s2508_s1 + $0x128] sm:$0xff]   ;;  %v1756_v19 = vcombine.high %v404_v16, %v408_v17  ;;  %v1755_v21 = vcombine.low %v404_v16, %v408_v17  ;;  %v2110_v24 = vld [vmem:[%s2508_s1 + $0x170] sm:$0xff]   ;;  %v1737_v39 = vcombine.low %v383_v36, %v387_v37  ;;  %v399_v48 = vld [vmem:[%s2289_s24 + $0x98] sm:$0xff] }
  0x1f   : > { %1922 = vmatprep.subr.bf16.mxu1 %v2079_v25  ;;  %v2109_v15 = vld [vmem:[%s2508_s1 + $0x1a8] sm:$0xff]   ;;  %v2111_v25 = vld [vmem:[%s2508_s1 + $0x1f0] sm:$0xff]   ;;  %v403_v49 = vld [vmem:[%s2289_s24 + $0xb8] sm:$0xff] }
  0x20   : > { %v405_v18 = vld [vmem:[%s2289_s24 + $0xc8] sm:$0xff] }
  0x21   : > { %1883 = vmatpush3.bf16.msra.mxu0 %v2080_v26  ;;  %v409_v20 = vld [vmem:[%s2289_s24 + $0xe8] sm:$0xff]  ;;  %v2112_v26 = vld [vmem:[%s2508_s1 + $0x130] sm:$0xff]  }
  0x22   : > { %1923 = vmatpush3.bf16.msra.mxu1 %v2081_v27  ;;  %1884 = vmatprep.subr.bf16.mxu0 %v2082_v28  ;;  %v1758_v22 = vcombine.high %v405_v18, %v409_v20  ;;  %v1757_v23 = vcombine.low %v405_v18, %v409_v20  ;;  %v2113_v27 = vld [vmem:[%s2508_s1 + $0x1b0] sm:$0xff]   ;;  %v2114_v28 = vld [vmem:[%s2508_s1 + $0x178] sm:$0xff]  }
  0x23   : > { %1924 = vmatprep.subr.bf16.mxu1 %v2083_v29  ;;  %v2115_v29 = vld [vmem:[%s2508_s1 + $0x1f8] sm:$0xff]  }
  0x25   : > { %1885 = vmatpush3.bf16.msra.mxu0 %v2084_v30  ;;  %v2116_v30 = vld [vmem:[%s2508_s1 + $0x138] sm:$0xff]  }
  0x26   : > { %1925 = vmatpush3.bf16.msra.mxu1 %v2085_v31  ;;  %1950 = vmatprep.subr.bf16.mxu0 %v2086_v40  ;;  %v2117_v31 = vld [vmem:[%s2508_s1 + $0x1b8] sm:$0xff]   ;;  %v1738_v40 = vcombine.high %v383_v36, %v387_v37 }
  0x27   : > { %1990 = vmatprep.subr.bf16.mxu1 %v2087_v41  ;;  %v394_v41 = vld [vmem:[%s2289_s24 + $0x70] sm:$0xff] }
  0x28   : > { %1117 = vmatmul.mubr.bf16.vlgmr.msra.gmra.mrb[0].mxu0 %v1731_v35  ;;  %v1736_v35 = vcombine.high %v382_v32, %v386_v33 }
  0x29   : > { %1182 = vmatmul.mubr.bf16.vlgmr.msra.gmra.mrb[0].mxu1 %v1733_v38  ;;  %1951 = vmatpush3.bf16.msra.mxu0 %v2088_v42  ;;  %v390_v38 = vld [vmem:[%s2289_s24 + $0x50] sm:$0xff]  ;;  %v391_v42 = vld [vmem:[%s2289_s24 + $0x58] sm:$0xff] }
  0x2a   : > { %1991 = vmatpush3.bf16.msra.mxu1 %v2089_v43  ;;  %1952 = vmatprep.subr.bf16.mxu0 %v2090_v44  ;;  %v395_v43 = vld [vmem:[%s2289_s24 + $0x78] sm:$0xff]  ;;  %v1744_v44 = vcombine.high %v390_v38, %v394_v41 }
  0x2b   : > { %1992 = vmatprep.subr.bf16.mxu1 %v2091_v45  ;;  %1124 = vmatprep.mubr.bf16.mxu0 %v1740_v50  ;;  %v1746_v45 = vcombine.high %v391_v42, %v395_v43  ;;  %v1743_v50 = vcombine.low %v390_v38, %v394_v41  ;;  %v1745_v51 = vcombine.low %v391_v42, %v395_v43 }
  0x2c   : > { %1189 = vmatprep.mubr.bf16.mxu1 %v1742_v54  ;;  %v406_v54 = vld [vmem:[%s2289_s24 + $0xd0] sm:$0xff] }
  0x2d   : > { %1953 = vmatpush3.bf16.msra.mxu0 %v2092_v46  ;;  %v398_v46 = vld [vmem:[%s2289_s24 + $0x90] sm:$0xff] }
  0x2e   : > { %1993 = vmatpush3.bf16.msra.mxu1 %v2093_v47  ;;  %1954 = vmatprep.subr.bf16.mxu0 %v2094_v56  ;;  %v402_v47 = vld [vmem:[%s2289_s24 + $0xb0] sm:$0xff]  ;;  %v407_v56 = vld [vmem:[%s2289_s24 + $0xd8] sm:$0xff] }
  0x2f   : > { %1994 = vmatprep.subr.bf16.mxu1 %v2095_v57  ;;  %v1752_v52 = vcombine.high %v398_v46, %v402_v47  ;;  %v411_v57 = vld [vmem:[%s2289_s24 + $0xf8] sm:$0xff] }
  0x30   : > { %1125 = vmatmul.mubr.bf16.gmra.mrb[4].mxu0 %v1739_v53  ;;  %v1754_v53 = vcombine.high %v399_v48, %v403_v49 }
  0x31   : > { %1190 = vmatmul.mubr.bf16.gmra.mrb[4].mxu1 %v1741_v55  ;;  %1955 = vmatpush3.bf16.msra.mxu0 %v2096_v58  ;;  %v410_v55 = vld [vmem:[%s2289_s24 + $0xf0] sm:$0xff]  ;;  %v1751_v58 = vcombine.low %v398_v46, %v402_v47  ;;  %s1730_s24 = sshll.u32 %s2132_s18, 6  ;;  %s2520_s18 = smov (!%p344_p5, %s2132_s18), 1 }
  0x32   : > { %1995 = vmatpush3.bf16.msra.mxu1 %v2097_v59  ;;  %1956 = vmatprep.subr.bf16.mxu0 %v2098_v60  ;;  %v1753_v59 = vcombine.low %v399_v48, %v403_v49  ;;  %v1760_v60 = vcombine.high %v406_v54, %v410_v55  ;;  %s1728_s17 = sshll.u32 %s2520_s18, 3 }
  0x33   : > { %1996 = vmatprep.subr.bf16.mxu1 %v2099_v61  ;;  %1132 = vmatprep.mubr.bf16.mxu0 %v1748_v4  ;;  %v1762_v61 = vcombine.high %v407_v56, %v411_v57  ;;  %s350_s25 = scalar_lea.vmem %s2511_s4, %s1728_s17  ;;  %s357_s28 = scalar_lea.vmem %s2512_s5, %s1728_s17 }
  0x34   : > { %1197 = vmatprep.mubr.bf16.mxu1 %v1750_v5 }
  0x35   : > { %1957 = vmatpush3.bf16.msra.mxu0 %v2100_v62  ;;  %v1759_v62 = vcombine.low %v406_v54, %v410_v55 }
  0x36   : > { %1997 = vmatpush3.bf16.msra.mxu1 %v2101_v63  ;;  %1958 = vmatprep.subr.bf16.mxu0 %v2102_v8  ;;  %v1761_v63 = vcombine.low %v407_v56, %v411_v57 }
  0x37   : > { %1998 = vmatprep.subr.bf16.mxu1 %v2103_v9 }
  0x38   : > { %1133 = vmatmul.mubr.bf16.gmra.mrb[8].mxu0 %v1747_v6 }
  0x39   : > { %1198 = vmatmul.mubr.bf16.gmra.mrb[8].mxu1 %v1749_v7  ;;  %1959 = vmatpush3.bf16.msra.mxu0 %v2104_v10 }
  0x3a   : > { %1999 = vmatpush3.bf16.msra.mxu1 %v2105_v11  ;;  %1960 = vmatprep.subr.bf16.mxu0 %v2106_v12 }
  0x3b   : > { %2000 = vmatprep.subr.bf16.mxu1 %v2107_v13  ;;  %1140 = vmatprep.mubr.bf16.mxu0 %v1756_v19 }
  0x3c   : > { %1205 = vmatprep.mubr.bf16.mxu1 %v1758_v22 }
  0x3d   : > { %1961 = vmatpush3.bf16.msra.mxu0 %v2108_v14 }
  0x3e   : > { %2001 = vmatpush3.bf16.msra.mxu1 %v2109_v15  ;;  %1962 = vmatprep.subr.bf16.mxu0 %v2110_v24 }
  0x3f   : > { %2002 = vmatprep.subr.bf16.mxu1 %v2111_v25 }
  0x40   : > { %1141 = vmatmul.mubr.bf16.gmra.mrb[12].mxu0 %v1755_v21 }
  0x41   : > { %1206 = vmatmul.mubr.bf16.gmra.mrb[12].mxu1 %v1757_v23  ;;  %1963 = vmatpush3.bf16.msra.mxu0 %v2112_v26 }
  0x42   : > { %2003 = vmatpush3.bf16.msra.mxu1 %v2113_v27  ;;  %1964 = vmatprep.subr.bf16.mxu0 %v2114_v28 }
  0x43   : > { %2004 = vmatprep.subr.bf16.mxu1 %v2115_v29  ;;  %1246 = vmatprep.mubr.bf16.mxu0 %v1736_v35 }
  0x44   : > { %1311 = vmatprep.mubr.bf16.mxu1 %v1738_v40 }
  0x45   : > { %1965 = vmatpush3.bf16.msra.mxu0 %v2116_v30 }
  0x46   : > { %2005 = vmatpush3.bf16.msra.mxu1 %v2117_v31 }
  0x48   : > { %1247 = vmatmul.mubr.bf16.vlgmr.msra.gmra.mrb[16].mxu0 %v1735_v34 }
  0x49   : > { %1312 = vmatmul.mubr.bf16.vlgmr.msra.gmra.mrb[16].mxu1 %v1737_v39  ;;  %1254 = vmatprep.mubr.bf16.mxu0 %v1744_v44 }
  0x4a   : > { %1319 = vmatprep.mubr.bf16.mxu1 %v1746_v45 }
  0x50   : > { %1255 = vmatmul.mubr.bf16.gmra.mrb[20].mxu0 %v1743_v50 }
  0x51   : > { %1320 = vmatmul.mubr.bf16.gmra.mrb[20].mxu1 %v1745_v51  ;;  %1262 = vmatprep.mubr.bf16.mxu0 %v1752_v52 }
  0x52   : > { %1327 = vmatprep.mubr.bf16.mxu1 %v1754_v53  ;;  %v1434_v53 = vlaneseq }
  0x54   : > { %v2440_v57 = vshrl.u32 %v1434_v53, 7 }
  0x56   : > { %v1439_v53 = vadd.s32 32, %v2440_v57 }
  0x58   : > { %1263 = vmatmul.mubr.bf16.gmra.mrb[24].mxu0 %v1751_v58 }
  0x59   : > { %1328 = vmatmul.mubr.bf16.gmra.mrb[24].mxu1 %v1753_v59  ;;  %1270 = vmatprep.mubr.bf16.mxu0 %v1760_v60 }
  0x5a   : > { %1335 = vmatprep.mubr.bf16.mxu1 %v1762_v61 }
  0x60   : > { %1271 = vmatmul.mubr.bf16.gmra.mrb[28].mxu0 %v1759_v62 }
  0x61   : > { %1336 = vmatmul.mubr.bf16.gmra.mrb[28].mxu1 %v1761_v63  ;;  %v2442_v63 = vstv %s1730_s24 }
  0xfb   : > { %v1886_v0 = vpop.f32.mrb[0].mxu0 }
  0xfc   : > { %v1926_v1 = vpop.f32.mrb[0].mxu1  ;;  %v1887_v2 = vpop.f32.mrb[1].mxu0 }
  0xfd   : > { %v1888_v3 = vadd.f32 %v1887_v2, %v1886_v0  ;;  %v1927_v4 = vpop.f32.mrb[1].mxu1  ;;  %v1889_v5 = vpop.f32.mrb[2].mxu0 }
  0xfe   : > { %v1928_v6 = vadd.f32 %v1927_v4, %v1926_v1  ;;  %v1929_v7 = vpop.f32.mrb[2].mxu1  ;;  %v1890_v8 = vpop.f32.mrb[3].mxu0  ;;  %v1436_v4 = vadd.s32 8, %v2440_v57 }
  0xff   : > { %v1891_v9 = vadd.f32 %v1890_v8, %v1889_v5  ;;  %v1930_v10 = vpop.f32.mrb[3].mxu1  ;;  %v2448_v8 = vld [vmem:[%s2509_s2] ss:$0 sm:$0xff] }
 0x100   : > { %v1184_v11 = vadd.f32 %v1928_v6, %v1888_v3  ;;  %v1931_v12 = vadd.f32 %v1930_v10, %v1929_v7 }
 0x102   : > { %v2425_v13 = vadd.f32 %v1931_v12, %v1891_v9  ;;  %v1444_v9 = vadd.s32 %v2442_v63, %v2440_v57 }
 0x103   : > { %v1892_v14 = vpop.f32.mrb[4].mxu0 }
 0x104   : > { %v1932_v15 = vpop.f32.mrb[4].mxu1  ;;  %v1893_v16 = vpop.f32.mrb[5].mxu0  ;;  %vm1452_vm0 = vcmp.lt.s32.totalorder %v1444_v9, 128 }
 0x105   : > { %v1894_v17 = vadd.f32 %v1893_v16, %v1892_v14  ;;  %v1933_v18 = vpop.f32.mrb[5].mxu1  ;;  %v1895_v19 = vpop.f32.mrb[6].mxu0 }
 0x106   : > { %v1934_v20 = vadd.f32 %v1933_v18, %v1932_v15  ;;  %v1935_v21 = vpop.f32.mrb[6].mxu1  ;;  %v1896_v22 = vpop.f32.mrb[7].mxu0  ;;  %v1445_v15 = vadd.s32 %v2442_v63, %v1436_v4 }
 0x107   : > { %v1897_v23 = vadd.f32 %v1896_v22, %v1895_v19  ;;  %v1936_v24 = vpop.f32.mrb[7].mxu1 }
 0x108   : > { %v2427_v25 = vadd.f32 %v1934_v20, %v1894_v17  ;;  %v1937_v26 = vadd.f32 %v1936_v24, %v1935_v21  ;;  %v1437_v20 = vadd.s32 16, %v2440_v57  ;;  %vm1453_vm1 = vcmp.lt.s32.totalorder %v1445_v15, 128 }
 0x10a   : > { %v2429_v27 = vadd.f32 %v1937_v26, %v1897_v23 }
 0x10b   : > { %v1898_v28 = vpop.f32.mrb[8].mxu0 }
 0x10c   : > { %v1938_v29 = vpop.f32.mrb[8].mxu1  ;;  %v1899_v30 = vpop.f32.mrb[9].mxu0 }
 0x10d   : > { %v1939_v31 = vpop.f32.mrb[9].mxu1  ;;  %v1900_v32 = vadd.f32 %v1899_v30, %v1898_v28  ;;  %v1901_v34 = vpop.f32.mrb[10].mxu0  ;;  %v1438_v30 = vadd.s32 24, %v2440_v57 }
 0x10e   : > { %v1940_v33 = vadd.f32 %v1939_v31, %v1938_v29  ;;  %v1941_v35 = vpop.f32.mrb[10].mxu1  ;;  %v1902_v36 = vpop.f32.mrb[11].mxu0 }
 0x10f   : > { %v1942_v37 = vpop.f32.mrb[11].mxu1  ;;  %v1903_v39 = vadd.f32 %v1902_v36, %v1901_v34  ;;  %v1446_v36 = vadd.s32 %v2442_v63, %v1437_v20 }
 0x110   : > { %v2431_v38 = vadd.f32 %v1940_v33, %v1900_v32  ;;  %v1943_v40 = vadd.f32 %v1942_v37, %v1941_v35 }
 0x111   : > { %vm1454_vm2 = vcmp.lt.s32.totalorder %v1446_v36, 128 }
 0x112   : > { %v2433_v41 = vadd.f32 %v1943_v40, %v1903_v39 }
 0x113   : > { %v1904_v42 = vpop.f32.mrb[12].mxu0 }
 0x114   : > { %v1944_v43 = vpop.f32.mrb[12].mxu1  ;;  %v1905_v44 = vpop.f32.mrb[13].mxu0 }
 0x115   : > { %v1906_v45 = vadd.f32 %v1905_v44, %v1904_v42  ;;  %v1945_v46 = vpop.f32.mrb[13].mxu1  ;;  %v1907_v47 = vpop.f32.mrb[14].mxu0 }
 0x116   : > { %v1946_v48 = vadd.f32 %v1945_v46, %v1944_v43  ;;  %v1947_v49 = vpop.f32.mrb[14].mxu1  ;;  %v1908_v50 = vpop.f32.mrb[15].mxu0 }
 0x117   : > { %v1909_v51 = vadd.f32 %v1908_v50, %v1907_v47  ;;  %v1948_v52 = vpop.f32.mrb[15].mxu1 }
 0x118   : > { %v2435_v54 = vadd.f32 %v1946_v48, %v1906_v45  ;;  %v1949_v55 = vadd.f32 %v1948_v52, %v1947_v49 }
 0x11a   : > { %v2437_v56 = vadd.f32 %v1949_v55, %v1909_v51 }
 0x11b   : > { %v1966_v58 = vpop.f32.mrb[16].mxu0 }
 0x11c   : > { %v2006_v59 = vpop.f32.mrb[16].mxu1  ;;  %v1967_v60 = vpop.f32.mrb[17].mxu0 }
 0x11d   : > { %v1968_v61 = vadd.f32 %v1967_v60, %v1966_v58  ;;  %v2007_v62 = vpop.f32.mrb[17].mxu1  ;;  %v1969_v0 = vpop.f32.mrb[18].mxu0 }
 0x11e   : > { %v2008_v1 = vadd.f32 %v2007_v62, %v2006_v59  ;;  %v2009_v2 = vpop.f32.mrb[18].mxu1  ;;  %v1970_v3 = vpop.f32.mrb[19].mxu0 }
 0x11f   : > { %v1249_v5 = vadd.f32 %v1968_v61, %v1184_v11  ;;  %v1971_v6 = vadd.f32 %v1970_v3, %v1969_v0  ;;  %v2010_v7 = vpop.f32.mrb[19].mxu1 }
 0x120   : > { %v2011_v10 = vadd.f32 %v2010_v7, %v2009_v2 }
 0x121   : > { %v1314_v12 = vadd.f32 %v2008_v1, %v1249_v5  ;;  %v1252_v14 = vadd.f32 %v1971_v6, %v2425_v13  ;;  %v1440_v1 = vadd.s32 40, %v2440_v57 }
 0x123   : > { %v1378_v16 = vadd.f32 %v2448_v8, %v1314_v12  ;;  %v1317_v11 = vadd.f32 %v2011_v10, %v1252_v14  ;;  %v1972_v17 = vpop.f32.mrb[20].mxu0  ;;  %v1448_v10 = vadd.s32 %v2442_v63, %v1439_v53  ;;  %v1449_v20 = vadd.s32 %v2442_v63, %v1440_v1 }
 0x124   : > { %v2012_v18 = vpop.f32.mrb[20].mxu1  ;;  %v1973_v19 = vpop.f32.mrb[21].mxu0 }
 0x125   : > { %v1386_v21 = vmax.f32 %v1378_v16, 0.0  ;;  %v1379_v22 = vadd.f32 %v2448_v8, %v1317_v11  ;;  %v1974_v23 = vadd.f32 %v1973_v19, %v1972_v17  ;;  %v2013_v24 = vpop.f32.mrb[21].mxu1  ;;  %v1975_v26 = vpop.f32.mrb[22].mxu0  ;;  %vm1456_vm4 = vcmp.lt.s32.totalorder %v1448_v10, 128 }
 0x126   : > { %v2014_v13 = vadd.f32 %v2013_v24, %v2012_v18  ;;  %v2015_v28 = vpop.f32.mrb[22].mxu1  ;;  %v1976_v29 = vpop.f32.mrb[23].mxu0  ;;  %vm1457_vm5 = vcmp.lt.s32.totalorder %v1449_v20, 128 }
 0x127   : > { %v1476_v31 = vsel %vm1452_vm0, %v1386_v21, 0.0  ;;  %v1387_v32 = vmax.f32 %v1379_v22, 0.0  ;;  %v1257_v33 = vadd.f32 %v1974_v23, %v2427_v25  ;;  %v1977_v34 = vadd.f32 %v1976_v29, %v1975_v26  ;;  %v2016_v35 = vpop.f32.mrb[23].mxu1 }
 0x128   : > { %v2017_v37 = vadd.f32 %v2016_v35, %v2015_v28  ;;  %v1498_v44 = vmul.f32 %v1476_v31, %v1476_v31  ;;  %v1447_v25 = vadd.s32 %v2442_v63, %v1438_v30  ;;  %v1442_v35 = vadd.s32 56, %v2440_v57 }
 0x129   : > { %v1850_v39 = vpack.c.bf16 %v1387_v32, %v1386_v21  ;;  %v1477_v40 = vsel %vm1453_vm1, %v1387_v32, 0.0  ;;  %v1322_v42 = vadd.f32 %v2014_v13, %v1257_v33  ;;  %v1260_v43 = vadd.f32 %v1977_v34, %v2429_v27 }
 0x12a   : > { %v1484_v45 = vadd.f32 %v1477_v40, %v1476_v31  ;;  %v1499_v46 = vmul.f32 %v1477_v40, %v1477_v40  ;;  %vm1455_vm3 = vcmp.lt.s32.totalorder %v1447_v25, 128  ;;  %v1441_v13 = vadd.s32 48, %v2440_v57 }
 0x12b   : > { %1851 = vst [vmem:[%s2463_s8] sm:$0xff] %v1850_v39   ;;  %v1380_v47 = vadd.f32 %v2448_v8, %v1322_v42  ;;  %v1325_v48 = vadd.f32 %v2017_v37, %v1260_v43  ;;  %v1978_v49 = vpop.f32.mrb[24].mxu0 }
 0x12c   : > { %v1506_v50 = vadd.f32 %v1499_v46, %v1498_v44  ;;  %v2018_v51 = vpop.f32.mrb[24].mxu1  ;;  %v1979_v52 = vpop.f32.mrb[25].mxu0 }
 0x12d   : > { %v1388_v55 = vmax.f32 %v1380_v47, 0.0  ;;  %v1381_v58 = vadd.f32 %v2448_v8, %v1325_v48  ;;  %v1980_v27 = vadd.f32 %v1979_v52, %v1978_v49  ;;  %v2019_v59 = vpop.f32.mrb[25].mxu1  ;;  %v1981_v60 = vpop.f32.mrb[26].mxu0  ;;  %v1451_v52 = vadd.s32 %v2442_v63, %v1442_v35 }
 0x12e   : > { %v2020_v61 = vadd.f32 %v2019_v59, %v2018_v51  ;;  %v2021_v62 = vpop.f32.mrb[26].mxu1  ;;  %v1982_v0 = vpop.f32.mrb[27].mxu0 }
 0x12f   : > { %v1478_v2 = vsel %vm1454_vm2, %v1388_v55, 0.0  ;;  %v1389_v3 = vmax.f32 %v1381_v58, 0.0  ;;  %v1265_v4 = vadd.f32 %v1980_v27, %v2431_v38  ;;  %v1983_v5 = vadd.f32 %v1982_v0, %v1981_v60  ;;  %v2022_v6 = vpop.f32.mrb[27].mxu1 }
 0x130   : > { %v1485_v7 = vadd.f32 %v1484_v45, %v1478_v2  ;;  %v1500_v9 = vmul.f32 %v1478_v2, %v1478_v2  ;;  %v2023_v12 = vadd.f32 %v2022_v6, %v2021_v62  ;;  %v1450_v45 = vadd.s32 %v2442_v63, %v1441_v13 }
 0x131   : > { %v1855_v14 = vpack.c.bf16 %v1389_v3, %v1388_v55  ;;  %v1479_v15 = vsel %vm1455_vm3, %v1389_v3, 0.0  ;;  %v1330_v16 = vadd.f32 %v2020_v61, %v1265_v4  ;;  %v1268_v11 = vadd.f32 %v1983_v5, %v2433_v41 }
 0x132   : > { %v1507_v17 = vadd.f32 %v1506_v50, %v1500_v9  ;;  %v1486_v18 = vadd.f32 %v1485_v7, %v1479_v15  ;;  %v1501_v19 = vmul.f32 %v1479_v15, %v1479_v15  ;;  %vm1458_vm6 = vcmp.lt.s32.totalorder %v1450_v45, 128 }
 0x133   : > { %1867 = vst [vmem:[%s2463_s8 + $0x8] sm:$0xff] %v1855_v14   ;;  %v1382_v38 = vadd.f32 %v2448_v8, %v1330_v16  ;;  %v1333_v21 = vadd.f32 %v2023_v12, %v1268_v11  ;;  %v1984_v22 = vpop.f32.mrb[28].mxu0  ;;  %vm1459_vm7 = vcmp.lt.s32.totalorder %v1451_v52, 128 }
 0x134   : > { %v1508_v23 = vadd.f32 %v1507_v17, %v1501_v19  ;;  %v2024_v24 = vpop.f32.mrb[28].mxu1  ;;  %v1985_v26 = vpop.f32.mrb[29].mxu0 }
 0x135   : > { %v1390_v28 = vmax.f32 %v1382_v38, 0.0  ;;  %v1383_v29 = vadd.f32 %v2448_v8, %v1333_v21  ;;  %v1986_v41 = vadd.f32 %v1985_v26, %v1984_v22  ;;  %v2025_v30 = vpop.f32.mrb[29].mxu1  ;;  %v1987_v31 = vpop.f32.mrb[30].mxu0 }
 0x136   : > { %v2026_v32 = vadd.f32 %v2025_v30, %v2024_v24  ;;  %v2027_v33 = vpop.f32.mrb[30].mxu1  ;;  %v1988_v34 = vpop.f32.mrb[31].mxu0 }
 0x137   : > { %v1480_v36 = vsel %vm1456_vm4, %v1390_v28, 0.0  ;;  %v1391_v37 = vmax.f32 %v1383_v29, 0.0  ;;  %v1273_v39 = vadd.f32 %v1986_v41, %v2435_v54  ;;  %v1989_v40 = vadd.f32 %v1988_v34, %v1987_v31  ;;  %v2028_v42 = vpop.f32.mrb[31].mxu1 }
 0x138   : > { %v1487_v43 = vadd.f32 %v1486_v18, %v1480_v36  ;;  %v1502_v44 = vmul.f32 %v1480_v36, %v1480_v36  ;;  %v2029_v46 = vadd.f32 %v2028_v42, %v2027_v33 }
 0x139   : > { %v1860_v25 = vpack.c.bf16 %v1391_v37, %v1390_v28  ;;  %v1481_v47 = vsel %vm1457_vm5, %v1391_v37, 0.0  ;;  %v1338_v48 = vadd.f32 %v2026_v32, %v1273_v39  ;;  %v1276_v49 = vadd.f32 %v1989_v40, %v2437_v56 }
 0x13a   : > { %v1509_v50 = vadd.f32 %v1508_v23, %v1502_v44  ;;  %v1488_v51 = vadd.f32 %v1487_v43, %v1481_v47  ;;  %v1503_v57 = vmul.f32 %v1481_v47, %v1481_v47 }
 0x13b   : > { %1868 = vst [vmem:[%s2463_s8 + $0x10] sm:$0xff] %v1860_v25   ;;  %v1384_v54 = vadd.f32 %v2448_v8, %v1338_v48  ;;  %v1341_v53 = vadd.f32 %v2029_v46, %v1276_v49 }
 0x13c   : > { %v1510_v55 = vadd.f32 %v1509_v50, %v1503_v57 }
 0x13d   : > { %v1392_v58 = vmax.f32 %v1384_v54, 0.0  ;;  %v1385_v27 = vadd.f32 %v2448_v8, %v1341_v53 }
 0x13f   : > { %v1482_v59 = vsel %vm1458_vm6, %v1392_v58, 0.0  ;;  %v1393_v56 = vmax.f32 %v1385_v27, 0.0 }
 0x140   : > { %v1489_v60 = vadd.f32 %v1488_v51, %v1482_v59  ;;  %v1504_v61 = vmul.f32 %v1482_v59, %v1482_v59 }
 0x141   : > { %v1865_v62 = vpack.c.bf16 %v1393_v56, %v1392_v58  ;;  %v1483_v0 = vsel %vm1459_vm7, %v1393_v56, 0.0 }
 0x142   : > { %v1511_v63 = vadd.f32 %v1510_v55, %v1504_v61  ;;  %v1490_v1 = vadd.f32 %v1489_v60, %v1483_v0  ;;  %v1505_v2 = vmul.f32 %v1483_v0, %v1483_v0 }
 0x143   : > { %1869 = vst [vmem:[%s2463_s8 + $0x18] sm:$0xff] %v1865_v62  }
 0x144   : > { %v1491_v3 = vrot.slane %v1490_v1, 4  ;;  %v1512_v4 = vadd.f32 %v1511_v63, %v1505_v2 }
 0x146   : > { %v1492_v5 = vadd.f32 %v1491_v3, %v1490_v1  ;;  %v1513_v6 = vrot.slane %v1512_v4, 4 }
 0x148   : > { %v1493_v7 = vrot.slane %v1492_v5, 2  ;;  %v1514_v9 = vadd.f32 %v1513_v6, %v1512_v4 }
 0x14a   : > { %v1494_v8 = vadd.f32 %v1493_v7, %v1492_v5  ;;  %v1515_v10 = vrot.slane %v1514_v9, 2 }
 0x14c   : > { %v1495_v12 = vrot.slane %v1494_v8, 1  ;;  %v1516_v14 = vadd.f32 %v1515_v10, %v1514_v9 }
 0x14e   : > { %v1496_v15 = vadd.f32 %v1495_v12, %v1494_v8  ;;  %v1517_v16 = vrot.slane %v1516_v14, 1 }
 0x150   : > { %1497 = vst [vmem:[%s350_s25] sm:$0xff] %v1496_v15  ;;  %v1518_v11 = vadd.f32 %v1517_v16, %v1516_v14 }
 0x152   : > { %1519 = vst [vmem:[%s357_s28] sm:$0xff] %v1518_v11 }
 0x153 PF: > { %s16_s20 = sadd.s32 1, %s2140_s20   ;;  %s2513_s18 = smov %s2136_s19 }
 0x154   : > { %p13_p6 = scmp.ge.s32.totalorder %s16_s20, 4   ;;  %s2514_s19 = smov %s2516_s21 }
 0x156   :  { %15 = sbr.rel (!%p13_p6) target bundleno = 2 (0x2), region = 100 }

// kernel: feature_extraction_forward.8
= control target key start
LH: loop header
LB: loop body
LE: loop exit
PB: predicated region body
PF: predicated region fallthrough
CT: control target
= control target key end

     0   :  { %s4043_s18 = smov 0   ;;  %s4045_s19 = smov 0   ;;  %s4900_s0 = inlined_call_operand.vmem [shape: bf16[32,2048], index: 0, kind: input, shape index: {}]   ;;  %s4901_s1 = inlined_call_operand.vmem [shape: bf16[2048,256], index: 1, kind: input, shape index: {}]   ;;  %s4902_s2 = inlined_call_operand.vmem [shape: f32[1,256], index: 2, kind: input, shape index: {}]   ;;  %s4903_s3 = inlined_call_operand.vmem [shape: bf16[32,256], index: 3, kind: output, shape index: {0}]   ;;  %s4904_s4 = inlined_call_operand.vmem [shape: f32[8,256], index: 4, kind: output, shape index: {1}]   ;;  %s4905_s5 = inlined_call_operand.vmem [shape: f32[8,256], index: 5, kind: output, shape index: {2}]  }
   0x1   :  { %s4047_s20 = smov 0   ;;  %s4049_s21 = smov 0  }
   0x2   :  { %s4051_s22 = smov 0  }
   0x3 LB: > { %s31_s23 = sadd.s32 1, %s4007_s21  ;;  %s3385_s24 = sadd.s32 4294967295, %s4011_s22   ;;  %s4011_s22 = sphi %s4051_s22, %s16_s22   ;;  %s4007_s21 = sphi %s4049_s21, %s4910_s21   ;;  %s4003_s20 = sphi %s4047_s20, %s4909_s20   ;;  %s3999_s19 = sphi %s4045_s19, %s4908_s19   ;;  %s3995_s18 = sphi %s4043_s18, %s4907_s18  }
   0x4   : > { %p33_p0 = scmp.ge.s32.totalorder %s31_s23, 2  ;;  %p79_p1 = scmp.ne.s32.totalorder %s3999_s19, %s3995_s18 }
   0x5   : > { %p80_p2 = scmp.eq.s32.totalorder %s4011_s22, 0  ;;  %p137_p4 = scmp.eq.s32.totalorder %s3385_s24, 1 }
   0x6   : > { %s4912_s23 = smov (%p33_p0, %s31_s23), 0  ;;  %s72_s26 = sadd.s32 1, %s3999_s19 }
   0x7   : > { %p81_p3 = por %p80_p2, %p79_p1  ;;  %s68_s25 = ssub.s32 %s4007_s21, %s4912_s23 }
   0x8   : > { %p70_p5 = scmp.eq.s32.totalorder %s68_s25, 0  ;;  %p4078_p6 = por %p137_p4, %p79_p1 }
   0x9   : > { %p3389_p7 = scmp.ge.s32.totalorder %s4011_s22, 2 }
   0xa   : > { %s4083_s28 = scalar_select %p70_p5, %s3999_s19, %s72_s26  }
   0xb   : > { %230 = sbr.rel (%p3389_p7) target bundleno = 192 (0xc0), region = 20 }
  0x12   : > { %233 = sbr.rel (!%p81_p3) target bundleno = 192 (0xc0), region = 24  ;;  %s235_s29 = sand.u32 (%p81_p3), 1, %s3999_s19  }
  0x13   : > { %s3391_s30 = sshll.u32 (%p81_p3), %s4007_s21, 2  ;;  %s3390_s6 = sshll.u32 (%p81_p3), %s235_s29, 10 }
  0x14   : > { %s4091_s9 = scalar_lea.vmem (%p81_p3), %s4901_s1, %s3391_s30  ;;  %s4095_s10 = scalar_lea.vmem (%p81_p3), [#allocation3], %s3390_s6 }
  0x15   : > { %v258_v0 = vld [vmem:[%s4091_s9] sm:$0xf] (%p81_p3)  ;;  %v260_v1 = vld [vmem:[%s4091_s9 + $0x8] sm:$0xf] (%p81_p3)  ;;  %v262_v2 = vld [vmem:[%s4091_s9 + $0x10] sm:$0xf] (%p81_p3) }
  0x16   : > { %259 = vst [vmem:[%s4095_s10] sm:$0xf] (%p81_p3), %v258_v0  ;;  %261 = vst [vmem:[%s4095_s10 + $0x4] sm:$0xf] (%p81_p3), %v260_v1  ;;  %v264_v3 = vld [vmem:[%s4091_s9 + $0x18] sm:$0xf] (%p81_p3) }
  0x17   : > { %v266_v4 = vld [vmem:[%s4091_s9 + $0x20] sm:$0xf] (%p81_p3)  ;;  %263 = vst [vmem:[%s4095_s10 + $0x8] sm:$0xf] (%p81_p3), %v262_v2  ;;  %265 = vst [vmem:[%s4095_s10 + $0xc] sm:$0xf] (%p81_p3), %v264_v3 }
  0x18   : > { %267 = vst [vmem:[%s4095_s10 + $0x10] sm:$0xf] (%p81_p3), %v266_v4  ;;  %v268_v5 = vld [vmem:[%s4091_s9 + $0x28] sm:$0xf] (%p81_p3)  ;;  %v270_v6 = vld [vmem:[%s4091_s9 + $0x30] sm:$0xf] (%p81_p3) }
  0x19   : > { %v272_v7 = vld [vmem:[%s4091_s9 + $0x38] sm:$0xf]  ;;  %269 = vst [vmem:[%s4095_s10 + $0x14] sm:$0xf] %v268_v5  ;;  %271 = vst [vmem:[%s4095_s10 + $0x18] sm:$0xf] %v270_v6 }
  0x1a   : > { %273 = vst [vmem:[%s4095_s10 + $0x1c] sm:$0xf] %v272_v7  ;;  %v274_v8 = vld [vmem:[%s4091_s9 + $0x40] sm:$0xf]  ;;  %v276_v9 = vld [vmem:[%s4091_s9 + $0x48] sm:$0xf] }
  0x1b   : > { %v278_v10 = vld [vmem:[%s4091_s9 + $0x50] sm:$0xf]  ;;  %275 = vst [vmem:[%s4095_s10 + $0x20] sm:$0xf] %v274_v8  ;;  %277 = vst [vmem:[%s4095_s10 + $0x24] sm:$0xf] %v276_v9 }
  0x1c   : > { %279 = vst [vmem:[%s4095_s10 + $0x28] sm:$0xf] %v278_v10  ;;  %v280_v11 = vld [vmem:[%s4091_s9 + $0x58] sm:$0xf]  ;;  %v282_v12 = vld [vmem:[%s4091_s9 + $0x60] sm:$0xf] }
  0x1d   : > { %v284_v13 = vld [vmem:[%s4091_s9 + $0x68] sm:$0xf]  ;;  %281 = vst [vmem:[%s4095_s10 + $0x2c] sm:$0xf] %v280_v11  ;;  %283 = vst [vmem:[%s4095_s10 + $0x30] sm:$0xf] %v282_v12 }
  0x1e   : > { %285 = vst [vmem:[%s4095_s10 + $0x34] sm:$0xf] %v284_v13  ;;  %v286_v14 = vld [vmem:[%s4091_s9 + $0x70] sm:$0xf]  ;;  %v288_v15 = vld [vmem:[%s4091_s9 + $0x78] sm:$0xf] }
  0x1f   : > { %v290_v16 = vld [vmem:[%s4091_s9 + $0x80] sm:$0xf]  ;;  %287 = vst [vmem:[%s4095_s10 + $0x38] sm:$0xf] %v286_v14  ;;  %289 = vst [vmem:[%s4095_s10 + $0x3c] sm:$0xf] %v288_v15 }
  0x20   : > { %291 = vst [vmem:[%s4095_s10 + $0x40] sm:$0xf] %v290_v16  ;;  %v292_v17 = vld [vmem:[%s4091_s9 + $0x88] sm:$0xf]  ;;  %v294_v18 = vld [vmem:[%s4091_s9 + $0x90] sm:$0xf] }
  0x21   : > { %v296_v19 = vld [vmem:[%s4091_s9 + $0x98] sm:$0xf]  ;;  %293 = vst [vmem:[%s4095_s10 + $0x44] sm:$0xf] %v292_v17  ;;  %295 = vst [vmem:[%s4095_s10 + $0x48] sm:$0xf] %v294_v18 }
  0x22   : > { %297 = vst [vmem:[%s4095_s10 + $0x4c] sm:$0xf] %v296_v19  ;;  %v298_v20 = vld [vmem:[%s4091_s9 + $0xa0] sm:$0xf]  ;;  %v300_v21 = vld [vmem:[%s4091_s9 + $0xa8] sm:$0xf] }
  0x23   : > { %v302_v22 = vld [vmem:[%s4091_s9 + $0xb0] sm:$0xf]  ;;  %299 = vst [vmem:[%s4095_s10 + $0x50] sm:$0xf] %v298_v20  ;;  %301 = vst [vmem:[%s4095_s10 + $0x54] sm:$0xf] %v300_v21 }
  0x24   : > { %303 = vst [vmem:[%s4095_s10 + $0x58] sm:$0xf] %v302_v22  ;;  %v304_v23 = vld [vmem:[%s4091_s9 + $0xb8] sm:$0xf]  ;;  %v306_v24 = vld [vmem:[%s4091_s9 + $0xc0] sm:$0xf] }
  0x25   : > { %v308_v25 = vld [vmem:[%s4091_s9 + $0xc8] sm:$0xf]  ;;  %305 = vst [vmem:[%s4095_s10 + $0x5c] sm:$0xf] %v304_v23  ;;  %307 = vst [vmem:[%s4095_s10 + $0x60] sm:$0xf] %v306_v24 }
  0x26   : > { %309 = vst [vmem:[%s4095_s10 + $0x64] sm:$0xf] %v308_v25  ;;  %v310_v26 = vld [vmem:[%s4091_s9 + $0xd0] sm:$0xf]  ;;  %v312_v27 = vld [vmem:[%s4091_s9 + $0xd8] sm:$0xf] }
  0x27   : > { %v314_v28 = vld [vmem:[%s4091_s9 + $0xe0] sm:$0xf]  ;;  %311 = vst [vmem:[%s4095_s10 + $0x68] sm:$0xf] %v310_v26  ;;  %313 = vst [vmem:[%s4095_s10 + $0x6c] sm:$0xf] %v312_v27 }
  0x28   : > { %315 = vst [vmem:[%s4095_s10 + $0x70] sm:$0xf] %v314_v28  ;;  %v316_v29 = vld [vmem:[%s4091_s9 + $0xe8] sm:$0xf]  ;;  %v318_v30 = vld [vmem:[%s4091_s9 + $0xf0] sm:$0xf] }
  0x29   : > { %v320_v31 = vld [vmem:[%s4091_s9 + $0xf8] sm:$0xf]  ;;  %317 = vst [vmem:[%s4095_s10 + $0x74] sm:$0xf] %v316_v29  ;;  %319 = vst [vmem:[%s4095_s10 + $0x78] sm:$0xf] %v318_v30 }
  0x2a   : > { %321 = vst [vmem:[%s4095_s10 + $0x7c] sm:$0xf] %v320_v31  ;;  %v322_v32 = vld [vmem:[%s4091_s9 + $0x100] sm:$0xf]  ;;  %v324_v33 = vld [vmem:[%s4091_s9 + $0x108] sm:$0xf] }
  0x2b   : > { %v326_v34 = vld [vmem:[%s4091_s9 + $0x110] sm:$0xf]  ;;  %323 = vst [vmem:[%s4095_s10 + $0x80] sm:$0xf] %v322_v32  ;;  %325 = vst [vmem:[%s4095_s10 + $0x84] sm:$0xf] %v324_v33 }
  0x2c   : > { %327 = vst [vmem:[%s4095_s10 + $0x88] sm:$0xf] %v326_v34  ;;  %v328_v35 = vld [vmem:[%s4091_s9 + $0x118] sm:$0xf]  ;;  %v330_v36 = vld [vmem:[%s4091_s9 + $0x120] sm:$0xf] }
  0x2d   : > { %v332_v37 = vld [vmem:[%s4091_s9 + $0x128] sm:$0xf]  ;;  %329 = vst [vmem:[%s4095_s10 + $0x8c] sm:$0xf] %v328_v35  ;;  %331 = vst [vmem:[%s4095_s10 + $0x90] sm:$0xf] %v330_v36 }
  0x2e   : > { %333 = vst [vmem:[%s4095_s10 + $0x94] sm:$0xf] %v332_v37  ;;  %v334_v38 = vld [vmem:[%s4091_s9 + $0x130] sm:$0xf]  ;;  %v336_v39 = vld [vmem:[%s4091_s9 + $0x138] sm:$0xf] }
  0x2f   : > { %v338_v40 = vld [vmem:[%s4091_s9 + $0x140] sm:$0xf]  ;;  %335 = vst [vmem:[%s4095_s10 + $0x98] sm:$0xf] %v334_v38  ;;  %337 = vst [vmem:[%s4095_s10 + $0x9c] sm:$0xf] %v336_v39 }
  0x30   : > { %339 = vst [vmem:[%s4095_s10 + $0xa0] sm:$0xf] %v338_v40  ;;  %v340_v41 = vld [vmem:[%s4091_s9 + $0x148] sm:$0xf]  ;;  %v342_v42 = vld [vmem:[%s4091_s9 + $0x150] sm:$0xf] }
  0x31   : > { %v344_v43 = vld [vmem:[%s4091_s9 + $0x158] sm:$0xf]  ;;  %341 = vst [vmem:[%s4095_s10 + $0xa4] sm:$0xf] %v340_v41  ;;  %343 = vst [vmem:[%s4095_s10 + $0xa8] sm:$0xf] %v342_v42 }
  0x32   : > { %345 = vst [vmem:[%s4095_s10 + $0xac] sm:$0xf] %v344_v43  ;;  %v346_v44 = vld [vmem:[%s4091_s9 + $0x160] sm:$0xf]  ;;  %v348_v45 = vld [vmem:[%s4091_s9 + $0x168] sm:$0xf] }
  0x33   : > { %v350_v46 = vld [vmem:[%s4091_s9 + $0x170] sm:$0xf]  ;;  %347 = vst [vmem:[%s4095_s10 + $0xb0] sm:$0xf] %v346_v44  ;;  %349 = vst [vmem:[%s4095_s10 + $0xb4] sm:$0xf] %v348_v45 }
  0x34   : > { %351 = vst [vmem:[%s4095_s10 + $0xb8] sm:$0xf] %v350_v46  ;;  %v352_v47 = vld [vmem:[%s4091_s9 + $0x178] sm:$0xf]  ;;  %v354_v48 = vld [vmem:[%s4091_s9 + $0x180] sm:$0xf] }
  0x35   : > { %v356_v49 = vld [vmem:[%s4091_s9 + $0x188] sm:$0xf]  ;;  %353 = vst [vmem:[%s4095_s10 + $0xbc] sm:$0xf] %v352_v47  ;;  %355 = vst [vmem:[%s4095_s10 + $0xc0] sm:$0xf] %v354_v48 }
  0x36   : > { %357 = vst [vmem:[%s4095_s10 + $0xc4] sm:$0xf] %v356_v49  ;;  %v358_v50 = vld [vmem:[%s4091_s9 + $0x190] sm:$0xf]  ;;  %v360_v51 = vld [vmem:[%s4091_s9 + $0x198] sm:$0xf] }
  0x37   : > { %v362_v52 = vld [vmem:[%s4091_s9 + $0x1a0] sm:$0xf]  ;;  %359 = vst [vmem:[%s4095_s10 + $0xc8] sm:$0xf] %v358_v50  ;;  %361 = vst [vmem:[%s4095_s10 + $0xcc] sm:$0xf] %v360_v51 }
  0x38   : > { %363 = vst [vmem:[%s4095_s10 + $0xd0] sm:$0xf] %v362_v52  ;;  %v364_v53 = vld [vmem:[%s4091_s9 + $0x1a8] sm:$0xf]  ;;  %v366_v54 = vld [vmem:[%s4091_s9 + $0x1b0] sm:$0xf] }
  0x39   : > { %v368_v55 = vld [vmem:[%s4091_s9 + $0x1b8] sm:$0xf]  ;;  %365 = vst [vmem:[%s4095_s10 + $0xd4] sm:$0xf] %v364_v53  ;;  %367 = vst [vmem:[%s4095_s10 + $0xd8] sm:$0xf] %v366_v54 }
  0x3a   : > { %369 = vst [vmem:[%s4095_s10 + $0xdc] sm:$0xf] %v368_v55  ;;  %v370_v56 = vld [vmem:[%s4091_s9 + $0x1c0] sm:$0xf]  ;;  %v372_v57 = vld [vmem:[%s4091_s9 + $0x1c8] sm:$0xf] }
  0x3b   : > { %v374_v58 = vld [vmem:[%s4091_s9 + $0x1d0] sm:$0xf]  ;;  %371 = vst [vmem:[%s4095_s10 + $0xe0] sm:$0xf] %v370_v56  ;;  %373 = vst [vmem:[%s4095_s10 + $0xe4] sm:$0xf] %v372_v57 }
  0x3c   : > { %375 = vst [vmem:[%s4095_s10 + $0xe8] sm:$0xf] %v374_v58  ;;  %v376_v59 = vld [vmem:[%s4091_s9 + $0x1d8] sm:$0xf]  ;;  %v378_v60 = vld [vmem:[%s4091_s9 + $0x1e0] sm:$0xf] }
  0x3d   : > { %v380_v61 = vld [vmem:[%s4091_s9 + $0x1e8] sm:$0xf]  ;;  %377 = vst [vmem:[%s4095_s10 + $0xec] sm:$0xf] %v376_v59  ;;  %379 = vst [vmem:[%s4095_s10 + $0xf0] sm:$0xf] %v378_v60 }
  0x3e   : > { %381 = vst [vmem:[%s4095_s10 + $0xf4] sm:$0xf] %v380_v61  ;;  %v382_v62 = vld [vmem:[%s4091_s9 + $0x1f0] sm:$0xf]  ;;  %v384_v63 = vld [vmem:[%s4091_s9 + $0x1f8] sm:$0xf] }
  0x3f   : > { %v386_v0 = vld [vmem:[%s4091_s9 + $0x200] sm:$0xf]  ;;  %383 = vst [vmem:[%s4095_s10 + $0xf8] sm:$0xf] %v382_v62  ;;  %385 = vst [vmem:[%s4095_s10 + $0xfc] sm:$0xf] %v384_v63 }
  0x40   : > { %387 = vst [vmem:[%s4095_s10 + $0x100] sm:$0xf] %v386_v0  ;;  %v388_v1 = vld [vmem:[%s4091_s9 + $0x208] sm:$0xf]  ;;  %v390_v2 = vld [vmem:[%s4091_s9 + $0x210] sm:$0xf] }
  0x41   : > { %v392_v3 = vld [vmem:[%s4091_s9 + $0x218] sm:$0xf]  ;;  %389 = vst [vmem:[%s4095_s10 + $0x104] sm:$0xf] %v388_v1  ;;  %391 = vst [vmem:[%s4095_s10 + $0x108] sm:$0xf] %v390_v2 }
  0x42   : > { %393 = vst [vmem:[%s4095_s10 + $0x10c] sm:$0xf] %v392_v3  ;;  %v394_v4 = vld [vmem:[%s4091_s9 + $0x220] sm:$0xf]  ;;  %v396_v5 = vld [vmem:[%s4091_s9 + $0x228] sm:$0xf] }
  0x43   : > { %v398_v6 = vld [vmem:[%s4091_s9 + $0x230] sm:$0xf]  ;;  %395 = vst [vmem:[%s4095_s10 + $0x110] sm:$0xf] %v394_v4  ;;  %397 = vst [vmem:[%s4095_s10 + $0x114] sm:$0xf] %v396_v5 }
  0x44   : > { %399 = vst [vmem:[%s4095_s10 + $0x118] sm:$0xf] %v398_v6  ;;  %v400_v7 = vld [vmem:[%s4091_s9 + $0x238] sm:$0xf]  ;;  %v402_v8 = vld [vmem:[%s4091_s9 + $0x240] sm:$0xf] }
  0x45   : > { %v404_v9 = vld [vmem:[%s4091_s9 + $0x248] sm:$0xf]  ;;  %401 = vst [vmem:[%s4095_s10 + $0x11c] sm:$0xf] %v400_v7  ;;  %403 = vst [vmem:[%s4095_s10 + $0x120] sm:$0xf] %v402_v8 }
  0x46   : > { %405 = vst [vmem:[%s4095_s10 + $0x124] sm:$0xf] %v404_v9  ;;  %v406_v10 = vld [vmem:[%s4091_s9 + $0x250] sm:$0xf]  ;;  %v408_v11 = vld [vmem:[%s4091_s9 + $0x258] sm:$0xf] }
  0x47   : > { %v410_v12 = vld [vmem:[%s4091_s9 + $0x260] sm:$0xf]  ;;  %407 = vst [vmem:[%s4095_s10 + $0x128] sm:$0xf] %v406_v10  ;;  %409 = vst [vmem:[%s4095_s10 + $0x12c] sm:$0xf] %v408_v11 }
  0x48   : > { %411 = vst [vmem:[%s4095_s10 + $0x130] sm:$0xf] %v410_v12  ;;  %v412_v13 = vld [vmem:[%s4091_s9 + $0x268] sm:$0xf]  ;;  %v414_v14 = vld [vmem:[%s4091_s9 + $0x270] sm:$0xf] }
  0x49   : > { %v416_v15 = vld [vmem:[%s4091_s9 + $0x278] sm:$0xf]  ;;  %413 = vst [vmem:[%s4095_s10 + $0x134] sm:$0xf] %v412_v13  ;;  %415 = vst [vmem:[%s4095_s10 + $0x138] sm:$0xf] %v414_v14 }
  0x4a   : > { %417 = vst [vmem:[%s4095_s10 + $0x13c] sm:$0xf] %v416_v15  ;;  %v418_v16 = vld [vmem:[%s4091_s9 + $0x280] sm:$0xf]  ;;  %v420_v17 = vld [vmem:[%s4091_s9 + $0x288] sm:$0xf] }
  0x4b   : > { %v422_v18 = vld [vmem:[%s4091_s9 + $0x290] sm:$0xf]  ;;  %419 = vst [vmem:[%s4095_s10 + $0x140] sm:$0xf] %v418_v16  ;;  %421 = vst [vmem:[%s4095_s10 + $0x144] sm:$0xf] %v420_v17 }
  0x4c   : > { %423 = vst [vmem:[%s4095_s10 + $0x148] sm:$0xf] %v422_v18  ;;  %v424_v19 = vld [vmem:[%s4091_s9 + $0x298] sm:$0xf]  ;;  %v426_v20 = vld [vmem:[%s4091_s9 + $0x2a0] sm:$0xf] }
  0x4d   : > { %v428_v21 = vld [vmem:[%s4091_s9 + $0x2a8] sm:$0xf]  ;;  %425 = vst [vmem:[%s4095_s10 + $0x14c] sm:$0xf] %v424_v19  ;;  %427 = vst [vmem:[%s4095_s10 + $0x150] sm:$0xf] %v426_v20 }
  0x4e   : > { %429 = vst [vmem:[%s4095_s10 + $0x154] sm:$0xf] %v428_v21  ;;  %v430_v22 = vld [vmem:[%s4091_s9 + $0x2b0] sm:$0xf]  ;;  %v432_v23 = vld [vmem:[%s4091_s9 + $0x2b8] sm:$0xf] }
  0x4f   : > { %v434_v24 = vld [vmem:[%s4091_s9 + $0x2c0] sm:$0xf]  ;;  %431 = vst [vmem:[%s4095_s10 + $0x158] sm:$0xf] %v430_v22  ;;  %433 = vst [vmem:[%s4095_s10 + $0x15c] sm:$0xf] %v432_v23 }
  0x50   : > { %435 = vst [vmem:[%s4095_s10 + $0x160] sm:$0xf] %v434_v24  ;;  %v436_v25 = vld [vmem:[%s4091_s9 + $0x2c8] sm:$0xf]  ;;  %v438_v26 = vld [vmem:[%s4091_s9 + $0x2d0] sm:$0xf] }
  0x51   : > { %v440_v27 = vld [vmem:[%s4091_s9 + $0x2d8] sm:$0xf]  ;;  %437 = vst [vmem:[%s4095_s10 + $0x164] sm:$0xf] %v436_v25  ;;  %439 = vst [vmem:[%s4095_s10 + $0x168] sm:$0xf] %v438_v26 }
  0x52   : > { %441 = vst [vmem:[%s4095_s10 + $0x16c] sm:$0xf] %v440_v27  ;;  %v442_v28 = vld [vmem:[%s4091_s9 + $0x2e0] sm:$0xf]  ;;  %v444_v29 = vld [vmem:[%s4091_s9 + $0x2e8] sm:$0xf] }
  0x53   : > { %v446_v30 = vld [vmem:[%s4091_s9 + $0x2f0] sm:$0xf]  ;;  %443 = vst [vmem:[%s4095_s10 + $0x170] sm:$0xf] %v442_v28  ;;  %445 = vst [vmem:[%s4095_s10 + $0x174] sm:$0xf] %v444_v29 }
  0x54   : > { %447 = vst [vmem:[%s4095_s10 + $0x178] sm:$0xf] %v446_v30  ;;  %v448_v31 = vld [vmem:[%s4091_s9 + $0x2f8] sm:$0xf]  ;;  %v450_v32 = vld [vmem:[%s4091_s9 + $0x300] sm:$0xf] }
  0x55   : > { %v452_v33 = vld [vmem:[%s4091_s9 + $0x308] sm:$0xf]  ;;  %449 = vst [vmem:[%s4095_s10 + $0x17c] sm:$0xf] %v448_v31  ;;  %451 = vst [vmem:[%s4095_s10 + $0x180] sm:$0xf] %v450_v32 }
  0x56   : > { %453 = vst [vmem:[%s4095_s10 + $0x184] sm:$0xf] %v452_v33  ;;  %v454_v34 = vld [vmem:[%s4091_s9 + $0x310] sm:$0xf]  ;;  %v456_v35 = vld [vmem:[%s4091_s9 + $0x318] sm:$0xf] }
  0x57   : > { %v458_v36 = vld [vmem:[%s4091_s9 + $0x320] sm:$0xf]  ;;  %455 = vst [vmem:[%s4095_s10 + $0x188] sm:$0xf] %v454_v34  ;;  %457 = vst [vmem:[%s4095_s10 + $0x18c] sm:$0xf] %v456_v35 }
  0x58   : > { %459 = vst [vmem:[%s4095_s10 + $0x190] sm:$0xf] %v458_v36  ;;  %v460_v37 = vld [vmem:[%s4091_s9 + $0x328] sm:$0xf]  ;;  %v462_v38 = vld [vmem:[%s4091_s9 + $0x330] sm:$0xf] }
  0x59   : > { %v464_v39 = vld [vmem:[%s4091_s9 + $0x338] sm:$0xf]  ;;  %461 = vst [vmem:[%s4095_s10 + $0x194] sm:$0xf] %v460_v37  ;;  %463 = vst [vmem:[%s4095_s10 + $0x198] sm:$0xf] %v462_v38 }
  0x5a   : > { %465 = vst [vmem:[%s4095_s10 + $0x19c] sm:$0xf] %v464_v39  ;;  %v466_v40 = vld [vmem:[%s4091_s9 + $0x340] sm:$0xf]  ;;  %v468_v41 = vld [vmem:[%s4091_s9 + $0x348] sm:$0xf] }
  0x5b   : > { %v470_v42 = vld [vmem:[%s4091_s9 + $0x350] sm:$0xf]  ;;  %467 = vst [vmem:[%s4095_s10 + $0x1a0] sm:$0xf] %v466_v40  ;;  %469 = vst [vmem:[%s4095_s10 + $0x1a4] sm:$0xf] %v468_v41 }
  0x5c   : > { %471 = vst [vmem:[%s4095_s10 + $0x1a8] sm:$0xf] %v470_v42  ;;  %v472_v43 = vld [vmem:[%s4091_s9 + $0x358] sm:$0xf]  ;;  %v474_v44 = vld [vmem:[%s4091_s9 + $0x360] sm:$0xf] }
  0x5d   : > { %v476_v45 = vld [vmem:[%s4091_s9 + $0x368] sm:$0xf]  ;;  %473 = vst [vmem:[%s4095_s10 + $0x1ac] sm:$0xf] %v472_v43  ;;  %475 = vst [vmem:[%s4095_s10 + $0x1b0] sm:$0xf] %v474_v44 }
  0x5e   : > { %477 = vst [vmem:[%s4095_s10 + $0x1b4] sm:$0xf] %v476_v45  ;;  %v478_v46 = vld [vmem:[%s4091_s9 + $0x370] sm:$0xf]  ;;  %v480_v47 = vld [vmem:[%s4091_s9 + $0x378] sm:$0xf] }
  0x5f   : > { %v482_v48 = vld [vmem:[%s4091_s9 + $0x380] sm:$0xf]  ;;  %479 = vst [vmem:[%s4095_s10 + $0x1b8] sm:$0xf] %v478_v46  ;;  %481 = vst [vmem:[%s4095_s10 + $0x1bc] sm:$0xf] %v480_v47 }
  0x60   : > { %483 = vst [vmem:[%s4095_s10 + $0x1c0] sm:$0xf] %v482_v48  ;;  %v484_v49 = vld [vmem:[%s4091_s9 + $0x388] sm:$0xf]  ;;  %v486_v50 = vld [vmem:[%s4091_s9 + $0x390] sm:$0xf] }
  0x61   : > { %v488_v51 = vld [vmem:[%s4091_s9 + $0x398] sm:$0xf]  ;;  %485 = vst [vmem:[%s4095_s10 + $0x1c4] sm:$0xf] %v484_v49  ;;  %487 = vst [vmem:[%s4095_s10 + $0x1c8] sm:$0xf] %v486_v50 }
  0x62   : > { %489 = vst [vmem:[%s4095_s10 + $0x1cc] sm:$0xf] %v488_v51  ;;  %v490_v52 = vld [vmem:[%s4091_s9 + $0x3a0] sm:$0xf]  ;;  %v492_v53 = vld [vmem:[%s4091_s9 + $0x3a8] sm:$0xf] }
  0x63   : > { %v494_v54 = vld [vmem:[%s4091_s9 + $0x3b0] sm:$0xf]  ;;  %491 = vst [vmem:[%s4095_s10 + $0x1d0] sm:$0xf] %v490_v52  ;;  %493 = vst [vmem:[%s4095_s10 + $0x1d4] sm:$0xf] %v492_v53 }
  0x64   : > { %495 = vst [vmem:[%s4095_s10 + $0x1d8] sm:$0xf] %v494_v54  ;;  %v496_v55 = vld [vmem:[%s4091_s9 + $0x3b8] sm:$0xf]  ;;  %v498_v56 = vld [vmem:[%s4091_s9 + $0x3c0] sm:$0xf] }
  0x65   : > { %v500_v57 = vld [vmem:[%s4091_s9 + $0x3c8] sm:$0xf]  ;;  %497 = vst [vmem:[%s4095_s10 + $0x1dc] sm:$0xf] %v496_v55  ;;  %499 = vst [vmem:[%s4095_s10 + $0x1e0] sm:$0xf] %v498_v56 }
  0x66   : > { %501 = vst [vmem:[%s4095_s10 + $0x1e4] sm:$0xf] %v500_v57  ;;  %v502_v58 = vld [vmem:[%s4091_s9 + $0x3d0] sm:$0xf]  ;;  %v504_v59 = vld [vmem:[%s4091_s9 + $0x3d8] sm:$0xf] }
  0x67   : > { %v506_v60 = vld [vmem:[%s4091_s9 + $0x3e0] sm:$0xf]  ;;  %503 = vst [vmem:[%s4095_s10 + $0x1e8] sm:$0xf] %v502_v58  ;;  %505 = vst [vmem:[%s4095_s10 + $0x1ec] sm:$0xf] %v504_v59 }
  0x68   : > { %507 = vst [vmem:[%s4095_s10 + $0x1f0] sm:$0xf] %v506_v60  ;;  %v508_v61 = vld [vmem:[%s4091_s9 + $0x3e8] sm:$0xf]  ;;  %v510_v62 = vld [vmem:[%s4091_s9 + $0x3f0] sm:$0xf] }
  0x69   : > { %v512_v63 = vld [vmem:[%s4091_s9 + $0x3f8] sm:$0xf]  ;;  %509 = vst [vmem:[%s4095_s10 + $0x1f4] sm:$0xf] %v508_v61  ;;  %511 = vst [vmem:[%s4095_s10 + $0x1f8] sm:$0xf] %v510_v62 }
  0x6a   : > { %513 = vst [vmem:[%s4095_s10 + $0x1fc] sm:$0xf] %v512_v63  ;;  %v514_v0 = vld [vmem:[%s4091_s9 + $0x400] sm:$0xf]  ;;  %v516_v1 = vld [vmem:[%s4091_s9 + $0x408] sm:$0xf] }
  0x6b   : > { %v518_v2 = vld [vmem:[%s4091_s9 + $0x410] sm:$0xf]  ;;  %515 = vst [vmem:[%s4095_s10 + $0x200] sm:$0xf] %v514_v0  ;;  %517 = vst [vmem:[%s4095_s10 + $0x204] sm:$0xf] %v516_v1 }
  0x6c   : > { %519 = vst [vmem:[%s4095_s10 + $0x208] sm:$0xf] %v518_v2  ;;  %v520_v3 = vld [vmem:[%s4091_s9 + $0x418] sm:$0xf]  ;;  %v522_v4 = vld [vmem:[%s4091_s9 + $0x420] sm:$0xf] }
  0x6d   : > { %v524_v5 = vld [vmem:[%s4091_s9 + $0x428] sm:$0xf]  ;;  %521 = vst [vmem:[%s4095_s10 + $0x20c] sm:$0xf] %v520_v3  ;;  %523 = vst [vmem:[%s4095_s10 + $0x210] sm:$0xf] %v522_v4 }
  0x6e   : > { %525 = vst [vmem:[%s4095_s10 + $0x214] sm:$0xf] %v524_v5  ;;  %v526_v6 = vld [vmem:[%s4091_s9 + $0x430] sm:$0xf]  ;;  %v528_v7 = vld [vmem:[%s4091_s9 + $0x438] sm:$0xf] }
  0x6f   : > { %v530_v8 = vld [vmem:[%s4091_s9 + $0x440] sm:$0xf]  ;;  %527 = vst [vmem:[%s4095_s10 + $0x218] sm:$0xf] %v526_v6  ;;  %529 = vst [vmem:[%s4095_s10 + $0x21c] sm:$0xf] %v528_v7 }
  0x70   : > { %531 = vst [vmem:[%s4095_s10 + $0x220] sm:$0xf] %v530_v8  ;;  %v532_v9 = vld [vmem:[%s4091_s9 + $0x448] sm:$0xf]  ;;  %v534_v10 = vld [vmem:[%s4091_s9 + $0x450] sm:$0xf] }
  0x71   : > { %v536_v11 = vld [vmem:[%s4091_s9 + $0x458] sm:$0xf]  ;;  %533 = vst [vmem:[%s4095_s10 + $0x224] sm:$0xf] %v532_v9  ;;  %535 = vst [vmem:[%s4095_s10 + $0x228] sm:$0xf] %v534_v10 }
  0x72   : > { %537 = vst [vmem:[%s4095_s10 + $0x22c] sm:$0xf] %v536_v11  ;;  %v538_v12 = vld [vmem:[%s4091_s9 + $0x460] sm:$0xf]  ;;  %v540_v13 = vld [vmem:[%s4091_s9 + $0x468] sm:$0xf] }
  0x73   : > { %v542_v14 = vld [vmem:[%s4091_s9 + $0x470] sm:$0xf]  ;;  %539 = vst [vmem:[%s4095_s10 + $0x230] sm:$0xf] %v538_v12  ;;  %541 = vst [vmem:[%s4095_s10 + $0x234] sm:$0xf] %v540_v13 }
  0x74   : > { %543 = vst [vmem:[%s4095_s10 + $0x238] sm:$0xf] %v542_v14  ;;  %v544_v15 = vld [vmem:[%s4091_s9 + $0x478] sm:$0xf]  ;;  %v546_v16 = vld [vmem:[%s4091_s9 + $0x480] sm:$0xf] }
  0x75   : > { %v548_v17 = vld [vmem:[%s4091_s9 + $0x488] sm:$0xf]  ;;  %545 = vst [vmem:[%s4095_s10 + $0x23c] sm:$0xf] %v544_v15  ;;  %547 = vst [vmem:[%s4095_s10 + $0x240] sm:$0xf] %v546_v16 }
  0x76   : > { %549 = vst [vmem:[%s4095_s10 + $0x244] sm:$0xf] %v548_v17  ;;  %v550_v18 = vld [vmem:[%s4091_s9 + $0x490] sm:$0xf]  ;;  %v552_v19 = vld [vmem:[%s4091_s9 + $0x498] sm:$0xf] }
  0x77   : > { %v554_v20 = vld [vmem:[%s4091_s9 + $0x4a0] sm:$0xf]  ;;  %551 = vst [vmem:[%s4095_s10 + $0x248] sm:$0xf] %v550_v18  ;;  %553 = vst [vmem:[%s4095_s10 + $0x24c] sm:$0xf] %v552_v19 }
  0x78   : > { %555 = vst [vmem:[%s4095_s10 + $0x250] sm:$0xf] %v554_v20  ;;  %v556_v21 = vld [vmem:[%s4091_s9 + $0x4a8] sm:$0xf]  ;;  %v558_v22 = vld [vmem:[%s4091_s9 + $0x4b0] sm:$0xf] }
  0x79   : > { %v560_v23 = vld [vmem:[%s4091_s9 + $0x4b8] sm:$0xf]  ;;  %557 = vst [vmem:[%s4095_s10 + $0x254] sm:$0xf] %v556_v21  ;;  %559 = vst [vmem:[%s4095_s10 + $0x258] sm:$0xf] %v558_v22 }
  0x7a   : > { %561 = vst [vmem:[%s4095_s10 + $0x25c] sm:$0xf] %v560_v23  ;;  %v562_v24 = vld [vmem:[%s4091_s9 + $0x4c0] sm:$0xf]  ;;  %v564_v25 = vld [vmem:[%s4091_s9 + $0x4c8] sm:$0xf] }
  0x7b   : > { %v566_v26 = vld [vmem:[%s4091_s9 + $0x4d0] sm:$0xf]  ;;  %563 = vst [vmem:[%s4095_s10 + $0x260] sm:$0xf] %v562_v24  ;;  %565 = vst [vmem:[%s4095_s10 + $0x264] sm:$0xf] %v564_v25 }
  0x7c   : > { %567 = vst [vmem:[%s4095_s10 + $0x268] sm:$0xf] %v566_v26  ;;  %v568_v27 = vld [vmem:[%s4091_s9 + $0x4d8] sm:$0xf]  ;;  %v570_v28 = vld [vmem:[%s4091_s9 + $0x4e0] sm:$0xf] }
  0x7d   : > { %v572_v29 = vld [vmem:[%s4091_s9 + $0x4e8] sm:$0xf]  ;;  %569 = vst [vmem:[%s4095_s10 + $0x26c] sm:$0xf] %v568_v27  ;;  %571 = vst [vmem:[%s4095_s10 + $0x270] sm:$0xf] %v570_v28 }
  0x7e   : > { %573 = vst [vmem:[%s4095_s10 + $0x274] sm:$0xf] %v572_v29  ;;  %v574_v30 = vld [vmem:[%s4091_s9 + $0x4f0] sm:$0xf]  ;;  %v576_v31 = vld [vmem:[%s4091_s9 + $0x4f8] sm:$0xf] }
  0x7f   : > { %v578_v32 = vld [vmem:[%s4091_s9 + $0x500] sm:$0xf]  ;;  %575 = vst [vmem:[%s4095_s10 + $0x278] sm:$0xf] %v574_v30  ;;  %577 = vst [vmem:[%s4095_s10 + $0x27c] sm:$0xf] %v576_v31 }
  0x80   : > { %579 = vst [vmem:[%s4095_s10 + $0x280] sm:$0xf] %v578_v32  ;;  %v580_v33 = vld [vmem:[%s4091_s9 + $0x508] sm:$0xf]  ;;  %v582_v34 = vld [vmem:[%s4091_s9 + $0x510] sm:$0xf] }
  0x81   : > { %v584_v35 = vld [vmem:[%s4091_s9 + $0x518] sm:$0xf]  ;;  %581 = vst [vmem:[%s4095_s10 + $0x284] sm:$0xf] %v580_v33  ;;  %583 = vst [vmem:[%s4095_s10 + $0x288] sm:$0xf] %v582_v34 }
  0x82   : > { %585 = vst [vmem:[%s4095_s10 + $0x28c] sm:$0xf] %v584_v35  ;;  %v586_v36 = vld [vmem:[%s4091_s9 + $0x520] sm:$0xf]  ;;  %v588_v37 = vld [vmem:[%s4091_s9 + $0x528] sm:$0xf] }
  0x83   : > { %v590_v38 = vld [vmem:[%s4091_s9 + $0x530] sm:$0xf]  ;;  %587 = vst [vmem:[%s4095_s10 + $0x290] sm:$0xf] %v586_v36  ;;  %589 = vst [vmem:[%s4095_s10 + $0x294] sm:$0xf] %v588_v37 }
  0x84   : > { %591 = vst [vmem:[%s4095_s10 + $0x298] sm:$0xf] %v590_v38  ;;  %v592_v39 = vld [vmem:[%s4091_s9 + $0x538] sm:$0xf]  ;;  %v594_v40 = vld [vmem:[%s4091_s9 + $0x540] sm:$0xf] }
  0x85   : > { %v596_v41 = vld [vmem:[%s4091_s9 + $0x548] sm:$0xf]  ;;  %593 = vst [vmem:[%s4095_s10 + $0x29c] sm:$0xf] %v592_v39  ;;  %595 = vst [vmem:[%s4095_s10 + $0x2a0] sm:$0xf] %v594_v40 }
  0x86   : > { %597 = vst [vmem:[%s4095_s10 + $0x2a4] sm:$0xf] %v596_v41  ;;  %v598_v42 = vld [vmem:[%s4091_s9 + $0x550] sm:$0xf]  ;;  %v600_v43 = vld [vmem:[%s4091_s9 + $0x558] sm:$0xf] }
  0x87   : > { %v602_v44 = vld [vmem:[%s4091_s9 + $0x560] sm:$0xf]  ;;  %599 = vst [vmem:[%s4095_s10 + $0x2a8] sm:$0xf] %v598_v42  ;;  %601 = vst [vmem:[%s4095_s10 + $0x2ac] sm:$0xf] %v600_v43 }
  0x88   : > { %603 = vst [vmem:[%s4095_s10 + $0x2b0] sm:$0xf] %v602_v44  ;;  %v604_v45 = vld [vmem:[%s4091_s9 + $0x568] sm:$0xf]  ;;  %v606_v46 = vld [vmem:[%s4091_s9 + $0x570] sm:$0xf] }
  0x89   : > { %v608_v47 = vld [vmem:[%s4091_s9 + $0x578] sm:$0xf]  ;;  %605 = vst [vmem:[%s4095_s10 + $0x2b4] sm:$0xf] %v604_v45  ;;  %607 = vst [vmem:[%s4095_s10 + $0x2b8] sm:$0xf] %v606_v46 }
  0x8a   : > { %609 = vst [vmem:[%s4095_s10 + $0x2bc] sm:$0xf] %v608_v47  ;;  %v610_v48 = vld [vmem:[%s4091_s9 + $0x580] sm:$0xf]  ;;  %v612_v49 = vld [vmem:[%s4091_s9 + $0x588] sm:$0xf] }
  0x8b   : > { %v614_v50 = vld [vmem:[%s4091_s9 + $0x590] sm:$0xf]  ;;  %611 = vst [vmem:[%s4095_s10 + $0x2c0] sm:$0xf] %v610_v48  ;;  %613 = vst [vmem:[%s4095_s10 + $0x2c4] sm:$0xf] %v612_v49 }
  0x8c   : > { %615 = vst [vmem:[%s4095_s10 + $0x2c8] sm:$0xf] %v614_v50  ;;  %v616_v51 = vld [vmem:[%s4091_s9 + $0x598] sm:$0xf]  ;;  %v618_v52 = vld [vmem:[%s4091_s9 + $0x5a0] sm:$0xf] }
  0x8d   : > { %v620_v53 = vld [vmem:[%s4091_s9 + $0x5a8] sm:$0xf]  ;;  %617 = vst [vmem:[%s4095_s10 + $0x2cc] sm:$0xf] %v616_v51  ;;  %619 = vst [vmem:[%s4095_s10 + $0x2d0] sm:$0xf] %v618_v52 }
  0x8e   : > { %621 = vst [vmem:[%s4095_s10 + $0x2d4] sm:$0xf] %v620_v53  ;;  %v622_v54 = vld [vmem:[%s4091_s9 + $0x5b0] sm:$0xf]  ;;  %v624_v55 = vld [vmem:[%s4091_s9 + $0x5b8] sm:$0xf] }
  0x8f   : > { %v626_v56 = vld [vmem:[%s4091_s9 + $0x5c0] sm:$0xf]  ;;  %623 = vst [vmem:[%s4095_s10 + $0x2d8] sm:$0xf] %v622_v54  ;;  %625 = vst [vmem:[%s4095_s10 + $0x2dc] sm:$0xf] %v624_v55 }
  0x90   : > { %627 = vst [vmem:[%s4095_s10 + $0x2e0] sm:$0xf] %v626_v56  ;;  %v628_v57 = vld [vmem:[%s4091_s9 + $0x5c8] sm:$0xf]  ;;  %v630_v58 = vld [vmem:[%s4091_s9 + $0x5d0] sm:$0xf] }
  0x91   : > { %v632_v59 = vld [vmem:[%s4091_s9 + $0x5d8] sm:$0xf]  ;;  %629 = vst [vmem:[%s4095_s10 + $0x2e4] sm:$0xf] %v628_v57  ;;  %631 = vst [vmem:[%s4095_s10 + $0x2e8] sm:$0xf] %v630_v58 }
  0x92   : > { %633 = vst [vmem:[%s4095_s10 + $0x2ec] sm:$0xf] %v632_v59  ;;  %v634_v60 = vld [vmem:[%s4091_s9 + $0x5e0] sm:$0xf]  ;;  %v636_v61 = vld [vmem:[%s4091_s9 + $0x5e8] sm:$0xf] }
  0x93   : > { %v638_v62 = vld [vmem:[%s4091_s9 + $0x5f0] sm:$0xf]  ;;  %635 = vst [vmem:[%s4095_s10 + $0x2f0] sm:$0xf] %v634_v60  ;;  %637 = vst [vmem:[%s4095_s10 + $0x2f4] sm:$0xf] %v636_v61 }
  0x94   : > { %639 = vst [vmem:[%s4095_s10 + $0x2f8] sm:$0xf] %v638_v62  ;;  %v640_v63 = vld [vmem:[%s4091_s9 + $0x5f8] sm:$0xf]  ;;  %v642_v0 = vld [vmem:[%s4091_s9 + $0x600] sm:$0xf] }
  0x95   : > { %v644_v1 = vld [vmem:[%s4091_s9 + $0x608] sm:$0xf]  ;;  %641 = vst [vmem:[%s4095_s10 + $0x2fc] sm:$0xf] %v640_v63  ;;  %643 = vst [vmem:[%s4095_s10 + $0x300] sm:$0xf] %v642_v0 }
  0x96   : > { %645 = vst [vmem:[%s4095_s10 + $0x304] sm:$0xf] %v644_v1  ;;  %v646_v2 = vld [vmem:[%s4091_s9 + $0x610] sm:$0xf]  ;;  %v648_v3 = vld [vmem:[%s4091_s9 + $0x618] sm:$0xf] }
  0x97   : > { %v650_v4 = vld [vmem:[%s4091_s9 + $0x620] sm:$0xf]  ;;  %647 = vst [vmem:[%s4095_s10 + $0x308] sm:$0xf] %v646_v2  ;;  %649 = vst [vmem:[%s4095_s10 + $0x30c] sm:$0xf] %v648_v3 }
  0x98   : > { %651 = vst [vmem:[%s4095_s10 + $0x310] sm:$0xf] %v650_v4  ;;  %v652_v5 = vld [vmem:[%s4091_s9 + $0x628] sm:$0xf]  ;;  %v654_v6 = vld [vmem:[%s4091_s9 + $0x630] sm:$0xf] }
  0x99   : > { %v656_v7 = vld [vmem:[%s4091_s9 + $0x638] sm:$0xf]  ;;  %653 = vst [vmem:[%s4095_s10 + $0x314] sm:$0xf] %v652_v5  ;;  %655 = vst [vmem:[%s4095_s10 + $0x318] sm:$0xf] %v654_v6 }
  0x9a   : > { %657 = vst [vmem:[%s4095_s10 + $0x31c] sm:$0xf] %v656_v7  ;;  %v658_v8 = vld [vmem:[%s4091_s9 + $0x640] sm:$0xf]  ;;  %v660_v9 = vld [vmem:[%s4091_s9 + $0x648] sm:$0xf] }
  0x9b   : > { %v662_v10 = vld [vmem:[%s4091_s9 + $0x650] sm:$0xf]  ;;  %659 = vst [vmem:[%s4095_s10 + $0x320] sm:$0xf] %v658_v8  ;;  %661 = vst [vmem:[%s4095_s10 + $0x324] sm:$0xf] %v660_v9 }
  0x9c   : > { %663 = vst [vmem:[%s4095_s10 + $0x328] sm:$0xf] %v662_v10  ;;  %v664_v11 = vld [vmem:[%s4091_s9 + $0x658] sm:$0xf]  ;;  %v666_v12 = vld [vmem:[%s4091_s9 + $0x660] sm:$0xf] }
  0x9d   : > { %v668_v13 = vld [vmem:[%s4091_s9 + $0x668] sm:$0xf]  ;;  %665 = vst [vmem:[%s4095_s10 + $0x32c] sm:$0xf] %v664_v11  ;;  %667 = vst [vmem:[%s4095_s10 + $0x330] sm:$0xf] %v666_v12 }
  0x9e   : > { %669 = vst [vmem:[%s4095_s10 + $0x334] sm:$0xf] %v668_v13  ;;  %v670_v14 = vld [vmem:[%s4091_s9 + $0x670] sm:$0xf]  ;;  %v672_v15 = vld [vmem:[%s4091_s9 + $0x678] sm:$0xf] }
  0x9f   : > { %v674_v16 = vld [vmem:[%s4091_s9 + $0x680] sm:$0xf]  ;;  %671 = vst [vmem:[%s4095_s10 + $0x338] sm:$0xf] %v670_v14  ;;  %673 = vst [vmem:[%s4095_s10 + $0x33c] sm:$0xf] %v672_v15 }
  0xa0   : > { %675 = vst [vmem:[%s4095_s10 + $0x340] sm:$0xf] %v674_v16  ;;  %v676_v17 = vld [vmem:[%s4091_s9 + $0x688] sm:$0xf]  ;;  %v678_v18 = vld [vmem:[%s4091_s9 + $0x690] sm:$0xf] }
  0xa1   : > { %v680_v19 = vld [vmem:[%s4091_s9 + $0x698] sm:$0xf]  ;;  %677 = vst [vmem:[%s4095_s10 + $0x344] sm:$0xf] %v676_v17  ;;  %679 = vst [vmem:[%s4095_s10 + $0x348] sm:$0xf] %v678_v18 }
  0xa2   : > { %681 = vst [vmem:[%s4095_s10 + $0x34c] sm:$0xf] %v680_v19  ;;  %v682_v20 = vld [vmem:[%s4091_s9 + $0x6a0] sm:$0xf]  ;;  %v684_v21 = vld [vmem:[%s4091_s9 + $0x6a8] sm:$0xf] }
  0xa3   : > { %v686_v22 = vld [vmem:[%s4091_s9 + $0x6b0] sm:$0xf]  ;;  %683 = vst [vmem:[%s4095_s10 + $0x350] sm:$0xf] %v682_v20  ;;  %685 = vst [vmem:[%s4095_s10 + $0x354] sm:$0xf] %v684_v21 }
  0xa4   : > { %687 = vst [vmem:[%s4095_s10 + $0x358] sm:$0xf] %v686_v22  ;;  %v688_v23 = vld [vmem:[%s4091_s9 + $0x6b8] sm:$0xf]  ;;  %v690_v24 = vld [vmem:[%s4091_s9 + $0x6c0] sm:$0xf] }
  0xa5   : > { %v692_v25 = vld [vmem:[%s4091_s9 + $0x6c8] sm:$0xf]  ;;  %689 = vst [vmem:[%s4095_s10 + $0x35c] sm:$0xf] %v688_v23  ;;  %691 = vst [vmem:[%s4095_s10 + $0x360] sm:$0xf] %v690_v24 }
  0xa6   : > { %693 = vst [vmem:[%s4095_s10 + $0x364] sm:$0xf] %v692_v25  ;;  %v694_v26 = vld [vmem:[%s4091_s9 + $0x6d0] sm:$0xf]  ;;  %v696_v27 = vld [vmem:[%s4091_s9 + $0x6d8] sm:$0xf] }
  0xa7   : > { %v698_v28 = vld [vmem:[%s4091_s9 + $0x6e0] sm:$0xf]  ;;  %695 = vst [vmem:[%s4095_s10 + $0x368] sm:$0xf] %v694_v26  ;;  %697 = vst [vmem:[%s4095_s10 + $0x36c] sm:$0xf] %v696_v27 }
  0xa8   : > { %699 = vst [vmem:[%s4095_s10 + $0x370] sm:$0xf] %v698_v28  ;;  %v700_v29 = vld [vmem:[%s4091_s9 + $0x6e8] sm:$0xf]  ;;  %v702_v30 = vld [vmem:[%s4091_s9 + $0x6f0] sm:$0xf] }
  0xa9   : > { %v704_v31 = vld [vmem:[%s4091_s9 + $0x6f8] sm:$0xf]  ;;  %701 = vst [vmem:[%s4095_s10 + $0x374] sm:$0xf] %v700_v29  ;;  %703 = vst [vmem:[%s4095_s10 + $0x378] sm:$0xf] %v702_v30 }
  0xaa   : > { %705 = vst [vmem:[%s4095_s10 + $0x37c] sm:$0xf] %v704_v31  ;;  %v706_v32 = vld [vmem:[%s4091_s9 + $0x700] sm:$0xf]  ;;  %v708_v33 = vld [vmem:[%s4091_s9 + $0x708] sm:$0xf] }
  0xab   : > { %v710_v34 = vld [vmem:[%s4091_s9 + $0x710] sm:$0xf]  ;;  %707 = vst [vmem:[%s4095_s10 + $0x380] sm:$0xf] %v706_v32  ;;  %709 = vst [vmem:[%s4095_s10 + $0x384] sm:$0xf] %v708_v33 }
  0xac   : > { %711 = vst [vmem:[%s4095_s10 + $0x388] sm:$0xf] %v710_v34  ;;  %v712_v35 = vld [vmem:[%s4091_s9 + $0x718] sm:$0xf]  ;;  %v714_v36 = vld [vmem:[%s4091_s9 + $0x720] sm:$0xf] }
  0xad   : > { %v716_v37 = vld [vmem:[%s4091_s9 + $0x728] sm:$0xf]  ;;  %713 = vst [vmem:[%s4095_s10 + $0x38c] sm:$0xf] %v712_v35  ;;  %715 = vst [vmem:[%s4095_s10 + $0x390] sm:$0xf] %v714_v36 }
  0xae   : > { %717 = vst [vmem:[%s4095_s10 + $0x394] sm:$0xf] %v716_v37  ;;  %v718_v38 = vld [vmem:[%s4091_s9 + $0x730] sm:$0xf]  ;;  %v720_v39 = vld [vmem:[%s4091_s9 + $0x738] sm:$0xf] }
  0xaf   : > { %v722_v40 = vld [vmem:[%s4091_s9 + $0x740] sm:$0xf]  ;;  %719 = vst [vmem:[%s4095_s10 + $0x398] sm:$0xf] %v718_v38  ;;  %721 = vst [vmem:[%s4095_s10 + $0x39c] sm:$0xf] %v720_v39 }
  0xb0   : > { %723 = vst [vmem:[%s4095_s10 + $0x3a0] sm:$0xf] %v722_v40  ;;  %v724_v41 = vld [vmem:[%s4091_s9 + $0x748] sm:$0xf]  ;;  %v726_v42 = vld [vmem:[%s4091_s9 + $0x750] sm:$0xf] }
  0xb1   : > { %v728_v43 = vld [vmem:[%s4091_s9 + $0x758] sm:$0xf]  ;;  %725 = vst [vmem:[%s4095_s10 + $0x3a4] sm:$0xf] %v724_v41  ;;  %727 = vst [vmem:[%s4095_s10 + $0x3a8] sm:$0xf] %v726_v42 }
  0xb2   : > { %729 = vst [vmem:[%s4095_s10 + $0x3ac] sm:$0xf] %v728_v43  ;;  %v730_v44 = vld [vmem:[%s4091_s9 + $0x760] sm:$0xf]  ;;  %v732_v45 = vld [vmem:[%s4091_s9 + $0x768] sm:$0xf] }
  0xb3   : > { %v734_v46 = vld [vmem:[%s4091_s9 + $0x770] sm:$0xf]  ;;  %731 = vst [vmem:[%s4095_s10 + $0x3b0] sm:$0xf] %v730_v44  ;;  %733 = vst [vmem:[%s4095_s10 + $0x3b4] sm:$0xf] %v732_v45 }
  0xb4   : > { %735 = vst [vmem:[%s4095_s10 + $0x3b8] sm:$0xf] %v734_v46  ;;  %v736_v47 = vld [vmem:[%s4091_s9 + $0x778] sm:$0xf]  ;;  %v738_v48 = vld [vmem:[%s4091_s9 + $0x780] sm:$0xf] }
  0xb5   : > { %v740_v49 = vld [vmem:[%s4091_s9 + $0x788] sm:$0xf]  ;;  %737 = vst [vmem:[%s4095_s10 + $0x3bc] sm:$0xf] %v736_v47  ;;  %739 = vst [vmem:[%s4095_s10 + $0x3c0] sm:$0xf] %v738_v48 }
  0xb6   : > { %741 = vst [vmem:[%s4095_s10 + $0x3c4] sm:$0xf] %v740_v49  ;;  %v742_v50 = vld [vmem:[%s4091_s9 + $0x790] sm:$0xf]  ;;  %v744_v51 = vld [vmem:[%s4091_s9 + $0x798] sm:$0xf] }
  0xb7   : > { %v746_v52 = vld [vmem:[%s4091_s9 + $0x7a0] sm:$0xf]  ;;  %743 = vst [vmem:[%s4095_s10 + $0x3c8] sm:$0xf] %v742_v50  ;;  %745 = vst [vmem:[%s4095_s10 + $0x3cc] sm:$0xf] %v744_v51 }
  0xb8   : > { %747 = vst [vmem:[%s4095_s10 + $0x3d0] sm:$0xf] %v746_v52  ;;  %v748_v53 = vld [vmem:[%s4091_s9 + $0x7a8] sm:$0xf]  ;;  %v750_v54 = vld [vmem:[%s4091_s9 + $0x7b0] sm:$0xf] }
  0xb9   : > { %v752_v55 = vld [vmem:[%s4091_s9 + $0x7b8] sm:$0xf]  ;;  %749 = vst [vmem:[%s4095_s10 + $0x3d4] sm:$0xf] %v748_v53  ;;  %751 = vst [vmem:[%s4095_s10 + $0x3d8] sm:$0xf] %v750_v54 }
  0xba   : > { %753 = vst [vmem:[%s4095_s10 + $0x3dc] sm:$0xf] %v752_v55  ;;  %v754_v56 = vld [vmem:[%s4091_s9 + $0x7c0] sm:$0xf]  ;;  %v756_v57 = vld [vmem:[%s4091_s9 + $0x7c8] sm:$0xf] }
  0xbb   : > { %v758_v58 = vld [vmem:[%s4091_s9 + $0x7d0] sm:$0xf]  ;;  %755 = vst [vmem:[%s4095_s10 + $0x3e0] sm:$0xf] %v754_v56  ;;  %757 = vst [vmem:[%s4095_s10 + $0x3e4] sm:$0xf] %v756_v57 }
  0xbc   : > { %759 = vst [vmem:[%s4095_s10 + $0x3e8] sm:$0xf] %v758_v58  ;;  %v760_v59 = vld [vmem:[%s4091_s9 + $0x7d8] sm:$0xf]  ;;  %v762_v60 = vld [vmem:[%s4091_s9 + $0x7e0] sm:$0xf] }
  0xbd   : > { %v764_v61 = vld [vmem:[%s4091_s9 + $0x7e8] sm:$0xf]  ;;  %761 = vst [vmem:[%s4095_s10 + $0x3ec] sm:$0xf] %v760_v59  ;;  %763 = vst [vmem:[%s4095_s10 + $0x3f0] sm:$0xf] %v762_v60 }
  0xbe   : > { %765 = vst [vmem:[%s4095_s10 + $0x3f4] sm:$0xf] %v764_v61  ;;  %v766_v62 = vld [vmem:[%s4091_s9 + $0x7f0] sm:$0xf]  ;;  %v768_v63 = vld [vmem:[%s4091_s9 + $0x7f8] sm:$0xf] }
  0xbf   : > { %767 = vst [vmem:[%s4095_s10 + $0x3f8] sm:$0xf] %v766_v62  ;;  %769 = vst [vmem:[%s4095_s10 + $0x3fc] sm:$0xf] %v768_v63 }
  0xc0 PF: > { %p3392_p8 = scmp.ge.s32.totalorder %s4011_s22, 1  ;;  %p1309_p9 = scmp.lt.s32.totalorder %s4011_s22, 3 }
  0xc2   : > { %p1310_p10 = pnand %p3392_p8, %p1309_p9 }
  0xc3   : > { %s1316_s11 = sand.u32 (!%p1310_p10), 1, %s3995_s18   ;;  %v4613_v0 = vld [vmem:[%s4900_s0] sm:$0xff] (!%p1310_p10)  ;;  %v4623_v2 = vld [vmem:[%s4900_s0 + $0x8] sm:$0xff] (!%p1310_p10)  ;;  %p1384_p11 = scmp.lt.s32.totalorder (!%p1310_p10), %s4003_s20, 1 }
  0xc4   : > { %1313 = sbr.rel (%p1310_p10) target bundleno = 579 (0x243), region = 69  ;;  %v4618_v1 = vld [vmem:[%s4900_s0 + $0x40] sm:$0xff] (!%p1310_p10)  ;;  %s3393_s24 = sshll.u32 (!%p1310_p10), %s1316_s11, 10  ;;  %v4632_v4 = vld [vmem:[%s4900_s0 + $0x48] sm:$0xff] (!%p1310_p10) }
  0xc5   : > { %v3398_v3 = vcombine.high (!%p1310_p10), %v4613_v0, %v4618_v1  ;;  %v3400_v5 = vcombine.high (!%p1310_p10), %v4623_v2, %v4632_v4  ;;  %s4636_s29 = scalar_lea.vmem (!%p1310_p10), [#allocation3], %s3393_s24  ;;  %v1434_v35 = vld [vmem:[%s4900_s0 + $0x80] sm:$0xff] (!%p1310_p10)  ;;  %v1435_v38 = vld [vmem:[%s4900_s0 + $0x88] sm:$0xff] (!%p1310_p10)  ;;  %v3397_v42 = vcombine.low (!%p1310_p10), %v4613_v0, %v4618_v1  ;;  %v3399_v43 = vcombine.low (!%p1310_p10), %v4623_v2, %v4632_v4  ;;  %s3394_s26 = sshll.u32 (!%p1310_p10), %s1316_s11, 4 }
  0xc6   : > { %v3845_v6 = vld [vmem:[%s4636_s29 + $0x40] sm:$0xff] (!%p1310_p10)   ;;  %v3849_v10 = vld [vmem:[%s4636_s29 + $0x48] sm:$0xff] (!%p1310_p10)   ;;  %v3853_v14 = vld [vmem:[%s4636_s29 + $0x50] sm:$0xff] (!%p1310_p10)   ;;  %s4864_s18 = scalar_lea.vmem (!%p1310_p10), [#allocation4], %s3394_s26 }
  0xc7   : > { %2666 = vmatprep.mubr.bf16.mxu0 (!%p1310_p10), %v3398_v3  ;;  %v3846_v7 = vld [vmem:[%s4636_s29 + $0xc0] sm:$0xff] (!%p1310_p10)   ;;  %2715 = vmatprep.mubr.bf16.mxu1 (!%p1310_p10), %v3400_v5  ;;  %v3850_v11 = vld [vmem:[%s4636_s29 + $0xc8] sm:$0xff] (!%p1310_p10)   ;;  %v3854_v15 = vld [vmem:[%s4636_s29 + $0xd0] sm:$0xff] (!%p1310_p10)  }
  0xc8   : > { %3581 = vmatprep.subr.bf16.mxu0 (!%p1310_p10), %v3845_v6  ;;  %v3847_v8 = vld [vmem:[%s4636_s29] sm:$0xff] (!%p1310_p10)   ;;  %3609 = vmatprep.subr.bf16.mxu1 (!%p1310_p10), %v3846_v7  ;;  %v3851_v12 = vld [vmem:[%s4636_s29 + $0x8] sm:$0xff] (!%p1310_p10)   ;;  %v3855_v16 = vld [vmem:[%s4636_s29 + $0x10] sm:$0xff] (!%p1310_p10)  }
  0xc9   : > { %v3848_v9 = vld [vmem:[%s4636_s29 + $0x80] sm:$0xff] (!%p1310_p10)   ;;  %3582 = vmatpush3.bf16.msra.mxu0 (!%p1310_p10), %v3847_v8  ;;  %v3852_v13 = vld [vmem:[%s4636_s29 + $0x88] sm:$0xff] (!%p1310_p10)   ;;  %v3856_v17 = vld [vmem:[%s4636_s29 + $0x90] sm:$0xff] (!%p1310_p10)  }
  0xca   : > { %3610 = vmatpush3.bf16.msra.mxu1 (!%p1310_p10), %v3848_v9  ;;  %3583 = vmatprep.subr.bf16.mxu0 (!%p1310_p10), %v3849_v10  ;;  %v3857_v18 = vld [vmem:[%s4636_s29 + $0x58] sm:$0xff] (!%p1310_p10)   ;;  %v3861_v22 = vld [vmem:[%s4636_s29 + $0x60] sm:$0xff] (!%p1310_p10)   ;;  %v3865_v26 = vld [vmem:[%s4636_s29 + $0x68] sm:$0xff] (!%p1310_p10)  }
  0xcb   : > { %3611 = vmatprep.subr.bf16.mxu1 %v3850_v11  ;;  %v3858_v19 = vld [vmem:[%s4636_s29 + $0xd8] sm:$0xff]   ;;  %v3862_v23 = vld [vmem:[%s4636_s29 + $0xe0] sm:$0xff]   ;;  %v3866_v27 = vld [vmem:[%s4636_s29 + $0xe8] sm:$0xff]   ;;  %s4856_s16 = scalar_select %p1384_p11, %s4003_s20, 1 }
  0xcc   : > { %v3859_v20 = vld [vmem:[%s4636_s29 + $0x18] sm:$0xff]   ;;  %v3863_v24 = vld [vmem:[%s4636_s29 + $0x20] sm:$0xff]   ;;  %v3867_v28 = vld [vmem:[%s4636_s29 + $0x28] sm:$0xff]   ;;  %s3563_s10 = sshll.u32 (%p4078_p6), %s4003_s20, 2 }
  0xcd   : > { %3584 = vmatpush3.bf16.msra.mxu0 %v3851_v12  ;;  %v3860_v21 = vld [vmem:[%s4636_s29 + $0x98] sm:$0xff]   ;;  %v3864_v25 = vld [vmem:[%s4636_s29 + $0xa0] sm:$0xff]   ;;  %v3868_v29 = vld [vmem:[%s4636_s29 + $0xa8] sm:$0xff]   ;;  %s1386_s25 = scalar_lea.vmem %s4902_s2, %s4856_s16  ;;  %s3395_s11 = sshll.u32 %s4856_s16, 3 }
  0xce   : > { %3612 = vmatpush3.bf16.msra.mxu1 %v3852_v13  ;;  %3585 = vmatprep.subr.bf16.mxu0 %v3853_v14  ;;  %v3869_v30 = vld [vmem:[%s4636_s29 + $0x70] sm:$0xff]   ;;  %v3873_v34 = vld [vmem:[%s4636_s29 + $0x78] sm:$0xff]   ;;  %v1442_v36 = vld [vmem:[%s4900_s0 + $0xc0] sm:$0xff]  ;;  %s1395_s7 = scalar_lea.vmem %s4904_s4, %s3395_s11  ;;  %s1403_s9 = scalar_lea.vmem %s4905_s5, %s3395_s11 }
  0xcf   : > { %3613 = vmatprep.subr.bf16.mxu1 %v3854_v15  ;;  %v3870_v31 = vld [vmem:[%s4636_s29 + $0xf0] sm:$0xff]   ;;  %v3874_v37 = vld [vmem:[%s4636_s29 + $0xf8] sm:$0xff]   ;;  %v1443_v39 = vld [vmem:[%s4900_s0 + $0xc8] sm:$0xff]  ;;  %v3414_v46 = vcombine.high %v1434_v35, %v1442_v36  ;;  %v3413_v54 = vcombine.low %v1434_v35, %v1442_v36  ;;  %s3153_s14 = scalar_lea.vmem (%p4078_p6), %s4903_s3, %s3563_s10 }
  0xd0   : > { %v3871_v32 = vld [vmem:[%s4636_s29 + $0x30] sm:$0xff]   ;;  %v3875_v40 = vld [vmem:[%s4636_s29 + $0x38] sm:$0xff]   ;;  %v3877_v44 = vld [vmem:[%s4636_s29 + $0x140] sm:$0xff]   ;;  %v3416_v48 = vcombine.high %v1435_v38, %v1443_v39  ;;  %v3415_v56 = vcombine.low %v1435_v38, %v1443_v39 }
  0xd1   : > { %3586 = vmatpush3.bf16.msra.mxu0 %v3855_v16  ;;  %v3872_v33 = vld [vmem:[%s4636_s29 + $0xb0] sm:$0xff]   ;;  %v3876_v41 = vld [vmem:[%s4636_s29 + $0xb8] sm:$0xff]   ;;  %v3878_v45 = vld [vmem:[%s4636_s29 + $0x1c0] sm:$0xff]  }
  0xd2   : > { %3614 = vmatpush3.bf16.msra.mxu1 %v3856_v17  ;;  %3587 = vmatprep.subr.bf16.mxu0 %v3857_v18  ;;  %v3879_v47 = vld [vmem:[%s4636_s29 + $0x100] sm:$0xff]   ;;  %v3881_v50 = vld [vmem:[%s4636_s29 + $0x148] sm:$0xff]   ;;  %v3885_v55 = vld [vmem:[%s4636_s29 + $0x150] sm:$0xff]  }
  0xd3   : > { %3615 = vmatprep.subr.bf16.mxu1 %v3858_v19  ;;  %v3880_v49 = vld [vmem:[%s4636_s29 + $0x180] sm:$0xff]   ;;  %v3882_v51 = vld [vmem:[%s4636_s29 + $0x1c8] sm:$0xff]   ;;  %v3886_v57 = vld [vmem:[%s4636_s29 + $0x1d0] sm:$0xff]  }
  0xd4   : > { %v3883_v52 = vld [vmem:[%s4636_s29 + $0x108] sm:$0xff]   ;;  %v3887_v58 = vld [vmem:[%s4636_s29 + $0x110] sm:$0xff]   ;;  %v3889_v60 = vld [vmem:[%s4636_s29 + $0x158] sm:$0xff]  }
  0xd5   : > { %3588 = vmatpush3.bf16.msra.mxu0 %v3859_v20  ;;  %v3884_v53 = vld [vmem:[%s4636_s29 + $0x188] sm:$0xff]   ;;  %v3888_v59 = vld [vmem:[%s4636_s29 + $0x190] sm:$0xff]   ;;  %v3890_v61 = vld [vmem:[%s4636_s29 + $0x1d8] sm:$0xff]  }
  0xd6   : > { %3616 = vmatpush3.bf16.msra.mxu1 %v3860_v21  ;;  %3589 = vmatprep.subr.bf16.mxu0 %v3861_v22  ;;  %v3891_v62 = vld [vmem:[%s4636_s29 + $0x118] sm:$0xff]   ;;  %v3893_v0 = vld [vmem:[%s4636_s29 + $0x160] sm:$0xff]   ;;  %v3897_v4 = vld [vmem:[%s4636_s29 + $0x168] sm:$0xff]  }
  0xd7   : > { %3617 = vmatprep.subr.bf16.mxu1 %v3862_v23  ;;  %v3892_v63 = vld [vmem:[%s4636_s29 + $0x198] sm:$0xff]   ;;  %v3894_v1 = vld [vmem:[%s4636_s29 + $0x1e0] sm:$0xff]   ;;  %v3898_v5 = vld [vmem:[%s4636_s29 + $0x1e8] sm:$0xff]  }
  0xd8   : > { %v3895_v2 = vld [vmem:[%s4636_s29 + $0x120] sm:$0xff]   ;;  %v3899_v6 = vld [vmem:[%s4636_s29 + $0x128] sm:$0xff]   ;;  %v3901_v8 = vld [vmem:[%s4636_s29 + $0x170] sm:$0xff]  }
  0xd9   : > { %3590 = vmatpush3.bf16.msra.mxu0 %v3863_v24  ;;  %v3896_v3 = vld [vmem:[%s4636_s29 + $0x1a0] sm:$0xff]   ;;  %v3900_v7 = vld [vmem:[%s4636_s29 + $0x1a8] sm:$0xff]   ;;  %v3902_v9 = vld [vmem:[%s4636_s29 + $0x1f0] sm:$0xff]  }
  0xda   : > { %3618 = vmatpush3.bf16.msra.mxu1 %v3864_v25  ;;  %3591 = vmatprep.subr.bf16.mxu0 %v3865_v26  ;;  %v3903_v10 = vld [vmem:[%s4636_s29 + $0x130] sm:$0xff]   ;;  %v3905_v12 = vld [vmem:[%s4636_s29 + $0x178] sm:$0xff]   ;;  %v3909_v24 = vld [vmem:[%s4636_s29 + $0x240] sm:$0xff]  }
  0xdb   : > { %3619 = vmatprep.subr.bf16.mxu1 %v3866_v27  ;;  %v3904_v11 = vld [vmem:[%s4636_s29 + $0x1b0] sm:$0xff]   ;;  %v3906_v14 = vld [vmem:[%s4636_s29 + $0x1f8] sm:$0xff]   ;;  %v3910_v25 = vld [vmem:[%s4636_s29 + $0x2c0] sm:$0xff]  }
  0xdc   : > { %v1420_v13 = vld [vmem:[%s4900_s0 + $0x10] sm:$0xff]  ;;  %v3907_v15 = vld [vmem:[%s4636_s29 + $0x138] sm:$0xff]   ;;  %v3911_v26 = vld [vmem:[%s4636_s29 + $0x200] sm:$0xff]  }
  0xdd   : > { %3592 = vmatpush3.bf16.msra.mxu0 %v3867_v28  ;;  %v3908_v16 = vld [vmem:[%s4636_s29 + $0x1b8] sm:$0xff]   ;;  %v1428_v17 = vld [vmem:[%s4900_s0 + $0x50] sm:$0xff]  ;;  %v3912_v27 = vld [vmem:[%s4636_s29 + $0x280] sm:$0xff]  }
  0xde   : > { %3620 = vmatpush3.bf16.msra.mxu1 %v3868_v29  ;;  %3593 = vmatprep.subr.bf16.mxu0 %v3869_v30  ;;  %v1421_v18 = vld [vmem:[%s4900_s0 + $0x18] sm:$0xff]  ;;  %v3401_v20 = vcombine.low %v1420_v13, %v1428_v17  ;;  %v3402_v21 = vcombine.high %v1420_v13, %v1428_v17  ;;  %v3913_v28 = vld [vmem:[%s4636_s29 + $0x248] sm:$0xff]   ;;  %v3917_v36 = vld [vmem:[%s4636_s29 + $0x250] sm:$0xff]  }
  0xdf   : > { %3621 = vmatprep.subr.bf16.mxu1 %v3870_v31  ;;  %v1429_v19 = vld [vmem:[%s4900_s0 + $0x58] sm:$0xff]  ;;  %v3914_v29 = vld [vmem:[%s4636_s29 + $0x2c8] sm:$0xff]   ;;  %v1446_v17 = vld [vmem:[%s4900_s0 + $0xe0] sm:$0xff] }
  0xe0   : > { %v3403_v22 = vcombine.low %v1421_v18, %v1429_v19  ;;  %v3404_v23 = vcombine.high %v1421_v18, %v1429_v19  ;;  %v3915_v30 = vld [vmem:[%s4636_s29 + $0x208] sm:$0xff]   ;;  %v1437_v38 = vld [vmem:[%s4900_s0 + $0x98] sm:$0xff] }
  0xe1   : > { %3594 = vmatpush3.bf16.msra.mxu0 %v3871_v32  ;;  %v3916_v31 = vld [vmem:[%s4636_s29 + $0x288] sm:$0xff]   ;;  %v1436_v32 = vld [vmem:[%s4900_s0 + $0x90] sm:$0xff]  ;;  %v1445_v39 = vld [vmem:[%s4900_s0 + $0xd8] sm:$0xff] }
  0xe2   : > { %3622 = vmatpush3.bf16.msra.mxu1 %v3872_v33  ;;  %3595 = vmatprep.subr.bf16.mxu0 %v3873_v34  ;;  %v1444_v33 = vld [vmem:[%s4900_s0 + $0xd0] sm:$0xff]  ;;  %v3946_v13 = vld [vmem:[%s4636_s29 + $0x3c8] sm:$0xff]  }
  0xe3   : > { %3623 = vmatprep.subr.bf16.mxu1 %v3874_v37  ;;  %v3418_v34 = vcombine.high %v1436_v32, %v1444_v33  ;;  %v3417_v35 = vcombine.low %v1436_v32, %v1444_v33  ;;  %v3918_v37 = vld [vmem:[%s4636_s29 + $0x2d0] sm:$0xff]   ;;  %v3957_v32 = vld [vmem:[%s4636_s29 + $0x360] sm:$0xff]  }
  0xe4   : > { %v3958_v33 = vld [vmem:[%s4636_s29 + $0x3e0] sm:$0xff]  }
  0xe5   : > { %3596 = vmatpush3.bf16.msra.mxu0 %v3875_v40  ;;  %v3420_v40 = vcombine.high %v1437_v38, %v1445_v39 }
  0xe6   : > { %3624 = vmatpush3.bf16.msra.mxu1 %v3876_v41  ;;  %3637 = vmatprep.subr.bf16.mxu0 %v3877_v44  ;;  %v3919_v41 = vld [vmem:[%s4636_s29 + $0x210] sm:$0xff]   ;;  %v3921_v44 = vld [vmem:[%s4636_s29 + $0x258] sm:$0xff]  }
  0xe7   : > { %3665 = vmatprep.subr.bf16.mxu1 %v3878_v45  ;;  %v3922_v45 = vld [vmem:[%s4636_s29 + $0x2d8] sm:$0xff]  }
  0xe8   : > { %2667 = vmatmul.mubr.bf16.vlgmr.msra.gmra.mrb[0].mxu0 %v3397_v42  ;;  %v3419_v42 = vcombine.low %v1437_v38, %v1445_v39  ;;  %v3963_v38 = vld [vmem:[%s4636_s29 + $0x328] sm:$0xff]  }
  0xe9   : > { %2716 = vmatmul.mubr.bf16.vlgmr.msra.gmra.mrb[0].mxu1 %v3399_v43  ;;  %3638 = vmatpush3.bf16.msra.mxu0 %v3879_v47  ;;  %v3920_v43 = vld [vmem:[%s4636_s29 + $0x290] sm:$0xff]   ;;  %v3924_v47 = vld [vmem:[%s4636_s29 + $0x298] sm:$0xff]   ;;  %v3964_v39 = vld [vmem:[%s4636_s29 + $0x3a8] sm:$0xff]  }
  0xea   : > { %3666 = vmatpush3.bf16.msra.mxu1 %v3880_v49  ;;  %2674 = vmatprep.mubr.bf16.mxu0 %v3414_v46  ;;  %v3923_v46 = vld [vmem:[%s4636_s29 + $0x218] sm:$0xff]   ;;  %v3926_v49 = vld [vmem:[%s4636_s29 + $0x2e0] sm:$0xff]  }
  0xeb   : > { %3639 = vmatprep.subr.bf16.mxu0 %v3881_v50  ;;  %2723 = vmatprep.mubr.bf16.mxu1 %v3416_v48  ;;  %v3925_v48 = vld [vmem:[%s4636_s29 + $0x260] sm:$0xff]  }
  0xec   : > { %3667 = vmatprep.subr.bf16.mxu1 %v3882_v51  ;;  %v3927_v50 = vld [vmem:[%s4636_s29 + $0x220] sm:$0xff]  }
  0xed   : > { %3640 = vmatpush3.bf16.msra.mxu0 %v3883_v52  ;;  %v3928_v51 = vld [vmem:[%s4636_s29 + $0x2a0] sm:$0xff]   ;;  %v3929_v52 = vld [vmem:[%s4636_s29 + $0x268] sm:$0xff]  }
  0xee   : > { %3668 = vmatpush3.bf16.msra.mxu1 %v3884_v53  ;;  %3641 = vmatprep.subr.bf16.mxu0 %v3885_v55  ;;  %v3930_v53 = vld [vmem:[%s4636_s29 + $0x2e8] sm:$0xff]  }
  0xef   : > { %3669 = vmatprep.subr.bf16.mxu1 %v3886_v57  ;;  %v3932_v55 = vld [vmem:[%s4636_s29 + $0x2a8] sm:$0xff]   ;;  %v3934_v57 = vld [vmem:[%s4636_s29 + $0x2f0] sm:$0xff]  }
  0xf0   : > { %2675 = vmatmul.mubr.bf16.gmra.mrb[4].mxu0 %v3413_v54  ;;  %v3931_v54 = vld [vmem:[%s4636_s29 + $0x228] sm:$0xff]  }
  0xf1   : > { %3642 = vmatpush3.bf16.msra.mxu0 %v3887_v58  ;;  %2724 = vmatmul.mubr.bf16.gmra.mrb[4].mxu1 %v3415_v56  ;;  %v3933_v56 = vld [vmem:[%s4636_s29 + $0x270] sm:$0xff]  }
  0xf2   : > { %3670 = vmatpush3.bf16.msra.mxu1 %v3888_v59  ;;  %3643 = vmatprep.subr.bf16.mxu0 %v3889_v60  ;;  %v3935_v58 = vld [vmem:[%s4636_s29 + $0x230] sm:$0xff]   ;;  %v3937_v60 = vld [vmem:[%s4636_s29 + $0x278] sm:$0xff]  }
  0xf3   : > { %3671 = vmatprep.subr.bf16.mxu1 %v3890_v61  ;;  %2764 = vmatprep.mubr.bf16.mxu0 %v3402_v21  ;;  %v3936_v59 = vld [vmem:[%s4636_s29 + $0x2b0] sm:$0xff]   ;;  %v3938_v61 = vld [vmem:[%s4636_s29 + $0x2f8] sm:$0xff]  }
  0xf4   : > { %2813 = vmatprep.mubr.bf16.mxu1 %v3404_v23  ;;  %v3950_v21 = vld [vmem:[%s4636_s29 + $0x3d0] sm:$0xff]   ;;  %v1447_v23 = vld [vmem:[%s4900_s0 + $0xe8] sm:$0xff] }
  0xf5   : > { %3644 = vmatpush3.bf16.msra.mxu0 %v3891_v62  ;;  %v3939_v62 = vld [vmem:[%s4636_s29 + $0x238] sm:$0xff]  }
  0xf6   : > { %3672 = vmatpush3.bf16.msra.mxu1 %v3892_v63  ;;  %3645 = vmatprep.subr.bf16.mxu0 %v3893_v0  ;;  %v3940_v63 = vld [vmem:[%s4636_s29 + $0x2b8] sm:$0xff]   ;;  %v1422_v0 = vld [vmem:[%s4900_s0 + $0x20] sm:$0xff] }
  0xf7   : > { %3673 = vmatprep.subr.bf16.mxu1 %v3894_v1  ;;  %v1430_v1 = vld [vmem:[%s4900_s0 + $0x60] sm:$0xff] }
  0xf9   : > { %3646 = vmatpush3.bf16.msra.mxu0 %v3895_v2  ;;  %v3405_v2 = vcombine.low %v1422_v0, %v1430_v1 }
  0xfa   : > { %3674 = vmatpush3.bf16.msra.mxu1 %v3896_v3  ;;  %3647 = vmatprep.subr.bf16.mxu0 %v3897_v4  ;;  %v3406_v3 = vcombine.high %v1422_v0, %v1430_v1  ;;  %v1423_v4 = vld [vmem:[%s4900_s0 + $0x28] sm:$0xff] }
  0xfb   : > { %3675 = vmatprep.subr.bf16.mxu1 %v3898_v5  ;;  %v1431_v5 = vld [vmem:[%s4900_s0 + $0x68] sm:$0xff] }
  0xfd   : > { %3648 = vmatpush3.bf16.msra.mxu0 %v3899_v6  ;;  %v3407_v6 = vcombine.low %v1423_v4, %v1431_v5 }
  0xfe   : > { %3676 = vmatpush3.bf16.msra.mxu1 %v3900_v7  ;;  %3649 = vmatprep.subr.bf16.mxu0 %v3901_v8  ;;  %v3408_v7 = vcombine.high %v1423_v4, %v1431_v5  ;;  %v3941_v8 = vld [vmem:[%s4636_s29 + $0x340] sm:$0xff]  }
  0xff   : > { %3677 = vmatprep.subr.bf16.mxu1 %v3902_v9  ;;  %v3942_v9 = vld [vmem:[%s4636_s29 + $0x3c0] sm:$0xff]  }
 0x101   : > { %3650 = vmatpush3.bf16.msra.mxu0 %v3903_v10  ;;  %v3943_v10 = vld [vmem:[%s4636_s29 + $0x300] sm:$0xff]  }
 0x102   : > { %3678 = vmatpush3.bf16.msra.mxu1 %v3904_v11  ;;  %3651 = vmatprep.subr.bf16.mxu0 %v3905_v12  ;;  %v3944_v11 = vld [vmem:[%s4636_s29 + $0x380] sm:$0xff]   ;;  %v3945_v12 = vld [vmem:[%s4636_s29 + $0x348] sm:$0xff]  }
 0x103   : > { %3679 = vmatprep.subr.bf16.mxu1 %v3906_v14  ;;  %v3947_v14 = vld [vmem:[%s4636_s29 + $0x308] sm:$0xff]  }
 0x105   : > { %3652 = vmatpush3.bf16.msra.mxu0 %v3907_v15  ;;  %v3948_v15 = vld [vmem:[%s4636_s29 + $0x388] sm:$0xff]  }
 0x106   : > { %3680 = vmatpush3.bf16.msra.mxu1 %v3908_v16  ;;  %3693 = vmatprep.subr.bf16.mxu0 %v3909_v24  ;;  %v1438_v16 = vld [vmem:[%s4900_s0 + $0xa0] sm:$0xff] }
 0x107   : > { %3721 = vmatprep.subr.bf16.mxu1 %v3910_v25  ;;  %v3422_v18 = vcombine.high %v1438_v16, %v1446_v17  ;;  %v3421_v19 = vcombine.low %v1438_v16, %v1446_v17  ;;  %v3951_v25 = vld [vmem:[%s4636_s29 + $0x310] sm:$0xff]  }
 0x108   : > { %2765 = vmatmul.mubr.bf16.vlgmr.msra.gmra.mrb[8].mxu0 %v3401_v20  ;;  %v3949_v20 = vld [vmem:[%s4636_s29 + $0x350] sm:$0xff]  }
 0x109   : > { %2814 = vmatmul.mubr.bf16.vlgmr.msra.gmra.mrb[8].mxu1 %v3403_v22  ;;  %3694 = vmatpush3.bf16.msra.mxu0 %v3911_v26  ;;  %v1439_v22 = vld [vmem:[%s4900_s0 + $0xa8] sm:$0xff] }
 0x10a   : > { %3722 = vmatpush3.bf16.msra.mxu1 %v3912_v27  ;;  %3695 = vmatprep.subr.bf16.mxu0 %v3913_v28  ;;  %v3424_v24 = vcombine.high %v1439_v22, %v1447_v23  ;;  %v3423_v26 = vcombine.low %v1439_v22, %v1447_v23  ;;  %v3952_v27 = vld [vmem:[%s4636_s29 + $0x390] sm:$0xff]   ;;  %v3953_v28 = vld [vmem:[%s4636_s29 + $0x358] sm:$0xff]  }
 0x10b   : > { %3723 = vmatprep.subr.bf16.mxu1 %v3914_v29  ;;  %2772 = vmatprep.mubr.bf16.mxu0 %v3418_v34  ;;  %v3954_v29 = vld [vmem:[%s4636_s29 + $0x3d8] sm:$0xff]   ;;  %v3959_v34 = vld [vmem:[%s4636_s29 + $0x320] sm:$0xff]  }
 0x10c   : > { %2821 = vmatprep.mubr.bf16.mxu1 %v3420_v40  ;;  %v3965_v40 = vld [vmem:[%s4636_s29 + $0x370] sm:$0xff]  }
 0x10d   : > { %3696 = vmatpush3.bf16.msra.mxu0 %v3915_v30  ;;  %v3955_v30 = vld [vmem:[%s4636_s29 + $0x318] sm:$0xff]  }
 0x10e   : > { %3724 = vmatpush3.bf16.msra.mxu1 %v3916_v31  ;;  %3697 = vmatprep.subr.bf16.mxu0 %v3917_v36  ;;  %v3956_v31 = vld [vmem:[%s4636_s29 + $0x398] sm:$0xff]   ;;  %v3961_v36 = vld [vmem:[%s4636_s29 + $0x368] sm:$0xff]  }
 0x10f   : > { %3725 = vmatprep.subr.bf16.mxu1 %v3918_v37  ;;  %v3962_v37 = vld [vmem:[%s4636_s29 + $0x3e8] sm:$0xff]  }
 0x110   : > { %2773 = vmatmul.mubr.bf16.gmra.mrb[12].mxu0 %v3417_v35  ;;  %v3960_v35 = vld [vmem:[%s4636_s29 + $0x3a0] sm:$0xff]  }
 0x111   : > { %3698 = vmatpush3.bf16.msra.mxu0 %v3919_v41  ;;  %2822 = vmatmul.mubr.bf16.gmra.mrb[12].mxu1 %v3419_v42  ;;  %v3966_v41 = vld [vmem:[%s4636_s29 + $0x3f0] sm:$0xff]  }
 0x112   : > { %3726 = vmatpush3.bf16.msra.mxu1 %v3920_v43  ;;  %3699 = vmatprep.subr.bf16.mxu0 %v3921_v44  ;;  %v3967_v42 = vld [vmem:[%s4636_s29 + $0x330] sm:$0xff]   ;;  %v3969_v44 = vld [vmem:[%s4636_s29 + $0x378] sm:$0xff]  }
 0x113   : > { %3727 = vmatprep.subr.bf16.mxu1 %v3922_v45  ;;  %2862 = vmatprep.mubr.bf16.mxu0 %v3406_v3  ;;  %v3968_v43 = vld [vmem:[%s4636_s29 + $0x3b0] sm:$0xff]   ;;  %v3970_v45 = vld [vmem:[%s4636_s29 + $0x3f8] sm:$0xff]  }
 0x114   : > { %2911 = vmatprep.mubr.bf16.mxu1 %v3408_v7 }
 0x115   : > { %3700 = vmatpush3.bf16.msra.mxu0 %v3923_v46  ;;  %v3971_v46 = vld [vmem:[%s4636_s29 + $0x338] sm:$0xff]  }
 0x116   : > { %3728 = vmatpush3.bf16.msra.mxu1 %v3924_v47  ;;  %3701 = vmatprep.subr.bf16.mxu0 %v3925_v48  ;;  %v3972_v47 = vld [vmem:[%s4636_s29 + $0x3b8] sm:$0xff]   ;;  %v1424_v48 = vld [vmem:[%s4900_s0 + $0x30] sm:$0xff] }
 0x117   : > { %3729 = vmatprep.subr.bf16.mxu1 %v3926_v49  ;;  %v1432_v49 = vld [vmem:[%s4900_s0 + $0x70] sm:$0xff] }
 0x119   : > { %3702 = vmatpush3.bf16.msra.mxu0 %v3927_v50  ;;  %v1425_v50 = vld [vmem:[%s4900_s0 + $0x38] sm:$0xff] }
 0x11a   : > { %3730 = vmatpush3.bf16.msra.mxu1 %v3928_v51  ;;  %3703 = vmatprep.subr.bf16.mxu0 %v3929_v52  ;;  %v3409_v51 = vcombine.low %v1424_v48, %v1432_v49  ;;  %v3410_v52 = vcombine.high %v1424_v48, %v1432_v49 }
 0x11b   : > { %3731 = vmatprep.subr.bf16.mxu1 %v3930_v53  ;;  %v1433_v53 = vld [vmem:[%s4900_s0 + $0x78] sm:$0xff] }
 0x11d   : > { %3704 = vmatpush3.bf16.msra.mxu0 %v3931_v54  ;;  %v1440_v54 = vld [vmem:[%s4900_s0 + $0xb0] sm:$0xff] }
 0x11e   : > { %3732 = vmatpush3.bf16.msra.mxu1 %v3932_v55  ;;  %3705 = vmatprep.subr.bf16.mxu0 %v3933_v56  ;;  %v1448_v55 = vld [vmem:[%s4900_s0 + $0xf0] sm:$0xff]  ;;  %v3411_v56 = vcombine.low %v1425_v50, %v1433_v53 }
 0x11f   : > { %3733 = vmatprep.subr.bf16.mxu1 %v3934_v57  ;;  %v3412_v57 = vcombine.high %v1425_v50, %v1433_v53 }
 0x121   : > { %3706 = vmatpush3.bf16.msra.mxu0 %v3935_v58  ;;  %v3426_v58 = vcombine.high %v1440_v54, %v1448_v55 }
 0x122   : > { %3734 = vmatpush3.bf16.msra.mxu1 %v3936_v59  ;;  %3707 = vmatprep.subr.bf16.mxu0 %v3937_v60  ;;  %v1441_v59 = vld [vmem:[%s4900_s0 + $0xb8] sm:$0xff] }
 0x123   : > { %3735 = vmatprep.subr.bf16.mxu1 %v3938_v61  ;;  %v1449_v60 = vld [vmem:[%s4900_s0 + $0xf8] sm:$0xff] }
 0x124   : > { %v3428_v61 = vcombine.high %v1441_v59, %v1449_v60 }
 0x125   : > { %3708 = vmatpush3.bf16.msra.mxu0 %v3939_v62  ;;  %v3425_v62 = vcombine.low %v1440_v54, %v1448_v55 }
 0x126   : > { %3736 = vmatpush3.bf16.msra.mxu1 %v3940_v63  ;;  %3749 = vmatprep.subr.bf16.mxu0 %v3941_v8  ;;  %v3427_v63 = vcombine.low %v1441_v59, %v1449_v60 }
 0x127   : > { %3777 = vmatprep.subr.bf16.mxu1 %v3942_v9 }
 0x128   : > { %2863 = vmatmul.mubr.bf16.vlgmr.msra.gmra.mrb[16].mxu0 %v3405_v2 }
 0x129   : > { %2912 = vmatmul.mubr.bf16.vlgmr.msra.gmra.mrb[16].mxu1 %v3407_v6  ;;  %3750 = vmatpush3.bf16.msra.mxu0 %v3943_v10 }
 0x12a   : > { %3778 = vmatpush3.bf16.msra.mxu1 %v3944_v11  ;;  %3751 = vmatprep.subr.bf16.mxu0 %v3945_v12 }
 0x12b   : > { %3779 = vmatprep.subr.bf16.mxu1 %v3946_v13  ;;  %2870 = vmatprep.mubr.bf16.mxu0 %v3422_v18 }
 0x12c   : > { %2919 = vmatprep.mubr.bf16.mxu1 %v3424_v24 }
 0x12d   : > { %3752 = vmatpush3.bf16.msra.mxu0 %v3947_v14 }
 0x12e   : > { %3780 = vmatpush3.bf16.msra.mxu1 %v3948_v15  ;;  %3753 = vmatprep.subr.bf16.mxu0 %v3949_v20 }
 0x12f   : > { %3781 = vmatprep.subr.bf16.mxu1 %v3950_v21 }
 0x130   : > { %2871 = vmatmul.mubr.bf16.gmra.mrb[20].mxu0 %v3421_v19 }
 0x131   : > { %3754 = vmatpush3.bf16.msra.mxu0 %v3951_v25  ;;  %2920 = vmatmul.mubr.bf16.gmra.mrb[20].mxu1 %v3423_v26 }
 0x132   : > { %3782 = vmatpush3.bf16.msra.mxu1 %v3952_v27  ;;  %3755 = vmatprep.subr.bf16.mxu0 %v3953_v28 }
 0x133   : > { %3783 = vmatprep.subr.bf16.mxu1 %v3954_v29  ;;  %2960 = vmatprep.mubr.bf16.mxu0 %v3410_v52 }
 0x134   : > { %3009 = vmatprep.mubr.bf16.mxu1 %v3412_v57 }
 0x135   : > { %3756 = vmatpush3.bf16.msra.mxu0 %v3955_v30 }
 0x136   : > { %3784 = vmatpush3.bf16.msra.mxu1 %v3956_v31  ;;  %3757 = vmatprep.subr.bf16.mxu0 %v3957_v32 }
 0x137   : > { %3785 = vmatprep.subr.bf16.mxu1 %v3958_v33 }
 0x139   : > { %3758 = vmatpush3.bf16.msra.mxu0 %v3959_v34 }
 0x13a   : > { %3786 = vmatpush3.bf16.msra.mxu1 %v3960_v35  ;;  %3759 = vmatprep.subr.bf16.mxu0 %v3961_v36 }
 0x13b   : > { %3787 = vmatprep.subr.bf16.mxu1 %v3962_v37 }
 0x13d   : > { %3760 = vmatpush3.bf16.msra.mxu0 %v3963_v38 }
 0x13e   : > { %3788 = vmatpush3.bf16.msra.mxu1 %v3964_v39  ;;  %3761 = vmatprep.subr.bf16.mxu0 %v3965_v40 }
 0x13f   : > { %3789 = vmatprep.subr.bf16.mxu1 %v3966_v41 }
 0x141   : > { %3762 = vmatpush3.bf16.msra.mxu0 %v3967_v42 }
 0x142   : > { %3790 = vmatpush3.bf16.msra.mxu1 %v3968_v43  ;;  %3763 = vmatprep.subr.bf16.mxu0 %v3969_v44 }
 0x143   : > { %3791 = vmatprep.subr.bf16.mxu1 %v3970_v45 }
 0x145   : > { %3764 = vmatpush3.bf16.msra.mxu0 %v3971_v46 }
 0x146   : > { %3792 = vmatpush3.bf16.msra.mxu1 %v3972_v47 }
 0x148   : > { %2961 = vmatmul.mubr.bf16.vlgmr.msra.gmra.mrb[24].mxu0 %v3409_v51 }
 0x149   : > { %3010 = vmatmul.mubr.bf16.vlgmr.msra.gmra.mrb[24].mxu1 %v3411_v56  ;;  %2968 = vmatprep.mubr.bf16.mxu0 %v3426_v58 }
 0x14a   : > { %3017 = vmatprep.mubr.bf16.mxu1 %v3428_v61 }
 0x150   : > { %2969 = vmatmul.mubr.bf16.gmra.mrb[28].mxu0 %v3425_v62 }
 0x151   : > { %3018 = vmatmul.mubr.bf16.gmra.mrb[28].mxu1 %v3427_v63 }
 0x1bb   : > { %v3597_v0 = vpop.f32.mrb[0].mxu0 }
 0x1bc   : > { %v3625_v1 = vpop.f32.mrb[0].mxu1  ;;  %v3598_v2 = vpop.f32.mrb[1].mxu0 }
 0x1bd   : > { %v3599_v3 = vadd.f32 %v3598_v2, %v3597_v0  ;;  %v3626_v4 = vpop.f32.mrb[1].mxu1  ;;  %v3600_v5 = vpop.f32.mrb[2].mxu0 }
 0x1be   : > { %v3627_v6 = vadd.f32 %v3626_v4, %v3625_v1  ;;  %v3628_v7 = vpop.f32.mrb[2].mxu1  ;;  %v3601_v8 = vpop.f32.mrb[3].mxu0 }
 0x1bf   : > { %v3602_v9 = vadd.f32 %v3601_v8, %v3600_v5  ;;  %v3629_v10 = vpop.f32.mrb[3].mxu1 }
 0x1c0   : > { %v2718_v11 = vadd.f32 %v3627_v6, %v3599_v3  ;;  %v3630_v12 = vadd.f32 %v3629_v10, %v3628_v7 }
 0x1c2   : > { %v2721_v13 = vadd.f32 %v3630_v12, %v3602_v9 }
 0x1c3   : > { %v3603_v14 = vpop.f32.mrb[4].mxu0 }
 0x1c4   : > { %v3631_v15 = vpop.f32.mrb[4].mxu1  ;;  %v3604_v16 = vpop.f32.mrb[5].mxu0 }
 0x1c5   : > { %v3605_v17 = vadd.f32 %v3604_v16, %v3603_v14  ;;  %v3632_v18 = vpop.f32.mrb[5].mxu1  ;;  %v3606_v19 = vpop.f32.mrb[6].mxu0 }
 0x1c6   : > { %v3633_v20 = vadd.f32 %v3632_v18, %v3631_v15  ;;  %v3634_v21 = vpop.f32.mrb[6].mxu1  ;;  %v3607_v22 = vpop.f32.mrb[7].mxu0 }
 0x1c7   : > { %v3608_v23 = vadd.f32 %v3607_v22, %v3606_v19  ;;  %v3635_v24 = vpop.f32.mrb[7].mxu1 }
 0x1c8   : > { %v2726_v25 = vadd.f32 %v3633_v20, %v3605_v17  ;;  %v3636_v26 = vadd.f32 %v3635_v24, %v3634_v21 }
 0x1ca   : > { %v2729_v27 = vadd.f32 %v3636_v26, %v3608_v23 }
 0x1db   : > { %v3653_v28 = vpop.f32.mrb[8].mxu0 }
 0x1dc   : > { %v3681_v29 = vpop.f32.mrb[8].mxu1  ;;  %v3654_v30 = vpop.f32.mrb[9].mxu0 }
 0x1dd   : > { %v3682_v31 = vpop.f32.mrb[9].mxu1  ;;  %v3655_v32 = vadd.f32 %v3654_v30, %v3653_v28  ;;  %v3656_v34 = vpop.f32.mrb[10].mxu0 }
 0x1de   : > { %v3683_v33 = vadd.f32 %v3682_v31, %v3681_v29  ;;  %v3684_v35 = vpop.f32.mrb[10].mxu1  ;;  %v3657_v36 = vpop.f32.mrb[11].mxu0 }
 0x1df   : > { %v3685_v37 = vpop.f32.mrb[11].mxu1  ;;  %v2767_v38 = vadd.f32 %v3655_v32, %v2718_v11  ;;  %v3658_v39 = vadd.f32 %v3657_v36, %v3656_v34 }
 0x1e0   : > { %v3686_v40 = vadd.f32 %v3685_v37, %v3684_v35 }
 0x1e1   : > { %v2816_v41 = vadd.f32 %v3683_v33, %v2767_v38  ;;  %v2770_v42 = vadd.f32 %v3658_v39, %v2721_v13 }
 0x1e3   : > { %v2819_v43 = vadd.f32 %v3686_v40, %v2770_v42  ;;  %v3659_v44 = vpop.f32.mrb[12].mxu0  ;;  %v3557_v40 = vld [vmem:[%s1386_s25] ss:$0 sm:$0xff] }
 0x1e4   : > { %v3660_v45 = vpop.f32.mrb[13].mxu0  ;;  %v3687_v50 = vpop.f32.mrb[12].mxu1 }
 0x1e5   : > { %v3661_v46 = vadd.f32 %v3660_v45, %v3659_v44  ;;  %v3662_v47 = vpop.f32.mrb[14].mxu0  ;;  %v3688_v52 = vpop.f32.mrb[13].mxu1 }
 0x1e6   : > { %v3663_v48 = vpop.f32.mrb[15].mxu0  ;;  %v3689_v54 = vadd.f32 %v3688_v52, %v3687_v50  ;;  %v3690_v55 = vpop.f32.mrb[14].mxu1 }
 0x1e7   : > { %v2775_v49 = vadd.f32 %v3661_v46, %v2726_v25  ;;  %v3664_v51 = vadd.f32 %v3663_v48, %v3662_v47  ;;  %v3691_v56 = vpop.f32.mrb[15].mxu1 }
 0x1e8   : > { %v3692_v58 = vadd.f32 %v3691_v56, %v3690_v55 }
 0x1e9   : > { %v2778_v53 = vadd.f32 %v3664_v51, %v2729_v27  ;;  %v2824_v57 = vadd.f32 %v3689_v54, %v2775_v49 }
 0x1eb   : > { %v2827_v59 = vadd.f32 %v3692_v58, %v2778_v53 }
 0x1fb   : > { %v3709_v60 = vpop.f32.mrb[16].mxu0 }
 0x1fc   : > { %v3737_v61 = vpop.f32.mrb[16].mxu1  ;;  %v3710_v62 = vpop.f32.mrb[17].mxu0 }
 0x1fd   : > { %v3711_v63 = vadd.f32 %v3710_v62, %v3709_v60  ;;  %v3738_v0 = vpop.f32.mrb[17].mxu1  ;;  %v3712_v1 = vpop.f32.mrb[18].mxu0 }
 0x1fe   : > { %v3739_v2 = vadd.f32 %v3738_v0, %v3737_v61  ;;  %v3740_v3 = vpop.f32.mrb[18].mxu1  ;;  %v3713_v4 = vpop.f32.mrb[19].mxu0 }
 0x1ff   : > { %v2865_v5 = vadd.f32 %v3711_v63, %v2816_v41  ;;  %v3714_v6 = vadd.f32 %v3713_v4, %v3712_v1  ;;  %v3741_v7 = vpop.f32.mrb[19].mxu1 }
 0x200   : > { %v3742_v8 = vadd.f32 %v3741_v7, %v3740_v3 }
 0x201   : > { %v2914_v9 = vadd.f32 %v3739_v2, %v2865_v5  ;;  %v2868_v10 = vadd.f32 %v3714_v6, %v2819_v43 }
 0x203   : > { %v2917_v11 = vadd.f32 %v3742_v8, %v2868_v10  ;;  %v3715_v12 = vpop.f32.mrb[20].mxu0 }
 0x204   : > { %v3716_v13 = vpop.f32.mrb[21].mxu0  ;;  %v3743_v16 = vpop.f32.mrb[20].mxu1 }
 0x205   : > { %v3717_v14 = vadd.f32 %v3716_v13, %v3715_v12  ;;  %v3718_v15 = vpop.f32.mrb[22].mxu0  ;;  %v3744_v20 = vpop.f32.mrb[21].mxu1 }
 0x206   : > { %v3719_v17 = vpop.f32.mrb[23].mxu0  ;;  %v3745_v21 = vadd.f32 %v3744_v20, %v3743_v16  ;;  %v3746_v22 = vpop.f32.mrb[22].mxu1 }
 0x207   : > { %v2873_v18 = vadd.f32 %v3717_v14, %v2824_v57  ;;  %v3720_v19 = vadd.f32 %v3719_v17, %v3718_v15  ;;  %v3747_v24 = vpop.f32.mrb[23].mxu1 }
 0x208   : > { %v3748_v26 = vadd.f32 %v3747_v24, %v3746_v22 }
 0x209   : > { %v2876_v23 = vadd.f32 %v3720_v19, %v2827_v59  ;;  %v2922_v25 = vadd.f32 %v3745_v21, %v2873_v18 }
 0x20b   : > { %v2925_v27 = vadd.f32 %v3748_v26, %v2876_v23 }
 0x21b   : > { %v3765_v28 = vpop.f32.mrb[24].mxu0 }
 0x21c   : > { %v3793_v29 = vpop.f32.mrb[24].mxu1  ;;  %v3766_v30 = vpop.f32.mrb[25].mxu0 }
 0x21d   : > { %v3767_v31 = vadd.f32 %v3766_v30, %v3765_v28  ;;  %v3794_v32 = vpop.f32.mrb[25].mxu1  ;;  %v3768_v33 = vpop.f32.mrb[26].mxu0 }
 0x21e   : > { %v3795_v34 = vadd.f32 %v3794_v32, %v3793_v29  ;;  %v3796_v35 = vpop.f32.mrb[26].mxu1  ;;  %v3769_v36 = vpop.f32.mrb[27].mxu0 }
 0x21f   : > { %v2963_v37 = vadd.f32 %v3767_v31, %v2914_v9  ;;  %v3770_v38 = vadd.f32 %v3769_v36, %v3768_v33  ;;  %v3797_v39 = vpop.f32.mrb[27].mxu1 }
 0x220   : > { %v3798_v41 = vadd.f32 %v3797_v39, %v3796_v35 }
 0x221   : > { %v3012_v42 = vadd.f32 %v3795_v34, %v2963_v37  ;;  %v2966_v43 = vadd.f32 %v3770_v38, %v2917_v11 }
 0x223   : > { %v3048_v44 = vadd.f32 %v3557_v40, %v3012_v42  ;;  %v3015_v45 = vadd.f32 %v3798_v41, %v2966_v43  ;;  %v3771_v46 = vpop.f32.mrb[28].mxu0 }
 0x224   : > { %v3799_v47 = vpop.f32.mrb[28].mxu1  ;;  %v3772_v48 = vpop.f32.mrb[29].mxu0 }
 0x225   : > { %v3052_v49 = vmax.f32 %v3048_v44, 0.0  ;;  %v3049_v50 = vadd.f32 %v3557_v40, %v3015_v45  ;;  %v3773_v51 = vadd.f32 %v3772_v48, %v3771_v46  ;;  %v3800_v52 = vpop.f32.mrb[29].mxu1  ;;  %v3774_v53 = vpop.f32.mrb[30].mxu0 }
 0x226   : > { %v3801_v54 = vadd.f32 %v3800_v52, %v3799_v47  ;;  %v3802_v55 = vpop.f32.mrb[30].mxu1  ;;  %v3775_v56 = vpop.f32.mrb[31].mxu0 }
 0x227   : > { %v3053_v57 = vmax.f32 %v3049_v50, 0.0  ;;  %v2971_v58 = vadd.f32 %v3773_v51, %v2922_v25  ;;  %v3776_v59 = vadd.f32 %v3775_v56, %v3774_v53  ;;  %v3803_v60 = vpop.f32.mrb[31].mxu1  ;;  %v3112_v61 = vmul.f32 %v3052_v49, %v3052_v49 }
 0x228   : > { %v3804_v62 = vadd.f32 %v3803_v60, %v3802_v55 }
 0x229   : > { %v3573_v63 = vpack.c.bf16 %v3053_v57, %v3052_v49  ;;  %v3102_v0 = vadd.f32 %v3053_v57, %v3052_v49  ;;  %v3113_v1 = vmul.f32 %v3053_v57, %v3053_v57  ;;  %v3020_v2 = vadd.f32 %v3801_v54, %v2971_v58 }
 0x22a   : > { %v2974_v3 = vadd.f32 %v3776_v59, %v2925_v27 }
 0x22b   : > { %3574 = vst [vmem:[%s4864_s18] sm:$0xff] %v3573_v63   ;;  %v3116_v4 = vadd.f32 %v3113_v1, %v3112_v61  ;;  %v3050_v5 = vadd.f32 %v3557_v40, %v3020_v2 }
 0x22c   : > { %v3023_v6 = vadd.f32 %v3804_v62, %v2974_v3 }
 0x22d   : > { %v3054_v7 = vmax.f32 %v3050_v5, 0.0 }
 0x22e   : > { %v3051_v8 = vadd.f32 %v3557_v40, %v3023_v6 }
 0x22f   : > { %v3103_v9 = vadd.f32 %v3102_v0, %v3054_v7  ;;  %v3114_v10 = vmul.f32 %v3054_v7, %v3054_v7 }
 0x230   : > { %v3055_v11 = vmax.f32 %v3051_v8, 0.0 }
 0x231   : > { %v3117_v12 = vadd.f32 %v3116_v4, %v3114_v10 }
 0x232   : > { %v3578_v13 = vpack.c.bf16 %v3055_v11, %v3054_v7  ;;  %v3104_v14 = vadd.f32 %v3103_v9, %v3055_v11  ;;  %v3115_v15 = vmul.f32 %v3055_v11, %v3055_v11  ;;  %v3169_v29 = vld [vmem:[%s4864_s18] sm:$0xf] (%p4078_p6)  ;;  %v3171_v30 = vld [vmem:[%s4864_s18 + $0x4] sm:$0xf] (%p4078_p6) }
 0x233   : > { %3170 = vst [vmem:[%s3153_s14] sm:$0xf] (%p4078_p6), %v3169_v29  ;;  %3172 = vst [vmem:[%s3153_s14 + $0x8] sm:$0xf] (%p4078_p6), %v3171_v30 }
 0x234   : > { %3580 = vst [vmem:[%s4864_s18 + $0x8] sm:$0xff] %v3578_v13   ;;  %v3105_v16 = vrot.slane %v3104_v14, 4  ;;  %v3118_v17 = vadd.f32 %v3117_v12, %v3115_v15 }
 0x236   : > { %v3106_v18 = vadd.f32 %v3105_v16, %v3104_v14  ;;  %v3119_v19 = vrot.slane %v3118_v17, 4 }
 0x238   : > { %v3107_v20 = vrot.slane %v3106_v18, 2  ;;  %v3120_v21 = vadd.f32 %v3119_v19, %v3118_v17 }
 0x23a   : > { %v3108_v22 = vadd.f32 %v3107_v20, %v3106_v18  ;;  %v3121_v23 = vrot.slane %v3120_v21, 2 }
 0x23b   : > { %v3173_v31 = vld [vmem:[%s4864_s18 + $0x8] sm:$0xf] (%p4078_p6)  ;;  %v3175_v32 = vld [vmem:[%s4864_s18 + $0xc] sm:$0xf] (%p4078_p6) }
 0x23c   : > { %v3109_v24 = vrot.slane %v3108_v22, 1  ;;  %v3122_v25 = vadd.f32 %v3121_v23, %v3120_v21  ;;  %3148 = sbr.rel (!%p4078_p6) target bundleno = 579 (0x243), region = 85  ;;  %3174 = vst [vmem:[%s3153_s14 + $0x10] sm:$0xf] (%p4078_p6), %v3173_v31  ;;  %3176 = vst [vmem:[%s3153_s14 + $0x18] sm:$0xf] (%p4078_p6), %v3175_v32 }
 0x23e   : > { %v3110_v26 = vadd.f32 %v3109_v24, %v3108_v22  ;;  %v3123_v27 = vrot.slane %v3122_v25, 1 }
 0x240   : > { %3111 = vst [vmem:[%s1395_s7] sm:$0xff] %v3110_v26  ;;  %v3124_v28 = vadd.f32 %v3123_v27, %v3122_v25 }
 0x242   : > { %3125 = vst [vmem:[%s1403_s9] sm:$0xff] %v3124_v28 }
 0x243 PF: > { %s16_s22 = sadd.s32 1, %s4011_s22   ;;  %s4907_s18 = smov %s3999_s19 }
 0x244   : > { %p13_p12 = scmp.ge.s32.totalorder %s16_s22, 4   ;;  %s4908_s19 = smov %s4083_s28 }
 0x245   : > { %s4909_s20 = smov %s4007_s21  ;;  %s4910_s21 = smov %s4912_s23 }
 0x246   :  { %15 = sbr.rel (!%p13_p12) target bundleno = 3 (0x3), region = 187 }

// kernel: feature_extraction_forward.10
= control target key start
LH: loop header
LB: loop body
LE: loop exit
PB: predicated region body
PF: predicated region fallthrough
CT: control target
= control target key end

     0   :  { %s4326_s0 = inlined_call_operand.vmem [shape: bf16[8,4608], index: 0, kind: input, shape index: {}]   ;;  %s4327_s1 = inlined_call_operand.vmem [shape: bf16[4608,512], index: 1, kind: input, shape index: {}]   ;;  %s4328_s2 = inlined_call_operand.vmem [shape: f32[1,512], index: 2, kind: input, shape index: {}]   ;;  %s4329_s3 = inlined_call_operand.vmem [shape: bf16[8,512], index: 3, kind: output, shape index: {0}]   ;;  %s4330_s4 = inlined_call_operand.vmem [shape: f32[8,512], index: 4, kind: output, shape index: {1}]   ;;  %s4331_s5 = inlined_call_operand.vmem [shape: f32[8,512], index: 5, kind: output, shape index: {2}]  }
   0x1   :  { %4332 = sst [smem:[#allocation4_spill]] %s4327_s1 }
   0x2   :  { %s3588_s18 = smov 0   ;;  %s3590_s19 = smov 0  }
   0x3   :  { %s3592_s20 = smov 0   ;;  %s3594_s21 = smov 0  }
   0x4   :  { %s3596_s22 = smov 0   ;;  %s3598_s23 = smov 0  }
   0x5   :  { %s3600_s24 = smov 0  }
   0x6 LB: > { %s28_s25 = sadd.s32 1, %s3547_s22  ;;  %s31_s26 = sadd.s32 1, %s3551_s23  ;;  %s3555_s24 = sphi %s3600_s24, %s16_s24   ;;  %s3551_s23 = sphi %s3598_s23, %s4339_s23   ;;  %s3547_s22 = sphi %s3596_s22, %s4338_s22   ;;  %s3543_s21 = sphi %s3594_s21, %s4337_s21   ;;  %s3539_s20 = sphi %s3592_s20, %s4336_s20   ;;  %s3535_s19 = sphi %s3590_s19, %s4335_s19   ;;  %s3531_s18 = sphi %s3588_s18, %s4334_s18  }
   0x7   : > { %p29_p0 = scmp.ge.s32.totalorder %s28_s25, 3  ;;  %p79_p1 = scmp.ne.s32.totalorder %s3535_s19, %s3531_s18 }
   0x8   : > { %p80_p2 = scmp.eq.s32.totalorder %s3555_s24, 0  ;;  %s72_s30 = sadd.s32 1, %s3535_s19 }
   0x9   : > { %s4341_s25 = smov (%p29_p0, %s28_s25), 0  ;;  %s4343_s26 = smov (!%p29_p0, %s31_s26), %s3551_s23 }
   0xa   : > { %p81_p3 = por %p80_p2, %p79_p1  ;;  %p33_p4 = scmp.ge.s32.totalorder %s4343_s26, 2 }
   0xb   : > { %s67_s27 = ssub.s32 %s3547_s22, %s4341_s25  ;;  %p2918_p6 = scmp.ge.s32.totalorder %s3555_s24, 6 }
   0xc   : > { %s4345_s26 = smov (%p33_p4, %s4343_s26), 0 }
   0xd   : > { %s68_s28 = ssub.s32 %s3551_s23, %s4345_s26  ;;  %215 = sbr.rel (%p2918_p6) target bundleno = 126 (0x7e), region = 16 }
   0xe   : > { %s69_s29 = sor.u32 %s68_s28, %s67_s27 }
   0xf   : > { %p70_p5 = scmp.eq.s32.totalorder %s69_s29, 0 }
  0x11   : > { %s3639_s6 = scalar_select %p70_p5, %s3535_s19, %s72_s30  }
  0x14   : > { %231 = sbr.rel (!%p81_p3) target bundleno = 126 (0x7e), region = 24  ;;  %s233_s7 = sand.u32 (%p81_p3), 1, %s3535_s19  }
  0x15   : > { %s3142_s8 = smul.u32 (%p81_p3), 1536, %s233_s7  ;;  %s2919_s9 = sshll.u32 (%p81_p3), %s3551_s23, 1 }
  0x16   : > { %s3140_s10 = smul.u32 (%p81_p3), 768, %s3547_s22  ;;  %s4333_s1 = sld [smem:[#allocation4_spill]] (%p81_p3) }
  0x17   : > { %s3653_s16 = scalar_lea.vmem (%p81_p3), [#allocation3], %s3142_s8 }
  0x18   : > { %s239_s11 = sadd.s32 (%p81_p3), %s3140_s10, %s2919_s9 }
  0x19   : > { %s2921_s12 = sshll.u32 (%p81_p3), %s239_s11, 2 }
  0x1c   : > { %s3648_s15 = scalar_lea.vmem %s4333_s1, %s2921_s12 }
  0x1d   : > { %v651_v0 = vld [vmem:[%s3648_s15] sm:$0xff]  ;;  %v653_v1 = vld [vmem:[%s3648_s15 + $0x10] sm:$0xff] }
  0x1e   : > { %v655_v2 = vld [vmem:[%s3648_s15 + $0x20] sm:$0xff]  ;;  %652 = vst [vmem:[%s3653_s16] sm:$0xff] %v651_v0  ;;  %654 = vst [vmem:[%s3653_s16 + $0x8] sm:$0xff] %v653_v1  ;;  %v657_v3 = vld [vmem:[%s3648_s15 + $0x30] sm:$0xff] }
  0x1f   : > { %656 = vst [vmem:[%s3653_s16 + $0x10] sm:$0xff] %v655_v2  ;;  %v659_v4 = vld [vmem:[%s3648_s15 + $0x40] sm:$0xff]  ;;  %v661_v5 = vld [vmem:[%s3648_s15 + $0x50] sm:$0xff]  ;;  %658 = vst [vmem:[%s3653_s16 + $0x18] sm:$0xff] %v657_v3 }
  0x20   : > { %660 = vst [vmem:[%s3653_s16 + $0x20] sm:$0xff] %v659_v4  ;;  %662 = vst [vmem:[%s3653_s16 + $0x28] sm:$0xff] %v661_v5  ;;  %v663_v6 = vld [vmem:[%s3648_s15 + $0x60] sm:$0xff]  ;;  %v665_v7 = vld [vmem:[%s3648_s15 + $0x70] sm:$0xff] }
  0x21   : > { %v667_v8 = vld [vmem:[%s3648_s15 + $0x80] sm:$0xff]  ;;  %664 = vst [vmem:[%s3653_s16 + $0x30] sm:$0xff] %v663_v6  ;;  %666 = vst [vmem:[%s3653_s16 + $0x38] sm:$0xff] %v665_v7  ;;  %v669_v9 = vld [vmem:[%s3648_s15 + $0x90] sm:$0xff] }
  0x22   : > { %668 = vst [vmem:[%s3653_s16 + $0x40] sm:$0xff] %v667_v8  ;;  %v671_v10 = vld [vmem:[%s3648_s15 + $0xa0] sm:$0xff]  ;;  %v673_v11 = vld [vmem:[%s3648_s15 + $0xb0] sm:$0xff]  ;;  %670 = vst [vmem:[%s3653_s16 + $0x48] sm:$0xff] %v669_v9 }
  0x23   : > { %672 = vst [vmem:[%s3653_s16 + $0x50] sm:$0xff] %v671_v10  ;;  %674 = vst [vmem:[%s3653_s16 + $0x58] sm:$0xff] %v673_v11  ;;  %v675_v12 = vld [vmem:[%s3648_s15 + $0xc0] sm:$0xff]  ;;  %v677_v13 = vld [vmem:[%s3648_s15 + $0xd0] sm:$0xff] }
  0x24   : > { %v679_v14 = vld [vmem:[%s3648_s15 + $0xe0] sm:$0xff]  ;;  %676 = vst [vmem:[%s3653_s16 + $0x60] sm:$0xff] %v675_v12  ;;  %678 = vst [vmem:[%s3653_s16 + $0x68] sm:$0xff] %v677_v13  ;;  %v681_v15 = vld [vmem:[%s3648_s15 + $0xf0] sm:$0xff] }
  0x25   : > { %680 = vst [vmem:[%s3653_s16 + $0x70] sm:$0xff] %v679_v14  ;;  %v683_v16 = vld [vmem:[%s3648_s15 + $0x100] sm:$0xff]  ;;  %v685_v17 = vld [vmem:[%s3648_s15 + $0x110] sm:$0xff]  ;;  %682 = vst [vmem:[%s3653_s16 + $0x78] sm:$0xff] %v681_v15 }
  0x26   : > { %684 = vst [vmem:[%s3653_s16 + $0x80] sm:$0xff] %v683_v16  ;;  %686 = vst [vmem:[%s3653_s16 + $0x88] sm:$0xff] %v685_v17  ;;  %v687_v18 = vld [vmem:[%s3648_s15 + $0x120] sm:$0xff]  ;;  %v689_v19 = vld [vmem:[%s3648_s15 + $0x130] sm:$0xff] }
  0x27   : > { %v691_v20 = vld [vmem:[%s3648_s15 + $0x140] sm:$0xff]  ;;  %688 = vst [vmem:[%s3653_s16 + $0x90] sm:$0xff] %v687_v18  ;;  %690 = vst [vmem:[%s3653_s16 + $0x98] sm:$0xff] %v689_v19  ;;  %v693_v21 = vld [vmem:[%s3648_s15 + $0x150] sm:$0xff] }
  0x28   : > { %692 = vst [vmem:[%s3653_s16 + $0xa0] sm:$0xff] %v691_v20  ;;  %v695_v22 = vld [vmem:[%s3648_s15 + $0x160] sm:$0xff]  ;;  %v697_v23 = vld [vmem:[%s3648_s15 + $0x170] sm:$0xff]  ;;  %694 = vst [vmem:[%s3653_s16 + $0xa8] sm:$0xff] %v693_v21 }
  0x29   : > { %696 = vst [vmem:[%s3653_s16 + $0xb0] sm:$0xff] %v695_v22  ;;  %698 = vst [vmem:[%s3653_s16 + $0xb8] sm:$0xff] %v697_v23  ;;  %v699_v24 = vld [vmem:[%s3648_s15 + $0x180] sm:$0xff]  ;;  %v701_v25 = vld [vmem:[%s3648_s15 + $0x190] sm:$0xff] }
  0x2a   : > { %v703_v26 = vld [vmem:[%s3648_s15 + $0x1a0] sm:$0xff]  ;;  %700 = vst [vmem:[%s3653_s16 + $0xc0] sm:$0xff] %v699_v24  ;;  %702 = vst [vmem:[%s3653_s16 + $0xc8] sm:$0xff] %v701_v25  ;;  %v705_v27 = vld [vmem:[%s3648_s15 + $0x1b0] sm:$0xff] }
  0x2b   : > { %704 = vst [vmem:[%s3653_s16 + $0xd0] sm:$0xff] %v703_v26  ;;  %v707_v28 = vld [vmem:[%s3648_s15 + $0x1c0] sm:$0xff]  ;;  %v709_v29 = vld [vmem:[%s3648_s15 + $0x1d0] sm:$0xff]  ;;  %706 = vst [vmem:[%s3653_s16 + $0xd8] sm:$0xff] %v705_v27 }
  0x2c   : > { %708 = vst [vmem:[%s3653_s16 + $0xe0] sm:$0xff] %v707_v28  ;;  %710 = vst [vmem:[%s3653_s16 + $0xe8] sm:$0xff] %v709_v29  ;;  %v711_v30 = vld [vmem:[%s3648_s15 + $0x1e0] sm:$0xff]  ;;  %v713_v31 = vld [vmem:[%s3648_s15 + $0x1f0] sm:$0xff] }
  0x2d   : > { %v715_v32 = vld [vmem:[%s3648_s15 + $0x200] sm:$0xff]  ;;  %712 = vst [vmem:[%s3653_s16 + $0xf0] sm:$0xff] %v711_v30  ;;  %714 = vst [vmem:[%s3653_s16 + $0xf8] sm:$0xff] %v713_v31  ;;  %v717_v33 = vld [vmem:[%s3648_s15 + $0x210] sm:$0xff] }
  0x2e   : > { %716 = vst [vmem:[%s3653_s16 + $0x100] sm:$0xff] %v715_v32  ;;  %v719_v34 = vld [vmem:[%s3648_s15 + $0x220] sm:$0xff]  ;;  %v721_v35 = vld [vmem:[%s3648_s15 + $0x230] sm:$0xff]  ;;  %718 = vst [vmem:[%s3653_s16 + $0x108] sm:$0xff] %v717_v33 }
  0x2f   : > { %720 = vst [vmem:[%s3653_s16 + $0x110] sm:$0xff] %v719_v34  ;;  %722 = vst [vmem:[%s3653_s16 + $0x118] sm:$0xff] %v721_v35  ;;  %v723_v36 = vld [vmem:[%s3648_s15 + $0x240] sm:$0xff]  ;;  %v725_v37 = vld [vmem:[%s3648_s15 + $0x250] sm:$0xff] }
  0x30   : > { %v727_v38 = vld [vmem:[%s3648_s15 + $0x260] sm:$0xff]  ;;  %724 = vst [vmem:[%s3653_s16 + $0x120] sm:$0xff] %v723_v36  ;;  %726 = vst [vmem:[%s3653_s16 + $0x128] sm:$0xff] %v725_v37  ;;  %v729_v39 = vld [vmem:[%s3648_s15 + $0x270] sm:$0xff] }
  0x31   : > { %728 = vst [vmem:[%s3653_s16 + $0x130] sm:$0xff] %v727_v38  ;;  %v731_v40 = vld [vmem:[%s3648_s15 + $0x280] sm:$0xff]  ;;  %v733_v41 = vld [vmem:[%s3648_s15 + $0x290] sm:$0xff]  ;;  %730 = vst [vmem:[%s3653_s16 + $0x138] sm:$0xff] %v729_v39 }
  0x32   : > { %732 = vst [vmem:[%s3653_s16 + $0x140] sm:$0xff] %v731_v40  ;;  %734 = vst [vmem:[%s3653_s16 + $0x148] sm:$0xff] %v733_v41  ;;  %v735_v42 = vld [vmem:[%s3648_s15 + $0x2a0] sm:$0xff]  ;;  %v737_v43 = vld [vmem:[%s3648_s15 + $0x2b0] sm:$0xff] }
  0x33   : > { %v739_v44 = vld [vmem:[%s3648_s15 + $0x2c0] sm:$0xff]  ;;  %736 = vst [vmem:[%s3653_s16 + $0x150] sm:$0xff] %v735_v42  ;;  %738 = vst [vmem:[%s3653_s16 + $0x158] sm:$0xff] %v737_v43  ;;  %v741_v45 = vld [vmem:[%s3648_s15 + $0x2d0] sm:$0xff] }
  0x34   : > { %740 = vst [vmem:[%s3653_s16 + $0x160] sm:$0xff] %v739_v44  ;;  %v743_v46 = vld [vmem:[%s3648_s15 + $0x2e0] sm:$0xff]  ;;  %v745_v47 = vld [vmem:[%s3648_s15 + $0x2f0] sm:$0xff]  ;;  %742 = vst [vmem:[%s3653_s16 + $0x168] sm:$0xff] %v741_v45 }
  0x35   : > { %744 = vst [vmem:[%s3653_s16 + $0x170] sm:$0xff] %v743_v46  ;;  %746 = vst [vmem:[%s3653_s16 + $0x178] sm:$0xff] %v745_v47  ;;  %v747_v48 = vld [vmem:[%s3648_s15 + $0x300] sm:$0xff]  ;;  %v749_v49 = vld [vmem:[%s3648_s15 + $0x310] sm:$0xff] }
  0x36   : > { %v751_v50 = vld [vmem:[%s3648_s15 + $0x320] sm:$0xff]  ;;  %748 = vst [vmem:[%s3653_s16 + $0x180] sm:$0xff] %v747_v48  ;;  %750 = vst [vmem:[%s3653_s16 + $0x188] sm:$0xff] %v749_v49  ;;  %v753_v51 = vld [vmem:[%s3648_s15 + $0x330] sm:$0xff] }
  0x37   : > { %752 = vst [vmem:[%s3653_s16 + $0x190] sm:$0xff] %v751_v50  ;;  %v755_v52 = vld [vmem:[%s3648_s15 + $0x340] sm:$0xff]  ;;  %v757_v53 = vld [vmem:[%s3648_s15 + $0x350] sm:$0xff]  ;;  %754 = vst [vmem:[%s3653_s16 + $0x198] sm:$0xff] %v753_v51 }
  0x38   : > { %756 = vst [vmem:[%s3653_s16 + $0x1a0] sm:$0xff] %v755_v52  ;;  %758 = vst [vmem:[%s3653_s16 + $0x1a8] sm:$0xff] %v757_v53  ;;  %v759_v54 = vld [vmem:[%s3648_s15 + $0x360] sm:$0xff]  ;;  %v761_v55 = vld [vmem:[%s3648_s15 + $0x370] sm:$0xff] }
  0x39   : > { %v763_v56 = vld [vmem:[%s3648_s15 + $0x380] sm:$0xff]  ;;  %760 = vst [vmem:[%s3653_s16 + $0x1b0] sm:$0xff] %v759_v54  ;;  %762 = vst [vmem:[%s3653_s16 + $0x1b8] sm:$0xff] %v761_v55  ;;  %v765_v57 = vld [vmem:[%s3648_s15 + $0x390] sm:$0xff] }
  0x3a   : > { %764 = vst [vmem:[%s3653_s16 + $0x1c0] sm:$0xff] %v763_v56  ;;  %v767_v58 = vld [vmem:[%s3648_s15 + $0x3a0] sm:$0xff]  ;;  %v769_v59 = vld [vmem:[%s3648_s15 + $0x3b0] sm:$0xff]  ;;  %766 = vst [vmem:[%s3653_s16 + $0x1c8] sm:$0xff] %v765_v57 }
  0x3b   : > { %768 = vst [vmem:[%s3653_s16 + $0x1d0] sm:$0xff] %v767_v58  ;;  %770 = vst [vmem:[%s3653_s16 + $0x1d8] sm:$0xff] %v769_v59  ;;  %v771_v60 = vld [vmem:[%s3648_s15 + $0x3c0] sm:$0xff]  ;;  %v773_v61 = vld [vmem:[%s3648_s15 + $0x3d0] sm:$0xff] }
  0x3c   : > { %v775_v62 = vld [vmem:[%s3648_s15 + $0x3e0] sm:$0xff]  ;;  %772 = vst [vmem:[%s3653_s16 + $0x1e0] sm:$0xff] %v771_v60  ;;  %774 = vst [vmem:[%s3653_s16 + $0x1e8] sm:$0xff] %v773_v61  ;;  %v777_v63 = vld [vmem:[%s3648_s15 + $0x3f0] sm:$0xff] }
  0x3d   : > { %776 = vst [vmem:[%s3653_s16 + $0x1f0] sm:$0xff] %v775_v62  ;;  %v779_v0 = vld [vmem:[%s3648_s15 + $0x400] sm:$0xff]  ;;  %v781_v1 = vld [vmem:[%s3648_s15 + $0x410] sm:$0xff]  ;;  %778 = vst [vmem:[%s3653_s16 + $0x1f8] sm:$0xff] %v777_v63 }
  0x3e   : > { %780 = vst [vmem:[%s3653_s16 + $0x200] sm:$0xff] %v779_v0  ;;  %782 = vst [vmem:[%s3653_s16 + $0x208] sm:$0xff] %v781_v1  ;;  %v783_v2 = vld [vmem:[%s3648_s15 + $0x420] sm:$0xff]  ;;  %v785_v3 = vld [vmem:[%s3648_s15 + $0x430] sm:$0xff] }
  0x3f   : > { %v787_v4 = vld [vmem:[%s3648_s15 + $0x440] sm:$0xff]  ;;  %784 = vst [vmem:[%s3653_s16 + $0x210] sm:$0xff] %v783_v2  ;;  %786 = vst [vmem:[%s3653_s16 + $0x218] sm:$0xff] %v785_v3  ;;  %v789_v5 = vld [vmem:[%s3648_s15 + $0x450] sm:$0xff] }
  0x40   : > { %788 = vst [vmem:[%s3653_s16 + $0x220] sm:$0xff] %v787_v4  ;;  %v791_v6 = vld [vmem:[%s3648_s15 + $0x460] sm:$0xff]  ;;  %v793_v7 = vld [vmem:[%s3648_s15 + $0x470] sm:$0xff]  ;;  %790 = vst [vmem:[%s3653_s16 + $0x228] sm:$0xff] %v789_v5 }
  0x41   : > { %792 = vst [vmem:[%s3653_s16 + $0x230] sm:$0xff] %v791_v6  ;;  %794 = vst [vmem:[%s3653_s16 + $0x238] sm:$0xff] %v793_v7  ;;  %v795_v8 = vld [vmem:[%s3648_s15 + $0x480] sm:$0xff]  ;;  %v797_v9 = vld [vmem:[%s3648_s15 + $0x490] sm:$0xff] }
  0x42   : > { %v799_v10 = vld [vmem:[%s3648_s15 + $0x4a0] sm:$0xff]  ;;  %796 = vst [vmem:[%s3653_s16 + $0x240] sm:$0xff] %v795_v8  ;;  %798 = vst [vmem:[%s3653_s16 + $0x248] sm:$0xff] %v797_v9  ;;  %v801_v11 = vld [vmem:[%s3648_s15 + $0x4b0] sm:$0xff] }
  0x43   : > { %800 = vst [vmem:[%s3653_s16 + $0x250] sm:$0xff] %v799_v10  ;;  %v803_v12 = vld [vmem:[%s3648_s15 + $0x4c0] sm:$0xff]  ;;  %v805_v13 = vld [vmem:[%s3648_s15 + $0x4d0] sm:$0xff]  ;;  %802 = vst [vmem:[%s3653_s16 + $0x258] sm:$0xff] %v801_v11 }
  0x44   : > { %804 = vst [vmem:[%s3653_s16 + $0x260] sm:$0xff] %v803_v12  ;;  %806 = vst [vmem:[%s3653_s16 + $0x268] sm:$0xff] %v805_v13  ;;  %v807_v14 = vld [vmem:[%s3648_s15 + $0x4e0] sm:$0xff]  ;;  %v809_v15 = vld [vmem:[%s3648_s15 + $0x4f0] sm:$0xff] }
  0x45   : > { %v811_v16 = vld [vmem:[%s3648_s15 + $0x500] sm:$0xff]  ;;  %808 = vst [vmem:[%s3653_s16 + $0x270] sm:$0xff] %v807_v14  ;;  %810 = vst [vmem:[%s3653_s16 + $0x278] sm:$0xff] %v809_v15  ;;  %v813_v17 = vld [vmem:[%s3648_s15 + $0x510] sm:$0xff] }
  0x46   : > { %812 = vst [vmem:[%s3653_s16 + $0x280] sm:$0xff] %v811_v16  ;;  %v815_v18 = vld [vmem:[%s3648_s15 + $0x520] sm:$0xff]  ;;  %v817_v19 = vld [vmem:[%s3648_s15 + $0x530] sm:$0xff]  ;;  %814 = vst [vmem:[%s3653_s16 + $0x288] sm:$0xff] %v813_v17 }
  0x47   : > { %816 = vst [vmem:[%s3653_s16 + $0x290] sm:$0xff] %v815_v18  ;;  %818 = vst [vmem:[%s3653_s16 + $0x298] sm:$0xff] %v817_v19  ;;  %v819_v20 = vld [vmem:[%s3648_s15 + $0x540] sm:$0xff]  ;;  %v821_v21 = vld [vmem:[%s3648_s15 + $0x550] sm:$0xff] }
  0x48   : > { %v823_v22 = vld [vmem:[%s3648_s15 + $0x560] sm:$0xff]  ;;  %820 = vst [vmem:[%s3653_s16 + $0x2a0] sm:$0xff] %v819_v20  ;;  %822 = vst [vmem:[%s3653_s16 + $0x2a8] sm:$0xff] %v821_v21  ;;  %v825_v23 = vld [vmem:[%s3648_s15 + $0x570] sm:$0xff] }
  0x49   : > { %824 = vst [vmem:[%s3653_s16 + $0x2b0] sm:$0xff] %v823_v22  ;;  %v827_v24 = vld [vmem:[%s3648_s15 + $0x580] sm:$0xff]  ;;  %v829_v25 = vld [vmem:[%s3648_s15 + $0x590] sm:$0xff]  ;;  %826 = vst [vmem:[%s3653_s16 + $0x2b8] sm:$0xff] %v825_v23 }
  0x4a   : > { %828 = vst [vmem:[%s3653_s16 + $0x2c0] sm:$0xff] %v827_v24  ;;  %830 = vst [vmem:[%s3653_s16 + $0x2c8] sm:$0xff] %v829_v25  ;;  %v831_v26 = vld [vmem:[%s3648_s15 + $0x5a0] sm:$0xff]  ;;  %v833_v27 = vld [vmem:[%s3648_s15 + $0x5b0] sm:$0xff] }
  0x4b   : > { %v835_v28 = vld [vmem:[%s3648_s15 + $0x5c0] sm:$0xff]  ;;  %832 = vst [vmem:[%s3653_s16 + $0x2d0] sm:$0xff] %v831_v26  ;;  %834 = vst [vmem:[%s3653_s16 + $0x2d8] sm:$0xff] %v833_v27  ;;  %v837_v29 = vld [vmem:[%s3648_s15 + $0x5d0] sm:$0xff] }
  0x4c   : > { %836 = vst [vmem:[%s3653_s16 + $0x2e0] sm:$0xff] %v835_v28  ;;  %v839_v30 = vld [vmem:[%s3648_s15 + $0x5e0] sm:$0xff]  ;;  %v841_v31 = vld [vmem:[%s3648_s15 + $0x5f0] sm:$0xff]  ;;  %838 = vst [vmem:[%s3653_s16 + $0x2e8] sm:$0xff] %v837_v29 }
  0x4d   : > { %840 = vst [vmem:[%s3653_s16 + $0x2f0] sm:$0xff] %v839_v30  ;;  %842 = vst [vmem:[%s3653_s16 + $0x2f8] sm:$0xff] %v841_v31  ;;  %v843_v32 = vld [vmem:[%s3648_s15 + $0x600] sm:$0xff]  ;;  %v845_v33 = vld [vmem:[%s3648_s15 + $0x610] sm:$0xff] }
  0x4e   : > { %v847_v34 = vld [vmem:[%s3648_s15 + $0x620] sm:$0xff]  ;;  %844 = vst [vmem:[%s3653_s16 + $0x300] sm:$0xff] %v843_v32  ;;  %846 = vst [vmem:[%s3653_s16 + $0x308] sm:$0xff] %v845_v33  ;;  %v849_v35 = vld [vmem:[%s3648_s15 + $0x630] sm:$0xff] }
  0x4f   : > { %848 = vst [vmem:[%s3653_s16 + $0x310] sm:$0xff] %v847_v34  ;;  %v851_v36 = vld [vmem:[%s3648_s15 + $0x640] sm:$0xff]  ;;  %v853_v37 = vld [vmem:[%s3648_s15 + $0x650] sm:$0xff]  ;;  %850 = vst [vmem:[%s3653_s16 + $0x318] sm:$0xff] %v849_v35 }
  0x50   : > { %852 = vst [vmem:[%s3653_s16 + $0x320] sm:$0xff] %v851_v36  ;;  %854 = vst [vmem:[%s3653_s16 + $0x328] sm:$0xff] %v853_v37  ;;  %v855_v38 = vld [vmem:[%s3648_s15 + $0x660] sm:$0xff]  ;;  %v857_v39 = vld [vmem:[%s3648_s15 + $0x670] sm:$0xff] }
  0x51   : > { %v859_v40 = vld [vmem:[%s3648_s15 + $0x680] sm:$0xff]  ;;  %856 = vst [vmem:[%s3653_s16 + $0x330] sm:$0xff] %v855_v38  ;;  %858 = vst [vmem:[%s3653_s16 + $0x338] sm:$0xff] %v857_v39  ;;  %v861_v41 = vld [vmem:[%s3648_s15 + $0x690] sm:$0xff] }
  0x52   : > { %860 = vst [vmem:[%s3653_s16 + $0x340] sm:$0xff] %v859_v40  ;;  %v863_v42 = vld [vmem:[%s3648_s15 + $0x6a0] sm:$0xff]  ;;  %v865_v43 = vld [vmem:[%s3648_s15 + $0x6b0] sm:$0xff]  ;;  %862 = vst [vmem:[%s3653_s16 + $0x348] sm:$0xff] %v861_v41 }
  0x53   : > { %864 = vst [vmem:[%s3653_s16 + $0x350] sm:$0xff] %v863_v42  ;;  %866 = vst [vmem:[%s3653_s16 + $0x358] sm:$0xff] %v865_v43  ;;  %v867_v44 = vld [vmem:[%s3648_s15 + $0x6c0] sm:$0xff]  ;;  %v869_v45 = vld [vmem:[%s3648_s15 + $0x6d0] sm:$0xff] }
  0x54   : > { %v871_v46 = vld [vmem:[%s3648_s15 + $0x6e0] sm:$0xff]  ;;  %868 = vst [vmem:[%s3653_s16 + $0x360] sm:$0xff] %v867_v44  ;;  %870 = vst [vmem:[%s3653_s16 + $0x368] sm:$0xff] %v869_v45  ;;  %v873_v47 = vld [vmem:[%s3648_s15 + $0x6f0] sm:$0xff] }
  0x55   : > { %872 = vst [vmem:[%s3653_s16 + $0x370] sm:$0xff] %v871_v46  ;;  %v875_v48 = vld [vmem:[%s3648_s15 + $0x700] sm:$0xff]  ;;  %v877_v49 = vld [vmem:[%s3648_s15 + $0x710] sm:$0xff]  ;;  %874 = vst [vmem:[%s3653_s16 + $0x378] sm:$0xff] %v873_v47 }
  0x56   : > { %876 = vst [vmem:[%s3653_s16 + $0x380] sm:$0xff] %v875_v48  ;;  %878 = vst [vmem:[%s3653_s16 + $0x388] sm:$0xff] %v877_v49  ;;  %v879_v50 = vld [vmem:[%s3648_s15 + $0x720] sm:$0xff]  ;;  %v881_v51 = vld [vmem:[%s3648_s15 + $0x730] sm:$0xff] }
  0x57   : > { %v883_v52 = vld [vmem:[%s3648_s15 + $0x740] sm:$0xff]  ;;  %880 = vst [vmem:[%s3653_s16 + $0x390] sm:$0xff] %v879_v50  ;;  %882 = vst [vmem:[%s3653_s16 + $0x398] sm:$0xff] %v881_v51  ;;  %v885_v53 = vld [vmem:[%s3648_s15 + $0x750] sm:$0xff] }
  0x58   : > { %884 = vst [vmem:[%s3653_s16 + $0x3a0] sm:$0xff] %v883_v52  ;;  %v887_v54 = vld [vmem:[%s3648_s15 + $0x760] sm:$0xff]  ;;  %v889_v55 = vld [vmem:[%s3648_s15 + $0x770] sm:$0xff]  ;;  %886 = vst [vmem:[%s3653_s16 + $0x3a8] sm:$0xff] %v885_v53 }
  0x59   : > { %888 = vst [vmem:[%s3653_s16 + $0x3b0] sm:$0xff] %v887_v54  ;;  %890 = vst [vmem:[%s3653_s16 + $0x3b8] sm:$0xff] %v889_v55  ;;  %v891_v56 = vld [vmem:[%s3648_s15 + $0x780] sm:$0xff]  ;;  %v893_v57 = vld [vmem:[%s3648_s15 + $0x790] sm:$0xff] }
  0x5a   : > { %v895_v58 = vld [vmem:[%s3648_s15 + $0x7a0] sm:$0xff]  ;;  %892 = vst [vmem:[%s3653_s16 + $0x3c0] sm:$0xff] %v891_v56  ;;  %894 = vst [vmem:[%s3653_s16 + $0x3c8] sm:$0xff] %v893_v57  ;;  %v897_v59 = vld [vmem:[%s3648_s15 + $0x7b0] sm:$0xff] }
  0x5b   : > { %896 = vst [vmem:[%s3653_s16 + $0x3d0] sm:$0xff] %v895_v58  ;;  %v899_v60 = vld [vmem:[%s3648_s15 + $0x7c0] sm:$0xff]  ;;  %v901_v61 = vld [vmem:[%s3648_s15 + $0x7d0] sm:$0xff]  ;;  %898 = vst [vmem:[%s3653_s16 + $0x3d8] sm:$0xff] %v897_v59 }
  0x5c   : > { %900 = vst [vmem:[%s3653_s16 + $0x3e0] sm:$0xff] %v899_v60  ;;  %902 = vst [vmem:[%s3653_s16 + $0x3e8] sm:$0xff] %v901_v61  ;;  %v903_v62 = vld [vmem:[%s3648_s15 + $0x7e0] sm:$0xff]  ;;  %v905_v63 = vld [vmem:[%s3648_s15 + $0x7f0] sm:$0xff] }
  0x5d   : > { %v907_v0 = vld [vmem:[%s3648_s15 + $0x800] sm:$0xff]  ;;  %904 = vst [vmem:[%s3653_s16 + $0x3f0] sm:$0xff] %v903_v62  ;;  %906 = vst [vmem:[%s3653_s16 + $0x3f8] sm:$0xff] %v905_v63  ;;  %v909_v1 = vld [vmem:[%s3648_s15 + $0x810] sm:$0xff] }
  0x5e   : > { %908 = vst [vmem:[%s3653_s16 + $0x400] sm:$0xff] %v907_v0  ;;  %v911_v2 = vld [vmem:[%s3648_s15 + $0x820] sm:$0xff]  ;;  %v913_v3 = vld [vmem:[%s3648_s15 + $0x830] sm:$0xff]  ;;  %910 = vst [vmem:[%s3653_s16 + $0x408] sm:$0xff] %v909_v1 }
  0x5f   : > { %912 = vst [vmem:[%s3653_s16 + $0x410] sm:$0xff] %v911_v2  ;;  %914 = vst [vmem:[%s3653_s16 + $0x418] sm:$0xff] %v913_v3  ;;  %v915_v4 = vld [vmem:[%s3648_s15 + $0x840] sm:$0xff]  ;;  %v917_v5 = vld [vmem:[%s3648_s15 + $0x850] sm:$0xff] }
  0x60   : > { %v919_v6 = vld [vmem:[%s3648_s15 + $0x860] sm:$0xff]  ;;  %916 = vst [vmem:[%s3653_s16 + $0x420] sm:$0xff] %v915_v4  ;;  %918 = vst [vmem:[%s3653_s16 + $0x428] sm:$0xff] %v917_v5  ;;  %v921_v7 = vld [vmem:[%s3648_s15 + $0x870] sm:$0xff] }
  0x61   : > { %920 = vst [vmem:[%s3653_s16 + $0x430] sm:$0xff] %v919_v6  ;;  %v923_v8 = vld [vmem:[%s3648_s15 + $0x880] sm:$0xff]  ;;  %v925_v9 = vld [vmem:[%s3648_s15 + $0x890] sm:$0xff]  ;;  %922 = vst [vmem:[%s3653_s16 + $0x438] sm:$0xff] %v921_v7 }
  0x62   : > { %924 = vst [vmem:[%s3653_s16 + $0x440] sm:$0xff] %v923_v8  ;;  %926 = vst [vmem:[%s3653_s16 + $0x448] sm:$0xff] %v925_v9  ;;  %v927_v10 = vld [vmem:[%s3648_s15 + $0x8a0] sm:$0xff]  ;;  %v929_v11 = vld [vmem:[%s3648_s15 + $0x8b0] sm:$0xff] }
  0x63   : > { %v931_v12 = vld [vmem:[%s3648_s15 + $0x8c0] sm:$0xff]  ;;  %928 = vst [vmem:[%s3653_s16 + $0x450] sm:$0xff] %v927_v10  ;;  %930 = vst [vmem:[%s3653_s16 + $0x458] sm:$0xff] %v929_v11  ;;  %v933_v13 = vld [vmem:[%s3648_s15 + $0x8d0] sm:$0xff] }
  0x64   : > { %932 = vst [vmem:[%s3653_s16 + $0x460] sm:$0xff] %v931_v12  ;;  %v935_v14 = vld [vmem:[%s3648_s15 + $0x8e0] sm:$0xff]  ;;  %v937_v15 = vld [vmem:[%s3648_s15 + $0x8f0] sm:$0xff]  ;;  %934 = vst [vmem:[%s3653_s16 + $0x468] sm:$0xff] %v933_v13 }
  0x65   : > { %936 = vst [vmem:[%s3653_s16 + $0x470] sm:$0xff] %v935_v14  ;;  %938 = vst [vmem:[%s3653_s16 + $0x478] sm:$0xff] %v937_v15  ;;  %v939_v16 = vld [vmem:[%s3648_s15 + $0x900] sm:$0xff]  ;;  %v941_v17 = vld [vmem:[%s3648_s15 + $0x910] sm:$0xff] }
  0x66   : > { %v943_v18 = vld [vmem:[%s3648_s15 + $0x920] sm:$0xff]  ;;  %940 = vst [vmem:[%s3653_s16 + $0x480] sm:$0xff] %v939_v16  ;;  %942 = vst [vmem:[%s3653_s16 + $0x488] sm:$0xff] %v941_v17  ;;  %v945_v19 = vld [vmem:[%s3648_s15 + $0x930] sm:$0xff] }
  0x67   : > { %944 = vst [vmem:[%s3653_s16 + $0x490] sm:$0xff] %v943_v18  ;;  %v947_v20 = vld [vmem:[%s3648_s15 + $0x940] sm:$0xff]  ;;  %v949_v21 = vld [vmem:[%s3648_s15 + $0x950] sm:$0xff]  ;;  %946 = vst [vmem:[%s3653_s16 + $0x498] sm:$0xff] %v945_v19 }
  0x68   : > { %948 = vst [vmem:[%s3653_s16 + $0x4a0] sm:$0xff] %v947_v20  ;;  %950 = vst [vmem:[%s3653_s16 + $0x4a8] sm:$0xff] %v949_v21  ;;  %v951_v22 = vld [vmem:[%s3648_s15 + $0x960] sm:$0xff]  ;;  %v953_v23 = vld [vmem:[%s3648_s15 + $0x970] sm:$0xff] }
  0x69   : > { %v955_v24 = vld [vmem:[%s3648_s15 + $0x980] sm:$0xff]  ;;  %952 = vst [vmem:[%s3653_s16 + $0x4b0] sm:$0xff] %v951_v22  ;;  %954 = vst [vmem:[%s3653_s16 + $0x4b8] sm:$0xff] %v953_v23  ;;  %v957_v25 = vld [vmem:[%s3648_s15 + $0x990] sm:$0xff] }
  0x6a   : > { %956 = vst [vmem:[%s3653_s16 + $0x4c0] sm:$0xff] %v955_v24  ;;  %v959_v26 = vld [vmem:[%s3648_s15 + $0x9a0] sm:$0xff]  ;;  %v961_v27 = vld [vmem:[%s3648_s15 + $0x9b0] sm:$0xff]  ;;  %958 = vst [vmem:[%s3653_s16 + $0x4c8] sm:$0xff] %v957_v25 }
  0x6b   : > { %960 = vst [vmem:[%s3653_s16 + $0x4d0] sm:$0xff] %v959_v26  ;;  %962 = vst [vmem:[%s3653_s16 + $0x4d8] sm:$0xff] %v961_v27  ;;  %v963_v28 = vld [vmem:[%s3648_s15 + $0x9c0] sm:$0xff]  ;;  %v965_v29 = vld [vmem:[%s3648_s15 + $0x9d0] sm:$0xff] }
  0x6c   : > { %v967_v30 = vld [vmem:[%s3648_s15 + $0x9e0] sm:$0xff]  ;;  %964 = vst [vmem:[%s3653_s16 + $0x4e0] sm:$0xff] %v963_v28  ;;  %966 = vst [vmem:[%s3653_s16 + $0x4e8] sm:$0xff] %v965_v29  ;;  %v969_v31 = vld [vmem:[%s3648_s15 + $0x9f0] sm:$0xff] }
  0x6d   : > { %968 = vst [vmem:[%s3653_s16 + $0x4f0] sm:$0xff] %v967_v30  ;;  %v971_v32 = vld [vmem:[%s3648_s15 + $0xa00] sm:$0xff]  ;;  %v973_v33 = vld [vmem:[%s3648_s15 + $0xa10] sm:$0xff]  ;;  %970 = vst [vmem:[%s3653_s16 + $0x4f8] sm:$0xff] %v969_v31 }
  0x6e   : > { %972 = vst [vmem:[%s3653_s16 + $0x500] sm:$0xff] %v971_v32  ;;  %974 = vst [vmem:[%s3653_s16 + $0x508] sm:$0xff] %v973_v33  ;;  %v975_v34 = vld [vmem:[%s3648_s15 + $0xa20] sm:$0xff]  ;;  %v977_v35 = vld [vmem:[%s3648_s15 + $0xa30] sm:$0xff] }
  0x6f   : > { %v979_v36 = vld [vmem:[%s3648_s15 + $0xa40] sm:$0xff]  ;;  %976 = vst [vmem:[%s3653_s16 + $0x510] sm:$0xff] %v975_v34  ;;  %978 = vst [vmem:[%s3653_s16 + $0x518] sm:$0xff] %v977_v35  ;;  %v981_v37 = vld [vmem:[%s3648_s15 + $0xa50] sm:$0xff] }
  0x70   : > { %980 = vst [vmem:[%s3653_s16 + $0x520] sm:$0xff] %v979_v36  ;;  %v983_v38 = vld [vmem:[%s3648_s15 + $0xa60] sm:$0xff]  ;;  %v985_v39 = vld [vmem:[%s3648_s15 + $0xa70] sm:$0xff]  ;;  %982 = vst [vmem:[%s3653_s16 + $0x528] sm:$0xff] %v981_v37 }
  0x71   : > { %984 = vst [vmem:[%s3653_s16 + $0x530] sm:$0xff] %v983_v38  ;;  %986 = vst [vmem:[%s3653_s16 + $0x538] sm:$0xff] %v985_v39  ;;  %v987_v40 = vld [vmem:[%s3648_s15 + $0xa80] sm:$0xff]  ;;  %v989_v41 = vld [vmem:[%s3648_s15 + $0xa90] sm:$0xff] }
  0x72   : > { %v991_v42 = vld [vmem:[%s3648_s15 + $0xaa0] sm:$0xff]  ;;  %988 = vst [vmem:[%s3653_s16 + $0x540] sm:$0xff] %v987_v40  ;;  %990 = vst [vmem:[%s3653_s16 + $0x548] sm:$0xff] %v989_v41  ;;  %v993_v43 = vld [vmem:[%s3648_s15 + $0xab0] sm:$0xff] }
  0x73   : > { %992 = vst [vmem:[%s3653_s16 + $0x550] sm:$0xff] %v991_v42  ;;  %v995_v44 = vld [vmem:[%s3648_s15 + $0xac0] sm:$0xff]  ;;  %v997_v45 = vld [vmem:[%s3648_s15 + $0xad0] sm:$0xff]  ;;  %994 = vst [vmem:[%s3653_s16 + $0x558] sm:$0xff] %v993_v43 }
  0x74   : > { %996 = vst [vmem:[%s3653_s16 + $0x560] sm:$0xff] %v995_v44  ;;  %998 = vst [vmem:[%s3653_s16 + $0x568] sm:$0xff] %v997_v45  ;;  %v999_v46 = vld [vmem:[%s3648_s15 + $0xae0] sm:$0xff]  ;;  %v1001_v47 = vld [vmem:[%s3648_s15 + $0xaf0] sm:$0xff] }
  0x75   : > { %v1003_v48 = vld [vmem:[%s3648_s15 + $0xb00] sm:$0xff]  ;;  %1000 = vst [vmem:[%s3653_s16 + $0x570] sm:$0xff] %v999_v46  ;;  %1002 = vst [vmem:[%s3653_s16 + $0x578] sm:$0xff] %v1001_v47  ;;  %v1005_v49 = vld [vmem:[%s3648_s15 + $0xb10] sm:$0xff] }
  0x76   : > { %1004 = vst [vmem:[%s3653_s16 + $0x580] sm:$0xff] %v1003_v48  ;;  %v1007_v50 = vld [vmem:[%s3648_s15 + $0xb20] sm:$0xff]  ;;  %v1009_v51 = vld [vmem:[%s3648_s15 + $0xb30] sm:$0xff]  ;;  %1006 = vst [vmem:[%s3653_s16 + $0x588] sm:$0xff] %v1005_v49 }
  0x77   : > { %1008 = vst [vmem:[%s3653_s16 + $0x590] sm:$0xff] %v1007_v50  ;;  %1010 = vst [vmem:[%s3653_s16 + $0x598] sm:$0xff] %v1009_v51  ;;  %v1011_v52 = vld [vmem:[%s3648_s15 + $0xb40] sm:$0xff]  ;;  %v1013_v53 = vld [vmem:[%s3648_s15 + $0xb50] sm:$0xff] }
  0x78   : > { %v1015_v54 = vld [vmem:[%s3648_s15 + $0xb60] sm:$0xff]  ;;  %1012 = vst [vmem:[%s3653_s16 + $0x5a0] sm:$0xff] %v1011_v52  ;;  %1014 = vst [vmem:[%s3653_s16 + $0x5a8] sm:$0xff] %v1013_v53  ;;  %v1017_v55 = vld [vmem:[%s3648_s15 + $0xb70] sm:$0xff] }
  0x79   : > { %1016 = vst [vmem:[%s3653_s16 + $0x5b0] sm:$0xff] %v1015_v54  ;;  %v1019_v56 = vld [vmem:[%s3648_s15 + $0xb80] sm:$0xff]  ;;  %v1021_v57 = vld [vmem:[%s3648_s15 + $0xb90] sm:$0xff]  ;;  %1018 = vst [vmem:[%s3653_s16 + $0x5b8] sm:$0xff] %v1017_v55 }
  0x7a   : > { %1020 = vst [vmem:[%s3653_s16 + $0x5c0] sm:$0xff] %v1019_v56  ;;  %1022 = vst [vmem:[%s3653_s16 + $0x5c8] sm:$0xff] %v1021_v57  ;;  %v1023_v58 = vld [vmem:[%s3648_s15 + $0xba0] sm:$0xff]  ;;  %v1025_v59 = vld [vmem:[%s3648_s15 + $0xbb0] sm:$0xff] }
  0x7b   : > { %v1027_v60 = vld [vmem:[%s3648_s15 + $0xbc0] sm:$0xff]  ;;  %1024 = vst [vmem:[%s3653_s16 + $0x5d0] sm:$0xff] %v1023_v58  ;;  %1026 = vst [vmem:[%s3653_s16 + $0x5d8] sm:$0xff] %v1025_v59  ;;  %v1029_v61 = vld [vmem:[%s3648_s15 + $0xbd0] sm:$0xff] }
  0x7c   : > { %1028 = vst [vmem:[%s3653_s16 + $0x5e0] sm:$0xff] %v1027_v60  ;;  %v1031_v62 = vld [vmem:[%s3648_s15 + $0xbe0] sm:$0xff]  ;;  %v1033_v63 = vld [vmem:[%s3648_s15 + $0xbf0] sm:$0xff]  ;;  %1030 = vst [vmem:[%s3653_s16 + $0x5e8] sm:$0xff] %v1029_v61 }
  0x7d   : > { %1032 = vst [vmem:[%s3653_s16 + $0x5f0] sm:$0xff] %v1031_v62  ;;  %1034 = vst [vmem:[%s3653_s16 + $0x5f8] sm:$0xff] %v1033_v63 }
  0x7e PF: > { %p2922_p7 = scmp.ge.s32.totalorder %s3555_s24, 1  ;;  %p1047_p8 = scmp.lt.s32.totalorder %s3555_s24, 7 }
  0x80   : > { %p1048_p9 = pnand %p2922_p7, %p1047_p8 }
  0x81   : > { %s1054_s17 = sand.u32 (!%p1048_p9), 1, %s3531_s18   ;;  %s1116_s27 = smul.u32 (!%p1048_p9), 12, %s3539_s20 }
  0x82   : > { %1051 = sbr.rel (%p1048_p9) target bundleno = 588 (0x24c), region = 66  ;;  %s2924_s29 = sshll.u32 (!%p1048_p9), %s3543_s21, 1 }
  0x83   : > { %s3143_s28 = smul.u32 (!%p1048_p9), 1536, %s1054_s17  ;;  %p1119_p10 = scmp.lt.s32.totalorder (!%p1048_p9), %s1116_s27, 35 }
  0x84   : > { %p1129_p11 = scmp.lt.s32.totalorder (!%p1048_p9), %s2924_s29, 3  ;;  %p2931_p12 = scmp.ne.s32.totalorder (!%p1048_p9), %s3539_s20, 0 }
  0x85   : > { %s4069_s8 = scalar_lea.vmem (!%p1048_p9), [#allocation3], %s3143_s28 }
  0x89   : > { %s4347_s27 = smov (!%p1119_p10, %s1116_s27), 35  ;;  %s4349_s29 = smov (!%p1129_p11, %s2924_s29), 3 }
  0x8a   : > { %s2923_s30 = sshll.u32 %s4347_s27, 2  ;;  %s1131_s18 = scalar_lea.vmem %s4328_s2, %s4349_s29  ;;  %v3557_v0 = vmov (!%p2931_p12), 0.0  }
  0x8b   : > { %s4046_s9 = scalar_lea.vmem %s4326_s0, %s2923_s30  ;;  %s2926_s12 = sshll.u32 %s4349_s29, 2  ;;  %1168 = vst [vmem:[#allocation2] sm:$0xff] (!%p2931_p12), %v3557_v0  ;;  %1169 = vst [vmem:[#allocation2 + $0x8] sm:$0xff] (!%p2931_p12), %v3557_v0 }
  0x8c   : > { %s2928_s21 = sshll.u32 %s4349_s29, 3  ;;  %s4057_s15 = scalar_lea.vmem %s4329_s3, %s2926_s12 }
  0x8d   : > { %s4062_s27 = scalar_lea.vmem %s4330_s4, %s2928_s21  ;;  %s4067_s30 = scalar_lea.vmem %s4331_s5, %s2928_s21 }
  0x8e   : > { %1167 = sbr.rel (%p2931_p12) target bundleno = 149 (0x95), region = 74 }
  0x95 PF: > { %v3201_v1 = vld [vmem:[%s4069_s8 + $0x4] ss:$8 sps:$4 sm:$0xff]   ;;  %v3205_v3 = vld [vmem:[%s4069_s8] ss:$8 sps:$4 sm:$0xff]   ;;  %v3207_v5 = vld [vmem:[%s4069_s8 + $0x14] ss:$8 sps:$4 sm:$0xff]  }
  0x96   : > { %v3203_v2 = vld [vmem:[%s4069_s8 + $0x104] ss:$8 sps:$4 sm:$0xff]   ;;  %2372 = vmatprep.subr.bf16.mxu0 %v3201_v1  ;;  %v3206_v4 = vld [vmem:[%s4069_s8 + $0x100] ss:$8 sps:$4 sm:$0xff]   ;;  %v3209_v6 = vld [vmem:[%s4069_s8 + $0x114] ss:$8 sps:$4 sm:$0xff]  }
  0x97   : > { %2413 = vmatprep.subr.bf16.mxu1 %v3203_v2  ;;  %2373 = vmatpush1.bf16.msra.mxu0 %v3205_v3  ;;  %v3211_v7 = vld [vmem:[%s4069_s8 + $0x10] ss:$8 sps:$4 sm:$0xff]   ;;  %v3213_v9 = vld [vmem:[%s4069_s8 + $0x24] ss:$8 sps:$4 sm:$0xff]   ;;  %v3217_v11 = vld [vmem:[%s4069_s8 + $0x20] ss:$8 sps:$4 sm:$0xff]  }
  0x98   : > { %2414 = vmatpush1.bf16.msra.mxu1 %v3206_v4  ;;  %2374 = vmatprep.subr.bf16.mxu0 %v3207_v5  ;;  %v3212_v8 = vld [vmem:[%s4069_s8 + $0x110] ss:$8 sps:$4 sm:$0xff]   ;;  %v3215_v10 = vld [vmem:[%s4069_s8 + $0x124] ss:$8 sps:$4 sm:$0xff]   ;;  %v3218_v12 = vld [vmem:[%s4069_s8 + $0x120] ss:$8 sps:$4 sm:$0xff]  }
  0x99   : > { %2415 = vmatprep.subr.bf16.mxu1 %v3209_v6  ;;  %v3219_v13 = vld [vmem:[%s4069_s8 + $0x34] ss:$8 sps:$4 sm:$0xff]   ;;  %v3223_v15 = vld [vmem:[%s4069_s8 + $0x30] ss:$8 sps:$4 sm:$0xff]   ;;  %v3225_v17 = vld [vmem:[%s4069_s8 + $0x44] ss:$8 sps:$4 sm:$0xff]  }
  0x9a   : > { %v3221_v14 = vld [vmem:[%s4069_s8 + $0x134] ss:$8 sps:$4 sm:$0xff]   ;;  %v3224_v16 = vld [vmem:[%s4069_s8 + $0x130] ss:$8 sps:$4 sm:$0xff]   ;;  %v3227_v18 = vld [vmem:[%s4069_s8 + $0x144] ss:$8 sps:$4 sm:$0xff]  }
  0x9b   : > { %2375 = vmatpush1.bf16.msra.mxu0 %v3211_v7  ;;  %v3229_v19 = vld [vmem:[%s4069_s8 + $0x40] ss:$8 sps:$4 sm:$0xff]   ;;  %v3231_v21 = vld [vmem:[%s4069_s8 + $0x54] ss:$8 sps:$4 sm:$0xff]   ;;  %v3235_v23 = vld [vmem:[%s4069_s8 + $0x50] ss:$8 sps:$4 sm:$0xff]  }
  0x9c   : > { %2416 = vmatpush1.bf16.msra.mxu1 %v3212_v8  ;;  %2376 = vmatprep.subr.bf16.mxu0 %v3213_v9  ;;  %v3230_v20 = vld [vmem:[%s4069_s8 + $0x140] ss:$8 sps:$4 sm:$0xff]   ;;  %v3233_v22 = vld [vmem:[%s4069_s8 + $0x154] ss:$8 sps:$4 sm:$0xff]   ;;  %v3236_v24 = vld [vmem:[%s4069_s8 + $0x150] ss:$8 sps:$4 sm:$0xff]  }
  0x9d   : > { %2417 = vmatprep.subr.bf16.mxu1 %v3215_v10  ;;  %v3237_v25 = vld [vmem:[%s4069_s8 + $0x64] ss:$8 sps:$4 sm:$0xff]   ;;  %v3241_v27 = vld [vmem:[%s4069_s8 + $0x60] ss:$8 sps:$4 sm:$0xff]   ;;  %v3243_v29 = vld [vmem:[%s4069_s8 + $0x74] ss:$8 sps:$4 sm:$0xff]  }
  0x9e   : > { %v3239_v26 = vld [vmem:[%s4069_s8 + $0x164] ss:$8 sps:$4 sm:$0xff]   ;;  %v3242_v28 = vld [vmem:[%s4069_s8 + $0x160] ss:$8 sps:$4 sm:$0xff]   ;;  %v3245_v30 = vld [vmem:[%s4069_s8 + $0x174] ss:$8 sps:$4 sm:$0xff]  }
  0x9f   : > { %2377 = vmatpush1.bf16.msra.mxu0 %v3217_v11  ;;  %v3247_v31 = vld [vmem:[%s4069_s8 + $0x70] ss:$8 sps:$4 sm:$0xff]   ;;  %v3249_v33 = vld [vmem:[%s4069_s8 + $0x84] ss:$8 sps:$4 sm:$0xff]   ;;  %v3253_v35 = vld [vmem:[%s4069_s8 + $0x80] ss:$8 sps:$4 sm:$0xff]  }
  0xa0   : > { %2418 = vmatpush1.bf16.msra.mxu1 %v3218_v12  ;;  %2378 = vmatprep.subr.bf16.mxu0 %v3219_v13  ;;  %v3248_v32 = vld [vmem:[%s4069_s8 + $0x170] ss:$8 sps:$4 sm:$0xff]   ;;  %v3251_v34 = vld [vmem:[%s4069_s8 + $0x184] ss:$8 sps:$4 sm:$0xff]   ;;  %v3254_v36 = vld [vmem:[%s4069_s8 + $0x180] ss:$8 sps:$4 sm:$0xff]  }
  0xa1   : > { %2419 = vmatprep.subr.bf16.mxu1 %v3221_v14  ;;  %v3255_v37 = vld [vmem:[%s4069_s8 + $0x94] ss:$8 sps:$4 sm:$0xff]   ;;  %v3259_v39 = vld [vmem:[%s4069_s8 + $0x90] ss:$8 sps:$4 sm:$0xff]   ;;  %v3261_v41 = vld [vmem:[%s4069_s8 + $0xa4] ss:$8 sps:$4 sm:$0xff]  }
  0xa2   : > { %v3257_v38 = vld [vmem:[%s4069_s8 + $0x194] ss:$8 sps:$4 sm:$0xff]   ;;  %v3260_v40 = vld [vmem:[%s4069_s8 + $0x190] ss:$8 sps:$4 sm:$0xff]   ;;  %v3263_v42 = vld [vmem:[%s4069_s8 + $0x1a4] ss:$8 sps:$4 sm:$0xff]  }
  0xa3   : > { %2379 = vmatpush1.bf16.msra.mxu0 %v3223_v15  ;;  %v3265_v43 = vld [vmem:[%s4069_s8 + $0xa0] ss:$8 sps:$4 sm:$0xff]   ;;  %v3267_v45 = vld [vmem:[%s4069_s8 + $0xb4] ss:$8 sps:$4 sm:$0xff]   ;;  %v3271_v50 = vld [vmem:[%s4069_s8 + $0xb0] ss:$8 sps:$4 sm:$0xff]  }
  0xa4   : > { %2420 = vmatpush1.bf16.msra.mxu1 %v3224_v16  ;;  %2380 = vmatprep.subr.bf16.mxu0 %v3225_v17  ;;  %v3266_v44 = vld [vmem:[%s4069_s8 + $0x1a0] ss:$8 sps:$4 sm:$0xff]   ;;  %v3269_v46 = vld [vmem:[%s4069_s8 + $0x1b4] ss:$8 sps:$4 sm:$0xff]   ;;  %v3272_v51 = vld [vmem:[%s4069_s8 + $0x1b0] ss:$8 sps:$4 sm:$0xff]  }
  0xa5   : > { %2421 = vmatprep.subr.bf16.mxu1 %v3227_v18  ;;  %v1172_v47 = vld [vmem:[%s4046_s9] sm:$0xff]  ;;  %v1173_v49 = vld [vmem:[%s4046_s9 + $0x8] sm:$0xff]  ;;  %v3273_v53 = vld [vmem:[%s4069_s8 + $0xc4] ss:$8 sps:$4 sm:$0xff]   ;;  %p3136_p13 = scmp.ne.s32.totalorder %s3539_s20, 2 }
  0xa6   : > { %v2933_v48 = vcombine.high %v1172_v47, %v1172_v47  ;;  %v2935_v52 = vcombine.high %v1173_v49, %v1173_v49  ;;  %v3275_v54 = vld [vmem:[%s4069_s8 + $0x1c4] ss:$8 sps:$4 sm:$0xff]   ;;  %v3277_v55 = vld [vmem:[%s4069_s8 + $0xc0] ss:$8 sps:$4 sm:$0xff]   ;;  %v3279_v57 = vld [vmem:[%s4069_s8 + $0xd4] ss:$8 sps:$4 sm:$0xff]   ;;  %v2932_v7 = vcombine.low %v1172_v47, %v1172_v47  ;;  %v2934_v8 = vcombine.low %v1173_v49, %v1173_v49 }
  0xa7   : > { %2381 = vmatpush1.bf16.msra.mxu0 %v3229_v19  ;;  %v3278_v56 = vld [vmem:[%s4069_s8 + $0x1c0] ss:$8 sps:$4 sm:$0xff]   ;;  %v3281_v58 = vld [vmem:[%s4069_s8 + $0x1d4] ss:$8 sps:$4 sm:$0xff]   ;;  %v3283_v59 = vld [vmem:[%s4069_s8 + $0xd0] ss:$8 sps:$4 sm:$0xff]  }
  0xa8   : > { %2422 = vmatpush1.bf16.msra.mxu1 %v3230_v20  ;;  %2382 = vmatprep.subr.bf16.mxu0 %v3231_v21  ;;  %v3284_v60 = vld [vmem:[%s4069_s8 + $0x1d0] ss:$8 sps:$4 sm:$0xff]   ;;  %v3285_v61 = vld [vmem:[%s4069_s8 + $0xe4] ss:$8 sps:$4 sm:$0xff]   ;;  %v3289_v63 = vld [vmem:[%s4069_s8 + $0xe0] ss:$8 sps:$4 sm:$0xff]  }
  0xa9   : > { %2423 = vmatprep.subr.bf16.mxu1 %v3233_v22  ;;  %2404 = vmatprep.mubr.bf16.mxu0 %v2933_v48  ;;  %v3287_v62 = vld [vmem:[%s4069_s8 + $0x1e4] ss:$8 sps:$4 sm:$0xff]   ;;  %v3290_v0 = vld [vmem:[%s4069_s8 + $0x1e0] ss:$8 sps:$4 sm:$0xff]   ;;  %v3291_v1 = vld [vmem:[%s4069_s8 + $0xf4] ss:$8 sps:$4 sm:$0xff]  }
  0xaa   : > { %2445 = vmatprep.mubr.bf16.mxu1 %v2935_v52  ;;  %v3293_v2 = vld [vmem:[%s4069_s8 + $0x1f4] ss:$8 sps:$4 sm:$0xff]   ;;  %v3295_v3 = vld [vmem:[%s4069_s8 + $0xf0] ss:$8 sps:$4 sm:$0xff]   ;;  %v3303_v5 = vld [vmem:[%s4069_s8 + $0x204] ss:$8 sps:$4 sm:$0xff]  }
  0xab   : > { %2383 = vmatpush1.bf16.msra.mxu0 %v3235_v23  ;;  %v3296_v4 = vld [vmem:[%s4069_s8 + $0x1f0] ss:$8 sps:$4 sm:$0xff]   ;;  %v3306_v6 = vld [vmem:[%s4069_s8 + $0x304] ss:$8 sps:$4 sm:$0xff]   ;;  %v3301_v9 = vld [vmem:[%s4069_s8 + $0x200] ss:$8 sps:$4 sm:$0xff]  }
  0xac   : > { %2424 = vmatpush1.bf16.msra.mxu1 %v3236_v24  ;;  %2384 = vmatprep.subr.bf16.mxu0 %v3237_v25  ;;  %v3304_v10 = vld [vmem:[%s4069_s8 + $0x300] ss:$8 sps:$4 sm:$0xff]   ;;  %v3309_v11 = vld [vmem:[%s4069_s8 + $0x214] ss:$8 sps:$4 sm:$0xff]   ;;  %v3307_v13 = vld [vmem:[%s4069_s8 + $0x210] ss:$8 sps:$4 sm:$0xff]  }
  0xad   : > { %2425 = vmatprep.subr.bf16.mxu1 %v3239_v26  ;;  %v3312_v12 = vld [vmem:[%s4069_s8 + $0x314] ss:$8 sps:$4 sm:$0xff]   ;;  %v3310_v14 = vld [vmem:[%s4069_s8 + $0x310] ss:$8 sps:$4 sm:$0xff]   ;;  %v3315_v15 = vld [vmem:[%s4069_s8 + $0x224] ss:$8 sps:$4 sm:$0xff]  }
  0xae   : > { %v3318_v16 = vld [vmem:[%s4069_s8 + $0x324] ss:$8 sps:$4 sm:$0xff]   ;;  %v3313_v17 = vld [vmem:[%s4069_s8 + $0x220] ss:$8 sps:$4 sm:$0xff]   ;;  %v3321_v19 = vld [vmem:[%s4069_s8 + $0x234] ss:$8 sps:$4 sm:$0xff]  }
  0xaf   : > { %2385 = vmatpush1.bf16.msra.mxu0 %v3241_v27  ;;  %v3316_v18 = vld [vmem:[%s4069_s8 + $0x320] ss:$8 sps:$4 sm:$0xff]   ;;  %v3324_v20 = vld [vmem:[%s4069_s8 + $0x334] ss:$8 sps:$4 sm:$0xff]   ;;  %v3319_v21 = vld [vmem:[%s4069_s8 + $0x230] ss:$8 sps:$4 sm:$0xff]  }
  0xb0   : > { %2426 = vmatpush1.bf16.msra.mxu1 %v3242_v28  ;;  %2386 = vmatprep.subr.bf16.mxu0 %v3243_v29  ;;  %v3322_v22 = vld [vmem:[%s4069_s8 + $0x330] ss:$8 sps:$4 sm:$0xff]   ;;  %v3327_v23 = vld [vmem:[%s4069_s8 + $0x244] ss:$8 sps:$4 sm:$0xff]   ;;  %v3325_v25 = vld [vmem:[%s4069_s8 + $0x240] ss:$8 sps:$4 sm:$0xff]  }
  0xb1   : > { %2427 = vmatprep.subr.bf16.mxu1 %v3245_v30  ;;  %v3330_v24 = vld [vmem:[%s4069_s8 + $0x344] ss:$8 sps:$4 sm:$0xff]   ;;  %v3328_v26 = vld [vmem:[%s4069_s8 + $0x340] ss:$8 sps:$4 sm:$0xff]   ;;  %v3333_v27 = vld [vmem:[%s4069_s8 + $0x254] ss:$8 sps:$4 sm:$0xff]  }
  0xb2   : > { %v3336_v28 = vld [vmem:[%s4069_s8 + $0x354] ss:$8 sps:$4 sm:$0xff]   ;;  %v3331_v29 = vld [vmem:[%s4069_s8 + $0x250] ss:$8 sps:$4 sm:$0xff]   ;;  %v3366_v52 = vld [vmem:[%s4069_s8 + $0x3a4] ss:$8 sps:$4 sm:$0xff]  }
  0xb3   : > { %2387 = vmatpush1.bf16.msra.mxu0 %v3247_v31  ;;  %v3334_v30 = vld [vmem:[%s4069_s8 + $0x350] ss:$8 sps:$4 sm:$0xff]   ;;  %v3339_v31 = vld [vmem:[%s4069_s8 + $0x264] ss:$8 sps:$4 sm:$0xff]   ;;  %v3357_v47 = vld [vmem:[%s4069_s8 + $0x294] ss:$8 sps:$4 sm:$0xff]  }
  0xb4   : > { %2428 = vmatpush1.bf16.msra.mxu1 %v3248_v32  ;;  %2388 = vmatprep.subr.bf16.mxu0 %v3249_v33  ;;  %v3342_v32 = vld [vmem:[%s4069_s8 + $0x364] ss:$8 sps:$4 sm:$0xff]   ;;  %v3360_v48 = vld [vmem:[%s4069_s8 + $0x394] ss:$8 sps:$4 sm:$0xff]   ;;  %v3355_v49 = vld [vmem:[%s4069_s8 + $0x290] ss:$8 sps:$4 sm:$0xff]  }
  0xb5   : > { %2429 = vmatprep.subr.bf16.mxu1 %v3251_v34  ;;  %v4165_v33 = vld [vmem:[%s4046_s9 + $0x10] sm:$0xff]  ;;  %v4168_v34 = vld [vmem:[%s4046_s9 + $0x18] sm:$0xff] }
  0xb7   : > { %2389 = vmatpush1.bf16.msra.mxu0 %v3253_v35  ;;  %v3337_v35 = vld [vmem:[%s4069_s8 + $0x260] ss:$8 sps:$4 sm:$0xff]  }
  0xb8   : > { %2430 = vmatpush1.bf16.msra.mxu1 %v3254_v36  ;;  %2390 = vmatprep.subr.bf16.mxu0 %v3255_v37  ;;  %v3340_v36 = vld [vmem:[%s4069_s8 + $0x360] ss:$8 sps:$4 sm:$0xff]   ;;  %v2937_v37 = vcombine.high %v4165_v33, %v4165_v33 }
  0xb9   : > { %2431 = vmatprep.subr.bf16.mxu1 %v3257_v38  ;;  %v2939_v38 = vcombine.high %v4168_v34, %v4168_v34 }
  0xbb   : > { %2391 = vmatpush1.bf16.msra.mxu0 %v3259_v39  ;;  %v3345_v39 = vld [vmem:[%s4069_s8 + $0x274] ss:$8 sps:$4 sm:$0xff]  }
  0xbc   : > { %2432 = vmatpush1.bf16.msra.mxu1 %v3260_v40  ;;  %2392 = vmatprep.subr.bf16.mxu0 %v3261_v41  ;;  %v3348_v40 = vld [vmem:[%s4069_s8 + $0x374] ss:$8 sps:$4 sm:$0xff]   ;;  %v3343_v41 = vld [vmem:[%s4069_s8 + $0x270] ss:$8 sps:$4 sm:$0xff]  }
  0xbd   : > { %2433 = vmatprep.subr.bf16.mxu1 %v3263_v42  ;;  %v3346_v42 = vld [vmem:[%s4069_s8 + $0x370] ss:$8 sps:$4 sm:$0xff]  }
  0xbf   : > { %2393 = vmatpush1.bf16.msra.mxu0 %v3265_v43  ;;  %v3351_v43 = vld [vmem:[%s4069_s8 + $0x284] ss:$8 sps:$4 sm:$0xff]  }
  0xc0   : > { %2434 = vmatpush1.bf16.msra.mxu1 %v3266_v44  ;;  %2394 = vmatprep.subr.bf16.mxu0 %v3267_v45  ;;  %v3354_v44 = vld [vmem:[%s4069_s8 + $0x384] ss:$8 sps:$4 sm:$0xff]   ;;  %v3349_v45 = vld [vmem:[%s4069_s8 + $0x280] ss:$8 sps:$4 sm:$0xff]  }
  0xc1   : > { %2435 = vmatprep.subr.bf16.mxu1 %v3269_v46  ;;  %v3352_v46 = vld [vmem:[%s4069_s8 + $0x380] ss:$8 sps:$4 sm:$0xff]  }
  0xc3   : > { %2395 = vmatpush1.bf16.msra.mxu0 %v3271_v50  ;;  %v3358_v50 = vld [vmem:[%s4069_s8 + $0x390] ss:$8 sps:$4 sm:$0xff]  }
  0xc4   : > { %2436 = vmatpush1.bf16.msra.mxu1 %v3272_v51  ;;  %2396 = vmatprep.subr.bf16.mxu0 %v3273_v53  ;;  %v3363_v51 = vld [vmem:[%s4069_s8 + $0x2a4] ss:$8 sps:$4 sm:$0xff]   ;;  %v3361_v53 = vld [vmem:[%s4069_s8 + $0x2a0] ss:$8 sps:$4 sm:$0xff]  }
  0xc5   : > { %2437 = vmatprep.subr.bf16.mxu1 %v3275_v54  ;;  %v3364_v54 = vld [vmem:[%s4069_s8 + $0x3a0] ss:$8 sps:$4 sm:$0xff]  }
  0xc7   : > { %2397 = vmatpush1.bf16.msra.mxu0 %v3277_v55  ;;  %v3369_v55 = vld [vmem:[%s4069_s8 + $0x2b4] ss:$8 sps:$4 sm:$0xff]  }
  0xc8   : > { %2438 = vmatpush1.bf16.msra.mxu1 %v3278_v56  ;;  %2398 = vmatprep.subr.bf16.mxu0 %v3279_v57  ;;  %v3372_v56 = vld [vmem:[%s4069_s8 + $0x3b4] ss:$8 sps:$4 sm:$0xff]   ;;  %v3367_v57 = vld [vmem:[%s4069_s8 + $0x2b0] ss:$8 sps:$4 sm:$0xff]  }
  0xc9   : > { %2439 = vmatprep.subr.bf16.mxu1 %v3281_v58  ;;  %v3370_v58 = vld [vmem:[%s4069_s8 + $0x3b0] ss:$8 sps:$4 sm:$0xff]  }
  0xcb   : > { %2399 = vmatpush1.bf16.msra.mxu0 %v3283_v59  ;;  %v3375_v59 = vld [vmem:[%s4069_s8 + $0x2c4] ss:$8 sps:$4 sm:$0xff]  }
  0xcc   : > { %2440 = vmatpush1.bf16.msra.mxu1 %v3284_v60  ;;  %2400 = vmatprep.subr.bf16.mxu0 %v3285_v61  ;;  %v3378_v60 = vld [vmem:[%s4069_s8 + $0x3c4] ss:$8 sps:$4 sm:$0xff]   ;;  %v3373_v61 = vld [vmem:[%s4069_s8 + $0x2c0] ss:$8 sps:$4 sm:$0xff]  }
  0xcd   : > { %2441 = vmatprep.subr.bf16.mxu1 %v3287_v62  ;;  %v3376_v62 = vld [vmem:[%s4069_s8 + $0x3c0] ss:$8 sps:$4 sm:$0xff]  }
  0xcf   : > { %2401 = vmatpush1.bf16.msra.mxu0 %v3289_v63  ;;  %v3381_v63 = vld [vmem:[%s4069_s8 + $0x2d4] ss:$8 sps:$4 sm:$0xff]  }
  0xd0   : > { %2442 = vmatpush1.bf16.msra.mxu1 %v3290_v0  ;;  %2402 = vmatprep.subr.bf16.mxu0 %v3291_v1  ;;  %v3384_v0 = vld [vmem:[%s4069_s8 + $0x3d4] ss:$8 sps:$4 sm:$0xff]   ;;  %v3379_v1 = vld [vmem:[%s4069_s8 + $0x2d0] ss:$8 sps:$4 sm:$0xff]  }
  0xd1   : > { %2443 = vmatprep.subr.bf16.mxu1 %v3293_v2  ;;  %v3382_v2 = vld [vmem:[%s4069_s8 + $0x3d0] ss:$8 sps:$4 sm:$0xff]  }
  0xd3   : > { %2403 = vmatpush1.bf16.msra.mxu0 %v3295_v3  ;;  %v3387_v3 = vld [vmem:[%s4069_s8 + $0x2e4] ss:$8 sps:$4 sm:$0xff]  }
  0xd4   : > { %2444 = vmatpush1.bf16.msra.mxu1 %v3296_v4  ;;  %2454 = vmatprep.subr.bf16.mxu0 %v3303_v5  ;;  %v3390_v4 = vld [vmem:[%s4069_s8 + $0x3e4] ss:$8 sps:$4 sm:$0xff]   ;;  %v3385_v5 = vld [vmem:[%s4069_s8 + $0x2e0] ss:$8 sps:$4 sm:$0xff]  }
  0xd5   : > { %2495 = vmatprep.subr.bf16.mxu1 %v3306_v6  ;;  %v3388_v6 = vld [vmem:[%s4069_s8 + $0x3e0] ss:$8 sps:$4 sm:$0xff]  }
  0xd6   : > { %2405 = vmatmul.mubr.bf16.vlgmr.msra.gmra.mrb[0].mxu0 %v2932_v7  ;;  %v3393_v7 = vld [vmem:[%s4069_s8 + $0x2f4] ss:$8 sps:$4 sm:$0xff]  }
  0xd7   : > { %2446 = vmatmul.mubr.bf16.vlgmr.msra.gmra.mrb[0].mxu1 %v2934_v8  ;;  %2455 = vmatpush1.bf16.msra.mxu0 %v3301_v9  ;;  %v3396_v8 = vld [vmem:[%s4069_s8 + $0x3f4] ss:$8 sps:$4 sm:$0xff]   ;;  %v3391_v9 = vld [vmem:[%s4069_s8 + $0x2f0] ss:$8 sps:$4 sm:$0xff]  }
  0xd8   : > { %2496 = vmatpush1.bf16.msra.mxu1 %v3304_v10  ;;  %2456 = vmatprep.subr.bf16.mxu0 %v3309_v11  ;;  %v3394_v10 = vld [vmem:[%s4069_s8 + $0x3f0] ss:$8 sps:$4 sm:$0xff]   ;;  %v3403_v11 = vld [vmem:[%s4069_s8 + $0x404] ss:$8 sps:$4 sm:$0xff]  }
  0xd9   : > { %2497 = vmatprep.subr.bf16.mxu1 %v3312_v12  ;;  %2486 = vmatprep.mubr.bf16.mxu0 %v2937_v37  ;;  %v3406_v12 = vld [vmem:[%s4069_s8 + $0x504] ss:$8 sps:$4 sm:$0xff]   ;;  %v3433_v37 = vld [vmem:[%s4069_s8 + $0x454] ss:$8 sps:$4 sm:$0xff]  }
  0xda   : > { %2527 = vmatprep.mubr.bf16.mxu1 %v2939_v38  ;;  %v3436_v38 = vld [vmem:[%s4069_s8 + $0x554] ss:$8 sps:$4 sm:$0xff]  }
  0xdb   : > { %2457 = vmatpush1.bf16.msra.mxu0 %v3307_v13  ;;  %v2936_v13 = vcombine.low %v4165_v33, %v4165_v33  ;;  %v3427_v33 = vld [vmem:[%s4069_s8 + $0x444] ss:$8 sps:$4 sm:$0xff]  }
  0xdc   : > { %2498 = vmatpush1.bf16.msra.mxu1 %v3310_v14  ;;  %2458 = vmatprep.subr.bf16.mxu0 %v3315_v15  ;;  %v2938_v14 = vcombine.low %v4168_v34, %v4168_v34  ;;  %v3401_v15 = vld [vmem:[%s4069_s8 + $0x400] ss:$8 sps:$4 sm:$0xff]   ;;  %v3430_v34 = vld [vmem:[%s4069_s8 + $0x544] ss:$8 sps:$4 sm:$0xff]  }
  0xdd   : > { %2499 = vmatprep.subr.bf16.mxu1 %v3318_v16  ;;  %v3404_v16 = vld [vmem:[%s4069_s8 + $0x500] ss:$8 sps:$4 sm:$0xff]  }
  0xdf   : > { %2459 = vmatpush1.bf16.msra.mxu0 %v3313_v17  ;;  %v3409_v17 = vld [vmem:[%s4069_s8 + $0x414] ss:$8 sps:$4 sm:$0xff]  }
  0xe0   : > { %2500 = vmatpush1.bf16.msra.mxu1 %v3316_v18  ;;  %2460 = vmatprep.subr.bf16.mxu0 %v3321_v19  ;;  %v3412_v18 = vld [vmem:[%s4069_s8 + $0x514] ss:$8 sps:$4 sm:$0xff]  }
  0xe1   : > { %2501 = vmatprep.subr.bf16.mxu1 %v3324_v20  ;;  %v4223_v19 = vld [vmem:[%s4046_s9 + $0x20] sm:$0xff]  ;;  %v4226_v20 = vld [vmem:[%s4046_s9 + $0x28] sm:$0xff] }
  0xe3   : > { %2461 = vmatpush1.bf16.msra.mxu0 %v3319_v21  ;;  %v2941_v21 = vcombine.high %v4223_v19, %v4223_v19 }
  0xe4   : > { %2502 = vmatpush1.bf16.msra.mxu1 %v3322_v22  ;;  %2462 = vmatprep.subr.bf16.mxu0 %v3327_v23  ;;  %v2943_v22 = vcombine.high %v4226_v20, %v4226_v20  ;;  %v3407_v23 = vld [vmem:[%s4069_s8 + $0x410] ss:$8 sps:$4 sm:$0xff]  }
  0xe5   : > { %2503 = vmatprep.subr.bf16.mxu1 %v3330_v24  ;;  %v3410_v24 = vld [vmem:[%s4069_s8 + $0x510] ss:$8 sps:$4 sm:$0xff]  }
  0xe7   : > { %2463 = vmatpush1.bf16.msra.mxu0 %v3325_v25  ;;  %v3415_v25 = vld [vmem:[%s4069_s8 + $0x424] ss:$8 sps:$4 sm:$0xff]  }
  0xe8   : > { %2504 = vmatpush1.bf16.msra.mxu1 %v3328_v26  ;;  %2464 = vmatprep.subr.bf16.mxu0 %v3333_v27  ;;  %v3418_v26 = vld [vmem:[%s4069_s8 + $0x524] ss:$8 sps:$4 sm:$0xff]   ;;  %v3413_v27 = vld [vmem:[%s4069_s8 + $0x420] ss:$8 sps:$4 sm:$0xff]  }
  0xe9   : > { %2505 = vmatprep.subr.bf16.mxu1 %v3336_v28  ;;  %v3416_v28 = vld [vmem:[%s4069_s8 + $0x520] ss:$8 sps:$4 sm:$0xff]  }
  0xeb   : > { %2465 = vmatpush1.bf16.msra.mxu0 %v3331_v29  ;;  %v3421_v29 = vld [vmem:[%s4069_s8 + $0x434] ss:$8 sps:$4 sm:$0xff]  }
  0xec   : > { %2506 = vmatpush1.bf16.msra.mxu1 %v3334_v30  ;;  %2466 = vmatprep.subr.bf16.mxu0 %v3339_v31  ;;  %v3424_v30 = vld [vmem:[%s4069_s8 + $0x534] ss:$8 sps:$4 sm:$0xff]   ;;  %v3419_v31 = vld [vmem:[%s4069_s8 + $0x430] ss:$8 sps:$4 sm:$0xff]  }
  0xed   : > { %2507 = vmatprep.subr.bf16.mxu1 %v3342_v32  ;;  %v3422_v32 = vld [vmem:[%s4069_s8 + $0x530] ss:$8 sps:$4 sm:$0xff]  }
  0xef   : > { %2467 = vmatpush1.bf16.msra.mxu0 %v3337_v35  ;;  %v3425_v35 = vld [vmem:[%s4069_s8 + $0x440] ss:$8 sps:$4 sm:$0xff]  }
  0xf0   : > { %2508 = vmatpush1.bf16.msra.mxu1 %v3340_v36  ;;  %2468 = vmatprep.subr.bf16.mxu0 %v3345_v39  ;;  %v3428_v36 = vld [vmem:[%s4069_s8 + $0x540] ss:$8 sps:$4 sm:$0xff]   ;;  %v3431_v39 = vld [vmem:[%s4069_s8 + $0x450] ss:$8 sps:$4 sm:$0xff]  }
  0xf1   : > { %2509 = vmatprep.subr.bf16.mxu1 %v3348_v40  ;;  %v3434_v40 = vld [vmem:[%s4069_s8 + $0x550] ss:$8 sps:$4 sm:$0xff]  }
  0xf3   : > { %2469 = vmatpush1.bf16.msra.mxu0 %v3343_v41  ;;  %v3439_v41 = vld [vmem:[%s4069_s8 + $0x464] ss:$8 sps:$4 sm:$0xff]  }
  0xf4   : > { %2510 = vmatpush1.bf16.msra.mxu1 %v3346_v42  ;;  %2470 = vmatprep.subr.bf16.mxu0 %v3351_v43  ;;  %v3442_v42 = vld [vmem:[%s4069_s8 + $0x564] ss:$8 sps:$4 sm:$0xff]   ;;  %v3437_v43 = vld [vmem:[%s4069_s8 + $0x460] ss:$8 sps:$4 sm:$0xff]  }
  0xf5   : > { %2511 = vmatprep.subr.bf16.mxu1 %v3354_v44  ;;  %v3440_v44 = vld [vmem:[%s4069_s8 + $0x560] ss:$8 sps:$4 sm:$0xff]  }
  0xf7   : > { %2471 = vmatpush1.bf16.msra.mxu0 %v3349_v45  ;;  %v3445_v45 = vld [vmem:[%s4069_s8 + $0x474] ss:$8 sps:$4 sm:$0xff]  }
  0xf8   : > { %2512 = vmatpush1.bf16.msra.mxu1 %v3352_v46  ;;  %2472 = vmatprep.subr.bf16.mxu0 %v3357_v47  ;;  %v3448_v46 = vld [vmem:[%s4069_s8 + $0x574] ss:$8 sps:$4 sm:$0xff]   ;;  %v3443_v47 = vld [vmem:[%s4069_s8 + $0x470] ss:$8 sps:$4 sm:$0xff]  }
  0xf9   : > { %2513 = vmatprep.subr.bf16.mxu1 %v3360_v48  ;;  %v3446_v48 = vld [vmem:[%s4069_s8 + $0x570] ss:$8 sps:$4 sm:$0xff]  }
  0xfb   : > { %2473 = vmatpush1.bf16.msra.mxu0 %v3355_v49  ;;  %v3451_v49 = vld [vmem:[%s4069_s8 + $0x484] ss:$8 sps:$4 sm:$0xff]  }
  0xfc   : > { %2514 = vmatpush1.bf16.msra.mxu1 %v3358_v50  ;;  %2474 = vmatprep.subr.bf16.mxu0 %v3363_v51  ;;  %v3454_v50 = vld [vmem:[%s4069_s8 + $0x584] ss:$8 sps:$4 sm:$0xff]   ;;  %v3449_v51 = vld [vmem:[%s4069_s8 + $0x480] ss:$8 sps:$4 sm:$0xff]  }
  0xfd   : > { %2515 = vmatprep.subr.bf16.mxu1 %v3366_v52  ;;  %v3452_v52 = vld [vmem:[%s4069_s8 + $0x580] ss:$8 sps:$4 sm:$0xff]  }
  0xff   : > { %2475 = vmatpush1.bf16.msra.mxu0 %v3361_v53  ;;  %v3457_v53 = vld [vmem:[%s4069_s8 + $0x494] ss:$8 sps:$4 sm:$0xff]  }
 0x100   : > { %2516 = vmatpush1.bf16.msra.mxu1 %v3364_v54  ;;  %2476 = vmatprep.subr.bf16.mxu0 %v3369_v55  ;;  %v3460_v54 = vld [vmem:[%s4069_s8 + $0x594] ss:$8 sps:$4 sm:$0xff]   ;;  %v3455_v55 = vld [vmem:[%s4069_s8 + $0x490] ss:$8 sps:$4 sm:$0xff]  }
 0x101   : > { %2517 = vmatprep.subr.bf16.mxu1 %v3372_v56  ;;  %v3458_v56 = vld [vmem:[%s4069_s8 + $0x590] ss:$8 sps:$4 sm:$0xff]  }
 0x103   : > { %2477 = vmatpush1.bf16.msra.mxu0 %v3367_v57  ;;  %v3463_v57 = vld [vmem:[%s4069_s8 + $0x4a4] ss:$8 sps:$4 sm:$0xff]  }
 0x104   : > { %2518 = vmatpush1.bf16.msra.mxu1 %v3370_v58  ;;  %2478 = vmatprep.subr.bf16.mxu0 %v3375_v59  ;;  %v3466_v58 = vld [vmem:[%s4069_s8 + $0x5a4] ss:$8 sps:$4 sm:$0xff]   ;;  %v3461_v59 = vld [vmem:[%s4069_s8 + $0x4a0] ss:$8 sps:$4 sm:$0xff]  }
 0x105   : > { %2519 = vmatprep.subr.bf16.mxu1 %v3378_v60  ;;  %v3464_v60 = vld [vmem:[%s4069_s8 + $0x5a0] ss:$8 sps:$4 sm:$0xff]  }
 0x107   : > { %2479 = vmatpush1.bf16.msra.mxu0 %v3373_v61  ;;  %v3469_v61 = vld [vmem:[%s4069_s8 + $0x4b4] ss:$8 sps:$4 sm:$0xff]  }
 0x108   : > { %2520 = vmatpush1.bf16.msra.mxu1 %v3376_v62  ;;  %2480 = vmatprep.subr.bf16.mxu0 %v3381_v63  ;;  %v3472_v62 = vld [vmem:[%s4069_s8 + $0x5b4] ss:$8 sps:$4 sm:$0xff]   ;;  %v3467_v63 = vld [vmem:[%s4069_s8 + $0x4b0] ss:$8 sps:$4 sm:$0xff]  }
 0x109   : > { %2521 = vmatprep.subr.bf16.mxu1 %v3384_v0  ;;  %v3470_v0 = vld [vmem:[%s4069_s8 + $0x5b0] ss:$8 sps:$4 sm:$0xff]  }
 0x10b   : > { %2481 = vmatpush1.bf16.msra.mxu0 %v3379_v1  ;;  %v3475_v1 = vld [vmem:[%s4069_s8 + $0x4c4] ss:$8 sps:$4 sm:$0xff]  }
 0x10c   : > { %2522 = vmatpush1.bf16.msra.mxu1 %v3382_v2  ;;  %2482 = vmatprep.subr.bf16.mxu0 %v3387_v3  ;;  %v3478_v2 = vld [vmem:[%s4069_s8 + $0x5c4] ss:$8 sps:$4 sm:$0xff]   ;;  %v3473_v3 = vld [vmem:[%s4069_s8 + $0x4c0] ss:$8 sps:$4 sm:$0xff]  }
 0x10d   : > { %2523 = vmatprep.subr.bf16.mxu1 %v3390_v4  ;;  %v3476_v4 = vld [vmem:[%s4069_s8 + $0x5c0] ss:$8 sps:$4 sm:$0xff]  }
 0x10f   : > { %2483 = vmatpush1.bf16.msra.mxu0 %v3385_v5  ;;  %v3481_v5 = vld [vmem:[%s4069_s8 + $0x4d4] ss:$8 sps:$4 sm:$0xff]  }
 0x110   : > { %2524 = vmatpush1.bf16.msra.mxu1 %v3388_v6  ;;  %2484 = vmatprep.subr.bf16.mxu0 %v3393_v7  ;;  %v3484_v6 = vld [vmem:[%s4069_s8 + $0x5d4] ss:$8 sps:$4 sm:$0xff]   ;;  %v3479_v7 = vld [vmem:[%s4069_s8 + $0x4d0] ss:$8 sps:$4 sm:$0xff]  }
 0x111   : > { %2525 = vmatprep.subr.bf16.mxu1 %v3396_v8  ;;  %v3482_v8 = vld [vmem:[%s4069_s8 + $0x5d0] ss:$8 sps:$4 sm:$0xff]  }
 0x113   : > { %2485 = vmatpush1.bf16.msra.mxu0 %v3391_v9  ;;  %v3487_v9 = vld [vmem:[%s4069_s8 + $0x4e4] ss:$8 sps:$4 sm:$0xff]  }
 0x114   : > { %2526 = vmatpush1.bf16.msra.mxu1 %v3394_v10  ;;  %2536 = vmatprep.subr.bf16.mxu0 %v3403_v11  ;;  %v3490_v10 = vld [vmem:[%s4069_s8 + $0x5e4] ss:$8 sps:$4 sm:$0xff]   ;;  %v3485_v11 = vld [vmem:[%s4069_s8 + $0x4e0] ss:$8 sps:$4 sm:$0xff]  }
 0x115   : > { %2577 = vmatprep.subr.bf16.mxu1 %v3406_v12  ;;  %v3488_v12 = vld [vmem:[%s4069_s8 + $0x5e0] ss:$8 sps:$4 sm:$0xff]  }
 0x116   : > { %2487 = vmatmul.mubr.bf16.vlgmr.msra.gmra.mrb[4].mxu0 %v2936_v13  ;;  %v3493_v13 = vld [vmem:[%s4069_s8 + $0x4f4] ss:$8 sps:$4 sm:$0xff]  }
 0x117   : > { %2528 = vmatmul.mubr.bf16.vlgmr.msra.gmra.mrb[4].mxu1 %v2938_v14  ;;  %2537 = vmatpush1.bf16.msra.mxu0 %v3401_v15  ;;  %v3496_v14 = vld [vmem:[%s4069_s8 + $0x5f4] ss:$8 sps:$4 sm:$0xff]   ;;  %v3491_v15 = vld [vmem:[%s4069_s8 + $0x4f0] ss:$8 sps:$4 sm:$0xff]  }
 0x118   : > { %2578 = vmatpush1.bf16.msra.mxu1 %v3404_v16  ;;  %2538 = vmatprep.subr.bf16.mxu0 %v3409_v17  ;;  %v3494_v16 = vld [vmem:[%s4069_s8 + $0x5f0] ss:$8 sps:$4 sm:$0xff]   ;;  %v2940_v17 = vcombine.low %v4223_v19, %v4223_v19 }
 0x119   : > { %2579 = vmatprep.subr.bf16.mxu1 %v3412_v18  ;;  %2568 = vmatprep.mubr.bf16.mxu0 %v2941_v21  ;;  %v2942_v18 = vcombine.low %v4226_v20, %v4226_v20 }
 0x11a   : > { %2609 = vmatprep.mubr.bf16.mxu1 %v2943_v22 }
 0x11b   : > { %2539 = vmatpush1.bf16.msra.mxu0 %v3407_v23 }
 0x11c   : > { %2580 = vmatpush1.bf16.msra.mxu1 %v3410_v24  ;;  %2540 = vmatprep.subr.bf16.mxu0 %v3415_v25 }
 0x11d   : > { %2581 = vmatprep.subr.bf16.mxu1 %v3418_v26 }
 0x11f   : > { %2541 = vmatpush1.bf16.msra.mxu0 %v3413_v27 }
 0x120   : > { %2582 = vmatpush1.bf16.msra.mxu1 %v3416_v28  ;;  %2542 = vmatprep.subr.bf16.mxu0 %v3421_v29 }
 0x121   : > { %2583 = vmatprep.subr.bf16.mxu1 %v3424_v30 }
 0x123   : > { %2543 = vmatpush1.bf16.msra.mxu0 %v3419_v31 }
 0x124   : > { %2584 = vmatpush1.bf16.msra.mxu1 %v3422_v32  ;;  %2544 = vmatprep.subr.bf16.mxu0 %v3427_v33 }
 0x125   : > { %2585 = vmatprep.subr.bf16.mxu1 %v3430_v34 }
 0x127   : > { %2545 = vmatpush1.bf16.msra.mxu0 %v3425_v35 }
 0x128   : > { %2586 = vmatpush1.bf16.msra.mxu1 %v3428_v36  ;;  %2546 = vmatprep.subr.bf16.mxu0 %v3433_v37 }
 0x129   : > { %2587 = vmatprep.subr.bf16.mxu1 %v3436_v38 }
 0x12b   : > { %2547 = vmatpush1.bf16.msra.mxu0 %v3431_v39 }
 0x12c   : > { %2588 = vmatpush1.bf16.msra.mxu1 %v3434_v40  ;;  %2548 = vmatprep.subr.bf16.mxu0 %v3439_v41 }
 0x12d   : > { %2589 = vmatprep.subr.bf16.mxu1 %v3442_v42 }
 0x12f   : > { %2549 = vmatpush1.bf16.msra.mxu0 %v3437_v43 }
 0x130   : > { %2590 = vmatpush1.bf16.msra.mxu1 %v3440_v44  ;;  %2550 = vmatprep.subr.bf16.mxu0 %v3445_v45 }
 0x131   : > { %2591 = vmatprep.subr.bf16.mxu1 %v3448_v46  ;;  %v1170_v46 = vld [vmem:[#allocation2] sm:$0xff] }
 0x133   : > { %2551 = vmatpush1.bf16.msra.mxu0 %v3443_v47 }
 0x134   : > { %2592 = vmatpush1.bf16.msra.mxu1 %v3446_v48  ;;  %2552 = vmatprep.subr.bf16.mxu0 %v3451_v49 }
 0x135   : > { %2593 = vmatprep.subr.bf16.mxu1 %v3454_v50 }
 0x137   : > { %2553 = vmatpush1.bf16.msra.mxu0 %v3449_v51  ;;  %v1171_v51 = vld [vmem:[#allocation2 + $0x8] sm:$0xff] }
 0x138   : > { %2594 = vmatpush1.bf16.msra.mxu1 %v3452_v52  ;;  %2554 = vmatprep.subr.bf16.mxu0 %v3457_v53 }
 0x139   : > { %2595 = vmatprep.subr.bf16.mxu1 %v3460_v54 }
 0x13b   : > { %2555 = vmatpush1.bf16.msra.mxu0 %v3455_v55 }
 0x13c   : > { %2596 = vmatpush1.bf16.msra.mxu1 %v3458_v56  ;;  %2556 = vmatprep.subr.bf16.mxu0 %v3463_v57  ;;  %v2630_v57 = vlaneseq (!%p3136_p13) }
 0x13d   : > { %2597 = vmatprep.subr.bf16.mxu1 %v3466_v58 }
 0x13e   : > { %v2631_v58 = vshrl.u32 (!%p3136_p13), %v2630_v57, 7 }
 0x13f   : > { %2557 = vmatpush1.bf16.msra.mxu0 %v3461_v59  ;;  %v2628_v59 = vld [vmem:[%s1131_s18] sm:$0x3] (!%p3136_p13) }
 0x140   : > { %2598 = vmatpush1.bf16.msra.mxu1 %v3464_v60  ;;  %2558 = vmatprep.subr.bf16.mxu0 %v3469_v61  ;;  %v2632_v60 = vsub.s32 (!%p3136_p13), 0, %v2631_v58  ;;  %v2636_v61 = vsub.s32 (!%p3136_p13), 1, %v2631_v58 }
 0x141   : > { %2599 = vmatprep.subr.bf16.mxu1 %v3472_v62 }
 0x143   : > { %2559 = vmatpush1.bf16.msra.mxu0 %v3467_v63 }
 0x144   : > { %2600 = vmatpush1.bf16.msra.mxu1 %v3470_v0  ;;  %2560 = vmatprep.subr.bf16.mxu0 %v3475_v1  ;;  %v2633_v0 = vrot.slane (!%p3136_p13), %v2628_v59, %v2632_v60  ;;  %v2637_v1 = vrot.slane (!%p3136_p13), %v2628_v59, %v2636_v61 }
 0x145   : > { %2601 = vmatprep.subr.bf16.mxu1 %v3478_v2 }
 0x147   : > { %2561 = vmatpush1.bf16.msra.mxu0 %v3473_v3 }
 0x148   : > { %2602 = vmatpush1.bf16.msra.mxu1 %v3476_v4  ;;  %2562 = vmatprep.subr.bf16.mxu0 %v3481_v5 }
 0x149   : > { %2603 = vmatprep.subr.bf16.mxu1 %v3484_v6 }
 0x14b   : > { %2563 = vmatpush1.bf16.msra.mxu0 %v3479_v7 }
 0x14c   : > { %2604 = vmatpush1.bf16.msra.mxu1 %v3482_v8  ;;  %2564 = vmatprep.subr.bf16.mxu0 %v3487_v9 }
 0x14d   : > { %2605 = vmatprep.subr.bf16.mxu1 %v3490_v10 }
 0x14f   : > { %2565 = vmatpush1.bf16.msra.mxu0 %v3485_v11 }
 0x150   : > { %2606 = vmatpush1.bf16.msra.mxu1 %v3488_v12  ;;  %2566 = vmatprep.subr.bf16.mxu0 %v3493_v13 }
 0x151   : > { %2607 = vmatprep.subr.bf16.mxu1 %v3496_v14 }
 0x153   : > { %2567 = vmatpush1.bf16.msra.mxu0 %v3491_v15 }
 0x154   : > { %2608 = vmatpush1.bf16.msra.mxu1 %v3494_v16 }
 0x156   : > { %2569 = vmatmul.mubr.bf16.vlgmr.msra.gmra.mrb[8].mxu0 %v2940_v17 }
 0x157   : > { %2610 = vmatmul.mubr.bf16.vlgmr.msra.gmra.mrb[8].mxu1 %v2942_v18 }
 0x1a9   : > { %v2406_v21 = vpop.f32.mrb[0].mxu0 }
 0x1aa   : > { %v2447_v22 = vpop.f32.mrb[0].mxu1  ;;  %v2408_v24 = vpop.f32.mrb[1].mxu0 }
 0x1ab   : > { %v2448_v23 = vadd.f32 %v2447_v22, %v2406_v21  ;;  %v2449_v25 = vpop.f32.mrb[1].mxu1  ;;  %v2410_v27 = vpop.f32.mrb[2].mxu0 }
 0x1ac   : > { %v2450_v26 = vadd.f32 %v2449_v25, %v2408_v24  ;;  %v2451_v28 = vpop.f32.mrb[2].mxu1  ;;  %v2411_v29 = vpop.f32.mrb[3].mxu0 }
 0x1ad   : > { %v2452_v30 = vpop.f32.mrb[3].mxu1 }
 0x1e9   : > { %v2488_v31 = vpop.f32.mrb[4].mxu0 }
 0x1ea   : > { %v2529_v32 = vpop.f32.mrb[4].mxu1  ;;  %v2489_v19 = vadd.f32 %v2488_v31, %v2448_v23  ;;  %v2490_v33 = vpop.f32.mrb[5].mxu0 }
 0x1eb   : > { %v2531_v34 = vpop.f32.mrb[5].mxu1  ;;  %v2491_v20 = vadd.f32 %v2490_v33, %v2450_v26  ;;  %v2492_v35 = vpop.f32.mrb[6].mxu0 }
 0x1ec   : > { %v2533_v36 = vpop.f32.mrb[6].mxu1  ;;  %v2530_v37 = vadd.f32 %v2529_v32, %v2489_v19  ;;  %v2493_v38 = vpop.f32.mrb[7].mxu0 }
 0x1ed   : > { %v2534_v39 = vpop.f32.mrb[7].mxu1  ;;  %v2532_v40 = vadd.f32 %v2531_v34, %v2491_v20 }
 0x229   : > { %v2570_v41 = vpop.f32.mrb[8].mxu0 }
 0x22a   : > { %v2611_v42 = vpop.f32.mrb[8].mxu1  ;;  %v2571_v43 = vadd.f32 %v2570_v41, %v2530_v37  ;;  %v2572_v44 = vpop.f32.mrb[9].mxu0 }
 0x22b   : > { %v2613_v45 = vpop.f32.mrb[9].mxu1  ;;  %v2573_v47 = vadd.f32 %v2572_v44, %v2532_v40  ;;  %v2574_v48 = vpop.f32.mrb[10].mxu0  ;;  %2625 = sbr.rel (%p3136_p13) target bundleno = 588 (0x24c), region = 78 }
 0x22c   : > { %v2615_v49 = vpop.f32.mrb[10].mxu1  ;;  %v2612_v50 = vadd.f32 %v2611_v42, %v2571_v43  ;;  %v2575_v52 = vpop.f32.mrb[11].mxu0 }
 0x22d   : > { %v2616_v53 = vpop.f32.mrb[11].mxu1  ;;  %v2614_v54 = vadd.f32 %v2613_v45, %v2573_v47 }
 0x22e   : > { %v2618_v55 = vadd.f32 %v2612_v50, %v1170_v46 }
 0x22f   : > { %v2619_v56 = vadd.f32 %v2614_v54, %v1171_v51 }
 0x230   : > { %2620 = vst [vmem:[#allocation2] sm:$0xff] %v2618_v55 }
 0x231   : > { %2621 = vst [vmem:[#allocation2 + $0x8] sm:$0xff] %v2619_v56 }
 0x237   : > { %v2626_v62 = vld [vmem:[#allocation2] sm:$0xff] }
 0x238   : > { %v2627_v63 = vld [vmem:[#allocation2 + $0x8] sm:$0xff]  ;;  %v2640_v2 = vadd.f32 %v2633_v0, %v2626_v62 }
 0x239   : > { %v2641_v3 = vadd.f32 %v2637_v1, %v2627_v63 }
 0x23a   : > { %v2642_v4 = vmax.f32 %v2640_v2, 0.0 }
 0x23b   : > { %v2643_v5 = vmax.f32 %v2641_v3, 0.0 }
 0x23c   : > { %v2662_v6 = vrot.slane %v2642_v4, 4  ;;  %v2676_v7 = vmul.f32 %v2642_v4, %v2642_v4 }
 0x23d   : > { %v3141_v8 = vpack.c.bf16 %v2643_v5, %v2642_v4  ;;  %v2668_v9 = vrot.slane %v2643_v5, 4  ;;  %v2677_v10 = vmul.f32 %v2643_v5, %v2643_v5 }
 0x23e   : > { %v2663_v11 = vadd.f32 %v2662_v6, %v2642_v4  ;;  %v2678_v12 = vrot.slane %v2676_v7, 4 }
 0x23f   : > { %2652 = vst [vmem:[%s4057_s15] sm:$0xff] %v3141_v8  ;;  %v2669_v13 = vadd.f32 %v2668_v9, %v2643_v5  ;;  %v2684_v14 = vrot.slane %v2677_v10, 4 }
 0x240   : > { %v2664_v15 = vrot.slane %v2663_v11, 2  ;;  %v2679_v16 = vadd.f32 %v2678_v12, %v2676_v7 }
 0x241   : > { %v2670_v17 = vrot.slane %v2669_v13, 2  ;;  %v2685_v18 = vadd.f32 %v2684_v14, %v2677_v10 }
 0x242   : > { %v2665_v21 = vadd.f32 %v2664_v15, %v2663_v11  ;;  %v2680_v22 = vrot.slane %v2679_v16, 2 }
 0x243   : > { %v2671_v23 = vadd.f32 %v2670_v17, %v2669_v13  ;;  %v2686_v24 = vrot.slane %v2685_v18, 2 }
 0x244   : > { %v2666_v25 = vrot.slane %v2665_v21, 1  ;;  %v2681_v26 = vadd.f32 %v2680_v22, %v2679_v16 }
 0x245   : > { %v2672_v27 = vrot.slane %v2671_v23, 1  ;;  %v2687_v28 = vadd.f32 %v2686_v24, %v2685_v18 }
 0x246   : > { %v2667_v29 = vadd.f32 %v2666_v25, %v2665_v21  ;;  %v2682_v30 = vrot.slane %v2681_v26, 1 }
 0x247   : > { %v2673_v31 = vadd.f32 %v2672_v27, %v2671_v23  ;;  %v2688_v32 = vrot.slane %v2687_v28, 1 }
 0x248   : > { %2674 = vst [vmem:[%s4062_s27] sm:$0xff] %v2667_v29  ;;  %v2683_v19 = vadd.f32 %v2682_v30, %v2681_v26 }
 0x249   : > { %2675 = vst [vmem:[%s4062_s27 + $0x8] sm:$0xff] %v2673_v31  ;;  %v2689_v33 = vadd.f32 %v2688_v32, %v2687_v28 }
 0x24a   : > { %2690 = vst [vmem:[%s4067_s30] sm:$0xff] %v2683_v19 }
 0x24b   : > { %2691 = vst [vmem:[%s4067_s30 + $0x8] sm:$0xff] %v2689_v33 }
 0x24c PF: > { %s16_s24 = sadd.s32 1, %s3555_s24   ;;  %s4334_s18 = smov %s3535_s19 }
 0x24d   : > { %p13_p0 = scmp.ge.s32.totalorder %s16_s24, 8   ;;  %s4335_s19 = smov %s3639_s6 }
 0x24e   : > { %s4336_s20 = smov %s3547_s22  ;;  %s4337_s21 = smov %s3551_s23 }
 0x24f   : > { %s4338_s22 = smov %s4341_s25  ;;  %s4339_s23 = smov %s4345_s26 }
 0x250   :  { %15 = sbr.rel (!%p13_p0) target bundleno = 6 (0x6), region = 143 }

// kernel: feature_extraction_forward.9
= control target key start
LH: loop header
LB: loop body
LE: loop exit
PB: predicated region body
PF: predicated region fallthrough
CT: control target
= control target key end

     0   :  { %s4496_s18 = smov 0   ;;  %s4498_s19 = smov 0   ;;  %s5440_s0 = inlined_call_operand.vmem [shape: bf16[8,4096], index: 0, kind: input, shape index: {}]   ;;  %s5441_s1 = inlined_call_operand.vmem [shape: bf16[4096,512], index: 1, kind: input, shape index: {}]   ;;  %s5442_s2 = inlined_call_operand.vmem [shape: f32[1,512], index: 2, kind: input, shape index: {}]   ;;  %s5443_s3 = inlined_call_operand.vmem [shape: bf16[8,512], index: 3, kind: output, shape index: {0}]   ;;  %s5444_s4 = inlined_call_operand.vmem [shape: f32[8,512], index: 4, kind: output, shape index: {1}]   ;;  %s5445_s5 = inlined_call_operand.vmem [shape: f32[8,512], index: 5, kind: output, shape index: {2}]  }
   0x1   :  { %s4500_s20 = smov 0   ;;  %s4502_s21 = smov 0  }
   0x2   :  { %s4504_s22 = smov 0   ;;  %s4506_s23 = smov 0  }
   0x3   :  { %s4508_s24 = smov 0  }
   0x4 LB: > { %s28_s25 = sadd.s32 1, %s4455_s22  ;;  %s31_s26 = sadd.s32 1, %s4459_s23  ;;  %s4463_s24 = sphi %s4508_s24, %s16_s24   ;;  %s4459_s23 = sphi %s4506_s23, %s5451_s23   ;;  %s4455_s22 = sphi %s4504_s22, %s5450_s22   ;;  %s4451_s21 = sphi %s4502_s21, %s5449_s21   ;;  %s4447_s20 = sphi %s4500_s20, %s5448_s20   ;;  %s4443_s19 = sphi %s4498_s19, %s5447_s19   ;;  %s4439_s18 = sphi %s4496_s18, %s5446_s18  }
   0x5   : > { %p29_p0 = scmp.ge.s32.totalorder %s28_s25, 2  ;;  %p79_p1 = scmp.ne.s32.totalorder %s4443_s19, %s4439_s18 }
   0x6   : > { %p80_p2 = scmp.eq.s32.totalorder %s4463_s24, 0  ;;  %s72_s30 = sadd.s32 1, %s4443_s19 }
   0x7   : > { %s5453_s25 = smov (%p29_p0, %s28_s25), 0  ;;  %s5455_s26 = smov (!%p29_p0, %s31_s26), %s4459_s23 }
   0x8   : > { %p81_p3 = por %p80_p2, %p79_p1  ;;  %p33_p4 = scmp.ge.s32.totalorder %s5455_s26, 2 }
   0x9   : > { %s67_s27 = ssub.s32 %s4455_s22, %s5453_s25  ;;  %p3656_p6 = scmp.ge.s32.totalorder %s4463_s24, 4 }
   0xa   : > { %s5457_s26 = smov (%p33_p4, %s5455_s26), 0 }
   0xb   : > { %s68_s28 = ssub.s32 %s4459_s23, %s5457_s26  ;;  %215 = sbr.rel (%p3656_p6) target bundleno = 153 (0x99), region = 16 }
   0xc   : > { %s69_s29 = sor.u32 %s68_s28, %s67_s27 }
   0xd   : > { %p70_p5 = scmp.eq.s32.totalorder %s69_s29, 0 }
   0xf   : > { %s4547_s6 = scalar_select %p70_p5, %s4443_s19, %s72_s30  }
  0x12   : > { %231 = sbr.rel (!%p81_p3) target bundleno = 153 (0x99), region = 24  ;;  %s233_s7 = sand.u32 (%p81_p3), 1, %s4443_s19  }
  0x13   : > { %s3659_s8 = sshll.u32 (%p81_p3), %s4459_s23, 1  ;;  %s3657_s9 = sshll.u32 (%p81_p3), %s233_s7, 11 }
  0x14   : > { %s3950_s10 = sshll.u32 (%p81_p3), %s4455_s22, 10  ;;  %s4561_s16 = scalar_lea.vmem (%p81_p3), [#allocation3], %s3657_s9 }
  0x15   : > { %s239_s11 = sadd.s32 (%p81_p3), %s3950_s10, %s3659_s8 }
  0x16   : > { %s3661_s12 = sshll.u32 (%p81_p3), %s239_s11, 2 }
  0x17   : > { %s4556_s15 = scalar_lea.vmem (%p81_p3), %s5441_s1, %s3661_s12 }
  0x18   : > { %v779_v0 = vld [vmem:[%s4556_s15] sm:$0xff] (%p81_p3)  ;;  %v781_v1 = vld [vmem:[%s4556_s15 + $0x10] sm:$0xff] (%p81_p3) }
  0x19   : > { %v783_v2 = vld [vmem:[%s4556_s15 + $0x20] sm:$0xff]  ;;  %780 = vst [vmem:[%s4561_s16] sm:$0xff] %v779_v0  ;;  %782 = vst [vmem:[%s4561_s16 + $0x8] sm:$0xff] %v781_v1  ;;  %v785_v3 = vld [vmem:[%s4556_s15 + $0x30] sm:$0xff] }
  0x1a   : > { %784 = vst [vmem:[%s4561_s16 + $0x10] sm:$0xff] %v783_v2  ;;  %v787_v4 = vld [vmem:[%s4556_s15 + $0x40] sm:$0xff]  ;;  %v789_v5 = vld [vmem:[%s4556_s15 + $0x50] sm:$0xff]  ;;  %786 = vst [vmem:[%s4561_s16 + $0x18] sm:$0xff] %v785_v3 }
  0x1b   : > { %788 = vst [vmem:[%s4561_s16 + $0x20] sm:$0xff] %v787_v4  ;;  %790 = vst [vmem:[%s4561_s16 + $0x28] sm:$0xff] %v789_v5  ;;  %v791_v6 = vld [vmem:[%s4556_s15 + $0x60] sm:$0xff]  ;;  %v793_v7 = vld [vmem:[%s4556_s15 + $0x70] sm:$0xff] }
  0x1c   : > { %v795_v8 = vld [vmem:[%s4556_s15 + $0x80] sm:$0xff]  ;;  %792 = vst [vmem:[%s4561_s16 + $0x30] sm:$0xff] %v791_v6  ;;  %794 = vst [vmem:[%s4561_s16 + $0x38] sm:$0xff] %v793_v7  ;;  %v797_v9 = vld [vmem:[%s4556_s15 + $0x90] sm:$0xff] }
  0x1d   : > { %796 = vst [vmem:[%s4561_s16 + $0x40] sm:$0xff] %v795_v8  ;;  %v799_v10 = vld [vmem:[%s4556_s15 + $0xa0] sm:$0xff]  ;;  %v801_v11 = vld [vmem:[%s4556_s15 + $0xb0] sm:$0xff]  ;;  %798 = vst [vmem:[%s4561_s16 + $0x48] sm:$0xff] %v797_v9 }
  0x1e   : > { %800 = vst [vmem:[%s4561_s16 + $0x50] sm:$0xff] %v799_v10  ;;  %802 = vst [vmem:[%s4561_s16 + $0x58] sm:$0xff] %v801_v11  ;;  %v803_v12 = vld [vmem:[%s4556_s15 + $0xc0] sm:$0xff]  ;;  %v805_v13 = vld [vmem:[%s4556_s15 + $0xd0] sm:$0xff] }
  0x1f   : > { %v807_v14 = vld [vmem:[%s4556_s15 + $0xe0] sm:$0xff]  ;;  %804 = vst [vmem:[%s4561_s16 + $0x60] sm:$0xff] %v803_v12  ;;  %806 = vst [vmem:[%s4561_s16 + $0x68] sm:$0xff] %v805_v13  ;;  %v809_v15 = vld [vmem:[%s4556_s15 + $0xf0] sm:$0xff] }
  0x20   : > { %808 = vst [vmem:[%s4561_s16 + $0x70] sm:$0xff] %v807_v14  ;;  %v811_v16 = vld [vmem:[%s4556_s15 + $0x100] sm:$0xff]  ;;  %v813_v17 = vld [vmem:[%s4556_s15 + $0x110] sm:$0xff]  ;;  %810 = vst [vmem:[%s4561_s16 + $0x78] sm:$0xff] %v809_v15 }
  0x21   : > { %812 = vst [vmem:[%s4561_s16 + $0x80] sm:$0xff] %v811_v16  ;;  %814 = vst [vmem:[%s4561_s16 + $0x88] sm:$0xff] %v813_v17  ;;  %v815_v18 = vld [vmem:[%s4556_s15 + $0x120] sm:$0xff]  ;;  %v817_v19 = vld [vmem:[%s4556_s15 + $0x130] sm:$0xff] }
  0x22   : > { %v819_v20 = vld [vmem:[%s4556_s15 + $0x140] sm:$0xff]  ;;  %816 = vst [vmem:[%s4561_s16 + $0x90] sm:$0xff] %v815_v18  ;;  %818 = vst [vmem:[%s4561_s16 + $0x98] sm:$0xff] %v817_v19  ;;  %v821_v21 = vld [vmem:[%s4556_s15 + $0x150] sm:$0xff] }
  0x23   : > { %820 = vst [vmem:[%s4561_s16 + $0xa0] sm:$0xff] %v819_v20  ;;  %v823_v22 = vld [vmem:[%s4556_s15 + $0x160] sm:$0xff]  ;;  %v825_v23 = vld [vmem:[%s4556_s15 + $0x170] sm:$0xff]  ;;  %822 = vst [vmem:[%s4561_s16 + $0xa8] sm:$0xff] %v821_v21 }
  0x24   : > { %824 = vst [vmem:[%s4561_s16 + $0xb0] sm:$0xff] %v823_v22  ;;  %826 = vst [vmem:[%s4561_s16 + $0xb8] sm:$0xff] %v825_v23  ;;  %v827_v24 = vld [vmem:[%s4556_s15 + $0x180] sm:$0xff]  ;;  %v829_v25 = vld [vmem:[%s4556_s15 + $0x190] sm:$0xff] }
  0x25   : > { %v831_v26 = vld [vmem:[%s4556_s15 + $0x1a0] sm:$0xff]  ;;  %828 = vst [vmem:[%s4561_s16 + $0xc0] sm:$0xff] %v827_v24  ;;  %830 = vst [vmem:[%s4561_s16 + $0xc8] sm:$0xff] %v829_v25  ;;  %v833_v27 = vld [vmem:[%s4556_s15 + $0x1b0] sm:$0xff] }
  0x26   : > { %832 = vst [vmem:[%s4561_s16 + $0xd0] sm:$0xff] %v831_v26  ;;  %v835_v28 = vld [vmem:[%s4556_s15 + $0x1c0] sm:$0xff]  ;;  %v837_v29 = vld [vmem:[%s4556_s15 + $0x1d0] sm:$0xff]  ;;  %834 = vst [vmem:[%s4561_s16 + $0xd8] sm:$0xff] %v833_v27 }
  0x27   : > { %836 = vst [vmem:[%s4561_s16 + $0xe0] sm:$0xff] %v835_v28  ;;  %838 = vst [vmem:[%s4561_s16 + $0xe8] sm:$0xff] %v837_v29  ;;  %v839_v30 = vld [vmem:[%s4556_s15 + $0x1e0] sm:$0xff]  ;;  %v841_v31 = vld [vmem:[%s4556_s15 + $0x1f0] sm:$0xff] }
  0x28   : > { %v843_v32 = vld [vmem:[%s4556_s15 + $0x200] sm:$0xff]  ;;  %840 = vst [vmem:[%s4561_s16 + $0xf0] sm:$0xff] %v839_v30  ;;  %842 = vst [vmem:[%s4561_s16 + $0xf8] sm:$0xff] %v841_v31  ;;  %v845_v33 = vld [vmem:[%s4556_s15 + $0x210] sm:$0xff] }
  0x29   : > { %844 = vst [vmem:[%s4561_s16 + $0x100] sm:$0xff] %v843_v32  ;;  %v847_v34 = vld [vmem:[%s4556_s15 + $0x220] sm:$0xff]  ;;  %v849_v35 = vld [vmem:[%s4556_s15 + $0x230] sm:$0xff]  ;;  %846 = vst [vmem:[%s4561_s16 + $0x108] sm:$0xff] %v845_v33 }
  0x2a   : > { %848 = vst [vmem:[%s4561_s16 + $0x110] sm:$0xff] %v847_v34  ;;  %850 = vst [vmem:[%s4561_s16 + $0x118] sm:$0xff] %v849_v35  ;;  %v851_v36 = vld [vmem:[%s4556_s15 + $0x240] sm:$0xff]  ;;  %v853_v37 = vld [vmem:[%s4556_s15 + $0x250] sm:$0xff] }
  0x2b   : > { %v855_v38 = vld [vmem:[%s4556_s15 + $0x260] sm:$0xff]  ;;  %852 = vst [vmem:[%s4561_s16 + $0x120] sm:$0xff] %v851_v36  ;;  %854 = vst [vmem:[%s4561_s16 + $0x128] sm:$0xff] %v853_v37  ;;  %v857_v39 = vld [vmem:[%s4556_s15 + $0x270] sm:$0xff] }
  0x2c   : > { %856 = vst [vmem:[%s4561_s16 + $0x130] sm:$0xff] %v855_v38  ;;  %v859_v40 = vld [vmem:[%s4556_s15 + $0x280] sm:$0xff]  ;;  %v861_v41 = vld [vmem:[%s4556_s15 + $0x290] sm:$0xff]  ;;  %858 = vst [vmem:[%s4561_s16 + $0x138] sm:$0xff] %v857_v39 }
  0x2d   : > { %860 = vst [vmem:[%s4561_s16 + $0x140] sm:$0xff] %v859_v40  ;;  %862 = vst [vmem:[%s4561_s16 + $0x148] sm:$0xff] %v861_v41  ;;  %v863_v42 = vld [vmem:[%s4556_s15 + $0x2a0] sm:$0xff]  ;;  %v865_v43 = vld [vmem:[%s4556_s15 + $0x2b0] sm:$0xff] }
  0x2e   : > { %v867_v44 = vld [vmem:[%s4556_s15 + $0x2c0] sm:$0xff]  ;;  %864 = vst [vmem:[%s4561_s16 + $0x150] sm:$0xff] %v863_v42  ;;  %866 = vst [vmem:[%s4561_s16 + $0x158] sm:$0xff] %v865_v43  ;;  %v869_v45 = vld [vmem:[%s4556_s15 + $0x2d0] sm:$0xff] }
  0x2f   : > { %868 = vst [vmem:[%s4561_s16 + $0x160] sm:$0xff] %v867_v44  ;;  %v871_v46 = vld [vmem:[%s4556_s15 + $0x2e0] sm:$0xff]  ;;  %v873_v47 = vld [vmem:[%s4556_s15 + $0x2f0] sm:$0xff]  ;;  %870 = vst [vmem:[%s4561_s16 + $0x168] sm:$0xff] %v869_v45 }
  0x30   : > { %872 = vst [vmem:[%s4561_s16 + $0x170] sm:$0xff] %v871_v46  ;;  %874 = vst [vmem:[%s4561_s16 + $0x178] sm:$0xff] %v873_v47  ;;  %v875_v48 = vld [vmem:[%s4556_s15 + $0x300] sm:$0xff]  ;;  %v877_v49 = vld [vmem:[%s4556_s15 + $0x310] sm:$0xff] }
  0x31   : > { %v879_v50 = vld [vmem:[%s4556_s15 + $0x320] sm:$0xff]  ;;  %876 = vst [vmem:[%s4561_s16 + $0x180] sm:$0xff] %v875_v48  ;;  %878 = vst [vmem:[%s4561_s16 + $0x188] sm:$0xff] %v877_v49  ;;  %v881_v51 = vld [vmem:[%s4556_s15 + $0x330] sm:$0xff] }
  0x32   : > { %880 = vst [vmem:[%s4561_s16 + $0x190] sm:$0xff] %v879_v50  ;;  %v883_v52 = vld [vmem:[%s4556_s15 + $0x340] sm:$0xff]  ;;  %v885_v53 = vld [vmem:[%s4556_s15 + $0x350] sm:$0xff]  ;;  %882 = vst [vmem:[%s4561_s16 + $0x198] sm:$0xff] %v881_v51 }
  0x33   : > { %884 = vst [vmem:[%s4561_s16 + $0x1a0] sm:$0xff] %v883_v52  ;;  %886 = vst [vmem:[%s4561_s16 + $0x1a8] sm:$0xff] %v885_v53  ;;  %v887_v54 = vld [vmem:[%s4556_s15 + $0x360] sm:$0xff]  ;;  %v889_v55 = vld [vmem:[%s4556_s15 + $0x370] sm:$0xff] }
  0x34   : > { %v891_v56 = vld [vmem:[%s4556_s15 + $0x380] sm:$0xff]  ;;  %888 = vst [vmem:[%s4561_s16 + $0x1b0] sm:$0xff] %v887_v54  ;;  %890 = vst [vmem:[%s4561_s16 + $0x1b8] sm:$0xff] %v889_v55  ;;  %v893_v57 = vld [vmem:[%s4556_s15 + $0x390] sm:$0xff] }
  0x35   : > { %892 = vst [vmem:[%s4561_s16 + $0x1c0] sm:$0xff] %v891_v56  ;;  %v895_v58 = vld [vmem:[%s4556_s15 + $0x3a0] sm:$0xff]  ;;  %v897_v59 = vld [vmem:[%s4556_s15 + $0x3b0] sm:$0xff]  ;;  %894 = vst [vmem:[%s4561_s16 + $0x1c8] sm:$0xff] %v893_v57 }
  0x36   : > { %896 = vst [vmem:[%s4561_s16 + $0x1d0] sm:$0xff] %v895_v58  ;;  %898 = vst [vmem:[%s4561_s16 + $0x1d8] sm:$0xff] %v897_v59  ;;  %v899_v60 = vld [vmem:[%s4556_s15 + $0x3c0] sm:$0xff]  ;;  %v901_v61 = vld [vmem:[%s4556_s15 + $0x3d0] sm:$0xff] }
  0x37   : > { %v903_v62 = vld [vmem:[%s4556_s15 + $0x3e0] sm:$0xff]  ;;  %900 = vst [vmem:[%s4561_s16 + $0x1e0] sm:$0xff] %v899_v60  ;;  %902 = vst [vmem:[%s4561_s16 + $0x1e8] sm:$0xff] %v901_v61  ;;  %v905_v63 = vld [vmem:[%s4556_s15 + $0x3f0] sm:$0xff] }
  0x38   : > { %904 = vst [vmem:[%s4561_s16 + $0x1f0] sm:$0xff] %v903_v62  ;;  %v907_v0 = vld [vmem:[%s4556_s15 + $0x400] sm:$0xff]  ;;  %v909_v1 = vld [vmem:[%s4556_s15 + $0x410] sm:$0xff]  ;;  %906 = vst [vmem:[%s4561_s16 + $0x1f8] sm:$0xff] %v905_v63 }
  0x39   : > { %908 = vst [vmem:[%s4561_s16 + $0x200] sm:$0xff] %v907_v0  ;;  %910 = vst [vmem:[%s4561_s16 + $0x208] sm:$0xff] %v909_v1  ;;  %v911_v2 = vld [vmem:[%s4556_s15 + $0x420] sm:$0xff]  ;;  %v913_v3 = vld [vmem:[%s4556_s15 + $0x430] sm:$0xff] }
  0x3a   : > { %v915_v4 = vld [vmem:[%s4556_s15 + $0x440] sm:$0xff]  ;;  %912 = vst [vmem:[%s4561_s16 + $0x210] sm:$0xff] %v911_v2  ;;  %914 = vst [vmem:[%s4561_s16 + $0x218] sm:$0xff] %v913_v3  ;;  %v917_v5 = vld [vmem:[%s4556_s15 + $0x450] sm:$0xff] }
  0x3b   : > { %916 = vst [vmem:[%s4561_s16 + $0x220] sm:$0xff] %v915_v4  ;;  %v919_v6 = vld [vmem:[%s4556_s15 + $0x460] sm:$0xff]  ;;  %v921_v7 = vld [vmem:[%s4556_s15 + $0x470] sm:$0xff]  ;;  %918 = vst [vmem:[%s4561_s16 + $0x228] sm:$0xff] %v917_v5 }
  0x3c   : > { %920 = vst [vmem:[%s4561_s16 + $0x230] sm:$0xff] %v919_v6  ;;  %922 = vst [vmem:[%s4561_s16 + $0x238] sm:$0xff] %v921_v7  ;;  %v923_v8 = vld [vmem:[%s4556_s15 + $0x480] sm:$0xff]  ;;  %v925_v9 = vld [vmem:[%s4556_s15 + $0x490] sm:$0xff] }
  0x3d   : > { %v927_v10 = vld [vmem:[%s4556_s15 + $0x4a0] sm:$0xff]  ;;  %924 = vst [vmem:[%s4561_s16 + $0x240] sm:$0xff] %v923_v8  ;;  %926 = vst [vmem:[%s4561_s16 + $0x248] sm:$0xff] %v925_v9  ;;  %v929_v11 = vld [vmem:[%s4556_s15 + $0x4b0] sm:$0xff] }
  0x3e   : > { %928 = vst [vmem:[%s4561_s16 + $0x250] sm:$0xff] %v927_v10  ;;  %v931_v12 = vld [vmem:[%s4556_s15 + $0x4c0] sm:$0xff]  ;;  %v933_v13 = vld [vmem:[%s4556_s15 + $0x4d0] sm:$0xff]  ;;  %930 = vst [vmem:[%s4561_s16 + $0x258] sm:$0xff] %v929_v11 }
  0x3f   : > { %932 = vst [vmem:[%s4561_s16 + $0x260] sm:$0xff] %v931_v12  ;;  %934 = vst [vmem:[%s4561_s16 + $0x268] sm:$0xff] %v933_v13  ;;  %v935_v14 = vld [vmem:[%s4556_s15 + $0x4e0] sm:$0xff]  ;;  %v937_v15 = vld [vmem:[%s4556_s15 + $0x4f0] sm:$0xff] }
  0x40   : > { %v939_v16 = vld [vmem:[%s4556_s15 + $0x500] sm:$0xff]  ;;  %936 = vst [vmem:[%s4561_s16 + $0x270] sm:$0xff] %v935_v14  ;;  %938 = vst [vmem:[%s4561_s16 + $0x278] sm:$0xff] %v937_v15  ;;  %v941_v17 = vld [vmem:[%s4556_s15 + $0x510] sm:$0xff] }
  0x41   : > { %940 = vst [vmem:[%s4561_s16 + $0x280] sm:$0xff] %v939_v16  ;;  %v943_v18 = vld [vmem:[%s4556_s15 + $0x520] sm:$0xff]  ;;  %v945_v19 = vld [vmem:[%s4556_s15 + $0x530] sm:$0xff]  ;;  %942 = vst [vmem:[%s4561_s16 + $0x288] sm:$0xff] %v941_v17 }
  0x42   : > { %944 = vst [vmem:[%s4561_s16 + $0x290] sm:$0xff] %v943_v18  ;;  %946 = vst [vmem:[%s4561_s16 + $0x298] sm:$0xff] %v945_v19  ;;  %v947_v20 = vld [vmem:[%s4556_s15 + $0x540] sm:$0xff]  ;;  %v949_v21 = vld [vmem:[%s4556_s15 + $0x550] sm:$0xff] }
  0x43   : > { %v951_v22 = vld [vmem:[%s4556_s15 + $0x560] sm:$0xff]  ;;  %948 = vst [vmem:[%s4561_s16 + $0x2a0] sm:$0xff] %v947_v20  ;;  %950 = vst [vmem:[%s4561_s16 + $0x2a8] sm:$0xff] %v949_v21  ;;  %v953_v23 = vld [vmem:[%s4556_s15 + $0x570] sm:$0xff] }
  0x44   : > { %952 = vst [vmem:[%s4561_s16 + $0x2b0] sm:$0xff] %v951_v22  ;;  %v955_v24 = vld [vmem:[%s4556_s15 + $0x580] sm:$0xff]  ;;  %v957_v25 = vld [vmem:[%s4556_s15 + $0x590] sm:$0xff]  ;;  %954 = vst [vmem:[%s4561_s16 + $0x2b8] sm:$0xff] %v953_v23 }
  0x45   : > { %956 = vst [vmem:[%s4561_s16 + $0x2c0] sm:$0xff] %v955_v24  ;;  %958 = vst [vmem:[%s4561_s16 + $0x2c8] sm:$0xff] %v957_v25  ;;  %v959_v26 = vld [vmem:[%s4556_s15 + $0x5a0] sm:$0xff]  ;;  %v961_v27 = vld [vmem:[%s4556_s15 + $0x5b0] sm:$0xff] }
  0x46   : > { %v963_v28 = vld [vmem:[%s4556_s15 + $0x5c0] sm:$0xff]  ;;  %960 = vst [vmem:[%s4561_s16 + $0x2d0] sm:$0xff] %v959_v26  ;;  %962 = vst [vmem:[%s4561_s16 + $0x2d8] sm:$0xff] %v961_v27  ;;  %v965_v29 = vld [vmem:[%s4556_s15 + $0x5d0] sm:$0xff] }
  0x47   : > { %964 = vst [vmem:[%s4561_s16 + $0x2e0] sm:$0xff] %v963_v28  ;;  %v967_v30 = vld [vmem:[%s4556_s15 + $0x5e0] sm:$0xff]  ;;  %v969_v31 = vld [vmem:[%s4556_s15 + $0x5f0] sm:$0xff]  ;;  %966 = vst [vmem:[%s4561_s16 + $0x2e8] sm:$0xff] %v965_v29 }
  0x48   : > { %968 = vst [vmem:[%s4561_s16 + $0x2f0] sm:$0xff] %v967_v30  ;;  %970 = vst [vmem:[%s4561_s16 + $0x2f8] sm:$0xff] %v969_v31  ;;  %v971_v32 = vld [vmem:[%s4556_s15 + $0x600] sm:$0xff]  ;;  %v973_v33 = vld [vmem:[%s4556_s15 + $0x610] sm:$0xff] }
  0x49   : > { %v975_v34 = vld [vmem:[%s4556_s15 + $0x620] sm:$0xff]  ;;  %972 = vst [vmem:[%s4561_s16 + $0x300] sm:$0xff] %v971_v32  ;;  %974 = vst [vmem:[%s4561_s16 + $0x308] sm:$0xff] %v973_v33  ;;  %v977_v35 = vld [vmem:[%s4556_s15 + $0x630] sm:$0xff] }
  0x4a   : > { %976 = vst [vmem:[%s4561_s16 + $0x310] sm:$0xff] %v975_v34  ;;  %v979_v36 = vld [vmem:[%s4556_s15 + $0x640] sm:$0xff]  ;;  %v981_v37 = vld [vmem:[%s4556_s15 + $0x650] sm:$0xff]  ;;  %978 = vst [vmem:[%s4561_s16 + $0x318] sm:$0xff] %v977_v35 }
  0x4b   : > { %980 = vst [vmem:[%s4561_s16 + $0x320] sm:$0xff] %v979_v36  ;;  %982 = vst [vmem:[%s4561_s16 + $0x328] sm:$0xff] %v981_v37  ;;  %v983_v38 = vld [vmem:[%s4556_s15 + $0x660] sm:$0xff]  ;;  %v985_v39 = vld [vmem:[%s4556_s15 + $0x670] sm:$0xff] }
  0x4c   : > { %v987_v40 = vld [vmem:[%s4556_s15 + $0x680] sm:$0xff]  ;;  %984 = vst [vmem:[%s4561_s16 + $0x330] sm:$0xff] %v983_v38  ;;  %986 = vst [vmem:[%s4561_s16 + $0x338] sm:$0xff] %v985_v39  ;;  %v989_v41 = vld [vmem:[%s4556_s15 + $0x690] sm:$0xff] }
  0x4d   : > { %988 = vst [vmem:[%s4561_s16 + $0x340] sm:$0xff] %v987_v40  ;;  %v991_v42 = vld [vmem:[%s4556_s15 + $0x6a0] sm:$0xff]  ;;  %v993_v43 = vld [vmem:[%s4556_s15 + $0x6b0] sm:$0xff]  ;;  %990 = vst [vmem:[%s4561_s16 + $0x348] sm:$0xff] %v989_v41 }
  0x4e   : > { %992 = vst [vmem:[%s4561_s16 + $0x350] sm:$0xff] %v991_v42  ;;  %994 = vst [vmem:[%s4561_s16 + $0x358] sm:$0xff] %v993_v43  ;;  %v995_v44 = vld [vmem:[%s4556_s15 + $0x6c0] sm:$0xff]  ;;  %v997_v45 = vld [vmem:[%s4556_s15 + $0x6d0] sm:$0xff] }
  0x4f   : > { %v999_v46 = vld [vmem:[%s4556_s15 + $0x6e0] sm:$0xff]  ;;  %996 = vst [vmem:[%s4561_s16 + $0x360] sm:$0xff] %v995_v44  ;;  %998 = vst [vmem:[%s4561_s16 + $0x368] sm:$0xff] %v997_v45  ;;  %v1001_v47 = vld [vmem:[%s4556_s15 + $0x6f0] sm:$0xff] }
  0x50   : > { %1000 = vst [vmem:[%s4561_s16 + $0x370] sm:$0xff] %v999_v46  ;;  %v1003_v48 = vld [vmem:[%s4556_s15 + $0x700] sm:$0xff]  ;;  %v1005_v49 = vld [vmem:[%s4556_s15 + $0x710] sm:$0xff]  ;;  %1002 = vst [vmem:[%s4561_s16 + $0x378] sm:$0xff] %v1001_v47 }
  0x51   : > { %1004 = vst [vmem:[%s4561_s16 + $0x380] sm:$0xff] %v1003_v48  ;;  %1006 = vst [vmem:[%s4561_s16 + $0x388] sm:$0xff] %v1005_v49  ;;  %v1007_v50 = vld [vmem:[%s4556_s15 + $0x720] sm:$0xff]  ;;  %v1009_v51 = vld [vmem:[%s4556_s15 + $0x730] sm:$0xff] }
  0x52   : > { %v1011_v52 = vld [vmem:[%s4556_s15 + $0x740] sm:$0xff]  ;;  %1008 = vst [vmem:[%s4561_s16 + $0x390] sm:$0xff] %v1007_v50  ;;  %1010 = vst [vmem:[%s4561_s16 + $0x398] sm:$0xff] %v1009_v51  ;;  %v1013_v53 = vld [vmem:[%s4556_s15 + $0x750] sm:$0xff] }
  0x53   : > { %1012 = vst [vmem:[%s4561_s16 + $0x3a0] sm:$0xff] %v1011_v52  ;;  %v1015_v54 = vld [vmem:[%s4556_s15 + $0x760] sm:$0xff]  ;;  %v1017_v55 = vld [vmem:[%s4556_s15 + $0x770] sm:$0xff]  ;;  %1014 = vst [vmem:[%s4561_s16 + $0x3a8] sm:$0xff] %v1013_v53 }
  0x54   : > { %1016 = vst [vmem:[%s4561_s16 + $0x3b0] sm:$0xff] %v1015_v54  ;;  %1018 = vst [vmem:[%s4561_s16 + $0x3b8] sm:$0xff] %v1017_v55  ;;  %v1019_v56 = vld [vmem:[%s4556_s15 + $0x780] sm:$0xff]  ;;  %v1021_v57 = vld [vmem:[%s4556_s15 + $0x790] sm:$0xff] }
  0x55   : > { %v1023_v58 = vld [vmem:[%s4556_s15 + $0x7a0] sm:$0xff]  ;;  %1020 = vst [vmem:[%s4561_s16 + $0x3c0] sm:$0xff] %v1019_v56  ;;  %1022 = vst [vmem:[%s4561_s16 + $0x3c8] sm:$0xff] %v1021_v57  ;;  %v1025_v59 = vld [vmem:[%s4556_s15 + $0x7b0] sm:$0xff] }
  0x56   : > { %1024 = vst [vmem:[%s4561_s16 + $0x3d0] sm:$0xff] %v1023_v58  ;;  %v1027_v60 = vld [vmem:[%s4556_s15 + $0x7c0] sm:$0xff]  ;;  %v1029_v61 = vld [vmem:[%s4556_s15 + $0x7d0] sm:$0xff]  ;;  %1026 = vst [vmem:[%s4561_s16 + $0x3d8] sm:$0xff] %v1025_v59 }
  0x57   : > { %1028 = vst [vmem:[%s4561_s16 + $0x3e0] sm:$0xff] %v1027_v60  ;;  %1030 = vst [vmem:[%s4561_s16 + $0x3e8] sm:$0xff] %v1029_v61  ;;  %v1031_v62 = vld [vmem:[%s4556_s15 + $0x7e0] sm:$0xff]  ;;  %v1033_v63 = vld [vmem:[%s4556_s15 + $0x7f0] sm:$0xff] }
  0x58   : > { %v1035_v0 = vld [vmem:[%s4556_s15 + $0x800] sm:$0xff]  ;;  %1032 = vst [vmem:[%s4561_s16 + $0x3f0] sm:$0xff] %v1031_v62  ;;  %1034 = vst [vmem:[%s4561_s16 + $0x3f8] sm:$0xff] %v1033_v63  ;;  %v1037_v1 = vld [vmem:[%s4556_s15 + $0x810] sm:$0xff] }
  0x59   : > { %1036 = vst [vmem:[%s4561_s16 + $0x400] sm:$0xff] %v1035_v0  ;;  %v1039_v2 = vld [vmem:[%s4556_s15 + $0x820] sm:$0xff]  ;;  %v1041_v3 = vld [vmem:[%s4556_s15 + $0x830] sm:$0xff]  ;;  %1038 = vst [vmem:[%s4561_s16 + $0x408] sm:$0xff] %v1037_v1 }
  0x5a   : > { %1040 = vst [vmem:[%s4561_s16 + $0x410] sm:$0xff] %v1039_v2  ;;  %1042 = vst [vmem:[%s4561_s16 + $0x418] sm:$0xff] %v1041_v3  ;;  %v1043_v4 = vld [vmem:[%s4556_s15 + $0x840] sm:$0xff]  ;;  %v1045_v5 = vld [vmem:[%s4556_s15 + $0x850] sm:$0xff] }
  0x5b   : > { %v1047_v6 = vld [vmem:[%s4556_s15 + $0x860] sm:$0xff]  ;;  %1044 = vst [vmem:[%s4561_s16 + $0x420] sm:$0xff] %v1043_v4  ;;  %1046 = vst [vmem:[%s4561_s16 + $0x428] sm:$0xff] %v1045_v5  ;;  %v1049_v7 = vld [vmem:[%s4556_s15 + $0x870] sm:$0xff] }
  0x5c   : > { %1048 = vst [vmem:[%s4561_s16 + $0x430] sm:$0xff] %v1047_v6  ;;  %v1051_v8 = vld [vmem:[%s4556_s15 + $0x880] sm:$0xff]  ;;  %v1053_v9 = vld [vmem:[%s4556_s15 + $0x890] sm:$0xff]  ;;  %1050 = vst [vmem:[%s4561_s16 + $0x438] sm:$0xff] %v1049_v7 }
  0x5d   : > { %1052 = vst [vmem:[%s4561_s16 + $0x440] sm:$0xff] %v1051_v8  ;;  %1054 = vst [vmem:[%s4561_s16 + $0x448] sm:$0xff] %v1053_v9  ;;  %v1055_v10 = vld [vmem:[%s4556_s15 + $0x8a0] sm:$0xff]  ;;  %v1057_v11 = vld [vmem:[%s4556_s15 + $0x8b0] sm:$0xff] }
  0x5e   : > { %v1059_v12 = vld [vmem:[%s4556_s15 + $0x8c0] sm:$0xff]  ;;  %1056 = vst [vmem:[%s4561_s16 + $0x450] sm:$0xff] %v1055_v10  ;;  %1058 = vst [vmem:[%s4561_s16 + $0x458] sm:$0xff] %v1057_v11  ;;  %v1061_v13 = vld [vmem:[%s4556_s15 + $0x8d0] sm:$0xff] }
  0x5f   : > { %1060 = vst [vmem:[%s4561_s16 + $0x460] sm:$0xff] %v1059_v12  ;;  %v1063_v14 = vld [vmem:[%s4556_s15 + $0x8e0] sm:$0xff]  ;;  %v1065_v15 = vld [vmem:[%s4556_s15 + $0x8f0] sm:$0xff]  ;;  %1062 = vst [vmem:[%s4561_s16 + $0x468] sm:$0xff] %v1061_v13 }
  0x60   : > { %1064 = vst [vmem:[%s4561_s16 + $0x470] sm:$0xff] %v1063_v14  ;;  %1066 = vst [vmem:[%s4561_s16 + $0x478] sm:$0xff] %v1065_v15  ;;  %v1067_v16 = vld [vmem:[%s4556_s15 + $0x900] sm:$0xff]  ;;  %v1069_v17 = vld [vmem:[%s4556_s15 + $0x910] sm:$0xff] }
  0x61   : > { %v1071_v18 = vld [vmem:[%s4556_s15 + $0x920] sm:$0xff]  ;;  %1068 = vst [vmem:[%s4561_s16 + $0x480] sm:$0xff] %v1067_v16  ;;  %1070 = vst [vmem:[%s4561_s16 + $0x488] sm:$0xff] %v1069_v17  ;;  %v1073_v19 = vld [vmem:[%s4556_s15 + $0x930] sm:$0xff] }
  0x62   : > { %1072 = vst [vmem:[%s4561_s16 + $0x490] sm:$0xff] %v1071_v18  ;;  %v1075_v20 = vld [vmem:[%s4556_s15 + $0x940] sm:$0xff]  ;;  %v1077_v21 = vld [vmem:[%s4556_s15 + $0x950] sm:$0xff]  ;;  %1074 = vst [vmem:[%s4561_s16 + $0x498] sm:$0xff] %v1073_v19 }
  0x63   : > { %1076 = vst [vmem:[%s4561_s16 + $0x4a0] sm:$0xff] %v1075_v20  ;;  %1078 = vst [vmem:[%s4561_s16 + $0x4a8] sm:$0xff] %v1077_v21  ;;  %v1079_v22 = vld [vmem:[%s4556_s15 + $0x960] sm:$0xff]  ;;  %v1081_v23 = vld [vmem:[%s4556_s15 + $0x970] sm:$0xff] }
  0x64   : > { %v1083_v24 = vld [vmem:[%s4556_s15 + $0x980] sm:$0xff]  ;;  %1080 = vst [vmem:[%s4561_s16 + $0x4b0] sm:$0xff] %v1079_v22  ;;  %1082 = vst [vmem:[%s4561_s16 + $0x4b8] sm:$0xff] %v1081_v23  ;;  %v1085_v25 = vld [vmem:[%s4556_s15 + $0x990] sm:$0xff] }
  0x65   : > { %1084 = vst [vmem:[%s4561_s16 + $0x4c0] sm:$0xff] %v1083_v24  ;;  %v1087_v26 = vld [vmem:[%s4556_s15 + $0x9a0] sm:$0xff]  ;;  %v1089_v27 = vld [vmem:[%s4556_s15 + $0x9b0] sm:$0xff]  ;;  %1086 = vst [vmem:[%s4561_s16 + $0x4c8] sm:$0xff] %v1085_v25 }
  0x66   : > { %1088 = vst [vmem:[%s4561_s16 + $0x4d0] sm:$0xff] %v1087_v26  ;;  %1090 = vst [vmem:[%s4561_s16 + $0x4d8] sm:$0xff] %v1089_v27  ;;  %v1091_v28 = vld [vmem:[%s4556_s15 + $0x9c0] sm:$0xff]  ;;  %v1093_v29 = vld [vmem:[%s4556_s15 + $0x9d0] sm:$0xff] }
  0x67   : > { %v1095_v30 = vld [vmem:[%s4556_s15 + $0x9e0] sm:$0xff]  ;;  %1092 = vst [vmem:[%s4561_s16 + $0x4e0] sm:$0xff] %v1091_v28  ;;  %1094 = vst [vmem:[%s4561_s16 + $0x4e8] sm:$0xff] %v1093_v29  ;;  %v1097_v31 = vld [vmem:[%s4556_s15 + $0x9f0] sm:$0xff] }
  0x68   : > { %1096 = vst [vmem:[%s4561_s16 + $0x4f0] sm:$0xff] %v1095_v30  ;;  %v1099_v32 = vld [vmem:[%s4556_s15 + $0xa00] sm:$0xff]  ;;  %v1101_v33 = vld [vmem:[%s4556_s15 + $0xa10] sm:$0xff]  ;;  %1098 = vst [vmem:[%s4561_s16 + $0x4f8] sm:$0xff] %v1097_v31 }
  0x69   : > { %1100 = vst [vmem:[%s4561_s16 + $0x500] sm:$0xff] %v1099_v32  ;;  %1102 = vst [vmem:[%s4561_s16 + $0x508] sm:$0xff] %v1101_v33  ;;  %v1103_v34 = vld [vmem:[%s4556_s15 + $0xa20] sm:$0xff]  ;;  %v1105_v35 = vld [vmem:[%s4556_s15 + $0xa30] sm:$0xff] }
  0x6a   : > { %v1107_v36 = vld [vmem:[%s4556_s15 + $0xa40] sm:$0xff]  ;;  %1104 = vst [vmem:[%s4561_s16 + $0x510] sm:$0xff] %v1103_v34  ;;  %1106 = vst [vmem:[%s4561_s16 + $0x518] sm:$0xff] %v1105_v35  ;;  %v1109_v37 = vld [vmem:[%s4556_s15 + $0xa50] sm:$0xff] }
  0x6b   : > { %1108 = vst [vmem:[%s4561_s16 + $0x520] sm:$0xff] %v1107_v36  ;;  %v1111_v38 = vld [vmem:[%s4556_s15 + $0xa60] sm:$0xff]  ;;  %v1113_v39 = vld [vmem:[%s4556_s15 + $0xa70] sm:$0xff]  ;;  %1110 = vst [vmem:[%s4561_s16 + $0x528] sm:$0xff] %v1109_v37 }
  0x6c   : > { %1112 = vst [vmem:[%s4561_s16 + $0x530] sm:$0xff] %v1111_v38  ;;  %1114 = vst [vmem:[%s4561_s16 + $0x538] sm:$0xff] %v1113_v39  ;;  %v1115_v40 = vld [vmem:[%s4556_s15 + $0xa80] sm:$0xff]  ;;  %v1117_v41 = vld [vmem:[%s4556_s15 + $0xa90] sm:$0xff] }
  0x6d   : > { %v1119_v42 = vld [vmem:[%s4556_s15 + $0xaa0] sm:$0xff]  ;;  %1116 = vst [vmem:[%s4561_s16 + $0x540] sm:$0xff] %v1115_v40  ;;  %1118 = vst [vmem:[%s4561_s16 + $0x548] sm:$0xff] %v1117_v41  ;;  %v1121_v43 = vld [vmem:[%s4556_s15 + $0xab0] sm:$0xff] }
  0x6e   : > { %1120 = vst [vmem:[%s4561_s16 + $0x550] sm:$0xff] %v1119_v42  ;;  %v1123_v44 = vld [vmem:[%s4556_s15 + $0xac0] sm:$0xff]  ;;  %v1125_v45 = vld [vmem:[%s4556_s15 + $0xad0] sm:$0xff]  ;;  %1122 = vst [vmem:[%s4561_s16 + $0x558] sm:$0xff] %v1121_v43 }
  0x6f   : > { %1124 = vst [vmem:[%s4561_s16 + $0x560] sm:$0xff] %v1123_v44  ;;  %1126 = vst [vmem:[%s4561_s16 + $0x568] sm:$0xff] %v1125_v45  ;;  %v1127_v46 = vld [vmem:[%s4556_s15 + $0xae0] sm:$0xff]  ;;  %v1129_v47 = vld [vmem:[%s4556_s15 + $0xaf0] sm:$0xff] }
  0x70   : > { %v1131_v48 = vld [vmem:[%s4556_s15 + $0xb00] sm:$0xff]  ;;  %1128 = vst [vmem:[%s4561_s16 + $0x570] sm:$0xff] %v1127_v46  ;;  %1130 = vst [vmem:[%s4561_s16 + $0x578] sm:$0xff] %v1129_v47  ;;  %v1133_v49 = vld [vmem:[%s4556_s15 + $0xb10] sm:$0xff] }
  0x71   : > { %1132 = vst [vmem:[%s4561_s16 + $0x580] sm:$0xff] %v1131_v48  ;;  %v1135_v50 = vld [vmem:[%s4556_s15 + $0xb20] sm:$0xff]  ;;  %v1137_v51 = vld [vmem:[%s4556_s15 + $0xb30] sm:$0xff]  ;;  %1134 = vst [vmem:[%s4561_s16 + $0x588] sm:$0xff] %v1133_v49 }
  0x72   : > { %1136 = vst [vmem:[%s4561_s16 + $0x590] sm:$0xff] %v1135_v50  ;;  %1138 = vst [vmem:[%s4561_s16 + $0x598] sm:$0xff] %v1137_v51  ;;  %v1139_v52 = vld [vmem:[%s4556_s15 + $0xb40] sm:$0xff]  ;;  %v1141_v53 = vld [vmem:[%s4556_s15 + $0xb50] sm:$0xff] }
  0x73   : > { %v1143_v54 = vld [vmem:[%s4556_s15 + $0xb60] sm:$0xff]  ;;  %1140 = vst [vmem:[%s4561_s16 + $0x5a0] sm:$0xff] %v1139_v52  ;;  %1142 = vst [vmem:[%s4561_s16 + $0x5a8] sm:$0xff] %v1141_v53  ;;  %v1145_v55 = vld [vmem:[%s4556_s15 + $0xb70] sm:$0xff] }
  0x74   : > { %1144 = vst [vmem:[%s4561_s16 + $0x5b0] sm:$0xff] %v1143_v54  ;;  %v1147_v56 = vld [vmem:[%s4556_s15 + $0xb80] sm:$0xff]  ;;  %v1149_v57 = vld [vmem:[%s4556_s15 + $0xb90] sm:$0xff]  ;;  %1146 = vst [vmem:[%s4561_s16 + $0x5b8] sm:$0xff] %v1145_v55 }
  0x75   : > { %1148 = vst [vmem:[%s4561_s16 + $0x5c0] sm:$0xff] %v1147_v56  ;;  %1150 = vst [vmem:[%s4561_s16 + $0x5c8] sm:$0xff] %v1149_v57  ;;  %v1151_v58 = vld [vmem:[%s4556_s15 + $0xba0] sm:$0xff]  ;;  %v1153_v59 = vld [vmem:[%s4556_s15 + $0xbb0] sm:$0xff] }
  0x76   : > { %v1155_v60 = vld [vmem:[%s4556_s15 + $0xbc0] sm:$0xff]  ;;  %1152 = vst [vmem:[%s4561_s16 + $0x5d0] sm:$0xff] %v1151_v58  ;;  %1154 = vst [vmem:[%s4561_s16 + $0x5d8] sm:$0xff] %v1153_v59  ;;  %v1157_v61 = vld [vmem:[%s4556_s15 + $0xbd0] sm:$0xff] }
  0x77   : > { %1156 = vst [vmem:[%s4561_s16 + $0x5e0] sm:$0xff] %v1155_v60  ;;  %v1159_v62 = vld [vmem:[%s4556_s15 + $0xbe0] sm:$0xff]  ;;  %v1161_v63 = vld [vmem:[%s4556_s15 + $0xbf0] sm:$0xff]  ;;  %1158 = vst [vmem:[%s4561_s16 + $0x5e8] sm:$0xff] %v1157_v61 }
  0x78   : > { %1160 = vst [vmem:[%s4561_s16 + $0x5f0] sm:$0xff] %v1159_v62  ;;  %1162 = vst [vmem:[%s4561_s16 + $0x5f8] sm:$0xff] %v1161_v63  ;;  %v1163_v0 = vld [vmem:[%s4556_s15 + $0xc00] sm:$0xff]  ;;  %v1165_v1 = vld [vmem:[%s4556_s15 + $0xc10] sm:$0xff] }
  0x79   : > { %v1167_v2 = vld [vmem:[%s4556_s15 + $0xc20] sm:$0xff]  ;;  %1164 = vst [vmem:[%s4561_s16 + $0x600] sm:$0xff] %v1163_v0  ;;  %1166 = vst [vmem:[%s4561_s16 + $0x608] sm:$0xff] %v1165_v1  ;;  %v1169_v3 = vld [vmem:[%s4556_s15 + $0xc30] sm:$0xff] }
  0x7a   : > { %1168 = vst [vmem:[%s4561_s16 + $0x610] sm:$0xff] %v1167_v2  ;;  %v1171_v4 = vld [vmem:[%s4556_s15 + $0xc40] sm:$0xff]  ;;  %v1173_v5 = vld [vmem:[%s4556_s15 + $0xc50] sm:$0xff]  ;;  %1170 = vst [vmem:[%s4561_s16 + $0x618] sm:$0xff] %v1169_v3 }
  0x7b   : > { %1172 = vst [vmem:[%s4561_s16 + $0x620] sm:$0xff] %v1171_v4  ;;  %1174 = vst [vmem:[%s4561_s16 + $0x628] sm:$0xff] %v1173_v5  ;;  %v1175_v6 = vld [vmem:[%s4556_s15 + $0xc60] sm:$0xff]  ;;  %v1177_v7 = vld [vmem:[%s4556_s15 + $0xc70] sm:$0xff] }
  0x7c   : > { %v1179_v8 = vld [vmem:[%s4556_s15 + $0xc80] sm:$0xff]  ;;  %1176 = vst [vmem:[%s4561_s16 + $0x630] sm:$0xff] %v1175_v6  ;;  %1178 = vst [vmem:[%s4561_s16 + $0x638] sm:$0xff] %v1177_v7  ;;  %v1181_v9 = vld [vmem:[%s4556_s15 + $0xc90] sm:$0xff] }
  0x7d   : > { %1180 = vst [vmem:[%s4561_s16 + $0x640] sm:$0xff] %v1179_v8  ;;  %v1183_v10 = vld [vmem:[%s4556_s15 + $0xca0] sm:$0xff]  ;;  %v1185_v11 = vld [vmem:[%s4556_s15 + $0xcb0] sm:$0xff]  ;;  %1182 = vst [vmem:[%s4561_s16 + $0x648] sm:$0xff] %v1181_v9 }
  0x7e   : > { %1184 = vst [vmem:[%s4561_s16 + $0x650] sm:$0xff] %v1183_v10  ;;  %1186 = vst [vmem:[%s4561_s16 + $0x658] sm:$0xff] %v1185_v11  ;;  %v1187_v12 = vld [vmem:[%s4556_s15 + $0xcc0] sm:$0xff]  ;;  %v1189_v13 = vld [vmem:[%s4556_s15 + $0xcd0] sm:$0xff] }
  0x7f   : > { %v1191_v14 = vld [vmem:[%s4556_s15 + $0xce0] sm:$0xff]  ;;  %1188 = vst [vmem:[%s4561_s16 + $0x660] sm:$0xff] %v1187_v12  ;;  %1190 = vst [vmem:[%s4561_s16 + $0x668] sm:$0xff] %v1189_v13  ;;  %v1193_v15 = vld [vmem:[%s4556_s15 + $0xcf0] sm:$0xff] }
  0x80   : > { %1192 = vst [vmem:[%s4561_s16 + $0x670] sm:$0xff] %v1191_v14  ;;  %v1195_v16 = vld [vmem:[%s4556_s15 + $0xd00] sm:$0xff]  ;;  %v1197_v17 = vld [vmem:[%s4556_s15 + $0xd10] sm:$0xff]  ;;  %1194 = vst [vmem:[%s4561_s16 + $0x678] sm:$0xff] %v1193_v15 }
  0x81   : > { %1196 = vst [vmem:[%s4561_s16 + $0x680] sm:$0xff] %v1195_v16  ;;  %1198 = vst [vmem:[%s4561_s16 + $0x688] sm:$0xff] %v1197_v17  ;;  %v1199_v18 = vld [vmem:[%s4556_s15 + $0xd20] sm:$0xff]  ;;  %v1201_v19 = vld [vmem:[%s4556_s15 + $0xd30] sm:$0xff] }
  0x82   : > { %v1203_v20 = vld [vmem:[%s4556_s15 + $0xd40] sm:$0xff]  ;;  %1200 = vst [vmem:[%s4561_s16 + $0x690] sm:$0xff] %v1199_v18  ;;  %1202 = vst [vmem:[%s4561_s16 + $0x698] sm:$0xff] %v1201_v19  ;;  %v1205_v21 = vld [vmem:[%s4556_s15 + $0xd50] sm:$0xff] }
  0x83   : > { %1204 = vst [vmem:[%s4561_s16 + $0x6a0] sm:$0xff] %v1203_v20  ;;  %v1207_v22 = vld [vmem:[%s4556_s15 + $0xd60] sm:$0xff]  ;;  %v1209_v23 = vld [vmem:[%s4556_s15 + $0xd70] sm:$0xff]  ;;  %1206 = vst [vmem:[%s4561_s16 + $0x6a8] sm:$0xff] %v1205_v21 }
  0x84   : > { %1208 = vst [vmem:[%s4561_s16 + $0x6b0] sm:$0xff] %v1207_v22  ;;  %1210 = vst [vmem:[%s4561_s16 + $0x6b8] sm:$0xff] %v1209_v23  ;;  %v1211_v24 = vld [vmem:[%s4556_s15 + $0xd80] sm:$0xff]  ;;  %v1213_v25 = vld [vmem:[%s4556_s15 + $0xd90] sm:$0xff] }
  0x85   : > { %v1215_v26 = vld [vmem:[%s4556_s15 + $0xda0] sm:$0xff]  ;;  %1212 = vst [vmem:[%s4561_s16 + $0x6c0] sm:$0xff] %v1211_v24  ;;  %1214 = vst [vmem:[%s4561_s16 + $0x6c8] sm:$0xff] %v1213_v25  ;;  %v1217_v27 = vld [vmem:[%s4556_s15 + $0xdb0] sm:$0xff] }
  0x86   : > { %1216 = vst [vmem:[%s4561_s16 + $0x6d0] sm:$0xff] %v1215_v26  ;;  %v1219_v28 = vld [vmem:[%s4556_s15 + $0xdc0] sm:$0xff]  ;;  %v1221_v29 = vld [vmem:[%s4556_s15 + $0xdd0] sm:$0xff]  ;;  %1218 = vst [vmem:[%s4561_s16 + $0x6d8] sm:$0xff] %v1217_v27 }
  0x87   : > { %1220 = vst [vmem:[%s4561_s16 + $0x6e0] sm:$0xff] %v1219_v28  ;;  %1222 = vst [vmem:[%s4561_s16 + $0x6e8] sm:$0xff] %v1221_v29  ;;  %v1223_v30 = vld [vmem:[%s4556_s15 + $0xde0] sm:$0xff]  ;;  %v1225_v31 = vld [vmem:[%s4556_s15 + $0xdf0] sm:$0xff] }
  0x88   : > { %v1227_v32 = vld [vmem:[%s4556_s15 + $0xe00] sm:$0xff]  ;;  %1224 = vst [vmem:[%s4561_s16 + $0x6f0] sm:$0xff] %v1223_v30  ;;  %1226 = vst [vmem:[%s4561_s16 + $0x6f8] sm:$0xff] %v1225_v31  ;;  %v1229_v33 = vld [vmem:[%s4556_s15 + $0xe10] sm:$0xff] }
  0x89   : > { %1228 = vst [vmem:[%s4561_s16 + $0x700] sm:$0xff] %v1227_v32  ;;  %v1231_v34 = vld [vmem:[%s4556_s15 + $0xe20] sm:$0xff]  ;;  %v1233_v35 = vld [vmem:[%s4556_s15 + $0xe30] sm:$0xff]  ;;  %1230 = vst [vmem:[%s4561_s16 + $0x708] sm:$0xff] %v1229_v33 }
  0x8a   : > { %1232 = vst [vmem:[%s4561_s16 + $0x710] sm:$0xff] %v1231_v34  ;;  %1234 = vst [vmem:[%s4561_s16 + $0x718] sm:$0xff] %v1233_v35  ;;  %v1235_v36 = vld [vmem:[%s4556_s15 + $0xe40] sm:$0xff]  ;;  %v1237_v37 = vld [vmem:[%s4556_s15 + $0xe50] sm:$0xff] }
  0x8b   : > { %v1239_v38 = vld [vmem:[%s4556_s15 + $0xe60] sm:$0xff]  ;;  %1236 = vst [vmem:[%s4561_s16 + $0x720] sm:$0xff] %v1235_v36  ;;  %1238 = vst [vmem:[%s4561_s16 + $0x728] sm:$0xff] %v1237_v37  ;;  %v1241_v39 = vld [vmem:[%s4556_s15 + $0xe70] sm:$0xff] }
  0x8c   : > { %1240 = vst [vmem:[%s4561_s16 + $0x730] sm:$0xff] %v1239_v38  ;;  %v1243_v40 = vld [vmem:[%s4556_s15 + $0xe80] sm:$0xff]  ;;  %v1245_v41 = vld [vmem:[%s4556_s15 + $0xe90] sm:$0xff]  ;;  %1242 = vst [vmem:[%s4561_s16 + $0x738] sm:$0xff] %v1241_v39 }
  0x8d   : > { %1244 = vst [vmem:[%s4561_s16 + $0x740] sm:$0xff] %v1243_v40  ;;  %1246 = vst [vmem:[%s4561_s16 + $0x748] sm:$0xff] %v1245_v41  ;;  %v1247_v42 = vld [vmem:[%s4556_s15 + $0xea0] sm:$0xff]  ;;  %v1249_v43 = vld [vmem:[%s4556_s15 + $0xeb0] sm:$0xff] }
  0x8e   : > { %v1251_v44 = vld [vmem:[%s4556_s15 + $0xec0] sm:$0xff]  ;;  %1248 = vst [vmem:[%s4561_s16 + $0x750] sm:$0xff] %v1247_v42  ;;  %1250 = vst [vmem:[%s4561_s16 + $0x758] sm:$0xff] %v1249_v43  ;;  %v1253_v45 = vld [vmem:[%s4556_s15 + $0xed0] sm:$0xff] }
  0x8f   : > { %1252 = vst [vmem:[%s4561_s16 + $0x760] sm:$0xff] %v1251_v44  ;;  %v1255_v46 = vld [vmem:[%s4556_s15 + $0xee0] sm:$0xff]  ;;  %v1257_v47 = vld [vmem:[%s4556_s15 + $0xef0] sm:$0xff]  ;;  %1254 = vst [vmem:[%s4561_s16 + $0x768] sm:$0xff] %v1253_v45 }
  0x90   : > { %1256 = vst [vmem:[%s4561_s16 + $0x770] sm:$0xff] %v1255_v46  ;;  %1258 = vst [vmem:[%s4561_s16 + $0x778] sm:$0xff] %v1257_v47  ;;  %v1259_v48 = vld [vmem:[%s4556_s15 + $0xf00] sm:$0xff]  ;;  %v1261_v49 = vld [vmem:[%s4556_s15 + $0xf10] sm:$0xff] }
  0x91   : > { %v1263_v50 = vld [vmem:[%s4556_s15 + $0xf20] sm:$0xff]  ;;  %1260 = vst [vmem:[%s4561_s16 + $0x780] sm:$0xff] %v1259_v48  ;;  %1262 = vst [vmem:[%s4561_s16 + $0x788] sm:$0xff] %v1261_v49  ;;  %v1265_v51 = vld [vmem:[%s4556_s15 + $0xf30] sm:$0xff] }
  0x92   : > { %1264 = vst [vmem:[%s4561_s16 + $0x790] sm:$0xff] %v1263_v50  ;;  %v1267_v52 = vld [vmem:[%s4556_s15 + $0xf40] sm:$0xff]  ;;  %v1269_v53 = vld [vmem:[%s4556_s15 + $0xf50] sm:$0xff]  ;;  %1266 = vst [vmem:[%s4561_s16 + $0x798] sm:$0xff] %v1265_v51 }
  0x93   : > { %1268 = vst [vmem:[%s4561_s16 + $0x7a0] sm:$0xff] %v1267_v52  ;;  %1270 = vst [vmem:[%s4561_s16 + $0x7a8] sm:$0xff] %v1269_v53  ;;  %v1271_v54 = vld [vmem:[%s4556_s15 + $0xf60] sm:$0xff]  ;;  %v1273_v55 = vld [vmem:[%s4556_s15 + $0xf70] sm:$0xff] }
  0x94   : > { %v1275_v56 = vld [vmem:[%s4556_s15 + $0xf80] sm:$0xff]  ;;  %1272 = vst [vmem:[%s4561_s16 + $0x7b0] sm:$0xff] %v1271_v54  ;;  %1274 = vst [vmem:[%s4561_s16 + $0x7b8] sm:$0xff] %v1273_v55  ;;  %v1277_v57 = vld [vmem:[%s4556_s15 + $0xf90] sm:$0xff] }
  0x95   : > { %1276 = vst [vmem:[%s4561_s16 + $0x7c0] sm:$0xff] %v1275_v56  ;;  %v1279_v58 = vld [vmem:[%s4556_s15 + $0xfa0] sm:$0xff]  ;;  %v1281_v59 = vld [vmem:[%s4556_s15 + $0xfb0] sm:$0xff]  ;;  %1278 = vst [vmem:[%s4561_s16 + $0x7c8] sm:$0xff] %v1277_v57 }
  0x96   : > { %1280 = vst [vmem:[%s4561_s16 + $0x7d0] sm:$0xff] %v1279_v58  ;;  %1282 = vst [vmem:[%s4561_s16 + $0x7d8] sm:$0xff] %v1281_v59  ;;  %v1283_v60 = vld [vmem:[%s4556_s15 + $0xfc0] sm:$0xff]  ;;  %v1285_v61 = vld [vmem:[%s4556_s15 + $0xfd0] sm:$0xff] }
  0x97   : > { %v1287_v62 = vld [vmem:[%s4556_s15 + $0xfe0] sm:$0xff]  ;;  %1284 = vst [vmem:[%s4561_s16 + $0x7e0] sm:$0xff] %v1283_v60  ;;  %1286 = vst [vmem:[%s4561_s16 + $0x7e8] sm:$0xff] %v1285_v61  ;;  %v1289_v63 = vld [vmem:[%s4556_s15 + $0xff0] sm:$0xff] }
  0x98   : > { %1288 = vst [vmem:[%s4561_s16 + $0x7f0] sm:$0xff] %v1287_v62  ;;  %1290 = vst [vmem:[%s4561_s16 + $0x7f8] sm:$0xff] %v1289_v63 }
  0x99 PF: > { %p3662_p7 = scmp.ge.s32.totalorder %s4463_s24, 1  ;;  %p1303_p8 = scmp.lt.s32.totalorder %s4463_s24, 5 }
  0x9b   : > { %p1304_p9 = pnand %p3662_p7, %p1303_p8 }
  0x9c   : > { %s1310_s17 = sand.u32 (!%p1304_p9), 1, %s4439_s18   ;;  %s3664_s27 = sshll.u32 (!%p1304_p9), %s4447_s20, 4 }
  0x9d   : > { %1307 = sbr.rel (%p1304_p9) target bundleno = 679 (0x2a7), region = 66  ;;  %s3663_s28 = sshll.u32 (!%p1304_p9), %s1310_s17, 11 }
  0x9e   : > { %p1375_p10 = scmp.lt.s32.totalorder (!%p1304_p9), %s3664_s27, 31  ;;  %s3666_s29 = sshll.u32 (!%p1304_p9), %s4451_s21, 1 }
  0x9f   : > { %p1385_p11 = scmp.lt.s32.totalorder (!%p1304_p9), %s3666_s29, 3  ;;  %s5105_s10 = scalar_lea.vmem (!%p1304_p9), [#allocation3], %s3663_s28 }
  0xa0   : > { %p3673_p12 = scmp.ne.s32.totalorder (!%p1304_p9), %s4447_s20, 0 }
  0xa4   : > { %s5459_s27 = smov (!%p1375_p10, %s3664_s27), 31  ;;  %s5461_s29 = smov (!%p1385_p11, %s3666_s29), 3 }
  0xa5   : > { %s3665_s30 = sshll.u32 %s5459_s27, 2  ;;  %s1387_s18 = scalar_lea.vmem %s5442_s2, %s5461_s29  ;;  %v4465_v0 = vmov (!%p3673_p12), 0.0  }
  0xa6   : > { %s5080_s9 = scalar_lea.vmem %s5440_s0, %s3665_s30  ;;  %s3668_s12 = sshll.u32 %s5461_s29, 2  ;;  %1424 = vst [vmem:[#allocation2] sm:$0xff] (!%p3673_p12), %v4465_v0  ;;  %1425 = vst [vmem:[#allocation2 + $0x8] sm:$0xff] (!%p3673_p12), %v4465_v0 }
  0xa7   : > { %s5092_s14 = scalar_lea.vmem %s5443_s3, %s3668_s12  ;;  %s3670_s15 = sshll.u32 %s5461_s29, 3 }
  0xa8   : > { %s5098_s27 = scalar_lea.vmem %s5444_s4, %s3670_s15  ;;  %s5103_s8 = scalar_lea.vmem %s5445_s5, %s3670_s15 }
  0xa9   : > { %1423 = sbr.rel (%p3673_p12) target bundleno = 176 (0xb0), region = 74 }
  0xb0 PF: > { %v4009_v1 = vld [vmem:[%s5105_s10 + $0x4] ss:$8 sps:$4 sm:$0xff]   ;;  %v4013_v3 = vld [vmem:[%s5105_s10] ss:$8 sps:$4 sm:$0xff]   ;;  %v4015_v5 = vld [vmem:[%s5105_s10 + $0x14] ss:$8 sps:$4 sm:$0xff]  }
  0xb1   : > { %v4011_v2 = vld [vmem:[%s5105_s10 + $0x104] ss:$8 sps:$4 sm:$0xff]   ;;  %3028 = vmatprep.subr.bf16.mxu0 %v4009_v1  ;;  %v4014_v4 = vld [vmem:[%s5105_s10 + $0x100] ss:$8 sps:$4 sm:$0xff]   ;;  %v4017_v6 = vld [vmem:[%s5105_s10 + $0x114] ss:$8 sps:$4 sm:$0xff]  }
  0xb2   : > { %3069 = vmatprep.subr.bf16.mxu1 %v4011_v2  ;;  %3029 = vmatpush1.bf16.msra.mxu0 %v4013_v3  ;;  %v4019_v7 = vld [vmem:[%s5105_s10 + $0x10] ss:$8 sps:$4 sm:$0xff]   ;;  %v4021_v9 = vld [vmem:[%s5105_s10 + $0x24] ss:$8 sps:$4 sm:$0xff]   ;;  %v4025_v11 = vld [vmem:[%s5105_s10 + $0x20] ss:$8 sps:$4 sm:$0xff]  }
  0xb3   : > { %3070 = vmatpush1.bf16.msra.mxu1 %v4014_v4  ;;  %3030 = vmatprep.subr.bf16.mxu0 %v4015_v5  ;;  %v4020_v8 = vld [vmem:[%s5105_s10 + $0x110] ss:$8 sps:$4 sm:$0xff]   ;;  %v4023_v10 = vld [vmem:[%s5105_s10 + $0x124] ss:$8 sps:$4 sm:$0xff]   ;;  %v4026_v12 = vld [vmem:[%s5105_s10 + $0x120] ss:$8 sps:$4 sm:$0xff]  }
  0xb4   : > { %3071 = vmatprep.subr.bf16.mxu1 %v4017_v6  ;;  %v4027_v13 = vld [vmem:[%s5105_s10 + $0x34] ss:$8 sps:$4 sm:$0xff]   ;;  %v4031_v15 = vld [vmem:[%s5105_s10 + $0x30] ss:$8 sps:$4 sm:$0xff]   ;;  %v4033_v17 = vld [vmem:[%s5105_s10 + $0x44] ss:$8 sps:$4 sm:$0xff]  }
  0xb5   : > { %v4029_v14 = vld [vmem:[%s5105_s10 + $0x134] ss:$8 sps:$4 sm:$0xff]   ;;  %v4032_v16 = vld [vmem:[%s5105_s10 + $0x130] ss:$8 sps:$4 sm:$0xff]   ;;  %v4035_v18 = vld [vmem:[%s5105_s10 + $0x144] ss:$8 sps:$4 sm:$0xff]  }
  0xb6   : > { %3031 = vmatpush1.bf16.msra.mxu0 %v4019_v7  ;;  %v4037_v19 = vld [vmem:[%s5105_s10 + $0x40] ss:$8 sps:$4 sm:$0xff]   ;;  %v4039_v21 = vld [vmem:[%s5105_s10 + $0x54] ss:$8 sps:$4 sm:$0xff]   ;;  %v4043_v23 = vld [vmem:[%s5105_s10 + $0x50] ss:$8 sps:$4 sm:$0xff]  }
  0xb7   : > { %3072 = vmatpush1.bf16.msra.mxu1 %v4020_v8  ;;  %3032 = vmatprep.subr.bf16.mxu0 %v4021_v9  ;;  %v4038_v20 = vld [vmem:[%s5105_s10 + $0x140] ss:$8 sps:$4 sm:$0xff]   ;;  %v4041_v22 = vld [vmem:[%s5105_s10 + $0x154] ss:$8 sps:$4 sm:$0xff]   ;;  %v4044_v24 = vld [vmem:[%s5105_s10 + $0x150] ss:$8 sps:$4 sm:$0xff]  }
  0xb8   : > { %3073 = vmatprep.subr.bf16.mxu1 %v4023_v10  ;;  %v4045_v25 = vld [vmem:[%s5105_s10 + $0x64] ss:$8 sps:$4 sm:$0xff]   ;;  %v4049_v27 = vld [vmem:[%s5105_s10 + $0x60] ss:$8 sps:$4 sm:$0xff]   ;;  %v4051_v29 = vld [vmem:[%s5105_s10 + $0x74] ss:$8 sps:$4 sm:$0xff]  }
  0xb9   : > { %v4047_v26 = vld [vmem:[%s5105_s10 + $0x164] ss:$8 sps:$4 sm:$0xff]   ;;  %v4050_v28 = vld [vmem:[%s5105_s10 + $0x160] ss:$8 sps:$4 sm:$0xff]   ;;  %v4053_v30 = vld [vmem:[%s5105_s10 + $0x174] ss:$8 sps:$4 sm:$0xff]  }
  0xba   : > { %3033 = vmatpush1.bf16.msra.mxu0 %v4025_v11  ;;  %v4055_v31 = vld [vmem:[%s5105_s10 + $0x70] ss:$8 sps:$4 sm:$0xff]   ;;  %v4057_v33 = vld [vmem:[%s5105_s10 + $0x84] ss:$8 sps:$4 sm:$0xff]   ;;  %v4061_v35 = vld [vmem:[%s5105_s10 + $0x80] ss:$8 sps:$4 sm:$0xff]  }
  0xbb   : > { %3074 = vmatpush1.bf16.msra.mxu1 %v4026_v12  ;;  %3034 = vmatprep.subr.bf16.mxu0 %v4027_v13  ;;  %v4056_v32 = vld [vmem:[%s5105_s10 + $0x170] ss:$8 sps:$4 sm:$0xff]   ;;  %v4059_v34 = vld [vmem:[%s5105_s10 + $0x184] ss:$8 sps:$4 sm:$0xff]   ;;  %v4062_v36 = vld [vmem:[%s5105_s10 + $0x180] ss:$8 sps:$4 sm:$0xff]  }
  0xbc   : > { %3075 = vmatprep.subr.bf16.mxu1 %v4029_v14  ;;  %v4063_v37 = vld [vmem:[%s5105_s10 + $0x94] ss:$8 sps:$4 sm:$0xff]   ;;  %v4067_v39 = vld [vmem:[%s5105_s10 + $0x90] ss:$8 sps:$4 sm:$0xff]   ;;  %v4069_v41 = vld [vmem:[%s5105_s10 + $0xa4] ss:$8 sps:$4 sm:$0xff]  }
  0xbd   : > { %v4065_v38 = vld [vmem:[%s5105_s10 + $0x194] ss:$8 sps:$4 sm:$0xff]   ;;  %v4068_v40 = vld [vmem:[%s5105_s10 + $0x190] ss:$8 sps:$4 sm:$0xff]   ;;  %v4071_v42 = vld [vmem:[%s5105_s10 + $0x1a4] ss:$8 sps:$4 sm:$0xff]  }
  0xbe   : > { %3035 = vmatpush1.bf16.msra.mxu0 %v4031_v15  ;;  %v4073_v43 = vld [vmem:[%s5105_s10 + $0xa0] ss:$8 sps:$4 sm:$0xff]   ;;  %v4075_v45 = vld [vmem:[%s5105_s10 + $0xb4] ss:$8 sps:$4 sm:$0xff]   ;;  %v4079_v50 = vld [vmem:[%s5105_s10 + $0xb0] ss:$8 sps:$4 sm:$0xff]  }
  0xbf   : > { %3076 = vmatpush1.bf16.msra.mxu1 %v4032_v16  ;;  %3036 = vmatprep.subr.bf16.mxu0 %v4033_v17  ;;  %v4074_v44 = vld [vmem:[%s5105_s10 + $0x1a0] ss:$8 sps:$4 sm:$0xff]   ;;  %v4077_v46 = vld [vmem:[%s5105_s10 + $0x1b4] ss:$8 sps:$4 sm:$0xff]   ;;  %v4080_v51 = vld [vmem:[%s5105_s10 + $0x1b0] ss:$8 sps:$4 sm:$0xff]  }
  0xc0   : > { %3077 = vmatprep.subr.bf16.mxu1 %v4035_v18  ;;  %v1428_v47 = vld [vmem:[%s5080_s9] sm:$0xff]  ;;  %v1429_v49 = vld [vmem:[%s5080_s9 + $0x8] sm:$0xff]  ;;  %v4081_v53 = vld [vmem:[%s5105_s10 + $0xc4] ss:$8 sps:$4 sm:$0xff]   ;;  %p3946_p13 = scmp.ne.s32.totalorder %s4447_s20, 1 }
  0xc1   : > { %v3675_v48 = vcombine.high %v1428_v47, %v1428_v47  ;;  %v3677_v52 = vcombine.high %v1429_v49, %v1429_v49  ;;  %v4083_v54 = vld [vmem:[%s5105_s10 + $0x1c4] ss:$8 sps:$4 sm:$0xff]   ;;  %v4085_v55 = vld [vmem:[%s5105_s10 + $0xc0] ss:$8 sps:$4 sm:$0xff]   ;;  %v4087_v57 = vld [vmem:[%s5105_s10 + $0xd4] ss:$8 sps:$4 sm:$0xff]   ;;  %v3674_v7 = vcombine.low %v1428_v47, %v1428_v47  ;;  %v3676_v8 = vcombine.low %v1429_v49, %v1429_v49 }
  0xc2   : > { %3037 = vmatpush1.bf16.msra.mxu0 %v4037_v19  ;;  %v4086_v56 = vld [vmem:[%s5105_s10 + $0x1c0] ss:$8 sps:$4 sm:$0xff]   ;;  %v4089_v58 = vld [vmem:[%s5105_s10 + $0x1d4] ss:$8 sps:$4 sm:$0xff]   ;;  %v4091_v59 = vld [vmem:[%s5105_s10 + $0xd0] ss:$8 sps:$4 sm:$0xff]  }
  0xc3   : > { %3078 = vmatpush1.bf16.msra.mxu1 %v4038_v20  ;;  %3038 = vmatprep.subr.bf16.mxu0 %v4039_v21  ;;  %v4092_v60 = vld [vmem:[%s5105_s10 + $0x1d0] ss:$8 sps:$4 sm:$0xff]   ;;  %v4093_v61 = vld [vmem:[%s5105_s10 + $0xe4] ss:$8 sps:$4 sm:$0xff]   ;;  %v4097_v63 = vld [vmem:[%s5105_s10 + $0xe0] ss:$8 sps:$4 sm:$0xff]  }
  0xc4   : > { %3079 = vmatprep.subr.bf16.mxu1 %v4041_v22  ;;  %3060 = vmatprep.mubr.bf16.mxu0 %v3675_v48  ;;  %v4095_v62 = vld [vmem:[%s5105_s10 + $0x1e4] ss:$8 sps:$4 sm:$0xff]   ;;  %v4098_v0 = vld [vmem:[%s5105_s10 + $0x1e0] ss:$8 sps:$4 sm:$0xff]   ;;  %v4099_v1 = vld [vmem:[%s5105_s10 + $0xf4] ss:$8 sps:$4 sm:$0xff]  }
  0xc5   : > { %3101 = vmatprep.mubr.bf16.mxu1 %v3677_v52  ;;  %v4101_v2 = vld [vmem:[%s5105_s10 + $0x1f4] ss:$8 sps:$4 sm:$0xff]   ;;  %v4103_v3 = vld [vmem:[%s5105_s10 + $0xf0] ss:$8 sps:$4 sm:$0xff]   ;;  %v4111_v5 = vld [vmem:[%s5105_s10 + $0x204] ss:$8 sps:$4 sm:$0xff]  }
  0xc6   : > { %3039 = vmatpush1.bf16.msra.mxu0 %v4043_v23  ;;  %v4104_v4 = vld [vmem:[%s5105_s10 + $0x1f0] ss:$8 sps:$4 sm:$0xff]   ;;  %v4114_v6 = vld [vmem:[%s5105_s10 + $0x304] ss:$8 sps:$4 sm:$0xff]   ;;  %v4109_v9 = vld [vmem:[%s5105_s10 + $0x200] ss:$8 sps:$4 sm:$0xff]  }
  0xc7   : > { %3080 = vmatpush1.bf16.msra.mxu1 %v4044_v24  ;;  %3040 = vmatprep.subr.bf16.mxu0 %v4045_v25  ;;  %v4112_v10 = vld [vmem:[%s5105_s10 + $0x300] ss:$8 sps:$4 sm:$0xff]   ;;  %v4117_v11 = vld [vmem:[%s5105_s10 + $0x214] ss:$8 sps:$4 sm:$0xff]   ;;  %v4115_v13 = vld [vmem:[%s5105_s10 + $0x210] ss:$8 sps:$4 sm:$0xff]  }
  0xc8   : > { %3081 = vmatprep.subr.bf16.mxu1 %v4047_v26  ;;  %v4120_v12 = vld [vmem:[%s5105_s10 + $0x314] ss:$8 sps:$4 sm:$0xff]   ;;  %v4118_v14 = vld [vmem:[%s5105_s10 + $0x310] ss:$8 sps:$4 sm:$0xff]   ;;  %v4123_v15 = vld [vmem:[%s5105_s10 + $0x224] ss:$8 sps:$4 sm:$0xff]  }
  0xc9   : > { %v4126_v16 = vld [vmem:[%s5105_s10 + $0x324] ss:$8 sps:$4 sm:$0xff]   ;;  %v4121_v17 = vld [vmem:[%s5105_s10 + $0x220] ss:$8 sps:$4 sm:$0xff]   ;;  %v4129_v19 = vld [vmem:[%s5105_s10 + $0x234] ss:$8 sps:$4 sm:$0xff]  }
  0xca   : > { %3041 = vmatpush1.bf16.msra.mxu0 %v4049_v27  ;;  %v4124_v18 = vld [vmem:[%s5105_s10 + $0x320] ss:$8 sps:$4 sm:$0xff]   ;;  %v4132_v20 = vld [vmem:[%s5105_s10 + $0x334] ss:$8 sps:$4 sm:$0xff]   ;;  %v4127_v21 = vld [vmem:[%s5105_s10 + $0x230] ss:$8 sps:$4 sm:$0xff]  }
  0xcb   : > { %3082 = vmatpush1.bf16.msra.mxu1 %v4050_v28  ;;  %3042 = vmatprep.subr.bf16.mxu0 %v4051_v29  ;;  %v4130_v22 = vld [vmem:[%s5105_s10 + $0x330] ss:$8 sps:$4 sm:$0xff]   ;;  %v4135_v23 = vld [vmem:[%s5105_s10 + $0x244] ss:$8 sps:$4 sm:$0xff]   ;;  %v4133_v25 = vld [vmem:[%s5105_s10 + $0x240] ss:$8 sps:$4 sm:$0xff]  }
  0xcc   : > { %3083 = vmatprep.subr.bf16.mxu1 %v4053_v30  ;;  %v4138_v24 = vld [vmem:[%s5105_s10 + $0x344] ss:$8 sps:$4 sm:$0xff]   ;;  %v4136_v26 = vld [vmem:[%s5105_s10 + $0x340] ss:$8 sps:$4 sm:$0xff]   ;;  %v4141_v27 = vld [vmem:[%s5105_s10 + $0x254] ss:$8 sps:$4 sm:$0xff]  }
  0xcd   : > { %v4144_v28 = vld [vmem:[%s5105_s10 + $0x354] ss:$8 sps:$4 sm:$0xff]   ;;  %v4139_v29 = vld [vmem:[%s5105_s10 + $0x250] ss:$8 sps:$4 sm:$0xff]   ;;  %v4174_v52 = vld [vmem:[%s5105_s10 + $0x3a4] ss:$8 sps:$4 sm:$0xff]  }
  0xce   : > { %3043 = vmatpush1.bf16.msra.mxu0 %v4055_v31  ;;  %v4142_v30 = vld [vmem:[%s5105_s10 + $0x350] ss:$8 sps:$4 sm:$0xff]   ;;  %v4147_v31 = vld [vmem:[%s5105_s10 + $0x264] ss:$8 sps:$4 sm:$0xff]   ;;  %v4165_v47 = vld [vmem:[%s5105_s10 + $0x294] ss:$8 sps:$4 sm:$0xff]  }
  0xcf   : > { %3084 = vmatpush1.bf16.msra.mxu1 %v4056_v32  ;;  %3044 = vmatprep.subr.bf16.mxu0 %v4057_v33  ;;  %v4150_v32 = vld [vmem:[%s5105_s10 + $0x364] ss:$8 sps:$4 sm:$0xff]   ;;  %v4168_v48 = vld [vmem:[%s5105_s10 + $0x394] ss:$8 sps:$4 sm:$0xff]   ;;  %v4163_v49 = vld [vmem:[%s5105_s10 + $0x290] ss:$8 sps:$4 sm:$0xff]  }
  0xd0   : > { %3085 = vmatprep.subr.bf16.mxu1 %v4059_v34  ;;  %v5201_v33 = vld [vmem:[%s5080_s9 + $0x10] sm:$0xff]  ;;  %v5204_v34 = vld [vmem:[%s5080_s9 + $0x18] sm:$0xff] }
  0xd2   : > { %3045 = vmatpush1.bf16.msra.mxu0 %v4061_v35  ;;  %v4145_v35 = vld [vmem:[%s5105_s10 + $0x260] ss:$8 sps:$4 sm:$0xff]  }
  0xd3   : > { %3086 = vmatpush1.bf16.msra.mxu1 %v4062_v36  ;;  %3046 = vmatprep.subr.bf16.mxu0 %v4063_v37  ;;  %v4148_v36 = vld [vmem:[%s5105_s10 + $0x360] ss:$8 sps:$4 sm:$0xff]   ;;  %v3679_v37 = vcombine.high %v5201_v33, %v5201_v33 }
  0xd4   : > { %3087 = vmatprep.subr.bf16.mxu1 %v4065_v38  ;;  %v3681_v38 = vcombine.high %v5204_v34, %v5204_v34 }
  0xd6   : > { %3047 = vmatpush1.bf16.msra.mxu0 %v4067_v39  ;;  %v4153_v39 = vld [vmem:[%s5105_s10 + $0x274] ss:$8 sps:$4 sm:$0xff]  }
  0xd7   : > { %3088 = vmatpush1.bf16.msra.mxu1 %v4068_v40  ;;  %3048 = vmatprep.subr.bf16.mxu0 %v4069_v41  ;;  %v4156_v40 = vld [vmem:[%s5105_s10 + $0x374] ss:$8 sps:$4 sm:$0xff]   ;;  %v4151_v41 = vld [vmem:[%s5105_s10 + $0x270] ss:$8 sps:$4 sm:$0xff]  }
  0xd8   : > { %3089 = vmatprep.subr.bf16.mxu1 %v4071_v42  ;;  %v4154_v42 = vld [vmem:[%s5105_s10 + $0x370] ss:$8 sps:$4 sm:$0xff]  }
  0xda   : > { %3049 = vmatpush1.bf16.msra.mxu0 %v4073_v43  ;;  %v4159_v43 = vld [vmem:[%s5105_s10 + $0x284] ss:$8 sps:$4 sm:$0xff]  }
  0xdb   : > { %3090 = vmatpush1.bf16.msra.mxu1 %v4074_v44  ;;  %3050 = vmatprep.subr.bf16.mxu0 %v4075_v45  ;;  %v4162_v44 = vld [vmem:[%s5105_s10 + $0x384] ss:$8 sps:$4 sm:$0xff]   ;;  %v4157_v45 = vld [vmem:[%s5105_s10 + $0x280] ss:$8 sps:$4 sm:$0xff]  }
  0xdc   : > { %3091 = vmatprep.subr.bf16.mxu1 %v4077_v46  ;;  %v4160_v46 = vld [vmem:[%s5105_s10 + $0x380] ss:$8 sps:$4 sm:$0xff]  }
  0xde   : > { %3051 = vmatpush1.bf16.msra.mxu0 %v4079_v50  ;;  %v4166_v50 = vld [vmem:[%s5105_s10 + $0x390] ss:$8 sps:$4 sm:$0xff]  }
  0xdf   : > { %3092 = vmatpush1.bf16.msra.mxu1 %v4080_v51  ;;  %3052 = vmatprep.subr.bf16.mxu0 %v4081_v53  ;;  %v4171_v51 = vld [vmem:[%s5105_s10 + $0x2a4] ss:$8 sps:$4 sm:$0xff]   ;;  %v4169_v53 = vld [vmem:[%s5105_s10 + $0x2a0] ss:$8 sps:$4 sm:$0xff]  }
  0xe0   : > { %3093 = vmatprep.subr.bf16.mxu1 %v4083_v54  ;;  %v4172_v54 = vld [vmem:[%s5105_s10 + $0x3a0] ss:$8 sps:$4 sm:$0xff]  }
  0xe2   : > { %3053 = vmatpush1.bf16.msra.mxu0 %v4085_v55  ;;  %v4177_v55 = vld [vmem:[%s5105_s10 + $0x2b4] ss:$8 sps:$4 sm:$0xff]  }
  0xe3   : > { %3094 = vmatpush1.bf16.msra.mxu1 %v4086_v56  ;;  %3054 = vmatprep.subr.bf16.mxu0 %v4087_v57  ;;  %v4180_v56 = vld [vmem:[%s5105_s10 + $0x3b4] ss:$8 sps:$4 sm:$0xff]   ;;  %v4175_v57 = vld [vmem:[%s5105_s10 + $0x2b0] ss:$8 sps:$4 sm:$0xff]  }
  0xe4   : > { %3095 = vmatprep.subr.bf16.mxu1 %v4089_v58  ;;  %v4178_v58 = vld [vmem:[%s5105_s10 + $0x3b0] ss:$8 sps:$4 sm:$0xff]  }
  0xe6   : > { %3055 = vmatpush1.bf16.msra.mxu0 %v4091_v59  ;;  %v4183_v59 = vld [vmem:[%s5105_s10 + $0x2c4] ss:$8 sps:$4 sm:$0xff]  }
  0xe7   : > { %3096 = vmatpush1.bf16.msra.mxu1 %v4092_v60  ;;  %3056 = vmatprep.subr.bf16.mxu0 %v4093_v61  ;;  %v4186_v60 = vld [vmem:[%s5105_s10 + $0x3c4] ss:$8 sps:$4 sm:$0xff]   ;;  %v4181_v61 = vld [vmem:[%s5105_s10 + $0x2c0] ss:$8 sps:$4 sm:$0xff]  }
  0xe8   : > { %3097 = vmatprep.subr.bf16.mxu1 %v4095_v62  ;;  %v4184_v62 = vld [vmem:[%s5105_s10 + $0x3c0] ss:$8 sps:$4 sm:$0xff]  }
  0xea   : > { %3057 = vmatpush1.bf16.msra.mxu0 %v4097_v63  ;;  %v4189_v63 = vld [vmem:[%s5105_s10 + $0x2d4] ss:$8 sps:$4 sm:$0xff]  }
  0xeb   : > { %3098 = vmatpush1.bf16.msra.mxu1 %v4098_v0  ;;  %3058 = vmatprep.subr.bf16.mxu0 %v4099_v1  ;;  %v4192_v0 = vld [vmem:[%s5105_s10 + $0x3d4] ss:$8 sps:$4 sm:$0xff]   ;;  %v4187_v1 = vld [vmem:[%s5105_s10 + $0x2d0] ss:$8 sps:$4 sm:$0xff]  }
  0xec   : > { %3099 = vmatprep.subr.bf16.mxu1 %v4101_v2  ;;  %v4190_v2 = vld [vmem:[%s5105_s10 + $0x3d0] ss:$8 sps:$4 sm:$0xff]  }
  0xee   : > { %3059 = vmatpush1.bf16.msra.mxu0 %v4103_v3  ;;  %v4195_v3 = vld [vmem:[%s5105_s10 + $0x2e4] ss:$8 sps:$4 sm:$0xff]  }
  0xef   : > { %3100 = vmatpush1.bf16.msra.mxu1 %v4104_v4  ;;  %3110 = vmatprep.subr.bf16.mxu0 %v4111_v5  ;;  %v4198_v4 = vld [vmem:[%s5105_s10 + $0x3e4] ss:$8 sps:$4 sm:$0xff]   ;;  %v4193_v5 = vld [vmem:[%s5105_s10 + $0x2e0] ss:$8 sps:$4 sm:$0xff]  }
  0xf0   : > { %3151 = vmatprep.subr.bf16.mxu1 %v4114_v6  ;;  %v4196_v6 = vld [vmem:[%s5105_s10 + $0x3e0] ss:$8 sps:$4 sm:$0xff]  }
  0xf1   : > { %3061 = vmatmul.mubr.bf16.vlgmr.msra.gmra.mrb[0].mxu0 %v3674_v7  ;;  %v4201_v7 = vld [vmem:[%s5105_s10 + $0x2f4] ss:$8 sps:$4 sm:$0xff]  }
  0xf2   : > { %3102 = vmatmul.mubr.bf16.vlgmr.msra.gmra.mrb[0].mxu1 %v3676_v8  ;;  %3111 = vmatpush1.bf16.msra.mxu0 %v4109_v9  ;;  %v4204_v8 = vld [vmem:[%s5105_s10 + $0x3f4] ss:$8 sps:$4 sm:$0xff]   ;;  %v4199_v9 = vld [vmem:[%s5105_s10 + $0x2f0] ss:$8 sps:$4 sm:$0xff]  }
  0xf3   : > { %3152 = vmatpush1.bf16.msra.mxu1 %v4112_v10  ;;  %3112 = vmatprep.subr.bf16.mxu0 %v4117_v11  ;;  %v4202_v10 = vld [vmem:[%s5105_s10 + $0x3f0] ss:$8 sps:$4 sm:$0xff]   ;;  %v4211_v11 = vld [vmem:[%s5105_s10 + $0x404] ss:$8 sps:$4 sm:$0xff]  }
  0xf4   : > { %3153 = vmatprep.subr.bf16.mxu1 %v4120_v12  ;;  %3142 = vmatprep.mubr.bf16.mxu0 %v3679_v37  ;;  %v4214_v12 = vld [vmem:[%s5105_s10 + $0x504] ss:$8 sps:$4 sm:$0xff]   ;;  %v4241_v37 = vld [vmem:[%s5105_s10 + $0x454] ss:$8 sps:$4 sm:$0xff]  }
  0xf5   : > { %3183 = vmatprep.mubr.bf16.mxu1 %v3681_v38  ;;  %v4244_v38 = vld [vmem:[%s5105_s10 + $0x554] ss:$8 sps:$4 sm:$0xff]  }
  0xf6   : > { %3113 = vmatpush1.bf16.msra.mxu0 %v4115_v13  ;;  %v3678_v13 = vcombine.low %v5201_v33, %v5201_v33  ;;  %v4235_v33 = vld [vmem:[%s5105_s10 + $0x444] ss:$8 sps:$4 sm:$0xff]  }
  0xf7   : > { %3154 = vmatpush1.bf16.msra.mxu1 %v4118_v14  ;;  %3114 = vmatprep.subr.bf16.mxu0 %v4123_v15  ;;  %v3680_v14 = vcombine.low %v5204_v34, %v5204_v34  ;;  %v4209_v15 = vld [vmem:[%s5105_s10 + $0x400] ss:$8 sps:$4 sm:$0xff]   ;;  %v4238_v34 = vld [vmem:[%s5105_s10 + $0x544] ss:$8 sps:$4 sm:$0xff]  }
  0xf8   : > { %3155 = vmatprep.subr.bf16.mxu1 %v4126_v16  ;;  %v4212_v16 = vld [vmem:[%s5105_s10 + $0x500] ss:$8 sps:$4 sm:$0xff]  }
  0xfa   : > { %3115 = vmatpush1.bf16.msra.mxu0 %v4121_v17  ;;  %v4217_v17 = vld [vmem:[%s5105_s10 + $0x414] ss:$8 sps:$4 sm:$0xff]  }
  0xfb   : > { %3156 = vmatpush1.bf16.msra.mxu1 %v4124_v18  ;;  %3116 = vmatprep.subr.bf16.mxu0 %v4129_v19  ;;  %v4220_v18 = vld [vmem:[%s5105_s10 + $0x514] ss:$8 sps:$4 sm:$0xff]  }
  0xfc   : > { %3157 = vmatprep.subr.bf16.mxu1 %v4132_v20  ;;  %v5259_v19 = vld [vmem:[%s5080_s9 + $0x20] sm:$0xff]  ;;  %v5262_v20 = vld [vmem:[%s5080_s9 + $0x28] sm:$0xff] }
  0xfe   : > { %3117 = vmatpush1.bf16.msra.mxu0 %v4127_v21  ;;  %v3683_v21 = vcombine.high %v5259_v19, %v5259_v19 }
  0xff   : > { %3158 = vmatpush1.bf16.msra.mxu1 %v4130_v22  ;;  %3118 = vmatprep.subr.bf16.mxu0 %v4135_v23  ;;  %v3685_v22 = vcombine.high %v5262_v20, %v5262_v20  ;;  %v4215_v23 = vld [vmem:[%s5105_s10 + $0x410] ss:$8 sps:$4 sm:$0xff]  }
 0x100   : > { %3159 = vmatprep.subr.bf16.mxu1 %v4138_v24  ;;  %v4218_v24 = vld [vmem:[%s5105_s10 + $0x510] ss:$8 sps:$4 sm:$0xff]  }
 0x102   : > { %3119 = vmatpush1.bf16.msra.mxu0 %v4133_v25  ;;  %v4223_v25 = vld [vmem:[%s5105_s10 + $0x424] ss:$8 sps:$4 sm:$0xff]  }
 0x103   : > { %3160 = vmatpush1.bf16.msra.mxu1 %v4136_v26  ;;  %3120 = vmatprep.subr.bf16.mxu0 %v4141_v27  ;;  %v4226_v26 = vld [vmem:[%s5105_s10 + $0x524] ss:$8 sps:$4 sm:$0xff]   ;;  %v4221_v27 = vld [vmem:[%s5105_s10 + $0x420] ss:$8 sps:$4 sm:$0xff]  }
 0x104   : > { %3161 = vmatprep.subr.bf16.mxu1 %v4144_v28  ;;  %v4224_v28 = vld [vmem:[%s5105_s10 + $0x520] ss:$8 sps:$4 sm:$0xff]  }
 0x106   : > { %3121 = vmatpush1.bf16.msra.mxu0 %v4139_v29  ;;  %v4229_v29 = vld [vmem:[%s5105_s10 + $0x434] ss:$8 sps:$4 sm:$0xff]  }
 0x107   : > { %3162 = vmatpush1.bf16.msra.mxu1 %v4142_v30  ;;  %3122 = vmatprep.subr.bf16.mxu0 %v4147_v31  ;;  %v4232_v30 = vld [vmem:[%s5105_s10 + $0x534] ss:$8 sps:$4 sm:$0xff]   ;;  %v4227_v31 = vld [vmem:[%s5105_s10 + $0x430] ss:$8 sps:$4 sm:$0xff]  }
 0x108   : > { %3163 = vmatprep.subr.bf16.mxu1 %v4150_v32  ;;  %v4230_v32 = vld [vmem:[%s5105_s10 + $0x530] ss:$8 sps:$4 sm:$0xff]  }
 0x10a   : > { %3123 = vmatpush1.bf16.msra.mxu0 %v4145_v35  ;;  %v4233_v35 = vld [vmem:[%s5105_s10 + $0x440] ss:$8 sps:$4 sm:$0xff]  }
 0x10b   : > { %3164 = vmatpush1.bf16.msra.mxu1 %v4148_v36  ;;  %3124 = vmatprep.subr.bf16.mxu0 %v4153_v39  ;;  %v4236_v36 = vld [vmem:[%s5105_s10 + $0x540] ss:$8 sps:$4 sm:$0xff]   ;;  %v4239_v39 = vld [vmem:[%s5105_s10 + $0x450] ss:$8 sps:$4 sm:$0xff]  }
 0x10c   : > { %3165 = vmatprep.subr.bf16.mxu1 %v4156_v40  ;;  %v4242_v40 = vld [vmem:[%s5105_s10 + $0x550] ss:$8 sps:$4 sm:$0xff]  }
 0x10e   : > { %3125 = vmatpush1.bf16.msra.mxu0 %v4151_v41  ;;  %v4247_v41 = vld [vmem:[%s5105_s10 + $0x464] ss:$8 sps:$4 sm:$0xff]  }
 0x10f   : > { %3166 = vmatpush1.bf16.msra.mxu1 %v4154_v42  ;;  %3126 = vmatprep.subr.bf16.mxu0 %v4159_v43  ;;  %v4250_v42 = vld [vmem:[%s5105_s10 + $0x564] ss:$8 sps:$4 sm:$0xff]   ;;  %v4245_v43 = vld [vmem:[%s5105_s10 + $0x460] ss:$8 sps:$4 sm:$0xff]  }
 0x110   : > { %3167 = vmatprep.subr.bf16.mxu1 %v4162_v44  ;;  %v4248_v44 = vld [vmem:[%s5105_s10 + $0x560] ss:$8 sps:$4 sm:$0xff]  }
 0x112   : > { %3127 = vmatpush1.bf16.msra.mxu0 %v4157_v45  ;;  %v4253_v45 = vld [vmem:[%s5105_s10 + $0x474] ss:$8 sps:$4 sm:$0xff]  }
 0x113   : > { %3168 = vmatpush1.bf16.msra.mxu1 %v4160_v46  ;;  %3128 = vmatprep.subr.bf16.mxu0 %v4165_v47  ;;  %v4256_v46 = vld [vmem:[%s5105_s10 + $0x574] ss:$8 sps:$4 sm:$0xff]   ;;  %v4251_v47 = vld [vmem:[%s5105_s10 + $0x470] ss:$8 sps:$4 sm:$0xff]  }
 0x114   : > { %3169 = vmatprep.subr.bf16.mxu1 %v4168_v48  ;;  %v4254_v48 = vld [vmem:[%s5105_s10 + $0x570] ss:$8 sps:$4 sm:$0xff]  }
 0x116   : > { %3129 = vmatpush1.bf16.msra.mxu0 %v4163_v49  ;;  %v4259_v49 = vld [vmem:[%s5105_s10 + $0x484] ss:$8 sps:$4 sm:$0xff]  }
 0x117   : > { %3170 = vmatpush1.bf16.msra.mxu1 %v4166_v50  ;;  %3130 = vmatprep.subr.bf16.mxu0 %v4171_v51  ;;  %v4262_v50 = vld [vmem:[%s5105_s10 + $0x584] ss:$8 sps:$4 sm:$0xff]   ;;  %v4257_v51 = vld [vmem:[%s5105_s10 + $0x480] ss:$8 sps:$4 sm:$0xff]  }
 0x118   : > { %3171 = vmatprep.subr.bf16.mxu1 %v4174_v52  ;;  %v4260_v52 = vld [vmem:[%s5105_s10 + $0x580] ss:$8 sps:$4 sm:$0xff]  }
 0x11a   : > { %3131 = vmatpush1.bf16.msra.mxu0 %v4169_v53  ;;  %v4265_v53 = vld [vmem:[%s5105_s10 + $0x494] ss:$8 sps:$4 sm:$0xff]  }
 0x11b   : > { %3172 = vmatpush1.bf16.msra.mxu1 %v4172_v54  ;;  %3132 = vmatprep.subr.bf16.mxu0 %v4177_v55  ;;  %v4268_v54 = vld [vmem:[%s5105_s10 + $0x594] ss:$8 sps:$4 sm:$0xff]   ;;  %v4263_v55 = vld [vmem:[%s5105_s10 + $0x490] ss:$8 sps:$4 sm:$0xff]  }
 0x11c   : > { %3173 = vmatprep.subr.bf16.mxu1 %v4180_v56  ;;  %v4266_v56 = vld [vmem:[%s5105_s10 + $0x590] ss:$8 sps:$4 sm:$0xff]  }
 0x11e   : > { %3133 = vmatpush1.bf16.msra.mxu0 %v4175_v57  ;;  %v4271_v57 = vld [vmem:[%s5105_s10 + $0x4a4] ss:$8 sps:$4 sm:$0xff]  }
 0x11f   : > { %3174 = vmatpush1.bf16.msra.mxu1 %v4178_v58  ;;  %3134 = vmatprep.subr.bf16.mxu0 %v4183_v59  ;;  %v4274_v58 = vld [vmem:[%s5105_s10 + $0x5a4] ss:$8 sps:$4 sm:$0xff]   ;;  %v4269_v59 = vld [vmem:[%s5105_s10 + $0x4a0] ss:$8 sps:$4 sm:$0xff]  }
 0x120   : > { %3175 = vmatprep.subr.bf16.mxu1 %v4186_v60  ;;  %v4272_v60 = vld [vmem:[%s5105_s10 + $0x5a0] ss:$8 sps:$4 sm:$0xff]  }
 0x122   : > { %3135 = vmatpush1.bf16.msra.mxu0 %v4181_v61  ;;  %v4277_v61 = vld [vmem:[%s5105_s10 + $0x4b4] ss:$8 sps:$4 sm:$0xff]  }
 0x123   : > { %3176 = vmatpush1.bf16.msra.mxu1 %v4184_v62  ;;  %3136 = vmatprep.subr.bf16.mxu0 %v4189_v63  ;;  %v4280_v62 = vld [vmem:[%s5105_s10 + $0x5b4] ss:$8 sps:$4 sm:$0xff]   ;;  %v4275_v63 = vld [vmem:[%s5105_s10 + $0x4b0] ss:$8 sps:$4 sm:$0xff]  }
 0x124   : > { %3177 = vmatprep.subr.bf16.mxu1 %v4192_v0  ;;  %v4278_v0 = vld [vmem:[%s5105_s10 + $0x5b0] ss:$8 sps:$4 sm:$0xff]  }
 0x126   : > { %3137 = vmatpush1.bf16.msra.mxu0 %v4187_v1  ;;  %v4283_v1 = vld [vmem:[%s5105_s10 + $0x4c4] ss:$8 sps:$4 sm:$0xff]  }
 0x127   : > { %3178 = vmatpush1.bf16.msra.mxu1 %v4190_v2  ;;  %3138 = vmatprep.subr.bf16.mxu0 %v4195_v3  ;;  %v4286_v2 = vld [vmem:[%s5105_s10 + $0x5c4] ss:$8 sps:$4 sm:$0xff]   ;;  %v4281_v3 = vld [vmem:[%s5105_s10 + $0x4c0] ss:$8 sps:$4 sm:$0xff]  }
 0x128   : > { %3179 = vmatprep.subr.bf16.mxu1 %v4198_v4  ;;  %v4284_v4 = vld [vmem:[%s5105_s10 + $0x5c0] ss:$8 sps:$4 sm:$0xff]  }
 0x12a   : > { %3139 = vmatpush1.bf16.msra.mxu0 %v4193_v5  ;;  %v4289_v5 = vld [vmem:[%s5105_s10 + $0x4d4] ss:$8 sps:$4 sm:$0xff]  }
 0x12b   : > { %3180 = vmatpush1.bf16.msra.mxu1 %v4196_v6  ;;  %3140 = vmatprep.subr.bf16.mxu0 %v4201_v7  ;;  %v4292_v6 = vld [vmem:[%s5105_s10 + $0x5d4] ss:$8 sps:$4 sm:$0xff]   ;;  %v4287_v7 = vld [vmem:[%s5105_s10 + $0x4d0] ss:$8 sps:$4 sm:$0xff]  }
 0x12c   : > { %3181 = vmatprep.subr.bf16.mxu1 %v4204_v8  ;;  %v4290_v8 = vld [vmem:[%s5105_s10 + $0x5d0] ss:$8 sps:$4 sm:$0xff]  }
 0x12e   : > { %3141 = vmatpush1.bf16.msra.mxu0 %v4199_v9  ;;  %v4295_v9 = vld [vmem:[%s5105_s10 + $0x4e4] ss:$8 sps:$4 sm:$0xff]  }
 0x12f   : > { %3182 = vmatpush1.bf16.msra.mxu1 %v4202_v10  ;;  %3192 = vmatprep.subr.bf16.mxu0 %v4211_v11  ;;  %v4298_v10 = vld [vmem:[%s5105_s10 + $0x5e4] ss:$8 sps:$4 sm:$0xff]   ;;  %v4293_v11 = vld [vmem:[%s5105_s10 + $0x4e0] ss:$8 sps:$4 sm:$0xff]  }
 0x130   : > { %3233 = vmatprep.subr.bf16.mxu1 %v4214_v12  ;;  %v4296_v12 = vld [vmem:[%s5105_s10 + $0x5e0] ss:$8 sps:$4 sm:$0xff]  }
 0x131   : > { %3143 = vmatmul.mubr.bf16.vlgmr.msra.gmra.mrb[4].mxu0 %v3678_v13  ;;  %v4301_v13 = vld [vmem:[%s5105_s10 + $0x4f4] ss:$8 sps:$4 sm:$0xff]  }
 0x132   : > { %3184 = vmatmul.mubr.bf16.vlgmr.msra.gmra.mrb[4].mxu1 %v3680_v14  ;;  %3193 = vmatpush1.bf16.msra.mxu0 %v4209_v15  ;;  %v4304_v14 = vld [vmem:[%s5105_s10 + $0x5f4] ss:$8 sps:$4 sm:$0xff]   ;;  %v4299_v15 = vld [vmem:[%s5105_s10 + $0x4f0] ss:$8 sps:$4 sm:$0xff]  }
 0x133   : > { %3234 = vmatpush1.bf16.msra.mxu1 %v4212_v16  ;;  %3194 = vmatprep.subr.bf16.mxu0 %v4217_v17  ;;  %v4302_v16 = vld [vmem:[%s5105_s10 + $0x5f0] ss:$8 sps:$4 sm:$0xff]   ;;  %v4311_v17 = vld [vmem:[%s5105_s10 + $0x604] ss:$8 sps:$4 sm:$0xff]  }
 0x134   : > { %3235 = vmatprep.subr.bf16.mxu1 %v4220_v18  ;;  %3224 = vmatprep.mubr.bf16.mxu0 %v3683_v21  ;;  %v4314_v18 = vld [vmem:[%s5105_s10 + $0x704] ss:$8 sps:$4 sm:$0xff]   ;;  %v3682_v21 = vcombine.low %v5259_v19, %v5259_v19 }
 0x135   : > { %3265 = vmatprep.mubr.bf16.mxu1 %v3685_v22  ;;  %v3684_v22 = vcombine.low %v5262_v20, %v5262_v20 }
 0x136   : > { %3195 = vmatpush1.bf16.msra.mxu0 %v4215_v23  ;;  %v5333_v23 = vld [vmem:[%s5080_s9 + $0x30] sm:$0xff] }
 0x137   : > { %3236 = vmatpush1.bf16.msra.mxu1 %v4218_v24  ;;  %3196 = vmatprep.subr.bf16.mxu0 %v4223_v25  ;;  %v5336_v24 = vld [vmem:[%s5080_s9 + $0x38] sm:$0xff]  ;;  %v3687_v19 = vcombine.high %v5333_v23, %v5333_v23 }
 0x138   : > { %3237 = vmatprep.subr.bf16.mxu1 %v4226_v26  ;;  %v4309_v25 = vld [vmem:[%s5105_s10 + $0x600] ss:$8 sps:$4 sm:$0xff]   ;;  %v3689_v20 = vcombine.high %v5336_v24, %v5336_v24 }
 0x139   : > { %v4312_v26 = vld [vmem:[%s5105_s10 + $0x700] ss:$8 sps:$4 sm:$0xff]  }
 0x13a   : > { %3197 = vmatpush1.bf16.msra.mxu0 %v4221_v27  ;;  %v4317_v27 = vld [vmem:[%s5105_s10 + $0x614] ss:$8 sps:$4 sm:$0xff]  }
 0x13b   : > { %3238 = vmatpush1.bf16.msra.mxu1 %v4224_v28  ;;  %3198 = vmatprep.subr.bf16.mxu0 %v4229_v29  ;;  %v4320_v28 = vld [vmem:[%s5105_s10 + $0x714] ss:$8 sps:$4 sm:$0xff]   ;;  %v4315_v29 = vld [vmem:[%s5105_s10 + $0x610] ss:$8 sps:$4 sm:$0xff]  }
 0x13c   : > { %3239 = vmatprep.subr.bf16.mxu1 %v4232_v30  ;;  %v4318_v30 = vld [vmem:[%s5105_s10 + $0x710] ss:$8 sps:$4 sm:$0xff]  }
 0x13e   : > { %3199 = vmatpush1.bf16.msra.mxu0 %v4227_v31  ;;  %v4323_v31 = vld [vmem:[%s5105_s10 + $0x624] ss:$8 sps:$4 sm:$0xff]  }
 0x13f   : > { %3240 = vmatpush1.bf16.msra.mxu1 %v4230_v32  ;;  %3200 = vmatprep.subr.bf16.mxu0 %v4235_v33  ;;  %v4326_v32 = vld [vmem:[%s5105_s10 + $0x724] ss:$8 sps:$4 sm:$0xff]   ;;  %v4321_v33 = vld [vmem:[%s5105_s10 + $0x620] ss:$8 sps:$4 sm:$0xff]  }
 0x140   : > { %3241 = vmatprep.subr.bf16.mxu1 %v4238_v34  ;;  %v4324_v34 = vld [vmem:[%s5105_s10 + $0x720] ss:$8 sps:$4 sm:$0xff]  }
 0x142   : > { %3201 = vmatpush1.bf16.msra.mxu0 %v4233_v35  ;;  %v4329_v35 = vld [vmem:[%s5105_s10 + $0x634] ss:$8 sps:$4 sm:$0xff]  }
 0x143   : > { %3242 = vmatpush1.bf16.msra.mxu1 %v4236_v36  ;;  %3202 = vmatprep.subr.bf16.mxu0 %v4241_v37  ;;  %v4332_v36 = vld [vmem:[%s5105_s10 + $0x734] ss:$8 sps:$4 sm:$0xff]   ;;  %v4327_v37 = vld [vmem:[%s5105_s10 + $0x630] ss:$8 sps:$4 sm:$0xff]  }
 0x144   : > { %3243 = vmatprep.subr.bf16.mxu1 %v4244_v38  ;;  %v4330_v38 = vld [vmem:[%s5105_s10 + $0x730] ss:$8 sps:$4 sm:$0xff]  }
 0x146   : > { %3203 = vmatpush1.bf16.msra.mxu0 %v4239_v39  ;;  %v4335_v39 = vld [vmem:[%s5105_s10 + $0x644] ss:$8 sps:$4 sm:$0xff]  }
 0x147   : > { %3244 = vmatpush1.bf16.msra.mxu1 %v4242_v40  ;;  %3204 = vmatprep.subr.bf16.mxu0 %v4247_v41  ;;  %v4338_v40 = vld [vmem:[%s5105_s10 + $0x744] ss:$8 sps:$4 sm:$0xff]   ;;  %v4333_v41 = vld [vmem:[%s5105_s10 + $0x640] ss:$8 sps:$4 sm:$0xff]  }
 0x148   : > { %3245 = vmatprep.subr.bf16.mxu1 %v4250_v42  ;;  %v4336_v42 = vld [vmem:[%s5105_s10 + $0x740] ss:$8 sps:$4 sm:$0xff]  }
 0x14a   : > { %3205 = vmatpush1.bf16.msra.mxu0 %v4245_v43  ;;  %v4341_v43 = vld [vmem:[%s5105_s10 + $0x654] ss:$8 sps:$4 sm:$0xff]  }
 0x14b   : > { %3246 = vmatpush1.bf16.msra.mxu1 %v4248_v44  ;;  %3206 = vmatprep.subr.bf16.mxu0 %v4253_v45  ;;  %v4344_v44 = vld [vmem:[%s5105_s10 + $0x754] ss:$8 sps:$4 sm:$0xff]   ;;  %v4339_v45 = vld [vmem:[%s5105_s10 + $0x650] ss:$8 sps:$4 sm:$0xff]  }
 0x14c   : > { %3247 = vmatprep.subr.bf16.mxu1 %v4256_v46  ;;  %v4342_v46 = vld [vmem:[%s5105_s10 + $0x750] ss:$8 sps:$4 sm:$0xff]  }
 0x14e   : > { %3207 = vmatpush1.bf16.msra.mxu0 %v4251_v47  ;;  %v4347_v47 = vld [vmem:[%s5105_s10 + $0x664] ss:$8 sps:$4 sm:$0xff]  }
 0x14f   : > { %3248 = vmatpush1.bf16.msra.mxu1 %v4254_v48  ;;  %3208 = vmatprep.subr.bf16.mxu0 %v4259_v49  ;;  %v4350_v48 = vld [vmem:[%s5105_s10 + $0x764] ss:$8 sps:$4 sm:$0xff]   ;;  %v4345_v49 = vld [vmem:[%s5105_s10 + $0x660] ss:$8 sps:$4 sm:$0xff]  }
 0x150   : > { %3249 = vmatprep.subr.bf16.mxu1 %v4262_v50  ;;  %v4348_v50 = vld [vmem:[%s5105_s10 + $0x760] ss:$8 sps:$4 sm:$0xff]  }
 0x152   : > { %3209 = vmatpush1.bf16.msra.mxu0 %v4257_v51  ;;  %v4353_v51 = vld [vmem:[%s5105_s10 + $0x674] ss:$8 sps:$4 sm:$0xff]  }
 0x153   : > { %3250 = vmatpush1.bf16.msra.mxu1 %v4260_v52  ;;  %3210 = vmatprep.subr.bf16.mxu0 %v4265_v53  ;;  %v4356_v52 = vld [vmem:[%s5105_s10 + $0x774] ss:$8 sps:$4 sm:$0xff]   ;;  %v4351_v53 = vld [vmem:[%s5105_s10 + $0x670] ss:$8 sps:$4 sm:$0xff]  }
 0x154   : > { %3251 = vmatprep.subr.bf16.mxu1 %v4268_v54  ;;  %v4354_v54 = vld [vmem:[%s5105_s10 + $0x770] ss:$8 sps:$4 sm:$0xff]  }
 0x156   : > { %3211 = vmatpush1.bf16.msra.mxu0 %v4263_v55  ;;  %v4359_v55 = vld [vmem:[%s5105_s10 + $0x684] ss:$8 sps:$4 sm:$0xff]  }
 0x157   : > { %3252 = vmatpush1.bf16.msra.mxu1 %v4266_v56  ;;  %3212 = vmatprep.subr.bf16.mxu0 %v4271_v57  ;;  %v4362_v56 = vld [vmem:[%s5105_s10 + $0x784] ss:$8 sps:$4 sm:$0xff]   ;;  %v4357_v57 = vld [vmem:[%s5105_s10 + $0x680] ss:$8 sps:$4 sm:$0xff]  }
 0x158   : > { %3253 = vmatprep.subr.bf16.mxu1 %v4274_v58  ;;  %v4360_v58 = vld [vmem:[%s5105_s10 + $0x780] ss:$8 sps:$4 sm:$0xff]  }
 0x15a   : > { %3213 = vmatpush1.bf16.msra.mxu0 %v4269_v59  ;;  %v4365_v59 = vld [vmem:[%s5105_s10 + $0x694] ss:$8 sps:$4 sm:$0xff]  }
 0x15b   : > { %3254 = vmatpush1.bf16.msra.mxu1 %v4272_v60  ;;  %3214 = vmatprep.subr.bf16.mxu0 %v4277_v61  ;;  %v4368_v60 = vld [vmem:[%s5105_s10 + $0x794] ss:$8 sps:$4 sm:$0xff]   ;;  %v4363_v61 = vld [vmem:[%s5105_s10 + $0x690] ss:$8 sps:$4 sm:$0xff]  }
 0x15c   : > { %3255 = vmatprep.subr.bf16.mxu1 %v4280_v62  ;;  %v4366_v62 = vld [vmem:[%s5105_s10 + $0x790] ss:$8 sps:$4 sm:$0xff]  }
 0x15e   : > { %3215 = vmatpush1.bf16.msra.mxu0 %v4275_v63  ;;  %v4371_v63 = vld [vmem:[%s5105_s10 + $0x6a4] ss:$8 sps:$4 sm:$0xff]  }
 0x15f   : > { %3256 = vmatpush1.bf16.msra.mxu1 %v4278_v0  ;;  %3216 = vmatprep.subr.bf16.mxu0 %v4283_v1  ;;  %v4374_v0 = vld [vmem:[%s5105_s10 + $0x7a4] ss:$8 sps:$4 sm:$0xff]   ;;  %v4369_v1 = vld [vmem:[%s5105_s10 + $0x6a0] ss:$8 sps:$4 sm:$0xff]  }
 0x160   : > { %3257 = vmatprep.subr.bf16.mxu1 %v4286_v2  ;;  %v4372_v2 = vld [vmem:[%s5105_s10 + $0x7a0] ss:$8 sps:$4 sm:$0xff]  }
 0x162   : > { %3217 = vmatpush1.bf16.msra.mxu0 %v4281_v3  ;;  %v4377_v3 = vld [vmem:[%s5105_s10 + $0x6b4] ss:$8 sps:$4 sm:$0xff]  }
 0x163   : > { %3258 = vmatpush1.bf16.msra.mxu1 %v4284_v4  ;;  %3218 = vmatprep.subr.bf16.mxu0 %v4289_v5  ;;  %v4380_v4 = vld [vmem:[%s5105_s10 + $0x7b4] ss:$8 sps:$4 sm:$0xff]   ;;  %v4375_v5 = vld [vmem:[%s5105_s10 + $0x6b0] ss:$8 sps:$4 sm:$0xff]  }
 0x164   : > { %3259 = vmatprep.subr.bf16.mxu1 %v4292_v6  ;;  %v4378_v6 = vld [vmem:[%s5105_s10 + $0x7b0] ss:$8 sps:$4 sm:$0xff]  }
 0x166   : > { %3219 = vmatpush1.bf16.msra.mxu0 %v4287_v7  ;;  %v4383_v7 = vld [vmem:[%s5105_s10 + $0x6c4] ss:$8 sps:$4 sm:$0xff]  }
 0x167   : > { %3260 = vmatpush1.bf16.msra.mxu1 %v4290_v8  ;;  %3220 = vmatprep.subr.bf16.mxu0 %v4295_v9  ;;  %v4386_v8 = vld [vmem:[%s5105_s10 + $0x7c4] ss:$8 sps:$4 sm:$0xff]   ;;  %v4381_v9 = vld [vmem:[%s5105_s10 + $0x6c0] ss:$8 sps:$4 sm:$0xff]  }
 0x168   : > { %3261 = vmatprep.subr.bf16.mxu1 %v4298_v10  ;;  %v4384_v10 = vld [vmem:[%s5105_s10 + $0x7c0] ss:$8 sps:$4 sm:$0xff]  }
 0x16a   : > { %3221 = vmatpush1.bf16.msra.mxu0 %v4293_v11  ;;  %v4389_v11 = vld [vmem:[%s5105_s10 + $0x6d4] ss:$8 sps:$4 sm:$0xff]  }
 0x16b   : > { %3262 = vmatpush1.bf16.msra.mxu1 %v4296_v12  ;;  %3222 = vmatprep.subr.bf16.mxu0 %v4301_v13  ;;  %v4392_v12 = vld [vmem:[%s5105_s10 + $0x7d4] ss:$8 sps:$4 sm:$0xff]   ;;  %v4387_v13 = vld [vmem:[%s5105_s10 + $0x6d0] ss:$8 sps:$4 sm:$0xff]  }
 0x16c   : > { %3263 = vmatprep.subr.bf16.mxu1 %v4304_v14  ;;  %v4390_v14 = vld [vmem:[%s5105_s10 + $0x7d0] ss:$8 sps:$4 sm:$0xff]  }
 0x16e   : > { %3223 = vmatpush1.bf16.msra.mxu0 %v4299_v15  ;;  %v4395_v15 = vld [vmem:[%s5105_s10 + $0x6e4] ss:$8 sps:$4 sm:$0xff]  }
 0x16f   : > { %3264 = vmatpush1.bf16.msra.mxu1 %v4302_v16  ;;  %3274 = vmatprep.subr.bf16.mxu0 %v4311_v17  ;;  %v4398_v16 = vld [vmem:[%s5105_s10 + $0x7e4] ss:$8 sps:$4 sm:$0xff]   ;;  %v4393_v17 = vld [vmem:[%s5105_s10 + $0x6e0] ss:$8 sps:$4 sm:$0xff]  }
 0x170   : > { %3315 = vmatprep.subr.bf16.mxu1 %v4314_v18  ;;  %v4396_v18 = vld [vmem:[%s5105_s10 + $0x7e0] ss:$8 sps:$4 sm:$0xff]  }
 0x171   : > { %3225 = vmatmul.mubr.bf16.vlgmr.msra.gmra.mrb[8].mxu0 %v3682_v21  ;;  %v4401_v21 = vld [vmem:[%s5105_s10 + $0x6f4] ss:$8 sps:$4 sm:$0xff]  }
 0x172   : > { %3266 = vmatmul.mubr.bf16.vlgmr.msra.gmra.mrb[8].mxu1 %v3684_v22  ;;  %3275 = vmatpush1.bf16.msra.mxu0 %v4309_v25  ;;  %v4404_v22 = vld [vmem:[%s5105_s10 + $0x7f4] ss:$8 sps:$4 sm:$0xff]   ;;  %v4399_v25 = vld [vmem:[%s5105_s10 + $0x6f0] ss:$8 sps:$4 sm:$0xff]  }
 0x173   : > { %3316 = vmatpush1.bf16.msra.mxu1 %v4312_v26  ;;  %3276 = vmatprep.subr.bf16.mxu0 %v4317_v27  ;;  %v4402_v26 = vld [vmem:[%s5105_s10 + $0x7f0] ss:$8 sps:$4 sm:$0xff]   ;;  %v3686_v27 = vcombine.low %v5333_v23, %v5333_v23 }
 0x174   : > { %3317 = vmatprep.subr.bf16.mxu1 %v4320_v28  ;;  %3306 = vmatprep.mubr.bf16.mxu0 %v3687_v19  ;;  %v3688_v28 = vcombine.low %v5336_v24, %v5336_v24 }
 0x175   : > { %3347 = vmatprep.mubr.bf16.mxu1 %v3689_v20 }
 0x176   : > { %3277 = vmatpush1.bf16.msra.mxu0 %v4315_v29 }
 0x177   : > { %3318 = vmatpush1.bf16.msra.mxu1 %v4318_v30  ;;  %3278 = vmatprep.subr.bf16.mxu0 %v4323_v31 }
 0x178   : > { %3319 = vmatprep.subr.bf16.mxu1 %v4326_v32 }
 0x17a   : > { %3279 = vmatpush1.bf16.msra.mxu0 %v4321_v33 }
 0x17b   : > { %3320 = vmatpush1.bf16.msra.mxu1 %v4324_v34  ;;  %3280 = vmatprep.subr.bf16.mxu0 %v4329_v35 }
 0x17c   : > { %3321 = vmatprep.subr.bf16.mxu1 %v4332_v36 }
 0x17e   : > { %3281 = vmatpush1.bf16.msra.mxu0 %v4327_v37 }
 0x17f   : > { %3322 = vmatpush1.bf16.msra.mxu1 %v4330_v38  ;;  %3282 = vmatprep.subr.bf16.mxu0 %v4335_v39 }
 0x180   : > { %3323 = vmatprep.subr.bf16.mxu1 %v4338_v40 }
 0x182   : > { %3283 = vmatpush1.bf16.msra.mxu0 %v4333_v41 }
 0x183   : > { %3324 = vmatpush1.bf16.msra.mxu1 %v4336_v42  ;;  %3284 = vmatprep.subr.bf16.mxu0 %v4341_v43 }
 0x184   : > { %3325 = vmatprep.subr.bf16.mxu1 %v4344_v44 }
 0x186   : > { %3285 = vmatpush1.bf16.msra.mxu0 %v4339_v45 }
 0x187   : > { %3326 = vmatpush1.bf16.msra.mxu1 %v4342_v46  ;;  %3286 = vmatprep.subr.bf16.mxu0 %v4347_v47 }
 0x188   : > { %3327 = vmatprep.subr.bf16.mxu1 %v4350_v48 }
 0x18a   : > { %3287 = vmatpush1.bf16.msra.mxu0 %v4345_v49 }
 0x18b   : > { %3328 = vmatpush1.bf16.msra.mxu1 %v4348_v50  ;;  %3288 = vmatprep.subr.bf16.mxu0 %v4353_v51 }
 0x18c   : > { %3329 = vmatprep.subr.bf16.mxu1 %v4356_v52 }
 0x18e   : > { %3289 = vmatpush1.bf16.msra.mxu0 %v4351_v53 }
 0x18f   : > { %3330 = vmatpush1.bf16.msra.mxu1 %v4354_v54  ;;  %3290 = vmatprep.subr.bf16.mxu0 %v4359_v55 }
 0x190   : > { %3331 = vmatprep.subr.bf16.mxu1 %v4362_v56 }
 0x192   : > { %3291 = vmatpush1.bf16.msra.mxu0 %v4357_v57 }
 0x193   : > { %3332 = vmatpush1.bf16.msra.mxu1 %v4360_v58  ;;  %3292 = vmatprep.subr.bf16.mxu0 %v4365_v59 }
 0x194   : > { %3333 = vmatprep.subr.bf16.mxu1 %v4368_v60 }
 0x196   : > { %3293 = vmatpush1.bf16.msra.mxu0 %v4363_v61 }
 0x197   : > { %3334 = vmatpush1.bf16.msra.mxu1 %v4366_v62  ;;  %3294 = vmatprep.subr.bf16.mxu0 %v4371_v63 }
 0x198   : > { %3335 = vmatprep.subr.bf16.mxu1 %v4374_v0  ;;  %v1426_v0 = vld [vmem:[#allocation2] sm:$0xff] }
 0x19a   : > { %3295 = vmatpush1.bf16.msra.mxu0 %v4369_v1 }
 0x19b   : > { %3336 = vmatpush1.bf16.msra.mxu1 %v4372_v2  ;;  %3296 = vmatprep.subr.bf16.mxu0 %v4377_v3 }
 0x19c   : > { %3337 = vmatprep.subr.bf16.mxu1 %v4380_v4 }
 0x19e   : > { %3297 = vmatpush1.bf16.msra.mxu0 %v4375_v5  ;;  %v1427_v5 = vld [vmem:[#allocation2 + $0x8] sm:$0xff] }
 0x19f   : > { %3338 = vmatpush1.bf16.msra.mxu1 %v4378_v6  ;;  %3298 = vmatprep.subr.bf16.mxu0 %v4383_v7 }
 0x1a0   : > { %3339 = vmatprep.subr.bf16.mxu1 %v4386_v8 }
 0x1a2   : > { %3299 = vmatpush1.bf16.msra.mxu0 %v4381_v9 }
 0x1a3   : > { %3340 = vmatpush1.bf16.msra.mxu1 %v4384_v10  ;;  %3300 = vmatprep.subr.bf16.mxu0 %v4389_v11  ;;  %v3368_v11 = vlaneseq (!%p3946_p13) }
 0x1a4   : > { %3341 = vmatprep.subr.bf16.mxu1 %v4392_v12 }
 0x1a5   : > { %v3369_v12 = vshrl.u32 (!%p3946_p13), %v3368_v11, 7 }
 0x1a6   : > { %3301 = vmatpush1.bf16.msra.mxu0 %v4387_v13  ;;  %v3366_v13 = vld [vmem:[%s1387_s18] sm:$0x3] (!%p3946_p13) }
 0x1a7   : > { %3342 = vmatpush1.bf16.msra.mxu1 %v4390_v14  ;;  %3302 = vmatprep.subr.bf16.mxu0 %v4395_v15  ;;  %v3370_v14 = vsub.s32 (!%p3946_p13), 0, %v3369_v12  ;;  %v3374_v15 = vsub.s32 (!%p3946_p13), 1, %v3369_v12 }
 0x1a8   : > { %3343 = vmatprep.subr.bf16.mxu1 %v4398_v16 }
 0x1aa   : > { %3303 = vmatpush1.bf16.msra.mxu0 %v4393_v17 }
 0x1ab   : > { %3344 = vmatpush1.bf16.msra.mxu1 %v4396_v18  ;;  %3304 = vmatprep.subr.bf16.mxu0 %v4401_v21  ;;  %v3371_v18 = vrot.slane (!%p3946_p13), %v3366_v13, %v3370_v14  ;;  %v3375_v21 = vrot.slane (!%p3946_p13), %v3366_v13, %v3374_v15 }
 0x1ac   : > { %3345 = vmatprep.subr.bf16.mxu1 %v4404_v22 }
 0x1ae   : > { %3305 = vmatpush1.bf16.msra.mxu0 %v4399_v25 }
 0x1af   : > { %3346 = vmatpush1.bf16.msra.mxu1 %v4402_v26 }
 0x1b1   : > { %3307 = vmatmul.mubr.bf16.vlgmr.msra.gmra.mrb[12].mxu0 %v3686_v27 }
 0x1b2   : > { %3348 = vmatmul.mubr.bf16.vlgmr.msra.gmra.mrb[12].mxu1 %v3688_v28 }
 0x1c4   : > { %v3062_v19 = vpop.f32.mrb[0].mxu0 }
 0x1c5   : > { %v3103_v20 = vpop.f32.mrb[0].mxu1  ;;  %v3064_v30 = vpop.f32.mrb[1].mxu0 }
 0x1c6   : > { %v3104_v29 = vadd.f32 %v3103_v20, %v3062_v19  ;;  %v3105_v31 = vpop.f32.mrb[1].mxu1  ;;  %v3066_v33 = vpop.f32.mrb[2].mxu0 }
 0x1c7   : > { %v3106_v32 = vadd.f32 %v3105_v31, %v3064_v30  ;;  %v3107_v34 = vpop.f32.mrb[2].mxu1  ;;  %v3067_v35 = vpop.f32.mrb[3].mxu0 }
 0x1c8   : > { %v3108_v36 = vpop.f32.mrb[3].mxu1 }
 0x204   : > { %v3144_v37 = vpop.f32.mrb[4].mxu0 }
 0x205   : > { %v3185_v38 = vpop.f32.mrb[4].mxu1  ;;  %v3145_v23 = vadd.f32 %v3144_v37, %v3104_v29  ;;  %v3146_v39 = vpop.f32.mrb[5].mxu0 }
 0x206   : > { %v3187_v40 = vpop.f32.mrb[5].mxu1  ;;  %v3147_v24 = vadd.f32 %v3146_v39, %v3106_v32  ;;  %v3148_v41 = vpop.f32.mrb[6].mxu0 }
 0x207   : > { %v3189_v42 = vpop.f32.mrb[6].mxu1  ;;  %v3186_v43 = vadd.f32 %v3185_v38, %v3145_v23  ;;  %v3149_v44 = vpop.f32.mrb[7].mxu0 }
 0x208   : > { %v3190_v45 = vpop.f32.mrb[7].mxu1  ;;  %v3188_v46 = vadd.f32 %v3187_v40, %v3147_v24 }
 0x244   : > { %v3226_v47 = vpop.f32.mrb[8].mxu0 }
 0x245   : > { %v3267_v48 = vpop.f32.mrb[8].mxu1  ;;  %v3227_v49 = vadd.f32 %v3226_v47, %v3186_v43  ;;  %v3228_v50 = vpop.f32.mrb[9].mxu0 }
 0x246   : > { %v3269_v51 = vpop.f32.mrb[9].mxu1  ;;  %v3229_v52 = vadd.f32 %v3228_v50, %v3188_v46  ;;  %v3230_v53 = vpop.f32.mrb[10].mxu0 }
 0x247   : > { %v3271_v54 = vpop.f32.mrb[10].mxu1  ;;  %v3268_v55 = vadd.f32 %v3267_v48, %v3227_v49  ;;  %v3231_v56 = vpop.f32.mrb[11].mxu0 }
 0x248   : > { %v3272_v57 = vpop.f32.mrb[11].mxu1  ;;  %v3270_v58 = vadd.f32 %v3269_v51, %v3229_v52 }
 0x284   : > { %v3308_v59 = vpop.f32.mrb[12].mxu0 }
 0x285   : > { %v3349_v60 = vpop.f32.mrb[12].mxu1  ;;  %v3309_v61 = vadd.f32 %v3308_v59, %v3268_v55  ;;  %v3310_v62 = vpop.f32.mrb[13].mxu0 }
 0x286   : > { %v3351_v63 = vpop.f32.mrb[13].mxu1  ;;  %v3311_v1 = vadd.f32 %v3310_v62, %v3270_v58  ;;  %v3312_v2 = vpop.f32.mrb[14].mxu0  ;;  %3363 = sbr.rel (%p3946_p13) target bundleno = 679 (0x2a7), region = 78 }
 0x287   : > { %v3353_v3 = vpop.f32.mrb[14].mxu1  ;;  %v3350_v4 = vadd.f32 %v3349_v60, %v3309_v61  ;;  %v3313_v6 = vpop.f32.mrb[15].mxu0 }
 0x288   : > { %v3354_v7 = vpop.f32.mrb[15].mxu1  ;;  %v3352_v8 = vadd.f32 %v3351_v63, %v3311_v1 }
 0x289   : > { %v3356_v9 = vadd.f32 %v3350_v4, %v1426_v0 }
 0x28a   : > { %v3357_v10 = vadd.f32 %v3352_v8, %v1427_v5 }
 0x28b   : > { %3358 = vst [vmem:[#allocation2] sm:$0xff] %v3356_v9 }
 0x28c   : > { %3359 = vst [vmem:[#allocation2 + $0x8] sm:$0xff] %v3357_v10 }
 0x292   : > { %v3364_v16 = vld [vmem:[#allocation2] sm:$0xff] }
 0x293   : > { %v3365_v17 = vld [vmem:[#allocation2 + $0x8] sm:$0xff]  ;;  %v3378_v22 = vadd.f32 %v3371_v18, %v3364_v16 }
 0x294   : > { %v3379_v25 = vadd.f32 %v3375_v21, %v3365_v17 }
 0x295   : > { %v3380_v26 = vmax.f32 %v3378_v22, 0.0 }
 0x296   : > { %v3381_v27 = vmax.f32 %v3379_v25, 0.0 }
 0x297   : > { %v3400_v28 = vrot.slane %v3380_v26, 4  ;;  %v3414_v19 = vmul.f32 %v3380_v26, %v3380_v26 }
 0x298   : > { %v3951_v20 = vpack.c.bf16 %v3381_v27, %v3380_v26  ;;  %v3406_v29 = vrot.slane %v3381_v27, 4  ;;  %v3415_v30 = vmul.f32 %v3381_v27, %v3381_v27 }
 0x299   : > { %v3401_v31 = vadd.f32 %v3400_v28, %v3380_v26  ;;  %v3416_v32 = vrot.slane %v3414_v19, 4 }
 0x29a   : > { %3390 = vst [vmem:[%s5092_s14] sm:$0xff] %v3951_v20  ;;  %v3407_v33 = vadd.f32 %v3406_v29, %v3381_v27  ;;  %v3422_v34 = vrot.slane %v3415_v30, 4 }
 0x29b   : > { %v3402_v35 = vrot.slane %v3401_v31, 2  ;;  %v3417_v36 = vadd.f32 %v3416_v32, %v3414_v19 }
 0x29c   : > { %v3408_v37 = vrot.slane %v3407_v33, 2  ;;  %v3423_v38 = vadd.f32 %v3422_v34, %v3415_v30 }
 0x29d   : > { %v3403_v23 = vadd.f32 %v3402_v35, %v3401_v31  ;;  %v3418_v39 = vrot.slane %v3417_v36, 2 }
 0x29e   : > { %v3409_v40 = vadd.f32 %v3408_v37, %v3407_v33  ;;  %v3424_v24 = vrot.slane %v3423_v38, 2 }
 0x29f   : > { %v3404_v41 = vrot.slane %v3403_v23, 1  ;;  %v3419_v42 = vadd.f32 %v3418_v39, %v3417_v36 }
 0x2a0   : > { %v3410_v43 = vrot.slane %v3409_v40, 1  ;;  %v3425_v44 = vadd.f32 %v3424_v24, %v3423_v38 }
 0x2a1   : > { %v3405_v45 = vadd.f32 %v3404_v41, %v3403_v23  ;;  %v3420_v46 = vrot.slane %v3419_v42, 1 }
 0x2a2   : > { %v3411_v47 = vadd.f32 %v3410_v43, %v3409_v40  ;;  %v3426_v48 = vrot.slane %v3425_v44, 1 }
 0x2a3   : > { %3412 = vst [vmem:[%s5098_s27] sm:$0xff] %v3405_v45  ;;  %v3421_v49 = vadd.f32 %v3420_v46, %v3419_v42 }
 0x2a4   : > { %3413 = vst [vmem:[%s5098_s27 + $0x8] sm:$0xff] %v3411_v47  ;;  %v3427_v50 = vadd.f32 %v3426_v48, %v3425_v44 }
 0x2a5   : > { %3428 = vst [vmem:[%s5103_s8] sm:$0xff] %v3421_v49 }
 0x2a6   : > { %3429 = vst [vmem:[%s5103_s8 + $0x8] sm:$0xff] %v3427_v50 }
 0x2a7 PF: > { %s16_s24 = sadd.s32 1, %s4463_s24   ;;  %s5446_s18 = smov %s4443_s19 }
 0x2a8   : > { %p13_p0 = scmp.ge.s32.totalorder %s16_s24, 6   ;;  %s5447_s19 = smov %s4547_s6 }
 0x2a9   : > { %s5448_s20 = smov %s4455_s22  ;;  %s5449_s21 = smov %s4459_s23 }
 0x2aa   : > { %s5450_s22 = smov %s5453_s25  ;;  %s5451_s23 = smov %s5457_s26 }
 0x2ab   :  { %15 = sbr.rel (!%p13_p0) target bundleno = 4 (0x4), region = 143 }

// kernel: feature_extraction_forward.11
= control target key start
LH: loop header
LB: loop body
LE: loop exit
PB: predicated region body
PF: predicated region fallthrough
CT: control target
= control target key end

     0   :  { %s4544_s0 = inlined_call_operand.vmem [shape: bf16[8,4608], index: 0, kind: input, shape index: {}]   ;;  %s4545_s1 = inlined_call_operand.vmem [shape: bf16[4608,512], index: 1, kind: input, shape index: {}]   ;;  %s4546_s2 = inlined_call_operand.vmem [shape: f32[1,512], index: 2, kind: input, shape index: {}]   ;;  %s4547_s3 = inlined_call_operand.vmem [shape: f32[8,512], index: 3, kind: output, shape index: {0}]   ;;  %s4548_s4 = inlined_call_operand.hbm [shape: f32[8,512], index: 4, kind: output, shape index: {1}]   ;;  %s4549_s5 = inlined_call_operand.hbm [shape: f32[8,512], index: 5, kind: output, shape index: {2}]  }
   0x1   :  { %4555 = sst [smem:[#allocation17_spill]] %s4545_s1 }
   0x2   :  { %11 = vsyncpa [#allocation5], 0 }
   0x3   :  { %13 = vsyncpa [#allocation5 + $0x1], 0 }
   0x4   :  { %14 = vsyncpa [#allocation7], 0 }
   0x5   :  { %16 = vsyncpa [#allocation7 + $0x1], 0  ;;  %s3703_s18 = smov 0   ;;  %s3705_s19 = smov 0  }
   0x6   :  { %s3707_s20 = smov 0   ;;  %s3709_s21 = smov 0  }
   0x7   :  { %s3711_s22 = smov 0   ;;  %s3713_s23 = smov 0  }
   0x8   :  { %s3715_s24 = smov 0   ;;  %s3717_s25 = smov 0  }
   0x9   :  { %s3719_s26 = smov 0   ;;  %s3721_s27 = smov 0  }
   0xa LB: > { %4556 = sst [smem:[#allocation10_spill]] %s3648_s22  ;;  %s2900_s28 = sadd.s32 4294967295, %s3668_s27   ;;  %s3668_s27 = sphi %s3721_s27, %s22_s27   ;;  %s3664_s26 = sphi %s3719_s26, %s4573_s26   ;;  %s3660_s25 = sphi %s3717_s25, %s4572_s25   ;;  %s3656_s24 = sphi %s3715_s24, %s4571_s24   ;;  %s3652_s23 = sphi %s3713_s23, %s4570_s23   ;;  %s3648_s22 = sphi %s3711_s22, %s4569_s22   ;;  %s3644_s21 = sphi %s3709_s21, %s4568_s21   ;;  %s3640_s20 = sphi %s3707_s20, %s4576_s20   ;;  %s3636_s19 = sphi %s3705_s19, %s4575_s19   ;;  %s3632_s18 = sphi %s3703_s18, %s4574_s18  }
   0xb   : > { %4557 = sst [smem:[#allocation11_spill]] %s3660_s25  ;;  %s2901_s29 = sadd.s32 4294967294, %s3668_s27  }
   0xc   : > { %4558 = sst [smem:[#allocation12_spill]] %s3664_s26  ;;  %s34_s30 = sadd.s32 1, %s3660_s25 }
   0xd   : > { %s37_s6 = sadd.s32 1, %s3664_s26  ;;  %p35_p0 = scmp.ge.s32.totalorder %s34_s30, 3 }
   0xe   : > { %s78_s7 = sadd.s32 1, %s3648_s22  ;;  %p85_p1 = scmp.ne.s32.totalorder %s3648_s22, %s3644_s21 }
   0xf   : > { %p86_p2 = scmp.eq.s32.totalorder %s3668_s27, 0  ;;  %s4578_s30 = smov (%p35_p0, %s34_s30), 0 }
  0x10   : > { %4559 = sst [smem:[#allocation13_spill]] %s4578_s30  ;;  %s4580_s6 = smov (!%p35_p0, %s37_s6), %s3664_s26 }
  0x11   : > { %s73_s8 = ssub.s32 %s3660_s25, %s4578_s30  ;;  %p3766_p3 = por %p86_p2, %p85_p1 }
  0x12   : > { %p39_p4 = scmp.ge.s32.totalorder %s4580_s6, 2  ;;  %s160_s10 = sadd.s32 1, %s3640_s20 }
  0x13   : > { %p170_p5 = scmp.ne.s32.totalorder %s3640_s20, %s3636_s19  ;;  %p171_p6 = scmp.eq.s32.totalorder %s2900_s28, 5 }
  0x14   : > { %s4582_s6 = smov (%p39_p4, %s4580_s6), 0  ;;  %p176_p8 = scmp.ne.s32.totalorder %s3636_s19, %s3632_s18 }
  0x15   : > { %4561 = sst [smem:[#allocation14_spill]] %s4582_s6  ;;  %p3775_p7 = por %p171_p6, %p170_p5 }
  0x16   : > { %s74_s12 = ssub.s32 %s3664_s26, %s4582_s6  ;;  %p177_p9 = scmp.eq.s32.totalorder %s2901_s29, 5 }
  0x17   : > { %s75_s13 = sor.u32 %s74_s12, %s73_s8  ;;  %p158_p10 = scmp.eq.s32.totalorder %s74_s12, 0 }
  0x18   : > { %p76_p11 = scmp.eq.s32.totalorder %s75_s13, 0  ;;  %p3783_p12 = por %p177_p9, %p176_p8 }
  0x19   : > { %s3788_s15 = scalar_select %p158_p10, %s3640_s20, %s160_s10  }
  0x1a   : > { %s3791_s16 = scalar_select %p76_p11, %s3648_s22, %s78_s7  }
  0x1b   : > { %4564 = sst [smem:[#allocation15_spill]] %s3788_s15  ;;  %p2903_p13 = scmp.ge.s32.totalorder %s3668_s27, 6 }
  0x1c   : > { %4565 = sst [smem:[#allocation16_spill]] %s3791_s16 }
  0x1d   : > { %221 = sbr.rel (%p2903_p13) target bundleno = 142 (0x8e), region = 16 }
  0x24   : > { %237 = sbr.rel (!%p3766_p3) target bundleno = 142 (0x8e), region = 24  ;;  %s239_s17 = sand.u32 (%p3766_p3), 1, %s3648_s22  }
  0x25   : > { %s3131_s28 = smul.u32 (%p3766_p3), 1536, %s239_s17  ;;  %s2904_s29 = sshll.u32 (%p3766_p3), %s3664_s26, 1 }
  0x26   : > { %s3128_s8 = smul.u32 (%p3766_p3), 768, %s3660_s25  ;;  %s4566_s1 = sld [smem:[#allocation17_spill]] (%p3766_p3) }
  0x27   : > { %s3807_s9 = scalar_lea.vmem (%p3766_p3), [#allocation3], %s3131_s28 }
  0x28   : > { %s245_s12 = sadd.s32 (%p3766_p3), %s3128_s8, %s2904_s29 }
  0x29   : > { %s2906_s13 = sshll.u32 (%p3766_p3), %s245_s12, 2 }
  0x2c   : > { %s3802_s7 = scalar_lea.vmem %s4566_s1, %s2906_s13 }
  0x2d   : > { %v657_v0 = vld [vmem:[%s3802_s7] sm:$0xff]  ;;  %v659_v1 = vld [vmem:[%s3802_s7 + $0x10] sm:$0xff] }
  0x2e   : > { %v661_v2 = vld [vmem:[%s3802_s7 + $0x20] sm:$0xff]  ;;  %658 = vst [vmem:[%s3807_s9] sm:$0xff] %v657_v0  ;;  %660 = vst [vmem:[%s3807_s9 + $0x8] sm:$0xff] %v659_v1  ;;  %v663_v3 = vld [vmem:[%s3802_s7 + $0x30] sm:$0xff] }
  0x2f   : > { %662 = vst [vmem:[%s3807_s9 + $0x10] sm:$0xff] %v661_v2  ;;  %v665_v4 = vld [vmem:[%s3802_s7 + $0x40] sm:$0xff]  ;;  %v667_v5 = vld [vmem:[%s3802_s7 + $0x50] sm:$0xff]  ;;  %664 = vst [vmem:[%s3807_s9 + $0x18] sm:$0xff] %v663_v3 }
  0x30   : > { %666 = vst [vmem:[%s3807_s9 + $0x20] sm:$0xff] %v665_v4  ;;  %668 = vst [vmem:[%s3807_s9 + $0x28] sm:$0xff] %v667_v5  ;;  %v669_v6 = vld [vmem:[%s3802_s7 + $0x60] sm:$0xff]  ;;  %v671_v7 = vld [vmem:[%s3802_s7 + $0x70] sm:$0xff] }
  0x31   : > { %v673_v8 = vld [vmem:[%s3802_s7 + $0x80] sm:$0xff]  ;;  %670 = vst [vmem:[%s3807_s9 + $0x30] sm:$0xff] %v669_v6  ;;  %672 = vst [vmem:[%s3807_s9 + $0x38] sm:$0xff] %v671_v7  ;;  %v675_v9 = vld [vmem:[%s3802_s7 + $0x90] sm:$0xff] }
  0x32   : > { %674 = vst [vmem:[%s3807_s9 + $0x40] sm:$0xff] %v673_v8  ;;  %v677_v10 = vld [vmem:[%s3802_s7 + $0xa0] sm:$0xff]  ;;  %v679_v11 = vld [vmem:[%s3802_s7 + $0xb0] sm:$0xff]  ;;  %676 = vst [vmem:[%s3807_s9 + $0x48] sm:$0xff] %v675_v9 }
  0x33   : > { %678 = vst [vmem:[%s3807_s9 + $0x50] sm:$0xff] %v677_v10  ;;  %680 = vst [vmem:[%s3807_s9 + $0x58] sm:$0xff] %v679_v11  ;;  %v681_v12 = vld [vmem:[%s3802_s7 + $0xc0] sm:$0xff]  ;;  %v683_v13 = vld [vmem:[%s3802_s7 + $0xd0] sm:$0xff] }
  0x34   : > { %v685_v14 = vld [vmem:[%s3802_s7 + $0xe0] sm:$0xff]  ;;  %682 = vst [vmem:[%s3807_s9 + $0x60] sm:$0xff] %v681_v12  ;;  %684 = vst [vmem:[%s3807_s9 + $0x68] sm:$0xff] %v683_v13  ;;  %v687_v15 = vld [vmem:[%s3802_s7 + $0xf0] sm:$0xff] }
  0x35   : > { %686 = vst [vmem:[%s3807_s9 + $0x70] sm:$0xff] %v685_v14  ;;  %v689_v16 = vld [vmem:[%s3802_s7 + $0x100] sm:$0xff]  ;;  %v691_v17 = vld [vmem:[%s3802_s7 + $0x110] sm:$0xff]  ;;  %688 = vst [vmem:[%s3807_s9 + $0x78] sm:$0xff] %v687_v15 }
  0x36   : > { %690 = vst [vmem:[%s3807_s9 + $0x80] sm:$0xff] %v689_v16  ;;  %692 = vst [vmem:[%s3807_s9 + $0x88] sm:$0xff] %v691_v17  ;;  %v693_v18 = vld [vmem:[%s3802_s7 + $0x120] sm:$0xff]  ;;  %v695_v19 = vld [vmem:[%s3802_s7 + $0x130] sm:$0xff] }
  0x37   : > { %v697_v20 = vld [vmem:[%s3802_s7 + $0x140] sm:$0xff]  ;;  %694 = vst [vmem:[%s3807_s9 + $0x90] sm:$0xff] %v693_v18  ;;  %696 = vst [vmem:[%s3807_s9 + $0x98] sm:$0xff] %v695_v19  ;;  %v699_v21 = vld [vmem:[%s3802_s7 + $0x150] sm:$0xff] }
  0x38   : > { %698 = vst [vmem:[%s3807_s9 + $0xa0] sm:$0xff] %v697_v20  ;;  %v701_v22 = vld [vmem:[%s3802_s7 + $0x160] sm:$0xff]  ;;  %v703_v23 = vld [vmem:[%s3802_s7 + $0x170] sm:$0xff]  ;;  %700 = vst [vmem:[%s3807_s9 + $0xa8] sm:$0xff] %v699_v21 }
  0x39   : > { %702 = vst [vmem:[%s3807_s9 + $0xb0] sm:$0xff] %v701_v22  ;;  %704 = vst [vmem:[%s3807_s9 + $0xb8] sm:$0xff] %v703_v23  ;;  %v705_v24 = vld [vmem:[%s3802_s7 + $0x180] sm:$0xff]  ;;  %v707_v25 = vld [vmem:[%s3802_s7 + $0x190] sm:$0xff] }
  0x3a   : > { %v709_v26 = vld [vmem:[%s3802_s7 + $0x1a0] sm:$0xff]  ;;  %706 = vst [vmem:[%s3807_s9 + $0xc0] sm:$0xff] %v705_v24  ;;  %708 = vst [vmem:[%s3807_s9 + $0xc8] sm:$0xff] %v707_v25  ;;  %v711_v27 = vld [vmem:[%s3802_s7 + $0x1b0] sm:$0xff] }
  0x3b   : > { %710 = vst [vmem:[%s3807_s9 + $0xd0] sm:$0xff] %v709_v26  ;;  %v713_v28 = vld [vmem:[%s3802_s7 + $0x1c0] sm:$0xff]  ;;  %v715_v29 = vld [vmem:[%s3802_s7 + $0x1d0] sm:$0xff]  ;;  %712 = vst [vmem:[%s3807_s9 + $0xd8] sm:$0xff] %v711_v27 }
  0x3c   : > { %714 = vst [vmem:[%s3807_s9 + $0xe0] sm:$0xff] %v713_v28  ;;  %716 = vst [vmem:[%s3807_s9 + $0xe8] sm:$0xff] %v715_v29  ;;  %v717_v30 = vld [vmem:[%s3802_s7 + $0x1e0] sm:$0xff]  ;;  %v719_v31 = vld [vmem:[%s3802_s7 + $0x1f0] sm:$0xff] }
  0x3d   : > { %v721_v32 = vld [vmem:[%s3802_s7 + $0x200] sm:$0xff]  ;;  %718 = vst [vmem:[%s3807_s9 + $0xf0] sm:$0xff] %v717_v30  ;;  %720 = vst [vmem:[%s3807_s9 + $0xf8] sm:$0xff] %v719_v31  ;;  %v723_v33 = vld [vmem:[%s3802_s7 + $0x210] sm:$0xff] }
  0x3e   : > { %722 = vst [vmem:[%s3807_s9 + $0x100] sm:$0xff] %v721_v32  ;;  %v725_v34 = vld [vmem:[%s3802_s7 + $0x220] sm:$0xff]  ;;  %v727_v35 = vld [vmem:[%s3802_s7 + $0x230] sm:$0xff]  ;;  %724 = vst [vmem:[%s3807_s9 + $0x108] sm:$0xff] %v723_v33 }
  0x3f   : > { %726 = vst [vmem:[%s3807_s9 + $0x110] sm:$0xff] %v725_v34  ;;  %728 = vst [vmem:[%s3807_s9 + $0x118] sm:$0xff] %v727_v35  ;;  %v729_v36 = vld [vmem:[%s3802_s7 + $0x240] sm:$0xff]  ;;  %v731_v37 = vld [vmem:[%s3802_s7 + $0x250] sm:$0xff] }
  0x40   : > { %v733_v38 = vld [vmem:[%s3802_s7 + $0x260] sm:$0xff]  ;;  %730 = vst [vmem:[%s3807_s9 + $0x120] sm:$0xff] %v729_v36  ;;  %732 = vst [vmem:[%s3807_s9 + $0x128] sm:$0xff] %v731_v37  ;;  %v735_v39 = vld [vmem:[%s3802_s7 + $0x270] sm:$0xff] }
  0x41   : > { %734 = vst [vmem:[%s3807_s9 + $0x130] sm:$0xff] %v733_v38  ;;  %v737_v40 = vld [vmem:[%s3802_s7 + $0x280] sm:$0xff]  ;;  %v739_v41 = vld [vmem:[%s3802_s7 + $0x290] sm:$0xff]  ;;  %736 = vst [vmem:[%s3807_s9 + $0x138] sm:$0xff] %v735_v39 }
  0x42   : > { %738 = vst [vmem:[%s3807_s9 + $0x140] sm:$0xff] %v737_v40  ;;  %740 = vst [vmem:[%s3807_s9 + $0x148] sm:$0xff] %v739_v41  ;;  %v741_v42 = vld [vmem:[%s3802_s7 + $0x2a0] sm:$0xff]  ;;  %v743_v43 = vld [vmem:[%s3802_s7 + $0x2b0] sm:$0xff] }
  0x43   : > { %v745_v44 = vld [vmem:[%s3802_s7 + $0x2c0] sm:$0xff]  ;;  %742 = vst [vmem:[%s3807_s9 + $0x150] sm:$0xff] %v741_v42  ;;  %744 = vst [vmem:[%s3807_s9 + $0x158] sm:$0xff] %v743_v43  ;;  %v747_v45 = vld [vmem:[%s3802_s7 + $0x2d0] sm:$0xff] }
  0x44   : > { %746 = vst [vmem:[%s3807_s9 + $0x160] sm:$0xff] %v745_v44  ;;  %v749_v46 = vld [vmem:[%s3802_s7 + $0x2e0] sm:$0xff]  ;;  %v751_v47 = vld [vmem:[%s3802_s7 + $0x2f0] sm:$0xff]  ;;  %748 = vst [vmem:[%s3807_s9 + $0x168] sm:$0xff] %v747_v45 }
  0x45   : > { %750 = vst [vmem:[%s3807_s9 + $0x170] sm:$0xff] %v749_v46  ;;  %752 = vst [vmem:[%s3807_s9 + $0x178] sm:$0xff] %v751_v47  ;;  %v753_v48 = vld [vmem:[%s3802_s7 + $0x300] sm:$0xff]  ;;  %v755_v49 = vld [vmem:[%s3802_s7 + $0x310] sm:$0xff] }
  0x46   : > { %v757_v50 = vld [vmem:[%s3802_s7 + $0x320] sm:$0xff]  ;;  %754 = vst [vmem:[%s3807_s9 + $0x180] sm:$0xff] %v753_v48  ;;  %756 = vst [vmem:[%s3807_s9 + $0x188] sm:$0xff] %v755_v49  ;;  %v759_v51 = vld [vmem:[%s3802_s7 + $0x330] sm:$0xff] }
  0x47   : > { %758 = vst [vmem:[%s3807_s9 + $0x190] sm:$0xff] %v757_v50  ;;  %v761_v52 = vld [vmem:[%s3802_s7 + $0x340] sm:$0xff]  ;;  %v763_v53 = vld [vmem:[%s3802_s7 + $0x350] sm:$0xff]  ;;  %760 = vst [vmem:[%s3807_s9 + $0x198] sm:$0xff] %v759_v51 }
  0x48   : > { %762 = vst [vmem:[%s3807_s9 + $0x1a0] sm:$0xff] %v761_v52  ;;  %764 = vst [vmem:[%s3807_s9 + $0x1a8] sm:$0xff] %v763_v53  ;;  %v765_v54 = vld [vmem:[%s3802_s7 + $0x360] sm:$0xff]  ;;  %v767_v55 = vld [vmem:[%s3802_s7 + $0x370] sm:$0xff] }
  0x49   : > { %v769_v56 = vld [vmem:[%s3802_s7 + $0x380] sm:$0xff]  ;;  %766 = vst [vmem:[%s3807_s9 + $0x1b0] sm:$0xff] %v765_v54  ;;  %768 = vst [vmem:[%s3807_s9 + $0x1b8] sm:$0xff] %v767_v55  ;;  %v771_v57 = vld [vmem:[%s3802_s7 + $0x390] sm:$0xff] }
  0x4a   : > { %770 = vst [vmem:[%s3807_s9 + $0x1c0] sm:$0xff] %v769_v56  ;;  %v773_v58 = vld [vmem:[%s3802_s7 + $0x3a0] sm:$0xff]  ;;  %v775_v59 = vld [vmem:[%s3802_s7 + $0x3b0] sm:$0xff]  ;;  %772 = vst [vmem:[%s3807_s9 + $0x1c8] sm:$0xff] %v771_v57 }
  0x4b   : > { %774 = vst [vmem:[%s3807_s9 + $0x1d0] sm:$0xff] %v773_v58  ;;  %776 = vst [vmem:[%s3807_s9 + $0x1d8] sm:$0xff] %v775_v59  ;;  %v777_v60 = vld [vmem:[%s3802_s7 + $0x3c0] sm:$0xff]  ;;  %v779_v61 = vld [vmem:[%s3802_s7 + $0x3d0] sm:$0xff] }
  0x4c   : > { %v781_v62 = vld [vmem:[%s3802_s7 + $0x3e0] sm:$0xff]  ;;  %778 = vst [vmem:[%s3807_s9 + $0x1e0] sm:$0xff] %v777_v60  ;;  %780 = vst [vmem:[%s3807_s9 + $0x1e8] sm:$0xff] %v779_v61  ;;  %v783_v63 = vld [vmem:[%s3802_s7 + $0x3f0] sm:$0xff] }
  0x4d   : > { %782 = vst [vmem:[%s3807_s9 + $0x1f0] sm:$0xff] %v781_v62  ;;  %v785_v0 = vld [vmem:[%s3802_s7 + $0x400] sm:$0xff]  ;;  %v787_v1 = vld [vmem:[%s3802_s7 + $0x410] sm:$0xff]  ;;  %784 = vst [vmem:[%s3807_s9 + $0x1f8] sm:$0xff] %v783_v63 }
  0x4e   : > { %786 = vst [vmem:[%s3807_s9 + $0x200] sm:$0xff] %v785_v0  ;;  %788 = vst [vmem:[%s3807_s9 + $0x208] sm:$0xff] %v787_v1  ;;  %v789_v2 = vld [vmem:[%s3802_s7 + $0x420] sm:$0xff]  ;;  %v791_v3 = vld [vmem:[%s3802_s7 + $0x430] sm:$0xff] }
  0x4f   : > { %v793_v4 = vld [vmem:[%s3802_s7 + $0x440] sm:$0xff]  ;;  %790 = vst [vmem:[%s3807_s9 + $0x210] sm:$0xff] %v789_v2  ;;  %792 = vst [vmem:[%s3807_s9 + $0x218] sm:$0xff] %v791_v3  ;;  %v795_v5 = vld [vmem:[%s3802_s7 + $0x450] sm:$0xff] }
  0x50   : > { %794 = vst [vmem:[%s3807_s9 + $0x220] sm:$0xff] %v793_v4  ;;  %v797_v6 = vld [vmem:[%s3802_s7 + $0x460] sm:$0xff]  ;;  %v799_v7 = vld [vmem:[%s3802_s7 + $0x470] sm:$0xff]  ;;  %796 = vst [vmem:[%s3807_s9 + $0x228] sm:$0xff] %v795_v5 }
  0x51   : > { %798 = vst [vmem:[%s3807_s9 + $0x230] sm:$0xff] %v797_v6  ;;  %800 = vst [vmem:[%s3807_s9 + $0x238] sm:$0xff] %v799_v7  ;;  %v801_v8 = vld [vmem:[%s3802_s7 + $0x480] sm:$0xff]  ;;  %v803_v9 = vld [vmem:[%s3802_s7 + $0x490] sm:$0xff] }
  0x52   : > { %v805_v10 = vld [vmem:[%s3802_s7 + $0x4a0] sm:$0xff]  ;;  %802 = vst [vmem:[%s3807_s9 + $0x240] sm:$0xff] %v801_v8  ;;  %804 = vst [vmem:[%s3807_s9 + $0x248] sm:$0xff] %v803_v9  ;;  %v807_v11 = vld [vmem:[%s3802_s7 + $0x4b0] sm:$0xff] }
  0x53   : > { %806 = vst [vmem:[%s3807_s9 + $0x250] sm:$0xff] %v805_v10  ;;  %v809_v12 = vld [vmem:[%s3802_s7 + $0x4c0] sm:$0xff]  ;;  %v811_v13 = vld [vmem:[%s3802_s7 + $0x4d0] sm:$0xff]  ;;  %808 = vst [vmem:[%s3807_s9 + $0x258] sm:$0xff] %v807_v11 }
  0x54   : > { %810 = vst [vmem:[%s3807_s9 + $0x260] sm:$0xff] %v809_v12  ;;  %812 = vst [vmem:[%s3807_s9 + $0x268] sm:$0xff] %v811_v13  ;;  %v813_v14 = vld [vmem:[%s3802_s7 + $0x4e0] sm:$0xff]  ;;  %v815_v15 = vld [vmem:[%s3802_s7 + $0x4f0] sm:$0xff] }
  0x55   : > { %v817_v16 = vld [vmem:[%s3802_s7 + $0x500] sm:$0xff]  ;;  %814 = vst [vmem:[%s3807_s9 + $0x270] sm:$0xff] %v813_v14  ;;  %816 = vst [vmem:[%s3807_s9 + $0x278] sm:$0xff] %v815_v15  ;;  %v819_v17 = vld [vmem:[%s3802_s7 + $0x510] sm:$0xff] }
  0x56   : > { %818 = vst [vmem:[%s3807_s9 + $0x280] sm:$0xff] %v817_v16  ;;  %v821_v18 = vld [vmem:[%s3802_s7 + $0x520] sm:$0xff]  ;;  %v823_v19 = vld [vmem:[%s3802_s7 + $0x530] sm:$0xff]  ;;  %820 = vst [vmem:[%s3807_s9 + $0x288] sm:$0xff] %v819_v17 }
  0x57   : > { %822 = vst [vmem:[%s3807_s9 + $0x290] sm:$0xff] %v821_v18  ;;  %824 = vst [vmem:[%s3807_s9 + $0x298] sm:$0xff] %v823_v19  ;;  %v825_v20 = vld [vmem:[%s3802_s7 + $0x540] sm:$0xff]  ;;  %v827_v21 = vld [vmem:[%s3802_s7 + $0x550] sm:$0xff] }
  0x58   : > { %v829_v22 = vld [vmem:[%s3802_s7 + $0x560] sm:$0xff]  ;;  %826 = vst [vmem:[%s3807_s9 + $0x2a0] sm:$0xff] %v825_v20  ;;  %828 = vst [vmem:[%s3807_s9 + $0x2a8] sm:$0xff] %v827_v21  ;;  %v831_v23 = vld [vmem:[%s3802_s7 + $0x570] sm:$0xff] }
  0x59   : > { %830 = vst [vmem:[%s3807_s9 + $0x2b0] sm:$0xff] %v829_v22  ;;  %v833_v24 = vld [vmem:[%s3802_s7 + $0x580] sm:$0xff]  ;;  %v835_v25 = vld [vmem:[%s3802_s7 + $0x590] sm:$0xff]  ;;  %832 = vst [vmem:[%s3807_s9 + $0x2b8] sm:$0xff] %v831_v23 }
  0x5a   : > { %834 = vst [vmem:[%s3807_s9 + $0x2c0] sm:$0xff] %v833_v24  ;;  %836 = vst [vmem:[%s3807_s9 + $0x2c8] sm:$0xff] %v835_v25  ;;  %v837_v26 = vld [vmem:[%s3802_s7 + $0x5a0] sm:$0xff]  ;;  %v839_v27 = vld [vmem:[%s3802_s7 + $0x5b0] sm:$0xff] }
  0x5b   : > { %v841_v28 = vld [vmem:[%s3802_s7 + $0x5c0] sm:$0xff]  ;;  %838 = vst [vmem:[%s3807_s9 + $0x2d0] sm:$0xff] %v837_v26  ;;  %840 = vst [vmem:[%s3807_s9 + $0x2d8] sm:$0xff] %v839_v27  ;;  %v843_v29 = vld [vmem:[%s3802_s7 + $0x5d0] sm:$0xff] }
  0x5c   : > { %842 = vst [vmem:[%s3807_s9 + $0x2e0] sm:$0xff] %v841_v28  ;;  %v845_v30 = vld [vmem:[%s3802_s7 + $0x5e0] sm:$0xff]  ;;  %v847_v31 = vld [vmem:[%s3802_s7 + $0x5f0] sm:$0xff]  ;;  %844 = vst [vmem:[%s3807_s9 + $0x2e8] sm:$0xff] %v843_v29 }
  0x5d   : > { %846 = vst [vmem:[%s3807_s9 + $0x2f0] sm:$0xff] %v845_v30  ;;  %848 = vst [vmem:[%s3807_s9 + $0x2f8] sm:$0xff] %v847_v31  ;;  %v849_v32 = vld [vmem:[%s3802_s7 + $0x600] sm:$0xff]  ;;  %v851_v33 = vld [vmem:[%s3802_s7 + $0x610] sm:$0xff] }
  0x5e   : > { %v853_v34 = vld [vmem:[%s3802_s7 + $0x620] sm:$0xff]  ;;  %850 = vst [vmem:[%s3807_s9 + $0x300] sm:$0xff] %v849_v32  ;;  %852 = vst [vmem:[%s3807_s9 + $0x308] sm:$0xff] %v851_v33  ;;  %v855_v35 = vld [vmem:[%s3802_s7 + $0x630] sm:$0xff] }
  0x5f   : > { %854 = vst [vmem:[%s3807_s9 + $0x310] sm:$0xff] %v853_v34  ;;  %v857_v36 = vld [vmem:[%s3802_s7 + $0x640] sm:$0xff]  ;;  %v859_v37 = vld [vmem:[%s3802_s7 + $0x650] sm:$0xff]  ;;  %856 = vst [vmem:[%s3807_s9 + $0x318] sm:$0xff] %v855_v35 }
  0x60   : > { %858 = vst [vmem:[%s3807_s9 + $0x320] sm:$0xff] %v857_v36  ;;  %860 = vst [vmem:[%s3807_s9 + $0x328] sm:$0xff] %v859_v37  ;;  %v861_v38 = vld [vmem:[%s3802_s7 + $0x660] sm:$0xff]  ;;  %v863_v39 = vld [vmem:[%s3802_s7 + $0x670] sm:$0xff] }
  0x61   : > { %v865_v40 = vld [vmem:[%s3802_s7 + $0x680] sm:$0xff]  ;;  %862 = vst [vmem:[%s3807_s9 + $0x330] sm:$0xff] %v861_v38  ;;  %864 = vst [vmem:[%s3807_s9 + $0x338] sm:$0xff] %v863_v39  ;;  %v867_v41 = vld [vmem:[%s3802_s7 + $0x690] sm:$0xff] }
  0x62   : > { %866 = vst [vmem:[%s3807_s9 + $0x340] sm:$0xff] %v865_v40  ;;  %v869_v42 = vld [vmem:[%s3802_s7 + $0x6a0] sm:$0xff]  ;;  %v871_v43 = vld [vmem:[%s3802_s7 + $0x6b0] sm:$0xff]  ;;  %868 = vst [vmem:[%s3807_s9 + $0x348] sm:$0xff] %v867_v41 }
  0x63   : > { %870 = vst [vmem:[%s3807_s9 + $0x350] sm:$0xff] %v869_v42  ;;  %872 = vst [vmem:[%s3807_s9 + $0x358] sm:$0xff] %v871_v43  ;;  %v873_v44 = vld [vmem:[%s3802_s7 + $0x6c0] sm:$0xff]  ;;  %v875_v45 = vld [vmem:[%s3802_s7 + $0x6d0] sm:$0xff] }
  0x64   : > { %v877_v46 = vld [vmem:[%s3802_s7 + $0x6e0] sm:$0xff]  ;;  %874 = vst [vmem:[%s3807_s9 + $0x360] sm:$0xff] %v873_v44  ;;  %876 = vst [vmem:[%s3807_s9 + $0x368] sm:$0xff] %v875_v45  ;;  %v879_v47 = vld [vmem:[%s3802_s7 + $0x6f0] sm:$0xff] }
  0x65   : > { %878 = vst [vmem:[%s3807_s9 + $0x370] sm:$0xff] %v877_v46  ;;  %v881_v48 = vld [vmem:[%s3802_s7 + $0x700] sm:$0xff]  ;;  %v883_v49 = vld [vmem:[%s3802_s7 + $0x710] sm:$0xff]  ;;  %880 = vst [vmem:[%s3807_s9 + $0x378] sm:$0xff] %v879_v47 }
  0x66   : > { %882 = vst [vmem:[%s3807_s9 + $0x380] sm:$0xff] %v881_v48  ;;  %884 = vst [vmem:[%s3807_s9 + $0x388] sm:$0xff] %v883_v49  ;;  %v885_v50 = vld [vmem:[%s3802_s7 + $0x720] sm:$0xff]  ;;  %v887_v51 = vld [vmem:[%s3802_s7 + $0x730] sm:$0xff] }
  0x67   : > { %v889_v52 = vld [vmem:[%s3802_s7 + $0x740] sm:$0xff]  ;;  %886 = vst [vmem:[%s3807_s9 + $0x390] sm:$0xff] %v885_v50  ;;  %888 = vst [vmem:[%s3807_s9 + $0x398] sm:$0xff] %v887_v51  ;;  %v891_v53 = vld [vmem:[%s3802_s7 + $0x750] sm:$0xff] }
  0x68   : > { %890 = vst [vmem:[%s3807_s9 + $0x3a0] sm:$0xff] %v889_v52  ;;  %v893_v54 = vld [vmem:[%s3802_s7 + $0x760] sm:$0xff]  ;;  %v895_v55 = vld [vmem:[%s3802_s7 + $0x770] sm:$0xff]  ;;  %892 = vst [vmem:[%s3807_s9 + $0x3a8] sm:$0xff] %v891_v53 }
  0x69   : > { %894 = vst [vmem:[%s3807_s9 + $0x3b0] sm:$0xff] %v893_v54  ;;  %896 = vst [vmem:[%s3807_s9 + $0x3b8] sm:$0xff] %v895_v55  ;;  %v897_v56 = vld [vmem:[%s3802_s7 + $0x780] sm:$0xff]  ;;  %v899_v57 = vld [vmem:[%s3802_s7 + $0x790] sm:$0xff] }
  0x6a   : > { %v901_v58 = vld [vmem:[%s3802_s7 + $0x7a0] sm:$0xff]  ;;  %898 = vst [vmem:[%s3807_s9 + $0x3c0] sm:$0xff] %v897_v56  ;;  %900 = vst [vmem:[%s3807_s9 + $0x3c8] sm:$0xff] %v899_v57  ;;  %v903_v59 = vld [vmem:[%s3802_s7 + $0x7b0] sm:$0xff] }
  0x6b   : > { %902 = vst [vmem:[%s3807_s9 + $0x3d0] sm:$0xff] %v901_v58  ;;  %v905_v60 = vld [vmem:[%s3802_s7 + $0x7c0] sm:$0xff]  ;;  %v907_v61 = vld [vmem:[%s3802_s7 + $0x7d0] sm:$0xff]  ;;  %904 = vst [vmem:[%s3807_s9 + $0x3d8] sm:$0xff] %v903_v59 }
  0x6c   : > { %906 = vst [vmem:[%s3807_s9 + $0x3e0] sm:$0xff] %v905_v60  ;;  %908 = vst [vmem:[%s3807_s9 + $0x3e8] sm:$0xff] %v907_v61  ;;  %v909_v62 = vld [vmem:[%s3802_s7 + $0x7e0] sm:$0xff]  ;;  %v911_v63 = vld [vmem:[%s3802_s7 + $0x7f0] sm:$0xff] }
  0x6d   : > { %v913_v0 = vld [vmem:[%s3802_s7 + $0x800] sm:$0xff]  ;;  %910 = vst [vmem:[%s3807_s9 + $0x3f0] sm:$0xff] %v909_v62  ;;  %912 = vst [vmem:[%s3807_s9 + $0x3f8] sm:$0xff] %v911_v63  ;;  %v915_v1 = vld [vmem:[%s3802_s7 + $0x810] sm:$0xff] }
  0x6e   : > { %914 = vst [vmem:[%s3807_s9 + $0x400] sm:$0xff] %v913_v0  ;;  %v917_v2 = vld [vmem:[%s3802_s7 + $0x820] sm:$0xff]  ;;  %v919_v3 = vld [vmem:[%s3802_s7 + $0x830] sm:$0xff]  ;;  %916 = vst [vmem:[%s3807_s9 + $0x408] sm:$0xff] %v915_v1 }
  0x6f   : > { %918 = vst [vmem:[%s3807_s9 + $0x410] sm:$0xff] %v917_v2  ;;  %920 = vst [vmem:[%s3807_s9 + $0x418] sm:$0xff] %v919_v3  ;;  %v921_v4 = vld [vmem:[%s3802_s7 + $0x840] sm:$0xff]  ;;  %v923_v5 = vld [vmem:[%s3802_s7 + $0x850] sm:$0xff] }
  0x70   : > { %v925_v6 = vld [vmem:[%s3802_s7 + $0x860] sm:$0xff]  ;;  %922 = vst [vmem:[%s3807_s9 + $0x420] sm:$0xff] %v921_v4  ;;  %924 = vst [vmem:[%s3807_s9 + $0x428] sm:$0xff] %v923_v5  ;;  %v927_v7 = vld [vmem:[%s3802_s7 + $0x870] sm:$0xff] }
  0x71   : > { %926 = vst [vmem:[%s3807_s9 + $0x430] sm:$0xff] %v925_v6  ;;  %v929_v8 = vld [vmem:[%s3802_s7 + $0x880] sm:$0xff]  ;;  %v931_v9 = vld [vmem:[%s3802_s7 + $0x890] sm:$0xff]  ;;  %928 = vst [vmem:[%s3807_s9 + $0x438] sm:$0xff] %v927_v7 }
  0x72   : > { %930 = vst [vmem:[%s3807_s9 + $0x440] sm:$0xff] %v929_v8  ;;  %932 = vst [vmem:[%s3807_s9 + $0x448] sm:$0xff] %v931_v9  ;;  %v933_v10 = vld [vmem:[%s3802_s7 + $0x8a0] sm:$0xff]  ;;  %v935_v11 = vld [vmem:[%s3802_s7 + $0x8b0] sm:$0xff] }
  0x73   : > { %v937_v12 = vld [vmem:[%s3802_s7 + $0x8c0] sm:$0xff]  ;;  %934 = vst [vmem:[%s3807_s9 + $0x450] sm:$0xff] %v933_v10  ;;  %936 = vst [vmem:[%s3807_s9 + $0x458] sm:$0xff] %v935_v11  ;;  %v939_v13 = vld [vmem:[%s3802_s7 + $0x8d0] sm:$0xff] }
  0x74   : > { %938 = vst [vmem:[%s3807_s9 + $0x460] sm:$0xff] %v937_v12  ;;  %v941_v14 = vld [vmem:[%s3802_s7 + $0x8e0] sm:$0xff]  ;;  %v943_v15 = vld [vmem:[%s3802_s7 + $0x8f0] sm:$0xff]  ;;  %940 = vst [vmem:[%s3807_s9 + $0x468] sm:$0xff] %v939_v13 }
  0x75   : > { %942 = vst [vmem:[%s3807_s9 + $0x470] sm:$0xff] %v941_v14  ;;  %944 = vst [vmem:[%s3807_s9 + $0x478] sm:$0xff] %v943_v15  ;;  %v945_v16 = vld [vmem:[%s3802_s7 + $0x900] sm:$0xff]  ;;  %v947_v17 = vld [vmem:[%s3802_s7 + $0x910] sm:$0xff] }
  0x76   : > { %v949_v18 = vld [vmem:[%s3802_s7 + $0x920] sm:$0xff]  ;;  %946 = vst [vmem:[%s3807_s9 + $0x480] sm:$0xff] %v945_v16  ;;  %948 = vst [vmem:[%s3807_s9 + $0x488] sm:$0xff] %v947_v17  ;;  %v951_v19 = vld [vmem:[%s3802_s7 + $0x930] sm:$0xff] }
  0x77   : > { %950 = vst [vmem:[%s3807_s9 + $0x490] sm:$0xff] %v949_v18  ;;  %v953_v20 = vld [vmem:[%s3802_s7 + $0x940] sm:$0xff]  ;;  %v955_v21 = vld [vmem:[%s3802_s7 + $0x950] sm:$0xff]  ;;  %952 = vst [vmem:[%s3807_s9 + $0x498] sm:$0xff] %v951_v19 }
  0x78   : > { %954 = vst [vmem:[%s3807_s9 + $0x4a0] sm:$0xff] %v953_v20  ;;  %956 = vst [vmem:[%s3807_s9 + $0x4a8] sm:$0xff] %v955_v21  ;;  %v957_v22 = vld [vmem:[%s3802_s7 + $0x960] sm:$0xff]  ;;  %v959_v23 = vld [vmem:[%s3802_s7 + $0x970] sm:$0xff] }
  0x79   : > { %v961_v24 = vld [vmem:[%s3802_s7 + $0x980] sm:$0xff]  ;;  %958 = vst [vmem:[%s3807_s9 + $0x4b0] sm:$0xff] %v957_v22  ;;  %960 = vst [vmem:[%s3807_s9 + $0x4b8] sm:$0xff] %v959_v23  ;;  %v963_v25 = vld [vmem:[%s3802_s7 + $0x990] sm:$0xff] }
  0x7a   : > { %962 = vst [vmem:[%s3807_s9 + $0x4c0] sm:$0xff] %v961_v24  ;;  %v965_v26 = vld [vmem:[%s3802_s7 + $0x9a0] sm:$0xff]  ;;  %v967_v27 = vld [vmem:[%s3802_s7 + $0x9b0] sm:$0xff]  ;;  %964 = vst [vmem:[%s3807_s9 + $0x4c8] sm:$0xff] %v963_v25 }
  0x7b   : > { %966 = vst [vmem:[%s3807_s9 + $0x4d0] sm:$0xff] %v965_v26  ;;  %968 = vst [vmem:[%s3807_s9 + $0x4d8] sm:$0xff] %v967_v27  ;;  %v969_v28 = vld [vmem:[%s3802_s7 + $0x9c0] sm:$0xff]  ;;  %v971_v29 = vld [vmem:[%s3802_s7 + $0x9d0] sm:$0xff] }
  0x7c   : > { %v973_v30 = vld [vmem:[%s3802_s7 + $0x9e0] sm:$0xff]  ;;  %970 = vst [vmem:[%s3807_s9 + $0x4e0] sm:$0xff] %v969_v28  ;;  %972 = vst [vmem:[%s3807_s9 + $0x4e8] sm:$0xff] %v971_v29  ;;  %v975_v31 = vld [vmem:[%s3802_s7 + $0x9f0] sm:$0xff] }
  0x7d   : > { %974 = vst [vmem:[%s3807_s9 + $0x4f0] sm:$0xff] %v973_v30  ;;  %v977_v32 = vld [vmem:[%s3802_s7 + $0xa00] sm:$0xff]  ;;  %v979_v33 = vld [vmem:[%s3802_s7 + $0xa10] sm:$0xff]  ;;  %976 = vst [vmem:[%s3807_s9 + $0x4f8] sm:$0xff] %v975_v31 }
  0x7e   : > { %978 = vst [vmem:[%s3807_s9 + $0x500] sm:$0xff] %v977_v32  ;;  %980 = vst [vmem:[%s3807_s9 + $0x508] sm:$0xff] %v979_v33  ;;  %v981_v34 = vld [vmem:[%s3802_s7 + $0xa20] sm:$0xff]  ;;  %v983_v35 = vld [vmem:[%s3802_s7 + $0xa30] sm:$0xff] }
  0x7f   : > { %v985_v36 = vld [vmem:[%s3802_s7 + $0xa40] sm:$0xff]  ;;  %982 = vst [vmem:[%s3807_s9 + $0x510] sm:$0xff] %v981_v34  ;;  %984 = vst [vmem:[%s3807_s9 + $0x518] sm:$0xff] %v983_v35  ;;  %v987_v37 = vld [vmem:[%s3802_s7 + $0xa50] sm:$0xff] }
  0x80   : > { %986 = vst [vmem:[%s3807_s9 + $0x520] sm:$0xff] %v985_v36  ;;  %v989_v38 = vld [vmem:[%s3802_s7 + $0xa60] sm:$0xff]  ;;  %v991_v39 = vld [vmem:[%s3802_s7 + $0xa70] sm:$0xff]  ;;  %988 = vst [vmem:[%s3807_s9 + $0x528] sm:$0xff] %v987_v37 }
  0x81   : > { %990 = vst [vmem:[%s3807_s9 + $0x530] sm:$0xff] %v989_v38  ;;  %992 = vst [vmem:[%s3807_s9 + $0x538] sm:$0xff] %v991_v39  ;;  %v993_v40 = vld [vmem:[%s3802_s7 + $0xa80] sm:$0xff]  ;;  %v995_v41 = vld [vmem:[%s3802_s7 + $0xa90] sm:$0xff] }
  0x82   : > { %v997_v42 = vld [vmem:[%s3802_s7 + $0xaa0] sm:$0xff]  ;;  %994 = vst [vmem:[%s3807_s9 + $0x540] sm:$0xff] %v993_v40  ;;  %996 = vst [vmem:[%s3807_s9 + $0x548] sm:$0xff] %v995_v41  ;;  %v999_v43 = vld [vmem:[%s3802_s7 + $0xab0] sm:$0xff] }
  0x83   : > { %998 = vst [vmem:[%s3807_s9 + $0x550] sm:$0xff] %v997_v42  ;;  %v1001_v44 = vld [vmem:[%s3802_s7 + $0xac0] sm:$0xff]  ;;  %v1003_v45 = vld [vmem:[%s3802_s7 + $0xad0] sm:$0xff]  ;;  %1000 = vst [vmem:[%s3807_s9 + $0x558] sm:$0xff] %v999_v43 }
  0x84   : > { %1002 = vst [vmem:[%s3807_s9 + $0x560] sm:$0xff] %v1001_v44  ;;  %1004 = vst [vmem:[%s3807_s9 + $0x568] sm:$0xff] %v1003_v45  ;;  %v1005_v46 = vld [vmem:[%s3802_s7 + $0xae0] sm:$0xff]  ;;  %v1007_v47 = vld [vmem:[%s3802_s7 + $0xaf0] sm:$0xff] }
  0x85   : > { %v1009_v48 = vld [vmem:[%s3802_s7 + $0xb00] sm:$0xff]  ;;  %1006 = vst [vmem:[%s3807_s9 + $0x570] sm:$0xff] %v1005_v46  ;;  %1008 = vst [vmem:[%s3807_s9 + $0x578] sm:$0xff] %v1007_v47  ;;  %v1011_v49 = vld [vmem:[%s3802_s7 + $0xb10] sm:$0xff] }
  0x86   : > { %1010 = vst [vmem:[%s3807_s9 + $0x580] sm:$0xff] %v1009_v48  ;;  %v1013_v50 = vld [vmem:[%s3802_s7 + $0xb20] sm:$0xff]  ;;  %v1015_v51 = vld [vmem:[%s3802_s7 + $0xb30] sm:$0xff]  ;;  %1012 = vst [vmem:[%s3807_s9 + $0x588] sm:$0xff] %v1011_v49 }
  0x87   : > { %1014 = vst [vmem:[%s3807_s9 + $0x590] sm:$0xff] %v1013_v50  ;;  %1016 = vst [vmem:[%s3807_s9 + $0x598] sm:$0xff] %v1015_v51  ;;  %v1017_v52 = vld [vmem:[%s3802_s7 + $0xb40] sm:$0xff]  ;;  %v1019_v53 = vld [vmem:[%s3802_s7 + $0xb50] sm:$0xff] }
  0x88   : > { %v1021_v54 = vld [vmem:[%s3802_s7 + $0xb60] sm:$0xff]  ;;  %1018 = vst [vmem:[%s3807_s9 + $0x5a0] sm:$0xff] %v1017_v52  ;;  %1020 = vst [vmem:[%s3807_s9 + $0x5a8] sm:$0xff] %v1019_v53  ;;  %v1023_v55 = vld [vmem:[%s3802_s7 + $0xb70] sm:$0xff] }
  0x89   : > { %1022 = vst [vmem:[%s3807_s9 + $0x5b0] sm:$0xff] %v1021_v54  ;;  %v1025_v56 = vld [vmem:[%s3802_s7 + $0xb80] sm:$0xff]  ;;  %v1027_v57 = vld [vmem:[%s3802_s7 + $0xb90] sm:$0xff]  ;;  %1024 = vst [vmem:[%s3807_s9 + $0x5b8] sm:$0xff] %v1023_v55 }
  0x8a   : > { %1026 = vst [vmem:[%s3807_s9 + $0x5c0] sm:$0xff] %v1025_v56  ;;  %1028 = vst [vmem:[%s3807_s9 + $0x5c8] sm:$0xff] %v1027_v57  ;;  %v1029_v58 = vld [vmem:[%s3802_s7 + $0xba0] sm:$0xff]  ;;  %v1031_v59 = vld [vmem:[%s3802_s7 + $0xbb0] sm:$0xff] }
  0x8b   : > { %v1033_v60 = vld [vmem:[%s3802_s7 + $0xbc0] sm:$0xff]  ;;  %1030 = vst [vmem:[%s3807_s9 + $0x5d0] sm:$0xff] %v1029_v58  ;;  %1032 = vst [vmem:[%s3807_s9 + $0x5d8] sm:$0xff] %v1031_v59  ;;  %v1035_v61 = vld [vmem:[%s3802_s7 + $0xbd0] sm:$0xff] }
  0x8c   : > { %1034 = vst [vmem:[%s3807_s9 + $0x5e0] sm:$0xff] %v1033_v60  ;;  %v1037_v62 = vld [vmem:[%s3802_s7 + $0xbe0] sm:$0xff]  ;;  %v1039_v63 = vld [vmem:[%s3802_s7 + $0xbf0] sm:$0xff]  ;;  %1036 = vst [vmem:[%s3807_s9 + $0x5e8] sm:$0xff] %v1035_v61 }
  0x8d   : > { %1038 = vst [vmem:[%s3807_s9 + $0x5f0] sm:$0xff] %v1037_v62  ;;  %1040 = vst [vmem:[%s3807_s9 + $0x5f8] sm:$0xff] %v1039_v63 }
  0x8e PF: > { %p2907_p0 = scmp.ge.s32.totalorder %s3668_s27, 1  ;;  %p1053_p1 = scmp.lt.s32.totalorder %s3668_s27, 7 }
  0x90   : > { %p1054_p2 = pnand %p2907_p0, %p1053_p1 }
  0x91   : > { %s1060_s6 = sand.u32 (!%p1054_p2), 1, %s3644_s21   ;;  %s4194_s17 = sand.u32 (!%p1054_p2), 1, %s3636_s19  }
  0x92   : > { %1057 = sbr.rel (%p1054_p2) target bundleno = 651 (0x28b), region = 66  ;;  %s2908_s29 = sshll.u32 (!%p1054_p2), %s4194_s17, 4 }
  0x93   : > { %s3132_s28 = smul.u32 (!%p1054_p2), 1536, %s1060_s6  ;;  %s2911_s12 = sshll.u32 (!%p1054_p2), %s3656_s24, 1 }
  0x94   : > { %s1114_s8 = smul.u32 (!%p1054_p2), 12, %s3652_s23  ;;  %p1127_p4 = scmp.lt.s32.totalorder (!%p1054_p2), %s2911_s12, 3 }
  0x95   : > { %s4216_s22 = scalar_lea.vmem (!%p1054_p2), [#allocation3], %s3132_s28  ;;  %s4218_s15 = scalar_lea.vmem (!%p1054_p2), [#allocation4], %s2908_s29 }
  0x96   : > { %p1117_p3 = scmp.lt.s32.totalorder (!%p1054_p2), %s1114_s8, 35  ;;  %p2914_p5 = scmp.ne.s32.totalorder (!%p1054_p2), %s3652_s23, 0 }
  0x99   : > { %s4584_s8 = smov (!%p1117_p3, %s1114_s8), 35  ;;  %s4586_s12 = smov (!%p1127_p4, %s2911_s12), 3 }
  0x9a   : > { %s2910_s13 = sshll.u32 %s4584_s8, 2  ;;  %s1129_s6 = scalar_lea.vmem %s4546_s2, %s4586_s12  ;;  %v3670_v0 = vmov (!%p2914_p5), 0.0  }
  0x9b   : > { %s4204_s9 = scalar_lea.vmem %s4544_s0, %s2910_s13  ;;  %s2913_s30 = sshll.u32 %s4586_s12, 3  ;;  %1148 = vst [vmem:[#allocation2] sm:$0xff] (!%p2914_p5), %v3670_v0  ;;  %1149 = vst [vmem:[#allocation2 + $0x8] sm:$0xff] (!%p2914_p5), %v3670_v0 }
  0x9c   : > { %s4214_s16 = scalar_lea.vmem %s4547_s3, %s2913_s30  ;;  %s4220_s8 = scalar_lea.vmem [#allocation6], %s2908_s29 }
  0x9d   : > { %1147 = sbr.rel (%p2914_p5) target bundleno = 164 (0xa4), region = 74 }
  0xa4 PF: > { %v3226_v1 = vld [vmem:[%s4216_s22 + $0x4] ss:$8 sps:$4 sm:$0xff]   ;;  %v3230_v3 = vld [vmem:[%s4216_s22] ss:$8 sps:$4 sm:$0xff]   ;;  %v3232_v5 = vld [vmem:[%s4216_s22 + $0x14] ss:$8 sps:$4 sm:$0xff]  }
  0xa5   : > { %v3228_v2 = vld [vmem:[%s4216_s22 + $0x104] ss:$8 sps:$4 sm:$0xff]   ;;  %2352 = vmatprep.subr.bf16.mxu0 %v3226_v1  ;;  %v3231_v4 = vld [vmem:[%s4216_s22 + $0x100] ss:$8 sps:$4 sm:$0xff]   ;;  %v3234_v6 = vld [vmem:[%s4216_s22 + $0x114] ss:$8 sps:$4 sm:$0xff]  }
  0xa6   : > { %2393 = vmatprep.subr.bf16.mxu1 %v3228_v2  ;;  %2353 = vmatpush1.bf16.msra.mxu0 %v3230_v3  ;;  %v3236_v7 = vld [vmem:[%s4216_s22 + $0x10] ss:$8 sps:$4 sm:$0xff]   ;;  %v3238_v9 = vld [vmem:[%s4216_s22 + $0x24] ss:$8 sps:$4 sm:$0xff]   ;;  %v3242_v11 = vld [vmem:[%s4216_s22 + $0x20] ss:$8 sps:$4 sm:$0xff]  }
  0xa7   : > { %2394 = vmatpush1.bf16.msra.mxu1 %v3231_v4  ;;  %2354 = vmatprep.subr.bf16.mxu0 %v3232_v5  ;;  %v3237_v8 = vld [vmem:[%s4216_s22 + $0x110] ss:$8 sps:$4 sm:$0xff]   ;;  %v3240_v10 = vld [vmem:[%s4216_s22 + $0x124] ss:$8 sps:$4 sm:$0xff]   ;;  %v3243_v12 = vld [vmem:[%s4216_s22 + $0x120] ss:$8 sps:$4 sm:$0xff]  }
  0xa8   : > { %2395 = vmatprep.subr.bf16.mxu1 %v3234_v6  ;;  %v3244_v13 = vld [vmem:[%s4216_s22 + $0x34] ss:$8 sps:$4 sm:$0xff]   ;;  %v3248_v15 = vld [vmem:[%s4216_s22 + $0x30] ss:$8 sps:$4 sm:$0xff]   ;;  %v3250_v17 = vld [vmem:[%s4216_s22 + $0x44] ss:$8 sps:$4 sm:$0xff]  }
  0xa9   : > { %v3246_v14 = vld [vmem:[%s4216_s22 + $0x134] ss:$8 sps:$4 sm:$0xff]   ;;  %v3249_v16 = vld [vmem:[%s4216_s22 + $0x130] ss:$8 sps:$4 sm:$0xff]   ;;  %v3252_v18 = vld [vmem:[%s4216_s22 + $0x144] ss:$8 sps:$4 sm:$0xff]  }
  0xaa   : > { %2355 = vmatpush1.bf16.msra.mxu0 %v3236_v7  ;;  %v3254_v19 = vld [vmem:[%s4216_s22 + $0x40] ss:$8 sps:$4 sm:$0xff]   ;;  %v3256_v21 = vld [vmem:[%s4216_s22 + $0x54] ss:$8 sps:$4 sm:$0xff]   ;;  %v3260_v23 = vld [vmem:[%s4216_s22 + $0x50] ss:$8 sps:$4 sm:$0xff]  }
  0xab   : > { %2396 = vmatpush1.bf16.msra.mxu1 %v3237_v8  ;;  %2356 = vmatprep.subr.bf16.mxu0 %v3238_v9  ;;  %v3255_v20 = vld [vmem:[%s4216_s22 + $0x140] ss:$8 sps:$4 sm:$0xff]   ;;  %v3258_v22 = vld [vmem:[%s4216_s22 + $0x154] ss:$8 sps:$4 sm:$0xff]   ;;  %v3261_v24 = vld [vmem:[%s4216_s22 + $0x150] ss:$8 sps:$4 sm:$0xff]  }
  0xac   : > { %2397 = vmatprep.subr.bf16.mxu1 %v3240_v10  ;;  %v3262_v25 = vld [vmem:[%s4216_s22 + $0x64] ss:$8 sps:$4 sm:$0xff]   ;;  %v3266_v27 = vld [vmem:[%s4216_s22 + $0x60] ss:$8 sps:$4 sm:$0xff]   ;;  %v3268_v29 = vld [vmem:[%s4216_s22 + $0x74] ss:$8 sps:$4 sm:$0xff]  }
  0xad   : > { %v3264_v26 = vld [vmem:[%s4216_s22 + $0x164] ss:$8 sps:$4 sm:$0xff]   ;;  %v3267_v28 = vld [vmem:[%s4216_s22 + $0x160] ss:$8 sps:$4 sm:$0xff]   ;;  %v3270_v30 = vld [vmem:[%s4216_s22 + $0x174] ss:$8 sps:$4 sm:$0xff]  }
  0xae   : > { %2357 = vmatpush1.bf16.msra.mxu0 %v3242_v11  ;;  %v3272_v31 = vld [vmem:[%s4216_s22 + $0x70] ss:$8 sps:$4 sm:$0xff]   ;;  %v3274_v33 = vld [vmem:[%s4216_s22 + $0x84] ss:$8 sps:$4 sm:$0xff]   ;;  %v3278_v35 = vld [vmem:[%s4216_s22 + $0x80] ss:$8 sps:$4 sm:$0xff]  }
  0xaf   : > { %2398 = vmatpush1.bf16.msra.mxu1 %v3243_v12  ;;  %2358 = vmatprep.subr.bf16.mxu0 %v3244_v13  ;;  %v3273_v32 = vld [vmem:[%s4216_s22 + $0x170] ss:$8 sps:$4 sm:$0xff]   ;;  %v3276_v34 = vld [vmem:[%s4216_s22 + $0x184] ss:$8 sps:$4 sm:$0xff]   ;;  %v3279_v36 = vld [vmem:[%s4216_s22 + $0x180] ss:$8 sps:$4 sm:$0xff]  }
  0xb0   : > { %2399 = vmatprep.subr.bf16.mxu1 %v3246_v14  ;;  %v3280_v37 = vld [vmem:[%s4216_s22 + $0x94] ss:$8 sps:$4 sm:$0xff]   ;;  %v3284_v39 = vld [vmem:[%s4216_s22 + $0x90] ss:$8 sps:$4 sm:$0xff]   ;;  %v3286_v41 = vld [vmem:[%s4216_s22 + $0xa4] ss:$8 sps:$4 sm:$0xff]  }
  0xb1   : > { %v3282_v38 = vld [vmem:[%s4216_s22 + $0x194] ss:$8 sps:$4 sm:$0xff]   ;;  %v3285_v40 = vld [vmem:[%s4216_s22 + $0x190] ss:$8 sps:$4 sm:$0xff]   ;;  %v3288_v42 = vld [vmem:[%s4216_s22 + $0x1a4] ss:$8 sps:$4 sm:$0xff]  }
  0xb2   : > { %2359 = vmatpush1.bf16.msra.mxu0 %v3248_v15  ;;  %v3290_v43 = vld [vmem:[%s4216_s22 + $0xa0] ss:$8 sps:$4 sm:$0xff]   ;;  %v3292_v45 = vld [vmem:[%s4216_s22 + $0xb4] ss:$8 sps:$4 sm:$0xff]   ;;  %v3296_v50 = vld [vmem:[%s4216_s22 + $0xb0] ss:$8 sps:$4 sm:$0xff]  }
  0xb3   : > { %2400 = vmatpush1.bf16.msra.mxu1 %v3249_v16  ;;  %2360 = vmatprep.subr.bf16.mxu0 %v3250_v17  ;;  %v3291_v44 = vld [vmem:[%s4216_s22 + $0x1a0] ss:$8 sps:$4 sm:$0xff]   ;;  %v3294_v46 = vld [vmem:[%s4216_s22 + $0x1b4] ss:$8 sps:$4 sm:$0xff]   ;;  %v3297_v51 = vld [vmem:[%s4216_s22 + $0x1b0] ss:$8 sps:$4 sm:$0xff]  }
  0xb4   : > { %2401 = vmatprep.subr.bf16.mxu1 %v3252_v18  ;;  %v1152_v47 = vld [vmem:[%s4204_s9] sm:$0xff]  ;;  %v1153_v49 = vld [vmem:[%s4204_s9 + $0x8] sm:$0xff]  ;;  %v3298_v53 = vld [vmem:[%s4216_s22 + $0xc4] ss:$8 sps:$4 sm:$0xff]   ;;  %p3119_p6 = scmp.ne.s32.totalorder %s3652_s23, 2 }
  0xb5   : > { %v2916_v48 = vcombine.high %v1152_v47, %v1152_v47  ;;  %v2918_v52 = vcombine.high %v1153_v49, %v1153_v49  ;;  %v3300_v54 = vld [vmem:[%s4216_s22 + $0x1c4] ss:$8 sps:$4 sm:$0xff]   ;;  %v3302_v55 = vld [vmem:[%s4216_s22 + $0xc0] ss:$8 sps:$4 sm:$0xff]   ;;  %v3304_v57 = vld [vmem:[%s4216_s22 + $0xd4] ss:$8 sps:$4 sm:$0xff]   ;;  %v2915_v7 = vcombine.low %v1152_v47, %v1152_v47  ;;  %v2917_v8 = vcombine.low %v1153_v49, %v1153_v49 }
  0xb6   : > { %2361 = vmatpush1.bf16.msra.mxu0 %v3254_v19  ;;  %v3303_v56 = vld [vmem:[%s4216_s22 + $0x1c0] ss:$8 sps:$4 sm:$0xff]   ;;  %v3306_v58 = vld [vmem:[%s4216_s22 + $0x1d4] ss:$8 sps:$4 sm:$0xff]   ;;  %v3308_v59 = vld [vmem:[%s4216_s22 + $0xd0] ss:$8 sps:$4 sm:$0xff]  }
  0xb7   : > { %2402 = vmatpush1.bf16.msra.mxu1 %v3255_v20  ;;  %2362 = vmatprep.subr.bf16.mxu0 %v3256_v21  ;;  %v3309_v60 = vld [vmem:[%s4216_s22 + $0x1d0] ss:$8 sps:$4 sm:$0xff]   ;;  %v3310_v61 = vld [vmem:[%s4216_s22 + $0xe4] ss:$8 sps:$4 sm:$0xff]   ;;  %v3314_v63 = vld [vmem:[%s4216_s22 + $0xe0] ss:$8 sps:$4 sm:$0xff]  }
  0xb8   : > { %2403 = vmatprep.subr.bf16.mxu1 %v3258_v22  ;;  %2384 = vmatprep.mubr.bf16.mxu0 %v2916_v48  ;;  %v3312_v62 = vld [vmem:[%s4216_s22 + $0x1e4] ss:$8 sps:$4 sm:$0xff]   ;;  %v3315_v0 = vld [vmem:[%s4216_s22 + $0x1e0] ss:$8 sps:$4 sm:$0xff]   ;;  %v3316_v1 = vld [vmem:[%s4216_s22 + $0xf4] ss:$8 sps:$4 sm:$0xff]  }
  0xb9   : > { %2425 = vmatprep.mubr.bf16.mxu1 %v2918_v52  ;;  %v3318_v2 = vld [vmem:[%s4216_s22 + $0x1f4] ss:$8 sps:$4 sm:$0xff]   ;;  %v3320_v3 = vld [vmem:[%s4216_s22 + $0xf0] ss:$8 sps:$4 sm:$0xff]   ;;  %v3328_v5 = vld [vmem:[%s4216_s22 + $0x204] ss:$8 sps:$4 sm:$0xff]  }
  0xba   : > { %2363 = vmatpush1.bf16.msra.mxu0 %v3260_v23  ;;  %v3321_v4 = vld [vmem:[%s4216_s22 + $0x1f0] ss:$8 sps:$4 sm:$0xff]   ;;  %v3331_v6 = vld [vmem:[%s4216_s22 + $0x304] ss:$8 sps:$4 sm:$0xff]   ;;  %v3326_v9 = vld [vmem:[%s4216_s22 + $0x200] ss:$8 sps:$4 sm:$0xff]  }
  0xbb   : > { %2404 = vmatpush1.bf16.msra.mxu1 %v3261_v24  ;;  %2364 = vmatprep.subr.bf16.mxu0 %v3262_v25  ;;  %v3329_v10 = vld [vmem:[%s4216_s22 + $0x300] ss:$8 sps:$4 sm:$0xff]   ;;  %v3334_v11 = vld [vmem:[%s4216_s22 + $0x214] ss:$8 sps:$4 sm:$0xff]   ;;  %v3332_v13 = vld [vmem:[%s4216_s22 + $0x210] ss:$8 sps:$4 sm:$0xff]  }
  0xbc   : > { %2405 = vmatprep.subr.bf16.mxu1 %v3264_v26  ;;  %v3337_v12 = vld [vmem:[%s4216_s22 + $0x314] ss:$8 sps:$4 sm:$0xff]   ;;  %v3335_v14 = vld [vmem:[%s4216_s22 + $0x310] ss:$8 sps:$4 sm:$0xff]   ;;  %v3340_v15 = vld [vmem:[%s4216_s22 + $0x224] ss:$8 sps:$4 sm:$0xff]  }
  0xbd   : > { %v3343_v16 = vld [vmem:[%s4216_s22 + $0x324] ss:$8 sps:$4 sm:$0xff]   ;;  %v3338_v17 = vld [vmem:[%s4216_s22 + $0x220] ss:$8 sps:$4 sm:$0xff]   ;;  %v3346_v19 = vld [vmem:[%s4216_s22 + $0x234] ss:$8 sps:$4 sm:$0xff]  }
  0xbe   : > { %2365 = vmatpush1.bf16.msra.mxu0 %v3266_v27  ;;  %v3341_v18 = vld [vmem:[%s4216_s22 + $0x320] ss:$8 sps:$4 sm:$0xff]   ;;  %v3349_v20 = vld [vmem:[%s4216_s22 + $0x334] ss:$8 sps:$4 sm:$0xff]   ;;  %v3344_v21 = vld [vmem:[%s4216_s22 + $0x230] ss:$8 sps:$4 sm:$0xff]  }
  0xbf   : > { %2406 = vmatpush1.bf16.msra.mxu1 %v3267_v28  ;;  %2366 = vmatprep.subr.bf16.mxu0 %v3268_v29  ;;  %v3347_v22 = vld [vmem:[%s4216_s22 + $0x330] ss:$8 sps:$4 sm:$0xff]   ;;  %v3352_v23 = vld [vmem:[%s4216_s22 + $0x244] ss:$8 sps:$4 sm:$0xff]   ;;  %v3350_v25 = vld [vmem:[%s4216_s22 + $0x240] ss:$8 sps:$4 sm:$0xff]  }
  0xc0   : > { %2407 = vmatprep.subr.bf16.mxu1 %v3270_v30  ;;  %v3355_v24 = vld [vmem:[%s4216_s22 + $0x344] ss:$8 sps:$4 sm:$0xff]   ;;  %v3353_v26 = vld [vmem:[%s4216_s22 + $0x340] ss:$8 sps:$4 sm:$0xff]   ;;  %v3358_v27 = vld [vmem:[%s4216_s22 + $0x254] ss:$8 sps:$4 sm:$0xff]  }
  0xc1   : > { %v3361_v28 = vld [vmem:[%s4216_s22 + $0x354] ss:$8 sps:$4 sm:$0xff]   ;;  %v3356_v29 = vld [vmem:[%s4216_s22 + $0x250] ss:$8 sps:$4 sm:$0xff]   ;;  %v3391_v52 = vld [vmem:[%s4216_s22 + $0x3a4] ss:$8 sps:$4 sm:$0xff]  }
  0xc2   : > { %2367 = vmatpush1.bf16.msra.mxu0 %v3272_v31  ;;  %v3359_v30 = vld [vmem:[%s4216_s22 + $0x350] ss:$8 sps:$4 sm:$0xff]   ;;  %v3364_v31 = vld [vmem:[%s4216_s22 + $0x264] ss:$8 sps:$4 sm:$0xff]   ;;  %v3382_v47 = vld [vmem:[%s4216_s22 + $0x294] ss:$8 sps:$4 sm:$0xff]  }
  0xc3   : > { %2408 = vmatpush1.bf16.msra.mxu1 %v3273_v32  ;;  %2368 = vmatprep.subr.bf16.mxu0 %v3274_v33  ;;  %v3367_v32 = vld [vmem:[%s4216_s22 + $0x364] ss:$8 sps:$4 sm:$0xff]   ;;  %v3385_v48 = vld [vmem:[%s4216_s22 + $0x394] ss:$8 sps:$4 sm:$0xff]   ;;  %v3380_v49 = vld [vmem:[%s4216_s22 + $0x290] ss:$8 sps:$4 sm:$0xff]  }
  0xc4   : > { %2409 = vmatprep.subr.bf16.mxu1 %v3276_v34  ;;  %v4316_v33 = vld [vmem:[%s4204_s9 + $0x10] sm:$0xff]  ;;  %v4319_v34 = vld [vmem:[%s4204_s9 + $0x18] sm:$0xff] }
  0xc6   : > { %2369 = vmatpush1.bf16.msra.mxu0 %v3278_v35  ;;  %v3362_v35 = vld [vmem:[%s4216_s22 + $0x260] ss:$8 sps:$4 sm:$0xff]  }
  0xc7   : > { %2410 = vmatpush1.bf16.msra.mxu1 %v3279_v36  ;;  %2370 = vmatprep.subr.bf16.mxu0 %v3280_v37  ;;  %v3365_v36 = vld [vmem:[%s4216_s22 + $0x360] ss:$8 sps:$4 sm:$0xff]   ;;  %v2920_v37 = vcombine.high %v4316_v33, %v4316_v33 }
  0xc8   : > { %2411 = vmatprep.subr.bf16.mxu1 %v3282_v38  ;;  %v2922_v38 = vcombine.high %v4319_v34, %v4319_v34 }
  0xca   : > { %2371 = vmatpush1.bf16.msra.mxu0 %v3284_v39  ;;  %v3370_v39 = vld [vmem:[%s4216_s22 + $0x274] ss:$8 sps:$4 sm:$0xff]  }
  0xcb   : > { %2412 = vmatpush1.bf16.msra.mxu1 %v3285_v40  ;;  %2372 = vmatprep.subr.bf16.mxu0 %v3286_v41  ;;  %v3373_v40 = vld [vmem:[%s4216_s22 + $0x374] ss:$8 sps:$4 sm:$0xff]   ;;  %v3368_v41 = vld [vmem:[%s4216_s22 + $0x270] ss:$8 sps:$4 sm:$0xff]  }
  0xcc   : > { %2413 = vmatprep.subr.bf16.mxu1 %v3288_v42  ;;  %v3371_v42 = vld [vmem:[%s4216_s22 + $0x370] ss:$8 sps:$4 sm:$0xff]  }
  0xce   : > { %2373 = vmatpush1.bf16.msra.mxu0 %v3290_v43  ;;  %v3376_v43 = vld [vmem:[%s4216_s22 + $0x284] ss:$8 sps:$4 sm:$0xff]  }
  0xcf   : > { %2414 = vmatpush1.bf16.msra.mxu1 %v3291_v44  ;;  %2374 = vmatprep.subr.bf16.mxu0 %v3292_v45  ;;  %v3379_v44 = vld [vmem:[%s4216_s22 + $0x384] ss:$8 sps:$4 sm:$0xff]   ;;  %v3374_v45 = vld [vmem:[%s4216_s22 + $0x280] ss:$8 sps:$4 sm:$0xff]  }
  0xd0   : > { %2415 = vmatprep.subr.bf16.mxu1 %v3294_v46  ;;  %v3377_v46 = vld [vmem:[%s4216_s22 + $0x380] ss:$8 sps:$4 sm:$0xff]  }
  0xd2   : > { %2375 = vmatpush1.bf16.msra.mxu0 %v3296_v50  ;;  %v3383_v50 = vld [vmem:[%s4216_s22 + $0x390] ss:$8 sps:$4 sm:$0xff]  }
  0xd3   : > { %2416 = vmatpush1.bf16.msra.mxu1 %v3297_v51  ;;  %2376 = vmatprep.subr.bf16.mxu0 %v3298_v53  ;;  %v3388_v51 = vld [vmem:[%s4216_s22 + $0x2a4] ss:$8 sps:$4 sm:$0xff]   ;;  %v3386_v53 = vld [vmem:[%s4216_s22 + $0x2a0] ss:$8 sps:$4 sm:$0xff]  }
  0xd4   : > { %2417 = vmatprep.subr.bf16.mxu1 %v3300_v54  ;;  %v3389_v54 = vld [vmem:[%s4216_s22 + $0x3a0] ss:$8 sps:$4 sm:$0xff]  }
  0xd6   : > { %2377 = vmatpush1.bf16.msra.mxu0 %v3302_v55  ;;  %v3394_v55 = vld [vmem:[%s4216_s22 + $0x2b4] ss:$8 sps:$4 sm:$0xff]  }
  0xd7   : > { %2418 = vmatpush1.bf16.msra.mxu1 %v3303_v56  ;;  %2378 = vmatprep.subr.bf16.mxu0 %v3304_v57  ;;  %v3397_v56 = vld [vmem:[%s4216_s22 + $0x3b4] ss:$8 sps:$4 sm:$0xff]   ;;  %v3392_v57 = vld [vmem:[%s4216_s22 + $0x2b0] ss:$8 sps:$4 sm:$0xff]  }
  0xd8   : > { %2419 = vmatprep.subr.bf16.mxu1 %v3306_v58  ;;  %v3395_v58 = vld [vmem:[%s4216_s22 + $0x3b0] ss:$8 sps:$4 sm:$0xff]  }
  0xda   : > { %2379 = vmatpush1.bf16.msra.mxu0 %v3308_v59  ;;  %v3400_v59 = vld [vmem:[%s4216_s22 + $0x2c4] ss:$8 sps:$4 sm:$0xff]  }
  0xdb   : > { %2420 = vmatpush1.bf16.msra.mxu1 %v3309_v60  ;;  %2380 = vmatprep.subr.bf16.mxu0 %v3310_v61  ;;  %v3403_v60 = vld [vmem:[%s4216_s22 + $0x3c4] ss:$8 sps:$4 sm:$0xff]   ;;  %v3398_v61 = vld [vmem:[%s4216_s22 + $0x2c0] ss:$8 sps:$4 sm:$0xff]  }
  0xdc   : > { %2421 = vmatprep.subr.bf16.mxu1 %v3312_v62  ;;  %v3401_v62 = vld [vmem:[%s4216_s22 + $0x3c0] ss:$8 sps:$4 sm:$0xff]  }
  0xde   : > { %2381 = vmatpush1.bf16.msra.mxu0 %v3314_v63  ;;  %v3406_v63 = vld [vmem:[%s4216_s22 + $0x2d4] ss:$8 sps:$4 sm:$0xff]  }
  0xdf   : > { %2422 = vmatpush1.bf16.msra.mxu1 %v3315_v0  ;;  %2382 = vmatprep.subr.bf16.mxu0 %v3316_v1  ;;  %v3409_v0 = vld [vmem:[%s4216_s22 + $0x3d4] ss:$8 sps:$4 sm:$0xff]   ;;  %v3404_v1 = vld [vmem:[%s4216_s22 + $0x2d0] ss:$8 sps:$4 sm:$0xff]  }
  0xe0   : > { %2423 = vmatprep.subr.bf16.mxu1 %v3318_v2  ;;  %v3407_v2 = vld [vmem:[%s4216_s22 + $0x3d0] ss:$8 sps:$4 sm:$0xff]  }
  0xe2   : > { %2383 = vmatpush1.bf16.msra.mxu0 %v3320_v3  ;;  %v3412_v3 = vld [vmem:[%s4216_s22 + $0x2e4] ss:$8 sps:$4 sm:$0xff]  }
  0xe3   : > { %2424 = vmatpush1.bf16.msra.mxu1 %v3321_v4  ;;  %2434 = vmatprep.subr.bf16.mxu0 %v3328_v5  ;;  %v3415_v4 = vld [vmem:[%s4216_s22 + $0x3e4] ss:$8 sps:$4 sm:$0xff]   ;;  %v3410_v5 = vld [vmem:[%s4216_s22 + $0x2e0] ss:$8 sps:$4 sm:$0xff]  }
  0xe4   : > { %2475 = vmatprep.subr.bf16.mxu1 %v3331_v6  ;;  %v3413_v6 = vld [vmem:[%s4216_s22 + $0x3e0] ss:$8 sps:$4 sm:$0xff]  }
  0xe5   : > { %2385 = vmatmul.mubr.bf16.vlgmr.msra.gmra.mrb[0].mxu0 %v2915_v7  ;;  %v3418_v7 = vld [vmem:[%s4216_s22 + $0x2f4] ss:$8 sps:$4 sm:$0xff]  }
  0xe6   : > { %2426 = vmatmul.mubr.bf16.vlgmr.msra.gmra.mrb[0].mxu1 %v2917_v8  ;;  %2435 = vmatpush1.bf16.msra.mxu0 %v3326_v9  ;;  %v3421_v8 = vld [vmem:[%s4216_s22 + $0x3f4] ss:$8 sps:$4 sm:$0xff]   ;;  %v3416_v9 = vld [vmem:[%s4216_s22 + $0x2f0] ss:$8 sps:$4 sm:$0xff]  }
  0xe7   : > { %2476 = vmatpush1.bf16.msra.mxu1 %v3329_v10  ;;  %2436 = vmatprep.subr.bf16.mxu0 %v3334_v11  ;;  %v3419_v10 = vld [vmem:[%s4216_s22 + $0x3f0] ss:$8 sps:$4 sm:$0xff]   ;;  %v3428_v11 = vld [vmem:[%s4216_s22 + $0x404] ss:$8 sps:$4 sm:$0xff]  }
  0xe8   : > { %2477 = vmatprep.subr.bf16.mxu1 %v3337_v12  ;;  %2466 = vmatprep.mubr.bf16.mxu0 %v2920_v37  ;;  %v3431_v12 = vld [vmem:[%s4216_s22 + $0x504] ss:$8 sps:$4 sm:$0xff]   ;;  %v3458_v37 = vld [vmem:[%s4216_s22 + $0x454] ss:$8 sps:$4 sm:$0xff]  }
  0xe9   : > { %2507 = vmatprep.mubr.bf16.mxu1 %v2922_v38  ;;  %v3461_v38 = vld [vmem:[%s4216_s22 + $0x554] ss:$8 sps:$4 sm:$0xff]  }
  0xea   : > { %2437 = vmatpush1.bf16.msra.mxu0 %v3332_v13  ;;  %v2919_v13 = vcombine.low %v4316_v33, %v4316_v33  ;;  %v3452_v33 = vld [vmem:[%s4216_s22 + $0x444] ss:$8 sps:$4 sm:$0xff]  }
  0xeb   : > { %2478 = vmatpush1.bf16.msra.mxu1 %v3335_v14  ;;  %2438 = vmatprep.subr.bf16.mxu0 %v3340_v15  ;;  %v2921_v14 = vcombine.low %v4319_v34, %v4319_v34  ;;  %v3426_v15 = vld [vmem:[%s4216_s22 + $0x400] ss:$8 sps:$4 sm:$0xff]   ;;  %v3455_v34 = vld [vmem:[%s4216_s22 + $0x544] ss:$8 sps:$4 sm:$0xff]  }
  0xec   : > { %2479 = vmatprep.subr.bf16.mxu1 %v3343_v16  ;;  %v3429_v16 = vld [vmem:[%s4216_s22 + $0x500] ss:$8 sps:$4 sm:$0xff]  }
  0xee   : > { %2439 = vmatpush1.bf16.msra.mxu0 %v3338_v17  ;;  %v3434_v17 = vld [vmem:[%s4216_s22 + $0x414] ss:$8 sps:$4 sm:$0xff]  }
  0xef   : > { %2480 = vmatpush1.bf16.msra.mxu1 %v3341_v18  ;;  %2440 = vmatprep.subr.bf16.mxu0 %v3346_v19  ;;  %v3437_v18 = vld [vmem:[%s4216_s22 + $0x514] ss:$8 sps:$4 sm:$0xff]  }
  0xf0   : > { %2481 = vmatprep.subr.bf16.mxu1 %v3349_v20  ;;  %v4374_v19 = vld [vmem:[%s4204_s9 + $0x20] sm:$0xff]  ;;  %v4377_v20 = vld [vmem:[%s4204_s9 + $0x28] sm:$0xff] }
  0xf2   : > { %2441 = vmatpush1.bf16.msra.mxu0 %v3344_v21  ;;  %v2924_v21 = vcombine.high %v4374_v19, %v4374_v19 }
  0xf3   : > { %2482 = vmatpush1.bf16.msra.mxu1 %v3347_v22  ;;  %2442 = vmatprep.subr.bf16.mxu0 %v3352_v23  ;;  %v2926_v22 = vcombine.high %v4377_v20, %v4377_v20  ;;  %v3432_v23 = vld [vmem:[%s4216_s22 + $0x410] ss:$8 sps:$4 sm:$0xff]  }
  0xf4   : > { %2483 = vmatprep.subr.bf16.mxu1 %v3355_v24  ;;  %v3435_v24 = vld [vmem:[%s4216_s22 + $0x510] ss:$8 sps:$4 sm:$0xff]  }
  0xf6   : > { %2443 = vmatpush1.bf16.msra.mxu0 %v3350_v25  ;;  %v3440_v25 = vld [vmem:[%s4216_s22 + $0x424] ss:$8 sps:$4 sm:$0xff]  }
  0xf7   : > { %2484 = vmatpush1.bf16.msra.mxu1 %v3353_v26  ;;  %2444 = vmatprep.subr.bf16.mxu0 %v3358_v27  ;;  %v3443_v26 = vld [vmem:[%s4216_s22 + $0x524] ss:$8 sps:$4 sm:$0xff]   ;;  %v3438_v27 = vld [vmem:[%s4216_s22 + $0x420] ss:$8 sps:$4 sm:$0xff]  }
  0xf8   : > { %2485 = vmatprep.subr.bf16.mxu1 %v3361_v28  ;;  %v3441_v28 = vld [vmem:[%s4216_s22 + $0x520] ss:$8 sps:$4 sm:$0xff]  }
  0xfa   : > { %2445 = vmatpush1.bf16.msra.mxu0 %v3356_v29  ;;  %v3446_v29 = vld [vmem:[%s4216_s22 + $0x434] ss:$8 sps:$4 sm:$0xff]  }
  0xfb   : > { %2486 = vmatpush1.bf16.msra.mxu1 %v3359_v30  ;;  %2446 = vmatprep.subr.bf16.mxu0 %v3364_v31  ;;  %v3449_v30 = vld [vmem:[%s4216_s22 + $0x534] ss:$8 sps:$4 sm:$0xff]   ;;  %v3444_v31 = vld [vmem:[%s4216_s22 + $0x430] ss:$8 sps:$4 sm:$0xff]  }
  0xfc   : > { %2487 = vmatprep.subr.bf16.mxu1 %v3367_v32  ;;  %v3447_v32 = vld [vmem:[%s4216_s22 + $0x530] ss:$8 sps:$4 sm:$0xff]  }
  0xfe   : > { %2447 = vmatpush1.bf16.msra.mxu0 %v3362_v35  ;;  %v3450_v35 = vld [vmem:[%s4216_s22 + $0x440] ss:$8 sps:$4 sm:$0xff]  }
  0xff   : > { %2488 = vmatpush1.bf16.msra.mxu1 %v3365_v36  ;;  %2448 = vmatprep.subr.bf16.mxu0 %v3370_v39  ;;  %v3453_v36 = vld [vmem:[%s4216_s22 + $0x540] ss:$8 sps:$4 sm:$0xff]   ;;  %v3456_v39 = vld [vmem:[%s4216_s22 + $0x450] ss:$8 sps:$4 sm:$0xff]  }
 0x100   : > { %2489 = vmatprep.subr.bf16.mxu1 %v3373_v40  ;;  %v3459_v40 = vld [vmem:[%s4216_s22 + $0x550] ss:$8 sps:$4 sm:$0xff]  }
 0x102   : > { %2449 = vmatpush1.bf16.msra.mxu0 %v3368_v41  ;;  %v3464_v41 = vld [vmem:[%s4216_s22 + $0x464] ss:$8 sps:$4 sm:$0xff]  }
 0x103   : > { %2490 = vmatpush1.bf16.msra.mxu1 %v3371_v42  ;;  %2450 = vmatprep.subr.bf16.mxu0 %v3376_v43  ;;  %v3467_v42 = vld [vmem:[%s4216_s22 + $0x564] ss:$8 sps:$4 sm:$0xff]   ;;  %v3462_v43 = vld [vmem:[%s4216_s22 + $0x460] ss:$8 sps:$4 sm:$0xff]  }
 0x104   : > { %2491 = vmatprep.subr.bf16.mxu1 %v3379_v44  ;;  %v3465_v44 = vld [vmem:[%s4216_s22 + $0x560] ss:$8 sps:$4 sm:$0xff]  }
 0x106   : > { %2451 = vmatpush1.bf16.msra.mxu0 %v3374_v45  ;;  %v3470_v45 = vld [vmem:[%s4216_s22 + $0x474] ss:$8 sps:$4 sm:$0xff]  }
 0x107   : > { %2492 = vmatpush1.bf16.msra.mxu1 %v3377_v46  ;;  %2452 = vmatprep.subr.bf16.mxu0 %v3382_v47  ;;  %v3473_v46 = vld [vmem:[%s4216_s22 + $0x574] ss:$8 sps:$4 sm:$0xff]   ;;  %v3468_v47 = vld [vmem:[%s4216_s22 + $0x470] ss:$8 sps:$4 sm:$0xff]  }
 0x108   : > { %2493 = vmatprep.subr.bf16.mxu1 %v3385_v48  ;;  %v3471_v48 = vld [vmem:[%s4216_s22 + $0x570] ss:$8 sps:$4 sm:$0xff]  }
 0x10a   : > { %2453 = vmatpush1.bf16.msra.mxu0 %v3380_v49  ;;  %v3476_v49 = vld [vmem:[%s4216_s22 + $0x484] ss:$8 sps:$4 sm:$0xff]  }
 0x10b   : > { %2494 = vmatpush1.bf16.msra.mxu1 %v3383_v50  ;;  %2454 = vmatprep.subr.bf16.mxu0 %v3388_v51  ;;  %v3479_v50 = vld [vmem:[%s4216_s22 + $0x584] ss:$8 sps:$4 sm:$0xff]   ;;  %v3474_v51 = vld [vmem:[%s4216_s22 + $0x480] ss:$8 sps:$4 sm:$0xff]  }
 0x10c   : > { %2495 = vmatprep.subr.bf16.mxu1 %v3391_v52  ;;  %v3477_v52 = vld [vmem:[%s4216_s22 + $0x580] ss:$8 sps:$4 sm:$0xff]  }
 0x10e   : > { %2455 = vmatpush1.bf16.msra.mxu0 %v3386_v53  ;;  %v3482_v53 = vld [vmem:[%s4216_s22 + $0x494] ss:$8 sps:$4 sm:$0xff]  }
 0x10f   : > { %2496 = vmatpush1.bf16.msra.mxu1 %v3389_v54  ;;  %2456 = vmatprep.subr.bf16.mxu0 %v3394_v55  ;;  %v3485_v54 = vld [vmem:[%s4216_s22 + $0x594] ss:$8 sps:$4 sm:$0xff]   ;;  %v3480_v55 = vld [vmem:[%s4216_s22 + $0x490] ss:$8 sps:$4 sm:$0xff]  }
 0x110   : > { %2497 = vmatprep.subr.bf16.mxu1 %v3397_v56  ;;  %v3483_v56 = vld [vmem:[%s4216_s22 + $0x590] ss:$8 sps:$4 sm:$0xff]  }
 0x112   : > { %2457 = vmatpush1.bf16.msra.mxu0 %v3392_v57  ;;  %v3488_v57 = vld [vmem:[%s4216_s22 + $0x4a4] ss:$8 sps:$4 sm:$0xff]  }
 0x113   : > { %2498 = vmatpush1.bf16.msra.mxu1 %v3395_v58  ;;  %2458 = vmatprep.subr.bf16.mxu0 %v3400_v59  ;;  %v3491_v58 = vld [vmem:[%s4216_s22 + $0x5a4] ss:$8 sps:$4 sm:$0xff]   ;;  %v3486_v59 = vld [vmem:[%s4216_s22 + $0x4a0] ss:$8 sps:$4 sm:$0xff]  }
 0x114   : > { %2499 = vmatprep.subr.bf16.mxu1 %v3403_v60  ;;  %v3489_v60 = vld [vmem:[%s4216_s22 + $0x5a0] ss:$8 sps:$4 sm:$0xff]  }
 0x116   : > { %2459 = vmatpush1.bf16.msra.mxu0 %v3398_v61  ;;  %v3494_v61 = vld [vmem:[%s4216_s22 + $0x4b4] ss:$8 sps:$4 sm:$0xff]  }
 0x117   : > { %2500 = vmatpush1.bf16.msra.mxu1 %v3401_v62  ;;  %2460 = vmatprep.subr.bf16.mxu0 %v3406_v63  ;;  %v3497_v62 = vld [vmem:[%s4216_s22 + $0x5b4] ss:$8 sps:$4 sm:$0xff]   ;;  %v3492_v63 = vld [vmem:[%s4216_s22 + $0x4b0] ss:$8 sps:$4 sm:$0xff]  }
 0x118   : > { %2501 = vmatprep.subr.bf16.mxu1 %v3409_v0  ;;  %v3495_v0 = vld [vmem:[%s4216_s22 + $0x5b0] ss:$8 sps:$4 sm:$0xff]  }
 0x11a   : > { %2461 = vmatpush1.bf16.msra.mxu0 %v3404_v1  ;;  %v3500_v1 = vld [vmem:[%s4216_s22 + $0x4c4] ss:$8 sps:$4 sm:$0xff]  }
 0x11b   : > { %2502 = vmatpush1.bf16.msra.mxu1 %v3407_v2  ;;  %2462 = vmatprep.subr.bf16.mxu0 %v3412_v3  ;;  %v3503_v2 = vld [vmem:[%s4216_s22 + $0x5c4] ss:$8 sps:$4 sm:$0xff]   ;;  %v3498_v3 = vld [vmem:[%s4216_s22 + $0x4c0] ss:$8 sps:$4 sm:$0xff]  }
 0x11c   : > { %2503 = vmatprep.subr.bf16.mxu1 %v3415_v4  ;;  %v3501_v4 = vld [vmem:[%s4216_s22 + $0x5c0] ss:$8 sps:$4 sm:$0xff]  }
 0x11e   : > { %2463 = vmatpush1.bf16.msra.mxu0 %v3410_v5  ;;  %v3506_v5 = vld [vmem:[%s4216_s22 + $0x4d4] ss:$8 sps:$4 sm:$0xff]  }
 0x11f   : > { %2504 = vmatpush1.bf16.msra.mxu1 %v3413_v6  ;;  %2464 = vmatprep.subr.bf16.mxu0 %v3418_v7  ;;  %v3509_v6 = vld [vmem:[%s4216_s22 + $0x5d4] ss:$8 sps:$4 sm:$0xff]   ;;  %v3504_v7 = vld [vmem:[%s4216_s22 + $0x4d0] ss:$8 sps:$4 sm:$0xff]  }
 0x120   : > { %2505 = vmatprep.subr.bf16.mxu1 %v3421_v8  ;;  %v3507_v8 = vld [vmem:[%s4216_s22 + $0x5d0] ss:$8 sps:$4 sm:$0xff]  }
 0x122   : > { %2465 = vmatpush1.bf16.msra.mxu0 %v3416_v9  ;;  %v3512_v9 = vld [vmem:[%s4216_s22 + $0x4e4] ss:$8 sps:$4 sm:$0xff]  }
 0x123   : > { %2506 = vmatpush1.bf16.msra.mxu1 %v3419_v10  ;;  %2516 = vmatprep.subr.bf16.mxu0 %v3428_v11  ;;  %v3515_v10 = vld [vmem:[%s4216_s22 + $0x5e4] ss:$8 sps:$4 sm:$0xff]   ;;  %v3510_v11 = vld [vmem:[%s4216_s22 + $0x4e0] ss:$8 sps:$4 sm:$0xff]  }
 0x124   : > { %2557 = vmatprep.subr.bf16.mxu1 %v3431_v12  ;;  %v3513_v12 = vld [vmem:[%s4216_s22 + $0x5e0] ss:$8 sps:$4 sm:$0xff]  }
 0x125   : > { %2467 = vmatmul.mubr.bf16.vlgmr.msra.gmra.mrb[4].mxu0 %v2919_v13  ;;  %v3518_v13 = vld [vmem:[%s4216_s22 + $0x4f4] ss:$8 sps:$4 sm:$0xff]  }
 0x126   : > { %2508 = vmatmul.mubr.bf16.vlgmr.msra.gmra.mrb[4].mxu1 %v2921_v14  ;;  %2517 = vmatpush1.bf16.msra.mxu0 %v3426_v15  ;;  %v3521_v14 = vld [vmem:[%s4216_s22 + $0x5f4] ss:$8 sps:$4 sm:$0xff]   ;;  %v3516_v15 = vld [vmem:[%s4216_s22 + $0x4f0] ss:$8 sps:$4 sm:$0xff]  }
 0x127   : > { %2558 = vmatpush1.bf16.msra.mxu1 %v3429_v16  ;;  %2518 = vmatprep.subr.bf16.mxu0 %v3434_v17  ;;  %v3519_v16 = vld [vmem:[%s4216_s22 + $0x5f0] ss:$8 sps:$4 sm:$0xff]   ;;  %v2923_v17 = vcombine.low %v4374_v19, %v4374_v19 }
 0x128   : > { %2559 = vmatprep.subr.bf16.mxu1 %v3437_v18  ;;  %2548 = vmatprep.mubr.bf16.mxu0 %v2924_v21  ;;  %v2925_v18 = vcombine.low %v4377_v20, %v4377_v20 }
 0x129   : > { %2589 = vmatprep.mubr.bf16.mxu1 %v2926_v22 }
 0x12a   : > { %2519 = vmatpush1.bf16.msra.mxu0 %v3432_v23 }
 0x12b   : > { %2560 = vmatpush1.bf16.msra.mxu1 %v3435_v24  ;;  %2520 = vmatprep.subr.bf16.mxu0 %v3440_v25 }
 0x12c   : > { %2561 = vmatprep.subr.bf16.mxu1 %v3443_v26 }
 0x12e   : > { %2521 = vmatpush1.bf16.msra.mxu0 %v3438_v27 }
 0x12f   : > { %2562 = vmatpush1.bf16.msra.mxu1 %v3441_v28  ;;  %2522 = vmatprep.subr.bf16.mxu0 %v3446_v29 }
 0x130   : > { %2563 = vmatprep.subr.bf16.mxu1 %v3449_v30 }
 0x132   : > { %2523 = vmatpush1.bf16.msra.mxu0 %v3444_v31 }
 0x133   : > { %2564 = vmatpush1.bf16.msra.mxu1 %v3447_v32  ;;  %2524 = vmatprep.subr.bf16.mxu0 %v3452_v33 }
 0x134   : > { %2565 = vmatprep.subr.bf16.mxu1 %v3455_v34 }
 0x136   : > { %2525 = vmatpush1.bf16.msra.mxu0 %v3450_v35 }
 0x137   : > { %2566 = vmatpush1.bf16.msra.mxu1 %v3453_v36  ;;  %2526 = vmatprep.subr.bf16.mxu0 %v3458_v37 }
 0x138   : > { %2567 = vmatprep.subr.bf16.mxu1 %v3461_v38 }
 0x13a   : > { %2527 = vmatpush1.bf16.msra.mxu0 %v3456_v39 }
 0x13b   : > { %2568 = vmatpush1.bf16.msra.mxu1 %v3459_v40  ;;  %2528 = vmatprep.subr.bf16.mxu0 %v3464_v41 }
 0x13c   : > { %2569 = vmatprep.subr.bf16.mxu1 %v3467_v42 }
 0x13e   : > { %2529 = vmatpush1.bf16.msra.mxu0 %v3462_v43 }
 0x13f   : > { %2570 = vmatpush1.bf16.msra.mxu1 %v3465_v44  ;;  %2530 = vmatprep.subr.bf16.mxu0 %v3470_v45 }
 0x140   : > { %2571 = vmatprep.subr.bf16.mxu1 %v3473_v46  ;;  %v1150_v46 = vld [vmem:[#allocation2] sm:$0xff] }
 0x142   : > { %2531 = vmatpush1.bf16.msra.mxu0 %v3468_v47 }
 0x143   : > { %2572 = vmatpush1.bf16.msra.mxu1 %v3471_v48  ;;  %2532 = vmatprep.subr.bf16.mxu0 %v3476_v49 }
 0x144   : > { %2573 = vmatprep.subr.bf16.mxu1 %v3479_v50 }
 0x146   : > { %2533 = vmatpush1.bf16.msra.mxu0 %v3474_v51  ;;  %v1151_v51 = vld [vmem:[#allocation2 + $0x8] sm:$0xff] }
 0x147   : > { %2574 = vmatpush1.bf16.msra.mxu1 %v3477_v52  ;;  %2534 = vmatprep.subr.bf16.mxu0 %v3482_v53 }
 0x148   : > { %2575 = vmatprep.subr.bf16.mxu1 %v3485_v54 }
 0x14a   : > { %2535 = vmatpush1.bf16.msra.mxu0 %v3480_v55 }
 0x14b   : > { %2576 = vmatpush1.bf16.msra.mxu1 %v3483_v56  ;;  %2536 = vmatprep.subr.bf16.mxu0 %v3488_v57  ;;  %v2610_v57 = vlaneseq (!%p3119_p6) }
 0x14c   : > { %2577 = vmatprep.subr.bf16.mxu1 %v3491_v58 }
 0x14d   : > { %v2611_v58 = vshrl.u32 (!%p3119_p6), %v2610_v57, 7 }
 0x14e   : > { %2537 = vmatpush1.bf16.msra.mxu0 %v3486_v59  ;;  %v2608_v59 = vld [vmem:[%s1129_s6] sm:$0x3] (!%p3119_p6) }
 0x14f   : > { %2578 = vmatpush1.bf16.msra.mxu1 %v3489_v60  ;;  %2538 = vmatprep.subr.bf16.mxu0 %v3494_v61  ;;  %v2612_v60 = vsub.s32 (!%p3119_p6), 0, %v2611_v58  ;;  %v2616_v61 = vsub.s32 (!%p3119_p6), 1, %v2611_v58 }
 0x150   : > { %2579 = vmatprep.subr.bf16.mxu1 %v3497_v62 }
 0x152   : > { %2539 = vmatpush1.bf16.msra.mxu0 %v3492_v63 }
 0x153   : > { %2580 = vmatpush1.bf16.msra.mxu1 %v3495_v0  ;;  %2540 = vmatprep.subr.bf16.mxu0 %v3500_v1  ;;  %v2613_v0 = vrot.slane (!%p3119_p6), %v2608_v59, %v2612_v60  ;;  %v2617_v1 = vrot.slane (!%p3119_p6), %v2608_v59, %v2616_v61 }
 0x154   : > { %2581 = vmatprep.subr.bf16.mxu1 %v3503_v2 }
 0x156   : > { %2541 = vmatpush1.bf16.msra.mxu0 %v3498_v3 }
 0x157   : > { %2582 = vmatpush1.bf16.msra.mxu1 %v3501_v4  ;;  %2542 = vmatprep.subr.bf16.mxu0 %v3506_v5 }
 0x158   : > { %2583 = vmatprep.subr.bf16.mxu1 %v3509_v6 }
 0x15a   : > { %2543 = vmatpush1.bf16.msra.mxu0 %v3504_v7 }
 0x15b   : > { %2584 = vmatpush1.bf16.msra.mxu1 %v3507_v8  ;;  %2544 = vmatprep.subr.bf16.mxu0 %v3512_v9 }
 0x15c   : > { %2585 = vmatprep.subr.bf16.mxu1 %v3515_v10 }
 0x15e   : > { %2545 = vmatpush1.bf16.msra.mxu0 %v3510_v11 }
 0x15f   : > { %2586 = vmatpush1.bf16.msra.mxu1 %v3513_v12  ;;  %2546 = vmatprep.subr.bf16.mxu0 %v3518_v13 }
 0x160   : > { %2587 = vmatprep.subr.bf16.mxu1 %v3521_v14 }
 0x162   : > { %2547 = vmatpush1.bf16.msra.mxu0 %v3516_v15 }
 0x163   : > { %2588 = vmatpush1.bf16.msra.mxu1 %v3519_v16 }
 0x165   : > { %2549 = vmatmul.mubr.bf16.vlgmr.msra.gmra.mrb[8].mxu0 %v2923_v17 }
 0x166   : > { %2590 = vmatmul.mubr.bf16.vlgmr.msra.gmra.mrb[8].mxu1 %v2925_v18 }
 0x1b8   : > { %v2386_v21 = vpop.f32.mrb[0].mxu0 }
 0x1b9   : > { %v2427_v22 = vpop.f32.mrb[0].mxu1  ;;  %v2388_v24 = vpop.f32.mrb[1].mxu0 }
 0x1ba   : > { %v2428_v23 = vadd.f32 %v2427_v22, %v2386_v21  ;;  %v2429_v25 = vpop.f32.mrb[1].mxu1  ;;  %v2390_v27 = vpop.f32.mrb[2].mxu0 }
 0x1bb   : > { %v2430_v26 = vadd.f32 %v2429_v25, %v2388_v24  ;;  %v2431_v28 = vpop.f32.mrb[2].mxu1  ;;  %v2391_v29 = vpop.f32.mrb[3].mxu0 }
 0x1bc   : > { %v2432_v30 = vpop.f32.mrb[3].mxu1 }
 0x1f8   : > { %v2468_v31 = vpop.f32.mrb[4].mxu0 }
 0x1f9   : > { %v2509_v32 = vpop.f32.mrb[4].mxu1  ;;  %v2469_v19 = vadd.f32 %v2468_v31, %v2428_v23  ;;  %v2470_v33 = vpop.f32.mrb[5].mxu0 }
 0x1fa   : > { %v2511_v34 = vpop.f32.mrb[5].mxu1  ;;  %v2471_v20 = vadd.f32 %v2470_v33, %v2430_v26  ;;  %v2472_v35 = vpop.f32.mrb[6].mxu0 }
 0x1fb   : > { %v2513_v36 = vpop.f32.mrb[6].mxu1  ;;  %v2510_v37 = vadd.f32 %v2509_v32, %v2469_v19  ;;  %v2473_v38 = vpop.f32.mrb[7].mxu0 }
 0x1fc   : > { %v2514_v39 = vpop.f32.mrb[7].mxu1  ;;  %v2512_v40 = vadd.f32 %v2511_v34, %v2471_v20 }
 0x238   : > { %v2550_v41 = vpop.f32.mrb[8].mxu0 }
 0x239   : > { %v2591_v42 = vpop.f32.mrb[8].mxu1  ;;  %v2551_v43 = vadd.f32 %v2550_v41, %v2510_v37  ;;  %v2552_v44 = vpop.f32.mrb[9].mxu0 }
 0x23a   : > { %v2593_v45 = vpop.f32.mrb[9].mxu1  ;;  %v2553_v47 = vadd.f32 %v2552_v44, %v2512_v40  ;;  %v2554_v48 = vpop.f32.mrb[10].mxu0  ;;  %2605 = sbr.rel (%p3119_p6) target bundleno = 603 (0x25b), region = 78 }
 0x23b   : > { %v2595_v49 = vpop.f32.mrb[10].mxu1  ;;  %v2592_v50 = vadd.f32 %v2591_v42, %v2551_v43  ;;  %v2555_v52 = vpop.f32.mrb[11].mxu0 }
 0x23c   : > { %v2596_v53 = vpop.f32.mrb[11].mxu1  ;;  %v2594_v54 = vadd.f32 %v2593_v45, %v2553_v47 }
 0x23d   : > { %v2598_v55 = vadd.f32 %v2592_v50, %v1150_v46 }
 0x23e   : > { %v2599_v56 = vadd.f32 %v2594_v54, %v1151_v51 }
 0x23f   : > { %2600 = vst [vmem:[#allocation2] sm:$0xff] %v2598_v55 }
 0x240   : > { %2601 = vst [vmem:[#allocation2 + $0x8] sm:$0xff] %v2599_v56 }
 0x246   : > { %v2606_v62 = vld [vmem:[#allocation2] sm:$0xff] }
 0x247   : > { %v2607_v63 = vld [vmem:[#allocation2 + $0x8] sm:$0xff]  ;;  %v2620_v2 = vadd.f32 %v2613_v0, %v2606_v62 }
 0x248   : > { %v2621_v3 = vadd.f32 %v2617_v1, %v2607_v63 }
 0x249   : > { %v2622_v4 = vmax.f32 %v2620_v2, 0.0 }
 0x24a   : > { %v2623_v5 = vmax.f32 %v2621_v3, 0.0 }
 0x24b   : > { %2624 = vst [vmem:[%s4214_s16] sm:$0xff] %v2622_v4  ;;  %v2635_v6 = vrot.slane %v2622_v4, 4  ;;  %v2649_v8 = vmul.f32 %v2622_v4, %v2622_v4 }
 0x24c   : > { %v2641_v7 = vrot.slane %v2623_v5, 4  ;;  %v2650_v9 = vmul.f32 %v2623_v5, %v2623_v5  ;;  %2625 = vst [vmem:[%s4214_s16 + $0x8] sm:$0xff] %v2623_v5 }
 0x24d   : > { %v2636_v10 = vadd.f32 %v2635_v6, %v2622_v4  ;;  %v2651_v12 = vrot.slane %v2649_v8, 4 }
 0x24e   : > { %v2642_v11 = vadd.f32 %v2641_v7, %v2623_v5  ;;  %v2657_v13 = vrot.slane %v2650_v9, 4 }
 0x24f   : > { %v2637_v14 = vrot.slane %v2636_v10, 2  ;;  %v2652_v16 = vadd.f32 %v2651_v12, %v2649_v8 }
 0x250   : > { %v2643_v15 = vrot.slane %v2642_v11, 2  ;;  %v2658_v17 = vadd.f32 %v2657_v13, %v2650_v9 }
 0x251   : > { %v2638_v18 = vadd.f32 %v2637_v14, %v2636_v10  ;;  %v2653_v22 = vrot.slane %v2652_v16, 2 }
 0x252   : > { %v2644_v21 = vadd.f32 %v2643_v15, %v2642_v11  ;;  %v2659_v23 = vrot.slane %v2658_v17, 2 }
 0x253   : > { %v2639_v24 = vrot.slane %v2638_v18, 1  ;;  %v2654_v26 = vadd.f32 %v2653_v22, %v2652_v16 }
 0x254   : > { %v2645_v25 = vrot.slane %v2644_v21, 1  ;;  %v2660_v27 = vadd.f32 %v2659_v23, %v2658_v17 }
 0x255   : > { %v2640_v28 = vadd.f32 %v2639_v24, %v2638_v18  ;;  %v2655_v30 = vrot.slane %v2654_v26, 1 }
 0x256   : > { %v2646_v29 = vadd.f32 %v2645_v25, %v2644_v21  ;;  %v2661_v31 = vrot.slane %v2660_v27, 1 }
 0x257   : > { %2647 = vst [vmem:[%s4218_s15] sm:$0xff] %v2640_v28  ;;  %v2656_v32 = vadd.f32 %v2655_v30, %v2654_v26 }
 0x258   : > { %2648 = vst [vmem:[%s4218_s15 + $0x8] sm:$0xff] %v2646_v29  ;;  %v2662_v19 = vadd.f32 %v2661_v31, %v2660_v27 }
 0x259   : > { %2663 = vst [vmem:[%s4220_s8] sm:$0xff] %v2656_v32 }
 0x25a   : > { %2664 = vst [vmem:[%s4220_s8 + $0x8] sm:$0xff] %v2662_v19 }
 0x25b PF: > { %s3129_s23 = sshll.u32 %s3656_s24, 8  ;;  %s2700_s16 = sshll.u32 %s4218_s15, 4  ;;  %s2701_s16 = int_to_ptr.vmem [resolvable:$true] %s2700_s16 }
 0x25c   : > { %s4463_s30 = scalar_lea.hbm %s4548_s4, %s3129_s23  ;;  %s2675_s28 = scalar_lea.sflag [#allocation5], %s4194_s17 }
 0x25d   : > { %s3526_s29 = scalar_lea.vmem %s2701_s16, 256  ;;  %s3671_s12 = smov [#allocation4]  }
 0x25e   : > { %p3527_p8 = scmp.ne.s32.totalorder %s2701_s16, %s3526_s29  ;;  %s3530_s13 = sshll.u32 %s3671_s12, 4  ;;  %s3531_s13 = int_to_ptr.vmem [resolvable:$false] %s3530_s13 }
 0x25f   : > { %s3532_s10 = scalar_lea.vmem %s3531_s13, 512  ;;  %p3533_p11 = scmp.lt.s32.totalorder %s2701_s16, %s3531_s13 }
 0x260   : > { %p3528_p9 = pnand %p3527_p8, %p3775_p7  ;;  %p3534_p13 = scmp.lt.s32.totalorder %s3532_s10, %s3526_s29 }
 0x262   : > { %p3529_p10 = pneg %p3528_p9  ;;  %p3535_p0 = por %p3534_p13, %p3533_p11 }
 0x264   : > { %p3536_p1 = pnand %p3535_p0, %p3529_p10 }
 0x266   : > { %3539 = shalt.err (!%p3536_p1)
}
 0x267   : > { %s3540_s15 = scalar_lea.hbm %s4463_s30, 256  ;;  %s3544_s21 = scalar_lea.hbm %s4548_s4, 512 }
 0x268   : > { %p3541_p2 = scmp.ne.s32.totalorder %s4463_s30, %s3540_s15  ;;  %p3545_p5 = scmp.lt.u32.totalorder %s4463_s30, %s4548_s4 }
 0x269   : > { %p3546_p6 = scmp.lt.u32.totalorder %s3544_s21, %s3540_s15  ;;  %p3548_p9 = scmp.lt.u32.totalorder %s3540_s15, %s4463_s30 }
 0x26a   : > { %p3542_p3 = pnand %p3541_p2, %p3775_p7 }
 0x26b   : > { %p3547_p8 = por %p3546_p6, %p3545_p5 }
 0x26c   : > { %p3543_p4 = pneg %p3542_p3 }
 0x26d   : > { %p3549_p10 = por %p3548_p9, %p3547_p8 }
 0x26f   : > { %p3550_p11 = pnand %p3549_p10, %p3543_p4 }
 0x271   : > { %3553 = shalt.err (!%p3550_p11)
}
 0x272   : > { %3133 = dma.vmem_to_hbm [thread:$0]  (%p3775_p7), %s2701_s16, 256, %s4463_s30, %s2675_s28  }
 0x273   : > { %s4489_s26 = scalar_lea.hbm %s4549_s5, %s3129_s23  ;;  %s2716_s29 = sshll.u32 %s4220_s8, 4  ;;  %s2717_s29 = int_to_ptr.vmem [resolvable:$true] %s2716_s29 }
 0x274   : > { %s2680_s12 = scalar_lea.sflag [#allocation7], %s4194_s17  ;;  %s3554_s13 = scalar_lea.vmem %s2717_s29, 256 }
 0x275   : > { %p3555_p13 = scmp.ne.s32.totalorder %s2717_s29, %s3554_s13  ;;  %s3672_s10 = smov [#allocation6]  }
 0x276   : > { %s3558_s15 = sshll.u32 %s3672_s10, 4  ;;  %s3559_s15 = int_to_ptr.vmem [resolvable:$false] %s3558_s15 }
 0x277   : > { %p3556_p0 = pnand %p3555_p13, %p3775_p7  ;;  %s3560_s7 = scalar_lea.vmem %s3559_s15, 512 }
 0x278   : > { %p3561_p2 = scmp.lt.s32.totalorder %s2717_s29, %s3559_s15  ;;  %p3562_p3 = scmp.lt.s32.totalorder %s3560_s7, %s3554_s13 }
 0x279   : > { %p3557_p1 = pneg %p3556_p0 }
 0x27a   : > { %p3563_p4 = por %p3562_p3, %p3561_p2 }
 0x27c   : > { %p3564_p5 = pnand %p3563_p4, %p3557_p1 }
 0x27e   : > { %3567 = shalt.err (!%p3564_p5)
}
 0x27f   : > { %s3568_s24 = scalar_lea.hbm %s4489_s26, 256  ;;  %s3572_s23 = scalar_lea.hbm %s4549_s5, 512 }
 0x280   : > { %p3569_p6 = scmp.ne.s32.totalorder %s4489_s26, %s3568_s24  ;;  %p3573_p10 = scmp.lt.u32.totalorder %s4489_s26, %s4549_s5 }
 0x281   : > { %p3574_p11 = scmp.lt.u32.totalorder %s3572_s23, %s3568_s24  ;;  %p3576_p0 = scmp.lt.u32.totalorder %s3568_s24, %s4489_s26 }
 0x282   : > { %p3570_p8 = pnand %p3569_p6, %p3775_p7 }
 0x283   : > { %p3575_p13 = por %p3574_p11, %p3573_p10 }
 0x284   : > { %p3571_p9 = pneg %p3570_p8 }
 0x285   : > { %p3577_p1 = por %p3576_p0, %p3575_p13 }
 0x287   : > { %p3578_p2 = pnand %p3577_p1, %p3571_p9 }
 0x289   : > { %3581 = shalt.err (!%p3578_p2)
}
 0x28a   : > { %3134 = dma.vmem_to_hbm [thread:$0]  (%p3775_p7), %s2717_s29, 256, %s4489_s26, %s2680_s12  }
 0x28b PF: > { %p3144_p3 = scmp.ge.s32.totalorder %s3668_s27, 2  ;;  %s2740_s28 = sand.u32 1, %s3632_s18  }
 0x28c   : > { %s2741_s9 = scalar_lea.sflag [#allocation5], %s2740_s28 }
 0x28d   : > { %p3138_p4 = pnand %p3144_p3, %p3783_p12 }
 0x28f   : > { %3623 = dma.done.wait (!%p3138_p4), %s2741_s9, 256  }
 0x290   : > { %3625 = vsyncadd (!%p3138_p4), %s2741_s9, 4294967040  ;;  %s2750_s21 = scalar_lea.sflag [#allocation7], %s2740_s28 }
 0x291   : > { %3627 = dma.done.wait (!%p3138_p4), %s2750_s21, 256  }
 0x292   : > { %3629 = vsyncadd (!%p3138_p4), %s2750_s21, 4294967040  ;;  %s22_s27 = sadd.s32 1, %s3668_s27   ;;  %s4567_s11 = sld [smem:[#allocation15_spill]] }
 0x293   : > { %p19_p5 = scmp.ge.s32.totalorder %s22_s27, 8   ;;  %s4568_s21 = sld [smem:[#allocation10_spill]] }
 0x294   : > { %s4569_s22 = sld [smem:[#allocation16_spill]]  ;;  %s4570_s23 = sld [smem:[#allocation11_spill]] }
 0x295   : > { %s4571_s24 = sld [smem:[#allocation12_spill]]  ;;  %s4572_s25 = sld [smem:[#allocation13_spill]] }
 0x296   : > { %s4573_s26 = sld [smem:[#allocation14_spill]]  ;;  %s4574_s18 = smov %s3636_s19 }
 0x297   : > { %s4575_s19 = smov %s3640_s20  ;;  %21 = sbr.rel (!%p19_p5) target bundleno = 10 (0xa), region = 153 }
 0x298   : > { %s4576_s20 = smov %s4567_s11 }
 0x29e   :  { %2755 = vsyncpa [#allocation5], 1 }
 0x29f   :  { %2757 = vsyncpa [#allocation5 + $0x1], 1 }
 0x2a0   :  { %2758 = vsyncpa [#allocation7], 1 }
 0x2a1   :  { %2760 = vsyncpa [#allocation7 + $0x1], 1 }

</bundles_post_ra>
